<compile_context>
chip_gen: v7x
topology: tpu7x:2x2x1
jax: 0.10.0
libtpu: 0.0.40
codegen_flags: <defaults>
</compile_context>

<pallas_src>
import functools

import jax
import jax.numpy as jnp
import numpy as np
from jax.experimental import pallas as pl
from jax.experimental.pallas import tpu as pltpu

EPS = 1e-5  # nn.BatchNorm3d default eps


# ------------------------------ small helpers ------------------------------ #

def _rup(v, m):
    return (v + m - 1) // m * m


def _pad2d(a, rows, cols):
    return jnp.pad(a, ((0, rows - a.shape[0]), (0, cols - a.shape[1])))


def _cost(flops, bytes_accessed):
    return pl.CostEstimate(flops=int(flops), transcendentals=0,
                           bytes_accessed=int(bytes_accessed))


def _vmem_limit_bytes():
    """Generation-aware scoped-VMEM limit (~75% of physical, capped)."""
    cap = 64 * 1024 * 1024
    try:
        info = pltpu.get_tpu_info()
        cap = int(getattr(info, "vmem_capacity_bytes", cap))
    except Exception:
        pass
    return int(min(cap * 3 // 4, 96 * 1024 * 1024))


def _pick_tile_m(m, row_bytes, budget_bytes, max_rows=4096):
    """Largest divisor of m that is a multiple of 8, fits the per-row VMEM
    budget, and (when possible) leaves >= 2 grid steps so both v7x TensorCores
    get work.  Falls back to one full block if m is not 8-aligned (full-dim
    blocks are always legal)."""
    if m % 8 != 0:
        return m
    cap = max(8, min(max_rows, budget_bytes // max(row_bytes, 1)))
    divs = [t for t in range(8, m + 1, 8) if m % t == 0]
    multi = [t for t in divs if t <= m // 2] or divs
    cand = [t for t in multi if t <= cap]
    return max(cand) if cand else min(multi)


def _fold_bn(stats, count, gamma, beta, cpad):
    """Reduce per-block [sum, sum-of-squares] partials -> folded scale/shift."""
    s = jnp.sum(stats.reshape(-1, 2, cpad).astype(jnp.float32), axis=0)
    mu = s[0] / count
    var = jnp.maximum(s[1] / count - mu * mu, 0.0)   # biased batch variance
    inv = jax.lax.rsqrt(var + EPS)
    g = jnp.pad(gamma.astype(jnp.float32), (0, cpad - gamma.shape[0]))
    b = jnp.pad(beta.astype(jnp.float32), (0, cpad - beta.shape[0]))
    scale = g * inv
    shift = b - mu * scale
    return scale.reshape(1, cpad), shift.reshape(1, cpad)


# ------------------------------ Pallas kernels ------------------------------ #

def _conv1_kernel_factory(has_ds, p_p, compute_dtype):
    """1x1x1 conv [+ downsample 1x1x1 conv fused as one wide matmul] + BN partials."""
    if has_ds:
        def kernel(x_ref, w_ref, y1_ref, yd_ref, s1_ref, sd_ref):
            y = jnp.dot(x_ref[...].astype(compute_dtype), w_ref[...],
                        preferred_element_type=jnp.float32)
            y1 = y[:, :p_p]
            yd = y[:, p_p:]
            y1_ref[...] = y1.astype(y1_ref.dtype)
            yd_ref[...] = yd.astype(yd_ref.dtype)
            s1_ref[...] = jnp.concatenate(
                [jnp.sum(y1, axis=0, keepdims=True),
                 jnp.sum(y1 * y1, axis=0, keepdims=True)], axis=0)
            sd_ref[...] = jnp.concatenate(
                [jnp.sum(yd, axis=0, keepdims=True),
                 jnp.sum(yd * yd, axis=0, keepdims=True)], axis=0)
    else:
        def kernel(x_ref, w_ref, y1_ref, s1_ref):
            y1 = jnp.dot(x_ref[...].astype(compute_dtype), w_ref[...],
                         preferred_element_type=jnp.float32)
            y1_ref[...] = y1.astype(y1_ref.dtype)
            s1_ref[...] = jnp.concatenate(
                [jnp.sum(y1, axis=0, keepdims=True),
                 jnp.sum(y1 * y1, axis=0, keepdims=True)], axis=0)
    return kernel


def _conv2_kernel_factory(d, h, w, compute_dtype):
    """bn1+relu (folded) fused into a 3x3x3 / stride 1 / pad 1 conv.

    One sample per grid step: the zero halo is built in-register (so the
    Conv3d(padding=1) zeros are exact and no padded activation ever hits HBM)
    and the 27 taps are accumulated as shifted matmuls with M = D*H*W rows."""
    dhw = d * h * w

    def kernel(y1_ref, sc_ref, sh_ref, w_ref, y2_ref, s_ref):
        cin = y1_ref.shape[-1]
        cout = w_ref.shape[-1]
        act = jnp.maximum(
            y1_ref[...].astype(jnp.float32) * sc_ref[...] + sh_ref[...], 0.0)
        act4 = act.reshape(d, h, w, cin).astype(compute_dtype)
        zw = jnp.zeros((d, h, 1, cin), compute_dtype)
        xp = jnp.concatenate([zw, act4, zw], axis=2)          # pad W
        zh = jnp.zeros((d, 1, w + 2, cin), compute_dtype)
        xp = jnp.concatenate([zh, xp, zh], axis=1)            # pad H
        zd = jnp.zeros((1, h + 2, w + 2, cin), compute_dtype)
        xp = jnp.concatenate([zd, xp, zd], axis=0)            # pad D
        acc = jnp.zeros((dhw, cout), jnp.float32)
        for kd in range(3):
            for kh in range(3):
                for kw in range(3):
                    tap = xp[kd:kd + d, kh:kh + h, kw:kw + w, :].reshape(dhw, cin)
                    acc = acc + jnp.dot(tap, w_ref[kd * 9 + kh * 3 + kw],
                                        preferred_element_type=jnp.float32)
        y2_ref[...] = acc.astype(y2_ref.dtype)
        s_ref[...] = jnp.concatenate(
            [jnp.sum(acc, axis=0, keepdims=True),
             jnp.sum(acc * acc, axis=0, keepdims=True)], axis=0)

    return kernel


def _conv3_kernel_factory(compute_dtype):
    """bn2 (folded) + relu + 1x1x1 conv3 + BN partials."""
    def kernel(y2_ref, sc_ref, sh_ref, w_ref, y3_ref, s_ref):
        a = jnp.maximum(
            y2_ref[...].astype(jnp.float32) * sc_ref[...] + sh_ref[...], 0.0)
        y3 = jnp.dot(a.astype(compute_dtype), w_ref[...],
                     preferred_element_type=jnp.float32)
        y3_ref[...] = y3.astype(y3_ref.dtype)
        s_ref[...] = jnp.concatenate(
            [jnp.sum(y3, axis=0, keepdims=True),
             jnp.sum(y3 * y3, axis=0, keepdims=True)], axis=0)
    return kernel


def _bn_add_relu_kernel(y_ref, sc_ref, sh_ref, r_ref, rsc_ref, rsh_ref, o_ref):
    """bn3 (folded) + residual (optionally bn-normalized downsample) + relu."""
    y = y_ref[...].astype(jnp.float32) * sc_ref[...] + sh_ref[...]
    r = r_ref[...].astype(jnp.float32) * rsc_ref[...] + rsh_ref[...]
    o_ref[...] = jnp.maximum(y + r, 0.0).astype(o_ref.dtype)


# ------------------------------ forward wrapper ----------------------------- #

def bottleneck_forward(x, params, *, compute_dtype=jnp.bfloat16, tile_m=None):
    """Bottleneck forward (stride=1), PyTorch-layout params:
       w1 (P,Cin,1,1,1), g1,b1 (P,), w2 (P,P,3,3,3), g2,b2 (P,),
       w3 (2P,P,1,1,1), g3,b3 (2P,), optional downsample wd (2P,Cin,1,1,1),
       gd,bd (2P,).  Returns NCDHW float32."""
    n, cin, d, h, w = x.shape
    p = params["w1"].shape[0]
    c2 = 2 * p
    has_ds = "wd" in params
    if not has_ds:
        assert cin == c2, "without downsample the residual add needs inplanes == 2*planes"

    f32 = jnp.float32
    cd = compute_dtype
    store_dtype = cd                       # intermediates follow compute dtype
    isz = jnp.dtype(cd).itemsize
    ssz = jnp.dtype(store_dtype).itemsize
    cin_p, p_p, c2_p = _rup(cin, 128), _rup(p, 128), _rup(c2, 128)
    m = n * d * h * w
    dhw = d * h * w

    vmem_limit = _vmem_limit_bytes()

    # M-tile for the flat (M, C) stages: must divide M exactly (no pad rows,
    # no stat masking, free reshapes between (M,C) and (N,DHW,C)).
    tm = None
    if tile_m is not None:
        t = int(tile_m)
        if m % t == 0 and (t % 8 == 0 or t == m):
            tm = t
    if tm is None:
        row_bytes = 2 * (cin_p * isz + (p_p + c2_p) * ssz + c2_p * 4)
        tm = _pick_tile_m(m, row_bytes, vmem_limit // 3)
    nt = m // tm

    cp = pltpu.CompilerParams(dimension_semantics=("parallel",),
                              vmem_limit_bytes=vmem_limit)

    # ---- parameter packing: PyTorch layouts -> padded, lane-dense matmuls ---
    w1p = _pad2d(params["w1"][:, :, 0, 0, 0].T, cin_p, p_p)
    if has_ds:
        wdp = _pad2d(params["wd"][:, :, 0, 0, 0].T, cin_p, c2_p)
        wap = jnp.concatenate([w1p, wdp], axis=1).astype(cd)   # (cin_p, p_p+c2_p)
    else:
        wap = w1p.astype(cd)
    w2r = jnp.transpose(params["w2"], (2, 3, 4, 1, 0)).reshape(27, p, p)
    w2p = jnp.pad(w2r, ((0, 0), (0, p_p - p), (0, p_p - p))).astype(cd)
    w3p = _pad2d(params["w3"][:, :, 0, 0, 0].T, p_p, c2_p).astype(cd)

    # ---- activation: NCDHW -> flattened channels-last (M exact, no pad) -----
    x_flat = jnp.transpose(x, (0, 2, 3, 4, 1)).reshape(m, cin)
    x2d = jnp.pad(x_flat, ((0, 0), (0, cin_p - cin))).astype(cd)

    row_in = pl.BlockSpec((tm, cin_p), lambda i: (i, 0))

    # ---------------- stage A: conv1 (+ fused downsample conv) + stats -------
    if has_ds:
        y1, yd, s1, sd = pl.pallas_call(
            _conv1_kernel_factory(True, p_p, cd),
            grid=(nt,),
            in_specs=[row_in,
                      pl.BlockSpec((cin_p, p_p + c2_p), lambda i: (0, 0))],
            out_specs=(pl.BlockSpec((tm, p_p), lambda i: (i, 0)),
                       pl.BlockSpec((tm, c2_p), lambda i: (i, 0)),
                       pl.BlockSpec((None, 2, p_p), lambda i: (i, 0, 0)),
                       pl.BlockSpec((None, 2, c2_p), lambda i: (i, 0, 0))),
            out_shape=(jax.ShapeDtypeStruct((m, p_p), store_dtype),
                       jax.ShapeDtypeStruct((m, c2_p), store_dtype),
                       jax.ShapeDtypeStruct((nt, 2, p_p), f32),
                       jax.ShapeDtypeStruct((nt, 2, c2_p), f32)),
            compiler_params=cp,
            cost_estimate=_cost(2 * m * cin_p * (p_p + c2_p),
                                m * cin_p * isz + m * (p_p + c2_p) * ssz),
        )(x2d, wap)
    else:
        y1, s1 = pl.pallas_call(
            _conv1_kernel_factory(False, p_p, cd),
            grid=(nt,),
            in_specs=[row_in,
                      pl.BlockSpec((cin_p, p_p), lambda i: (0, 0))],
            out_specs=(pl.BlockSpec((tm, p_p), lambda i: (i, 0)),
                       pl.BlockSpec((None, 2, p_p), lambda i: (i, 0, 0))),
            out_shape=(jax.ShapeDtypeStruct((m, p_p), store_dtype),
                       jax.ShapeDtypeStruct((nt, 2, p_p), f32)),
            compiler_params=cp,
            cost_estimate=_cost(2 * m * cin_p * p_p,
                                m * cin_p * isz + m * p_p * ssz),
        )(x2d, wap)

    sc1, sh1 = _fold_bn(s1, m, params["g1"], params["b1"], p_p)

    # -------- stage C: bn1+relu fused into conv2 3x3x3 (per sample) + stats --
    y1_3 = y1.reshape(n, dhw, p_p)          # free reshape (M divides exactly)
    y2, s2 = pl.pallas_call(
        _conv2_kernel_factory(d, h, w, cd),
        grid=(n,),
        in_specs=[pl.BlockSpec((None, dhw, p_p), lambda b: (b, 0, 0)),
                  pl.BlockSpec((1, p_p), lambda b: (0, 0)),
                  pl.BlockSpec((1, p_p), lambda b: (0, 0)),
                  pl.BlockSpec((27, p_p, p_p), lambda b: (0, 0, 0))],
        out_specs=(pl.BlockSpec((None, dhw, p_p), lambda b: (b, 0, 0)),
                   pl.BlockSpec((None, 2, p_p), lambda b: (b, 0, 0))),
        out_shape=(jax.ShapeDtypeStruct((n, dhw, p_p), store_dtype),
                   jax.ShapeDtypeStruct((n, 2, p_p), f32)),
        compiler_params=cp,
        cost_estimate=_cost(2 * m * 27 * p_p * p_p,
                            2 * m * p_p * ssz + 27 * p_p * p_p * isz),
    )(y1_3, sc1, sh1, w2p)

    sc2, sh2 = _fold_bn(s2, m, params["g2"], params["b2"], p_p)

    # ---------------- stage D: bn2 + relu + conv3 + stats ---------------------
    y2f = y2.reshape(m, p_p)                # free reshape
    y3, s3 = pl.pallas_call(
        _conv3_kernel_factory(cd),
        grid=(nt,),
        in_specs=[pl.BlockSpec((tm, p_p), lambda i: (i, 0)),
                  pl.BlockSpec((1, p_p), lambda i: (0, 0)),
                  pl.BlockSpec((1, p_p), lambda i: (0, 0)),
                  pl.BlockSpec((p_p, c2_p), lambda i: (0, 0))],
        out_specs=(pl.BlockSpec((tm, c2_p), lambda i: (i, 0)),
                   pl.BlockSpec((None, 2, c2_p), lambda i: (i, 0, 0))),
        out_shape=(jax.ShapeDtypeStruct((m, c2_p), store_dtype),
                   jax.ShapeDtypeStruct((nt, 2, c2_p), f32)),
        compiler_params=cp,
        cost_estimate=_cost(2 * m * p_p * c2_p, m * (p_p + c2_p) * ssz),
    )(y2f, sc2, sh2, w3p)

    sc3, sh3 = _fold_bn(s3, m, params["g3"], params["b3"], c2_p)

    # ---------------- stage E: bn3 (+ downsample bn) + residual + relu --------
    if has_ds:
        rsc, rsh = _fold_bn(sd, m, params["gd"], params["bd"], c2_p)
        res = yd
    else:
        rsc = jnp.ones((1, c2_p), f32)
        rsh = jnp.zeros((1, c2_p), f32)
        res = x2d                           # identity residual (cin_p == c2_p)

    out = pl.pallas_call(
        _bn_add_relu_kernel,
        grid=(nt,),
        in_specs=[pl.BlockSpec((tm, c2_p), lambda i: (i, 0)),
                  pl.BlockSpec((1, c2_p), lambda i: (0, 0)),
                  pl.BlockSpec((1, c2_p), lambda i: (0, 0)),
                  pl.BlockSpec((tm, c2_p), lambda i: (i, 0)),
                  pl.BlockSpec((1, c2_p), lambda i: (0, 0)),
                  pl.BlockSpec((1, c2_p), lambda i: (0, 0))],
        out_specs=pl.BlockSpec((tm, c2_p), lambda i: (i, 0)),
        out_shape=jax.ShapeDtypeStruct((m, c2_p), f32),
        compiler_params=cp,
    )(y3, sc3, sh3, res, rsc, rsh)

    out5 = out.reshape(n, d, h, w, c2_p)
    if c2_p != c2:
        out5 = out5[..., :c2]
    return jnp.transpose(out5, (0, 4, 1, 2, 3))


# ---------------------------- pure-JAX reference ----------------------------- #

def reference_forward(x, params, compute_dtype=jnp.float32):
    cd = compute_dtype

    def conv(v, wt, padding):
        return jax.lax.conv_general_dilated(
            v.astype(cd), wt.astype(cd), window_strides=(1, 1, 1),
            padding=padding, dimension_numbers=("NCDHW", "OIDHW", "NCDHW"),
            preferred_element_type=jnp.float32,
            precision=jax.lax.Precision.HIGHEST)

    def bn(v, g, b):
        mu = jnp.mean(v, axis=(0, 2, 3, 4), keepdims=True)
        var = jnp.mean((v - mu) ** 2, axis=(0, 2, 3, 4), keepdims=True)
        vn = (v - mu) * jax.lax.rsqrt(var + EPS)
        return vn * g.reshape(1, -1, 1, 1, 1) + b.reshape(1, -1, 1, 1, 1)

    out = jnp.maximum(bn(conv(x, params["w1"], "VALID"), params["g1"], params["b1"]), 0.0)
    out = jnp.maximum(bn(conv(out, params["w2"], [(1, 1)] * 3), params["g2"], params["b2"]), 0.0)
    out = bn(conv(out, params["w3"], "VALID"), params["g3"], params["b3"])
    if "wd" in params:
        res = bn(conv(x, params["wd"], "VALID"), params["gd"], params["bd"])
    else:
        res = x
    return jnp.maximum(out + res, 0.0)


# ----------------------------------- main ------------------------------------ #

if __name__ == "__main__":
    def make_case(key, n, cin, planes, d, h, w, with_downsample):
        c2 = 2 * planes
        ks = jax.random.split(key, 16)
        x = jax.random.normal(ks[0], (n, cin, d, h, w), jnp.float32)
        prm = {
            "w1": 0.2 * jax.random.normal(ks[1], (planes, cin, 1, 1, 1), jnp.float32),
            "w2": 0.1 * jax.random.normal(ks[2], (planes, planes, 3, 3, 3), jnp.float32),
            "w3": 0.2 * jax.random.normal(ks[3], (c2, planes, 1, 1, 1), jnp.float32),
            "g1": 1.0 + 0.1 * jax.random.normal(ks[4], (planes,), jnp.float32),
            "b1": 0.1 * jax.random.normal(ks[5], (planes,), jnp.float32),
            "g2": 1.0 + 0.1 * jax.random.normal(ks[6], (planes,), jnp.float32),
            "b2": 0.1 * jax.random.normal(ks[7], (planes,), jnp.float32),
            "g3": 1.0 + 0.1 * jax.random.normal(ks[8], (c2,), jnp.float32),
            "b3": 0.1 * jax.random.normal(ks[9], (c2,), jnp.float32),
        }
        if with_downsample:
            prm["wd"] = 0.2 * jax.random.normal(ks[10], (c2, cin, 1, 1, 1), jnp.float32)
            prm["gd"] = 1.0 + 0.1 * jax.random.normal(ks[11], (c2,), jnp.float32)
            prm["bd"] = 0.1 * jax.random.normal(ks[12], (c2,), jnp.float32)
        return x, prm

    k1, k2 = jax.random.split(jax.random.PRNGKey(0))

    # Case 1: with downsample (the configuration rgb_slowfast64f_50 actually
    # uses for mapper_slow / mapper_fast): default bf16 MXU compute with f32
    # accumulation and bf16 intermediates.
    x, prm = make_case(k1, n=2, cin=16, planes=4, d=4, h=8, w=8, with_downsample=True)
    fwd = jax.jit(functools.partial(bottleneck_forward, compute_dtype=jnp.bfloat16))
    ref_fn = jax.jit(functools.partial(reference_forward, compute_dtype=jnp.bfloat16))
    out = jax.block_until_ready(fwd(x, prm))
    ref = jax.block_until_ready(ref_fn(x, prm))
    assert out.shape == (2, 8, 4, 8, 8), out.shape
    np.testing.assert_allclose(np.asarray(out), np.asarray(ref), rtol=5e-2, atol=5e-2)

    # Case 2: no downsample (inplanes == 2*planes), f32 compute for a tight
    # numerical check; the requested tile_m=192 does not divide M=512, which
    # exercises the automatic exact-divisor tile reselection.
    x, prm = make_case(k2, n=2, cin=8, planes=4, d=4, h=8, w=8, with_downsample=False)
    fwd = jax.jit(functools.partial(bottleneck_forward,
                                    compute_dtype=jnp.float32, tile_m=192))
    ref_fn = jax.jit(functools.partial(reference_forward, compute_dtype=jnp.float32))
    out = jax.block_until_ready(fwd(x, prm))
    ref = jax.block_until_ready(ref_fn(x, prm))
    assert out.shape == (2, 8, 4, 8, 8), out.shape
    np.testing.assert_allclose(np.asarray(out), np.asarray(ref), rtol=1e-3, atol=2e-3)

    print("KERNEL_OK")
</pallas_src>

<mosaic_0001>
module attributes {stable_mosaic.version = 11 : i64} {
  func.func @kernel(%arg0: i32, %arg1: memref<256x128xbf16, #tpu.memory_space<vmem>>, %arg2: memref<128x256xbf16, #tpu.memory_space<vmem>>, %arg3: memref<256x128xbf16, #tpu.memory_space<vmem>>, %arg4: memref<256x128xbf16, #tpu.memory_space<vmem>>, %arg5: memref<1x2x128xf32, #tpu.memory_space<vmem>>, %arg6: memref<1x2x128xf32, #tpu.memory_space<vmem>>) attributes {dimension_semantics = [#tpu.dimension_semantics<parallel>], iteration_bounds = array<i64: 2>, scalar_prefetch = 0 : i64, scratch_operands = 0 : i64, tpu.core_type = #tpu.core_type<tc>, window_params = [{transform_indices = @transform_0, window_bounds = array<i64: 256, 128>}, {pipeline_mode = #tpu.pipeline_mode<synchronous>, transform_indices = @transform_1, window_bounds = array<i64: 128, 256>}, {transform_indices = @transform_2, window_bounds = array<i64: 256, 128>}, {transform_indices = @transform_3, window_bounds = array<i64: 256, 128>}, {transform_indices = @transform_4, window_bounds = array<i64: 1, 2, 128>}, {transform_indices = @transform_5, window_bounds = array<i64: 1, 2, 128>}]} {
    %c0 = arith.constant 0 : index
    %c0_0 = arith.constant 0 : index
    %0 = vector.load %arg1[%c0, %c0_0] : memref<256x128xbf16, #tpu.memory_space<vmem>>, vector<256x128xbf16>
    %c0_1 = arith.constant 0 : index
    %c0_2 = arith.constant 0 : index
    %1 = vector.load %arg2[%c0_1, %c0_2] : memref<128x256xbf16, #tpu.memory_space<vmem>>, vector<128x256xbf16>
    %cst = arith.constant dense<0.000000e+00> : vector<256x256xf32>
    %2 = tpu.matmul %0, %1, %cst {dimension_numbers = #tpu.dot_dimension_numbers<[1], [0], [0], [1], [0, 0, 1, 1], [], []>} : vector<256x128xbf16>, vector<128x256xbf16>, vector<256x256xf32> -> vector<256x256xf32>
    %3 = vector.extract_strided_slice %2 {offsets = [0, 0], sizes = [256, 128], strides = [1, 1]} : vector<256x256xf32> to vector<256x128xf32>
    %4 = vector.extract_strided_slice %2 {offsets = [0, 128], sizes = [256, 128], strides = [1, 1]} : vector<256x256xf32> to vector<256x128xf32>
    %5 = arith.truncf %3 : vector<256x128xf32> to vector<256x128xbf16>
    %c0_3 = arith.constant 0 : index
    %c0_4 = arith.constant 0 : index
    %6 = vector.load %arg3[%c0_3, %c0_4] : memref<256x128xbf16, #tpu.memory_space<vmem>>, vector<256x128xbf16>
    tpu.vector_store %arg3[%c0_3, %c0_4], %5 {strides = array<i32>} : memref<256x128xbf16, #tpu.memory_space<vmem>>, vector<256x128xbf16>,
    %7 = arith.truncf %4 : vector<256x128xf32> to vector<256x128xbf16>
    %c0_5 = arith.constant 0 : index
    %c0_6 = arith.constant 0 : index
    %8 = vector.load %arg4[%c0_5, %c0_6] : memref<256x128xbf16, #tpu.memory_space<vmem>>, vector<256x128xbf16>
    tpu.vector_store %arg4[%c0_5, %c0_6], %7 {strides = array<i32>} : memref<256x128xbf16, #tpu.memory_space<vmem>>, vector<256x128xbf16>,
    %cst_7 = arith.constant dense<0.000000e+00> : vector<128xf32>
    %9 = vector.multi_reduction <add>, %3, %cst_7 [0] : vector<256x128xf32> to vector<128xf32>
    %10 = vector.shape_cast %9 : vector<128xf32> to vector<1x128xf32>
    %11 = arith.mulf %3, %3 : vector<256x128xf32>
    %cst_8 = arith.constant dense<0.000000e+00> : vector<128xf32>
    %12 = vector.multi_reduction <add>, %11, %cst_8 [0] : vector<256x128xf32> to vector<128xf32>
    %13 = vector.shape_cast %12 : vector<128xf32> to vector<1x128xf32>
    %14 = tpu.concatenate %10, %13 in 0 : vector<1x128xf32>, vector<1x128xf32> -> vector<2x128xf32>
    %c0_9 = arith.constant 0 : index
    %c0_10 = arith.constant 0 : index
    %c0_11 = arith.constant 0 : index
    %15 = vector.load %arg5[%c0_9, %c0_10, %c0_11] : memref<1x2x128xf32, #tpu.memory_space<vmem>>, vector<1x2x128xf32>
    %16 = vector.shape_cast %15 : vector<1x2x128xf32> to vector<2x128xf32>
    %17 = vector.shape_cast %14 : vector<2x128xf32> to vector<1x2x128xf32>
    tpu.vector_store %arg5[%c0_9, %c0_10, %c0_11], %17 {strides = array<i32>} : memref<1x2x128xf32, #tpu.memory_space<vmem>>, vector<1x2x128xf32>,
    %cst_12 = arith.constant dense<0.000000e+00> : vector<128xf32>
    %18 = vector.multi_reduction <add>, %4, %cst_12 [0] : vector<256x128xf32> to vector<128xf32>
    %19 = vector.shape_cast %18 : vector<128xf32> to vector<1x128xf32>
    %20 = arith.mulf %4, %4 : vector<256x128xf32>
    %cst_13 = arith.constant dense<0.000000e+00> : vector<128xf32>
    %21 = vector.multi_reduction <add>, %20, %cst_13 [0] : vector<256x128xf32> to vector<128xf32>
    %22 = vector.shape_cast %21 : vector<128xf32> to vector<1x128xf32>
    %23 = tpu.concatenate %19, %22 in 0 : vector<1x128xf32>, vector<1x128xf32> -> vector<2x128xf32>
    %c0_14 = arith.constant 0 : index
    %c0_15 = arith.constant 0 : index
    %c0_16 = arith.constant 0 : index
    %24 = vector.load %arg6[%c0_14, %c0_15, %c0_16] : memref<1x2x128xf32, #tpu.memory_space<vmem>>, vector<1x2x128xf32>
    %25 = vector.shape_cast %24 : vector<1x2x128xf32> to vector<2x128xf32>
    %26 = vector.shape_cast %23 : vector<2x128xf32> to vector<1x2x128xf32>
    tpu.vector_store %arg6[%c0_14, %c0_15, %c0_16], %26 {strides = array<i32>} : memref<1x2x128xf32, #tpu.memory_space<vmem>>, vector<1x2x128xf32>,
    return
  }
  func.func @transform_0(%arg0: i32) -> (i32, i32) {
    %c0_i32 = arith.constant 0 : i32
    %c0_i32_0 = arith.constant 0 : i32
    return %arg0, %c0_i32 : i32, i32
  }
  func.func @transform_1(%arg0: i32) -> (i32, i32) {
    %c0_i32 = arith.constant 0 : i32
    %c0_i32_0 = arith.constant 0 : i32
    %c0_i32_1 = arith.constant 0 : i32
    return %c0_i32, %c0_i32_0 : i32, i32
  }
  func.func @transform_2(%arg0: i32) -> (i32, i32) {
    %c0_i32 = arith.constant 0 : i32
    %c0_i32_0 = arith.constant 0 : i32
    return %arg0, %c0_i32 : i32, i32
  }
  func.func @transform_3(%arg0: i32) -> (i32, i32) {
    %c0_i32 = arith.constant 0 : i32
    %c0_i32_0 = arith.constant 0 : i32
    return %arg0, %c0_i32 : i32, i32
  }
  func.func @transform_4(%arg0: i32) -> (i32, i32, i32) {
    %c0_i32 = arith.constant 0 : i32
    %c0_i32_0 = arith.constant 0 : i32
    %c0_i32_1 = arith.constant 0 : i32
    return %arg0, %c0_i32, %c0_i32_0 : i32, i32, i32
  }
  func.func @transform_5(%arg0: i32) -> (i32, i32, i32) {
    %c0_i32 = arith.constant 0 : i32
    %c0_i32_0 = arith.constant 0 : i32
    %c0_i32_1 = arith.constant 0 : i32
    return %arg0, %c0_i32, %c0_i32_0 : i32, i32, i32
  }
}

module attributes {stable_mosaic.version = 11 : i64} {
  func.func @kernel(%arg0: i32, %arg1: memref<1x256x128xbf16, #tpu.memory_space<vmem>>, %arg2: memref<1x128xf32, #tpu.memory_space<vmem>>, %arg3: memref<1x128xf32, #tpu.memory_space<vmem>>, %arg4: memref<27x128x128xbf16, #tpu.memory_space<vmem>>, %arg5: memref<1x256x128xbf16, #tpu.memory_space<vmem>>, %arg6: memref<1x2x128xf32, #tpu.memory_space<vmem>>) attributes {dimension_semantics = [#tpu.dimension_semantics<parallel>], iteration_bounds = array<i64: 2>, scalar_prefetch = 0 : i64, scratch_operands = 0 : i64, tpu.core_type = #tpu.core_type<tc>, window_params = [{transform_indices = @transform_0, window_bounds = array<i64: 1, 256, 128>}, {pipeline_mode = #tpu.pipeline_mode<synchronous>, transform_indices = @transform_1, window_bounds = array<i64: 1, 128>}, {pipeline_mode = #tpu.pipeline_mode<synchronous>, transform_indices = @transform_2, window_bounds = array<i64: 1, 128>}, {pipeline_mode = #tpu.pipeline_mode<synchronous>, transform_indices = @transform_3, window_bounds = array<i64: 27, 128, 128>}, {transform_indices = @transform_4, window_bounds = array<i64: 1, 256, 128>}, {transform_indices = @transform_5, window_bounds = array<i64: 1, 2, 128>}]} {
    %c0 = arith.constant 0 : index
    %c0_0 = arith.constant 0 : index
    %c0_1 = arith.constant 0 : index
    %0 = vector.load %arg1[%c0, %c0_0, %c0_1] : memref<1x256x128xbf16, #tpu.memory_space<vmem>>, vector<1x256x128xbf16>
    %1 = vector.shape_cast %0 : vector<1x256x128xbf16> to vector<256x128xbf16>
    %2 = arith.extf %1 : vector<256x128xbf16> to vector<256x128xf32>
    %c0_2 = arith.constant 0 : index
    %c0_3 = arith.constant 0 : index
    %3 = vector.load %arg2[%c0_2, %c0_3] : memref<1x128xf32, #tpu.memory_space<vmem>>, vector<1x128xf32>
    %4 = vector.broadcast %3 : vector<1x128xf32> to vector<256x128xf32>
    %5 = arith.mulf %2, %4 : vector<256x128xf32>
    %c0_4 = arith.constant 0 : index
    %c0_5 = arith.constant 0 : index
    %6 = vector.load %arg3[%c0_4, %c0_5] : memref<1x128xf32, #tpu.memory_space<vmem>>, vector<1x128xf32>
    %7 = vector.broadcast %6 : vector<1x128xf32> to vector<256x128xf32>
    %8 = arith.addf %5, %7 : vector<256x128xf32>
    %cst = arith.constant 0.000000e+00 : f32
    %9 = vector.broadcast %cst : f32 to vector<256x128xf32>
    %10 = arith.maximumf %8, %9 : vector<256x128xf32>
    %11 = vector.shape_cast %10 : vector<256x128xf32> to vector<4x8x8x128xf32>
    %12 = arith.truncf %11 : vector<4x8x8x128xf32> to vector<4x8x8x128xbf16>
    %cst_6 = arith.constant 0.000000e+00 : bf16
    %13 = vector.broadcast %cst_6 : bf16 to vector<4x8x1x128xbf16>
    %14 = tpu.concatenate %13, %12, %13 in 2 : vector<4x8x1x128xbf16>, vector<4x8x8x128xbf16>, vector<4x8x1x128xbf16> -> vector<4x8x10x128xbf16>
    %cst_7 = arith.constant 0.000000e+00 : bf16
    %15 = vector.broadcast %cst_7 : bf16 to vector<4x1x10x128xbf16>
    %16 = tpu.concatenate %15, %14, %15 in 1 : vector<4x1x10x128xbf16>, vector<4x8x10x128xbf16>, vector<4x1x10x128xbf16> -> vector<4x10x10x128xbf16>
    %cst_8 = arith.constant 0.000000e+00 : bf16
    %17 = vector.broadcast %cst_8 : bf16 to vector<1x10x10x128xbf16>
    %18 = tpu.concatenate %17, %16, %17 in 0 : vector<1x10x10x128xbf16>, vector<4x10x10x128xbf16>, vector<1x10x10x128xbf16> -> vector<6x10x10x128xbf16>
    %cst_9 = arith.constant 0.000000e+00 : f32
    %19 = vector.broadcast %cst_9 : f32 to vector<256x128xf32>
    %20 = vector.extract_strided_slice %18 {offsets = [0, 0, 0, 0], sizes = [4, 8, 8, 128], strides = [1, 1, 1, 1]} : vector<6x10x10x128xbf16> to vector<4x8x8x128xbf16>
    %21 = vector.shape_cast %20 : vector<4x8x8x128xbf16> to vector<256x128xbf16>
    %c0_10 = arith.constant 0 : index
    %c0_11 = arith.constant 0 : index
    %c0_12 = arith.constant 0 : index
    %22 = vector.load %arg4[%c0_10, %c0_11, %c0_12] : memref<27x128x128xbf16, #tpu.memory_space<vmem>>, vector<1x128x128xbf16>
    %23 = vector.shape_cast %22 : vector<1x128x128xbf16> to vector<128x128xbf16>
    %cst_13 = arith.constant dense<0.000000e+00> : vector<256x128xf32>
    %24 = tpu.matmul %21, %23, %cst_13 {dimension_numbers = #tpu.dot_dimension_numbers<[1], [0], [0], [1], [0, 0, 1, 1], [], []>} : vector<256x128xbf16>, vector<128x128xbf16>, vector<256x128xf32> -> vector<256x128xf32>
    %25 = arith.addf %19, %24 : vector<256x128xf32>
    %26 = vector.extract_strided_slice %18 {offsets = [0, 0, 1, 0], sizes = [4, 8, 8, 128], strides = [1, 1, 1, 1]} : vector<6x10x10x128xbf16> to vector<4x8x8x128xbf16>
    %27 = vector.shape_cast %26 : vector<4x8x8x128xbf16> to vector<256x128xbf16>
    %c1 = arith.constant 1 : index
    %c0_14 = arith.constant 0 : index
    %c0_15 = arith.constant 0 : index
    %28 = vector.load %arg4[%c1, %c0_14, %c0_15] : memref<27x128x128xbf16, #tpu.memory_space<vmem>>, vector<1x128x128xbf16>
    %29 = vector.shape_cast %28 : vector<1x128x128xbf16> to vector<128x128xbf16>
    %cst_16 = arith.constant dense<0.000000e+00> : vector<256x128xf32>
    %30 = tpu.matmul %27, %29, %cst_16 {dimension_numbers = #tpu.dot_dimension_numbers<[1], [0], [0], [1], [0, 0, 1, 1], [], []>} : vector<256x128xbf16>, vector<128x128xbf16>, vector<256x128xf32> -> vector<256x128xf32>
    %31 = arith.addf %25, %30 : vector<256x128xf32>
    %32 = vector.extract_strided_slice %18 {offsets = [0, 0, 2, 0], sizes = [4, 8, 8, 128], strides = [1, 1, 1, 1]} : vector<6x10x10x128xbf16> to vector<4x8x8x128xbf16>
    %33 = vector.shape_cast %32 : vector<4x8x8x128xbf16> to vector<256x128xbf16>
    %c2 = arith.constant 2 : index
    %c0_17 = arith.constant 0 : index
    %c0_18 = arith.constant 0 : index
    %34 = vector.load %arg4[%c2, %c0_17, %c0_18] : memref<27x128x128xbf16, #tpu.memory_space<vmem>>, vector<1x128x128xbf16>
    %35 = vector.shape_cast %34 : vector<1x128x128xbf16> to vector<128x128xbf16>
    %cst_19 = arith.constant dense<0.000000e+00> : vector<256x128xf32>
    %36 = tpu.matmul %33, %35, %cst_19 {dimension_numbers = #tpu.dot_dimension_numbers<[1], [0], [0], [1], [0, 0, 1, 1], [], []>} : vector<256x128xbf16>, vector<128x128xbf16>, vector<256x128xf32> -> vector<256x128xf32>
    %37 = arith.addf %31, %36 : vector<256x128xf32>
    %38 = vector.extract_strided_slice %18 {offsets = [0, 1, 0, 0], sizes = [4, 8, 8, 128], strides = [1, 1, 1, 1]} : vector<6x10x10x128xbf16> to vector<4x8x8x128xbf16>
    %39 = vector.shape_cast %38 : vector<4x8x8x128xbf16> to vector<256x128xbf16>
    %c3 = arith.constant 3 : index
    %c0_20 = arith.constant 0 : index
    %c0_21 = arith.constant 0 : index
    %40 = vector.load %arg4[%c3, %c0_20, %c0_21] : memref<27x128x128xbf16, #tpu.memory_space<vmem>>, vector<1x128x128xbf16>
    %41 = vector.shape_cast %40 : vector<1x128x128xbf16> to vector<128x128xbf16>
    %cst_22 = arith.constant dense<0.000000e+00> : vector<256x128xf32>
    %42 = tpu.matmul %39, %41, %cst_22 {dimension_numbers = #tpu.dot_dimension_numbers<[1], [0], [0], [1], [0, 0, 1, 1], [], []>} : vector<256x128xbf16>, vector<128x128xbf16>, vector<256x128xf32> -> vector<256x128xf32>
    %43 = arith.addf %37, %42 : vector<256x128xf32>
    %44 = vector.extract_strided_slice %18 {offsets = [0, 1, 1, 0], sizes = [4, 8, 8, 128], strides = [1, 1, 1, 1]} : vector<6x10x10x128xbf16> to vector<4x8x8x128xbf16>
    %45 = vector.shape_cast %44 : vector<4x8x8x128xbf16> to vector<256x128xbf16>
    %c4 = arith.constant 4 : index
    %c0_23 = arith.constant 0 : index
    %c0_24 = arith.constant 0 : index
    %46 = vector.load %arg4[%c4, %c0_23, %c0_24] : memref<27x128x128xbf16, #tpu.memory_space<vmem>>, vector<1x128x128xbf16>
    %47 = vector.shape_cast %46 : vector<1x128x128xbf16> to vector<128x128xbf16>
    %cst_25 = arith.constant dense<0.000000e+00> : vector<256x128xf32>
    %48 = tpu.matmul %45, %47, %cst_25 {dimension_numbers = #tpu.dot_dimension_numbers<[1], [0], [0], [1], [0, 0, 1, 1], [], []>} : vector<256x128xbf16>, vector<128x128xbf16>, vector<256x128xf32> -> vector<256x128xf32>
    %49 = arith.addf %43, %48 : vector<256x128xf32>
    %50 = vector.extract_strided_slice %18 {offsets = [0, 1, 2, 0], sizes = [4, 8, 8, 128], strides = [1, 1, 1, 1]} : vector<6x10x10x128xbf16> to vector<4x8x8x128xbf16>
    %51 = vector.shape_cast %50 : vector<4x8x8x128xbf16> to vector<256x128xbf16>
    %c5 = arith.constant 5 : index
    %c0_26 = arith.constant 0 : index
    %c0_27 = arith.constant 0 : index
    %52 = vector.load %arg4[%c5, %c0_26, %c0_27] : memref<27x128x128xbf16, #tpu.memory_space<vmem>>, vector<1x128x128xbf16>
    %53 = vector.shape_cast %52 : vector<1x128x128xbf16> to vector<128x128xbf16>
    %cst_28 = arith.constant dense<0.000000e+00> : vector<256x128xf32>
    %54 = tpu.matmul %51, %53, %cst_28 {dimension_numbers = #tpu.dot_dimension_numbers<[1], [0], [0], [1], [0, 0, 1, 1], [], []>} : vector<256x128xbf16>, vector<128x128xbf16>, vector<256x128xf32> -> vector<256x128xf32>
    %55 = arith.addf %49, %54 : vector<256x128xf32>
    %56 = vector.extract_strided_slice %18 {offsets = [0, 2, 0, 0], sizes = [4, 8, 8, 128], strides = [1, 1, 1, 1]} : vector<6x10x10x128xbf16> to vector<4x8x8x128xbf16>
    %57 = vector.shape_cast %56 : vector<4x8x8x128xbf16> to vector<256x128xbf16>
    %c6 = arith.constant 6 : index
    %c0_29 = arith.constant 0 : index
    %c0_30 = arith.constant 0 : index
    %58 = vector.load %arg4[%c6, %c0_29, %c0_30] : memref<27x128x128xbf16, #tpu.memory_space<vmem>>, vector<1x128x128xbf16>
    %59 = vector.shape_cast %58 : vector<1x128x128xbf16> to vector<128x128xbf16>
    %cst_31 = arith.constant dense<0.000000e+00> : vector<256x128xf32>
    %60 = tpu.matmul %57, %59, %cst_31 {dimension_numbers = #tpu.dot_dimension_numbers<[1], [0], [0], [1], [0, 0, 1, 1], [], []>} : vector<256x128xbf16>, vector<128x128xbf16>, vector<256x128xf32> -> vector<256x128xf32>
    %61 = arith.addf %55, %60 : vector<256x128xf32>
    %62 = vector.extract_strided_slice %18 {offsets = [0, 2, 1, 0], sizes = [4, 8, 8, 128], strides = [1, 1, 1, 1]} : vector<6x10x10x128xbf16> to vector<4x8x8x128xbf16>
    %63 = vector.shape_cast %62 : vector<4x8x8x128xbf16> to vector<256x128xbf16>
    %c7 = arith.constant 7 : index
    %c0_32 = arith.constant 0 : index
    %c0_33 = arith.constant 0 : index
    %64 = vector.load %arg4[%c7, %c0_32, %c0_33] : memref<27x128x128xbf16, #tpu.memory_space<vmem>>, vector<1x128x128xbf16>
    %65 = vector.shape_cast %64 : vector<1x128x128xbf16> to vector<128x128xbf16>
    %cst_34 = arith.constant dense<0.000000e+00> : vector<256x128xf32>
    %66 = tpu.matmul %63, %65, %cst_34 {dimension_numbers = #tpu.dot_dimension_numbers<[1], [0], [0], [1], [0, 0, 1, 1], [], []>} : vector<256x128xbf16>, vector<128x128xbf16>, vector<256x128xf32> -> vector<256x128xf32>
    %67 = arith.addf %61, %66 : vector<256x128xf32>
    %68 = vector.extract_strided_slice %18 {offsets = [0, 2, 2, 0], sizes = [4, 8, 8, 128], strides = [1, 1, 1, 1]} : vector<6x10x10x128xbf16> to vector<4x8x8x128xbf16>
    %69 = vector.shape_cast %68 : vector<4x8x8x128xbf16> to vector<256x128xbf16>
    %c8 = arith.constant 8 : index
    %c0_35 = arith.constant 0 : index
    %c0_36 = arith.constant 0 : index
    %70 = vector.load %arg4[%c8, %c0_35, %c0_36] : memref<27x128x128xbf16, #tpu.memory_space<vmem>>, vector<1x128x128xbf16>
    %71 = vector.shape_cast %70 : vector<1x128x128xbf16> to vector<128x128xbf16>
    %cst_37 = arith.constant dense<0.000000e+00> : vector<256x128xf32>
    %72 = tpu.matmul %69, %71, %cst_37 {dimension_numbers = #tpu.dot_dimension_numbers<[1], [0], [0], [1], [0, 0, 1, 1], [], []>} : vector<256x128xbf16>, vector<128x128xbf16>, vector<256x128xf32> -> vector<256x128xf32>
    %73 = arith.addf %67, %72 : vector<256x128xf32>
    %74 = vector.extract_strided_slice %18 {offsets = [1, 0, 0, 0], sizes = [4, 8, 8, 128], strides = [1, 1, 1, 1]} : vector<6x10x10x128xbf16> to vector<4x8x8x128xbf16>
    %75 = vector.shape_cast %74 : vector<4x8x8x128xbf16> to vector<256x128xbf16>
    %c9 = arith.constant 9 : index
    %c0_38 = arith.constant 0 : index
    %c0_39 = arith.constant 0 : index
    %76 = vector.load %arg4[%c9, %c0_38, %c0_39] : memref<27x128x128xbf16, #tpu.memory_space<vmem>>, vector<1x128x128xbf16>
    %77 = vector.shape_cast %76 : vector<1x128x128xbf16> to vector<128x128xbf16>
    %cst_40 = arith.constant dense<0.000000e+00> : vector<256x128xf32>
    %78 = tpu.matmul %75, %77, %cst_40 {dimension_numbers = #tpu.dot_dimension_numbers<[1], [0], [0], [1], [0, 0, 1, 1], [], []>} : vector<256x128xbf16>, vector<128x128xbf16>, vector<256x128xf32> -> vector<256x128xf32>
    %79 = arith.addf %73, %78 : vector<256x128xf32>
    %80 = vector.extract_strided_slice %18 {offsets = [1, 0, 1, 0], sizes = [4, 8, 8, 128], strides = [1, 1, 1, 1]} : vector<6x10x10x128xbf16> to vector<4x8x8x128xbf16>
    %81 = vector.shape_cast %80 : vector<4x8x8x128xbf16> to vector<256x128xbf16>
    %c10 = arith.constant 10 : index
    %c0_41 = arith.constant 0 : index
    %c0_42 = arith.constant 0 : index
    %82 = vector.load %arg4[%c10, %c0_41, %c0_42] : memref<27x128x128xbf16, #tpu.memory_space<vmem>>, vector<1x128x128xbf16>
    %83 = vector.shape_cast %82 : vector<1x128x128xbf16> to vector<128x128xbf16>
    %cst_43 = arith.constant dense<0.000000e+00> : vector<256x128xf32>
    %84 = tpu.matmul %81, %83, %cst_43 {dimension_numbers = #tpu.dot_dimension_numbers<[1], [0], [0], [1], [0, 0, 1, 1], [], []>} : vector<256x128xbf16>, vector<128x128xbf16>, vector<256x128xf32> -> vector<256x128xf32>
    %85 = arith.addf %79, %84 : vector<256x128xf32>
    %86 = vector.extract_strided_slice %18 {offsets = [1, 0, 2, 0], sizes = [4, 8, 8, 128], strides = [1, 1, 1, 1]} : vector<6x10x10x128xbf16> to vector<4x8x8x128xbf16>
    %87 = vector.shape_cast %86 : vector<4x8x8x128xbf16> to vector<256x128xbf16>
    %c11 = arith.constant 11 : index
    %c0_44 = arith.constant 0 : index
    %c0_45 = arith.constant 0 : index
    %88 = vector.load %arg4[%c11, %c0_44, %c0_45] : memref<27x128x128xbf16, #tpu.memory_space<vmem>>, vector<1x128x128xbf16>
    %89 = vector.shape_cast %88 : vector<1x128x128xbf16> to vector<128x128xbf16>
    %cst_46 = arith.constant dense<0.000000e+00> : vector<256x128xf32>
    %90 = tpu.matmul %87, %89, %cst_46 {dimension_numbers = #tpu.dot_dimension_numbers<[1], [0], [0], [1], [0, 0, 1, 1], [], []>} : vector<256x128xbf16>, vector<128x128xbf16>, vector<256x128xf32> -> vector<256x128xf32>
    %91 = arith.addf %85, %90 : vector<256x128xf32>
    %92 = vector.extract_strided_slice %18 {offsets = [1, 1, 0, 0], sizes = [4, 8, 8, 128], strides = [1, 1, 1, 1]} : vector<6x10x10x128xbf16> to vector<4x8x8x128xbf16>
    %93 = vector.shape_cast %92 : vector<4x8x8x128xbf16> to vector<256x128xbf16>
    %c12 = arith.constant 12 : index
    %c0_47 = arith.constant 0 : index
    %c0_48 = arith.constant 0 : index
    %94 = vector.load %arg4[%c12, %c0_47, %c0_48] : memref<27x128x128xbf16, #tpu.memory_space<vmem>>, vector<1x128x128xbf16>
    %95 = vector.shape_cast %94 : vector<1x128x128xbf16> to vector<128x128xbf16>
    %cst_49 = arith.constant dense<0.000000e+00> : vector<256x128xf32>
    %96 = tpu.matmul %93, %95, %cst_49 {dimension_numbers = #tpu.dot_dimension_numbers<[1], [0], [0], [1], [0, 0, 1, 1], [], []>} : vector<256x128xbf16>, vector<128x128xbf16>, vector<256x128xf32> -> vector<256x128xf32>
    %97 = arith.addf %91, %96 : vector<256x128xf32>
    %98 = vector.extract_strided_slice %18 {offsets = [1, 1, 1, 0], sizes = [4, 8, 8, 128], strides = [1, 1, 1, 1]} : vector<6x10x10x128xbf16> to vector<4x8x8x128xbf16>
    %99 = vector.shape_cast %98 : vector<4x8x8x128xbf16> to vector<256x128xbf16>
    %c13 = arith.constant 13 : index
    %c0_50 = arith.constant 0 : index
    %c0_51 = arith.constant 0 : index
    %100 = vector.load %arg4[%c13, %c0_50, %c0_51] : memref<27x128x128xbf16, #tpu.memory_space<vmem>>, vector<1x128x128xbf16>
    %101 = vector.shape_cast %100 : vector<1x128x128xbf16> to vector<128x128xbf16>
    %cst_52 = arith.constant dense<0.000000e+00> : vector<256x128xf32>
    %102 = tpu.matmul %99, %101, %cst_52 {dimension_numbers = #tpu.dot_dimension_numbers<[1], [0], [0], [1], [0, 0, 1, 1], [], []>} : vector<256x128xbf16>, vector<128x128xbf16>, vector<256x128xf32> -> vector<256x128xf32>
    %103 = arith.addf %97, %102 : vector<256x128xf32>
    %104 = vector.extract_strided_slice %18 {offsets = [1, 1, 2, 0], sizes = [4, 8, 8, 128], strides = [1, 1, 1, 1]} : vector<6x10x10x128xbf16> to vector<4x8x8x128xbf16>
    %105 = vector.shape_cast %104 : vector<4x8x8x128xbf16> to vector<256x128xbf16>
    %c14 = arith.constant 14 : index
    %c0_53 = arith.constant 0 : index
    %c0_54 = arith.constant 0 : index
    %106 = vector.load %arg4[%c14, %c0_53, %c0_54] : memref<27x128x128xbf16, #tpu.memory_space<vmem>>, vector<1x128x128xbf16>
    %107 = vector.shape_cast %106 : vector<1x128x128xbf16> to vector<128x128xbf16>
    %cst_55 = arith.constant dense<0.000000e+00> : vector<256x128xf32>
    %108 = tpu.matmul %105, %107, %cst_55 {dimension_numbers = #tpu.dot_dimension_numbers<[1], [0], [0], [1], [0, 0, 1, 1], [], []>} : vector<256x128xbf16>, vector<128x128xbf16>, vector<256x128xf32> -> vector<256x128xf32>
    %109 = arith.addf %103, %108 : vector<256x128xf32>
    %110 = vector.extract_strided_slice %18 {offsets = [1, 2, 0, 0], sizes = [4, 8, 8, 128], strides = [1, 1, 1, 1]} : vector<6x10x10x128xbf16> to vector<4x8x8x128xbf16>
    %111 = vector.shape_cast %110 : vector<4x8x8x128xbf16> to vector<256x128xbf16>
    %c15 = arith.constant 15 : index
    %c0_56 = arith.constant 0 : index
    %c0_57 = arith.constant 0 : index
    %112 = vector.load %arg4[%c15, %c0_56, %c0_57] : memref<27x128x128xbf16, #tpu.memory_space<vmem>>, vector<1x128x128xbf16>
    %113 = vector.shape_cast %112 : vector<1x128x128xbf16> to vector<128x128xbf16>
    %cst_58 = arith.constant dense<0.000000e+00> : vector<256x128xf32>
    %114 = tpu.matmul %111, %113, %cst_58 {dimension_numbers = #tpu.dot_dimension_numbers<[1], [0], [0], [1], [0, 0, 1, 1], [], []>} : vector<256x128xbf16>, vector<128x128xbf16>, vector<256x128xf32> -> vector<256x128xf32>
    %115 = arith.addf %109, %114 : vector<256x128xf32>
    %116 = vector.extract_strided_slice %18 {offsets = [1, 2, 1, 0], sizes = [4, 8, 8, 128], strides = [1, 1, 1, 1]} : vector<6x10x10x128xbf16> to vector<4x8x8x128xbf16>
    %117 = vector.shape_cast %116 : vector<4x8x8x128xbf16> to vector<256x128xbf16>
    %c16 = arith.constant 16 : index
    %c0_59 = arith.constant 0 : index
    %c0_60 = arith.constant 0 : index
    %118 = vector.load %arg4[%c16, %c0_59, %c0_60] : memref<27x128x128xbf16, #tpu.memory_space<vmem>>, vector<1x128x128xbf16>
    %119 = vector.shape_cast %118 : vector<1x128x128xbf16> to vector<128x128xbf16>
    %cst_61 = arith.constant dense<0.000000e+00> : vector<256x128xf32>
    %120 = tpu.matmul %117, %119, %cst_61 {dimension_numbers = #tpu.dot_dimension_numbers<[1], [0], [0], [1], [0, 0, 1, 1], [], []>} : vector<256x128xbf16>, vector<128x128xbf16>, vector<256x128xf32> -> vector<256x128xf32>
    %121 = arith.addf %115, %120 : vector<256x128xf32>
    %122 = vector.extract_strided_slice %18 {offsets = [1, 2, 2, 0], sizes = [4, 8, 8, 128], strides = [1, 1, 1, 1]} : vector<6x10x10x128xbf16> to vector<4x8x8x128xbf16>
    %123 = vector.shape_cast %122 : vector<4x8x8x128xbf16> to vector<256x128xbf16>
    %c17 = arith.constant 17 : index
    %c0_62 = arith.constant 0 : index
    %c0_63 = arith.constant 0 : index
    %124 = vector.load %arg4[%c17, %c0_62, %c0_63] : memref<27x128x128xbf16, #tpu.memory_space<vmem>>, vector<1x128x128xbf16>
    %125 = vector.shape_cast %124 : vector<1x128x128xbf16> to vector<128x128xbf16>
    %cst_64 = arith.constant dense<0.000000e+00> : vector<256x128xf32>
    %126 = tpu.matmul %123, %125, %cst_64 {dimension_numbers = #tpu.dot_dimension_numbers<[1], [0], [0], [1], [0, 0, 1, 1], [], []>} : vector<256x128xbf16>, vector<128x128xbf16>, vector<256x128xf32> -> vector<256x128xf32>
    %127 = arith.addf %121, %126 : vector<256x128xf32>
    %128 = vector.extract_strided_slice %18 {offsets = [2, 0, 0, 0], sizes = [4, 8, 8, 128], strides = [1, 1, 1, 1]} : vector<6x10x10x128xbf16> to vector<4x8x8x128xbf16>
    %129 = vector.shape_cast %128 : vector<4x8x8x128xbf16> to vector<256x128xbf16>
    %c18 = arith.constant 18 : index
    %c0_65 = arith.constant 0 : index
    %c0_66 = arith.constant 0 : index
    %130 = vector.load %arg4[%c18, %c0_65, %c0_66] : memref<27x128x128xbf16, #tpu.memory_space<vmem>>, vector<1x128x128xbf16>
    %131 = vector.shape_cast %130 : vector<1x128x128xbf16> to vector<128x128xbf16>
    %cst_67 = arith.constant dense<0.000000e+00> : vector<256x128xf32>
    %132 = tpu.matmul %129, %131, %cst_67 {dimension_numbers = #tpu.dot_dimension_numbers<[1], [0], [0], [1], [0, 0, 1, 1], [], []>} : vector<256x128xbf16>, vector<128x128xbf16>, vector<256x128xf32> -> vector<256x128xf32>
    %133 = arith.addf %127, %132 : vector<256x128xf32>
    %134 = vector.extract_strided_slice %18 {offsets = [2, 0, 1, 0], sizes = [4, 8, 8, 128], strides = [1, 1, 1, 1]} : vector<6x10x10x128xbf16> to vector<4x8x8x128xbf16>
    %135 = vector.shape_cast %134 : vector<4x8x8x128xbf16> to vector<256x128xbf16>
    %c19 = arith.constant 19 : index
    %c0_68 = arith.constant 0 : index
    %c0_69 = arith.constant 0 : index
    %136 = vector.load %arg4[%c19, %c0_68, %c0_69] : memref<27x128x128xbf16, #tpu.memory_space<vmem>>, vector<1x128x128xbf16>
    %137 = vector.shape_cast %136 : vector<1x128x128xbf16> to vector<128x128xbf16>
    %cst_70 = arith.constant dense<0.000000e+00> : vector<256x128xf32>
    %138 = tpu.matmul %135, %137, %cst_70 {dimension_numbers = #tpu.dot_dimension_numbers<[1], [0], [0], [1], [0, 0, 1, 1], [], []>} : vector<256x128xbf16>, vector<128x128xbf16>, vector<256x128xf32> -> vector<256x128xf32>
    %139 = arith.addf %133, %138 : vector<256x128xf32>
    %140 = vector.extract_strided_slice %18 {offsets = [2, 0, 2, 0], sizes = [4, 8, 8, 128], strides = [1, 1, 1, 1]} : vector<6x10x10x128xbf16> to vector<4x8x8x128xbf16>
    %141 = vector.shape_cast %140 : vector<4x8x8x128xbf16> to vector<256x128xbf16>
    %c20 = arith.constant 20 : index
    %c0_71 = arith.constant 0 : index
    %c0_72 = arith.constant 0 : index
    %142 = vector.load %arg4[%c20, %c0_71, %c0_72] : memref<27x128x128xbf16, #tpu.memory_space<vmem>>, vector<1x128x128xbf16>
    %143 = vector.shape_cast %142 : vector<1x128x128xbf16> to vector<128x128xbf16>
    %cst_73 = arith.constant dense<0.000000e+00> : vector<256x128xf32>
    %144 = tpu.matmul %141, %143, %cst_73 {dimension_numbers = #tpu.dot_dimension_numbers<[1], [0], [0], [1], [0, 0, 1, 1], [], []>} : vector<256x128xbf16>, vector<128x128xbf16>, vector<256x128xf32> -> vector<256x128xf32>
    %145 = arith.addf %139, %144 : vector<256x128xf32>
    %146 = vector.extract_strided_slice %18 {offsets = [2, 1, 0, 0], sizes = [4, 8, 8, 128], strides = [1, 1, 1, 1]} : vector<6x10x10x128xbf16> to vector<4x8x8x128xbf16>
    %147 = vector.shape_cast %146 : vector<4x8x8x128xbf16> to vector<256x128xbf16>
    %c21 = arith.constant 21 : index
    %c0_74 = arith.constant 0 : index
    %c0_75 = arith.constant 0 : index
    %148 = vector.load %arg4[%c21, %c0_74, %c0_75] : memref<27x128x128xbf16, #tpu.memory_space<vmem>>, vector<1x128x128xbf16>
    %149 = vector.shape_cast %148 : vector<1x128x128xbf16> to vector<128x128xbf16>
    %cst_76 = arith.constant dense<0.000000e+00> : vector<256x128xf32>
    %150 = tpu.matmul %147, %149, %cst_76 {dimension_numbers = #tpu.dot_dimension_numbers<[1], [0], [0], [1], [0, 0, 1, 1], [], []>} : vector<256x128xbf16>, vector<128x128xbf16>, vector<256x128xf32> -> vector<256x128xf32>
    %151 = arith.addf %145, %150 : vector<256x128xf32>
    %152 = vector.extract_strided_slice %18 {offsets = [2, 1, 1, 0], sizes = [4, 8, 8, 128], strides = [1, 1, 1, 1]} : vector<6x10x10x128xbf16> to vector<4x8x8x128xbf16>
    %153 = vector.shape_cast %152 : vector<4x8x8x128xbf16> to vector<256x128xbf16>
    %c22 = arith.constant 22 : index
    %c0_77 = arith.constant 0 : index
    %c0_78 = arith.constant 0 : index
    %154 = vector.load %arg4[%c22, %c0_77, %c0_78] : memref<27x128x128xbf16, #tpu.memory_space<vmem>>, vector<1x128x128xbf16>
    %155 = vector.shape_cast %154 : vector<1x128x128xbf16> to vector<128x128xbf16>
    %cst_79 = arith.constant dense<0.000000e+00> : vector<256x128xf32>
    %156 = tpu.matmul %153, %155, %cst_79 {dimension_numbers = #tpu.dot_dimension_numbers<[1], [0], [0], [1], [0, 0, 1, 1], [], []>} : vector<256x128xbf16>, vector<128x128xbf16>, vector<256x128xf32> -> vector<256x128xf32>
    %157 = arith.addf %151, %156 : vector<256x128xf32>
    %158 = vector.extract_strided_slice %18 {offsets = [2, 1, 2, 0], sizes = [4, 8, 8, 128], strides = [1, 1, 1, 1]} : vector<6x10x10x128xbf16> to vector<4x8x8x128xbf16>
    %159 = vector.shape_cast %158 : vector<4x8x8x128xbf16> to vector<256x128xbf16>
    %c23 = arith.constant 23 : index
    %c0_80 = arith.constant 0 : index
    %c0_81 = arith.constant 0 : index
    %160 = vector.load %arg4[%c23, %c0_80, %c0_81] : memref<27x128x128xbf16, #tpu.memory_space<vmem>>, vector<1x128x128xbf16>
    %161 = vector.shape_cast %160 : vector<1x128x128xbf16> to vector<128x128xbf16>
    %cst_82 = arith.constant dense<0.000000e+00> : vector<256x128xf32>
    %162 = tpu.matmul %159, %161, %cst_82 {dimension_numbers = #tpu.dot_dimension_numbers<[1], [0], [0], [1], [0, 0, 1, 1], [], []>} : vector<256x128xbf16>, vector<128x128xbf16>, vector<256x128xf32> -> vector<256x128xf32>
    %163 = arith.addf %157, %162 : vector<256x128xf32>
    %164 = vector.extract_strided_slice %18 {offsets = [2, 2, 0, 0], sizes = [4, 8, 8, 128], strides = [1, 1, 1, 1]} : vector<6x10x10x128xbf16> to vector<4x8x8x128xbf16>
    %165 = vector.shape_cast %164 : vector<4x8x8x128xbf16> to vector<256x128xbf16>
    %c24 = arith.constant 24 : index
    %c0_83 = arith.constant 0 : index
    %c0_84 = arith.constant 0 : index
    %166 = vector.load %arg4[%c24, %c0_83, %c0_84] : memref<27x128x128xbf16, #tpu.memory_space<vmem>>, vector<1x128x128xbf16>
    %167 = vector.shape_cast %166 : vector<1x128x128xbf16> to vector<128x128xbf16>
    %cst_85 = arith.constant dense<0.000000e+00> : vector<256x128xf32>
    %168 = tpu.matmul %165, %167, %cst_85 {dimension_numbers = #tpu.dot_dimension_numbers<[1], [0], [0], [1], [0, 0, 1, 1], [], []>} : vector<256x128xbf16>, vector<128x128xbf16>, vector<256x128xf32> -> vector<256x128xf32>
    %169 = arith.addf %163, %168 : vector<256x128xf32>
    %170 = vector.extract_strided_slice %18 {offsets = [2, 2, 1, 0], sizes = [4, 8, 8, 128], strides = [1, 1, 1, 1]} : vector<6x10x10x128xbf16> to vector<4x8x8x128xbf16>
    %171 = vector.shape_cast %170 : vector<4x8x8x128xbf16> to vector<256x128xbf16>
    %c25 = arith.constant 25 : index
    %c0_86 = arith.constant 0 : index
    %c0_87 = arith.constant 0 : index
    %172 = vector.load %arg4[%c25, %c0_86, %c0_87] : memref<27x128x128xbf16, #tpu.memory_space<vmem>>, vector<1x128x128xbf16>
    %173 = vector.shape_cast %172 : vector<1x128x128xbf16> to vector<128x128xbf16>
    %cst_88 = arith.constant dense<0.000000e+00> : vector<256x128xf32>
    %174 = tpu.matmul %171, %173, %cst_88 {dimension_numbers = #tpu.dot_dimension_numbers<[1], [0], [0], [1], [0, 0, 1, 1], [], []>} : vector<256x128xbf16>, vector<128x128xbf16>, vector<256x128xf32> -> vector<256x128xf32>
    %175 = arith.addf %169, %174 : vector<256x128xf32>
    %176 = vector.extract_strided_slice %18 {offsets = [2, 2, 2, 0], sizes = [4, 8, 8, 128], strides = [1, 1, 1, 1]} : vector<6x10x10x128xbf16> to vector<4x8x8x128xbf16>
    %177 = vector.shape_cast %176 : vector<4x8x8x128xbf16> to vector<256x128xbf16>
    %c26 = arith.constant 26 : index
    %c0_89 = arith.constant 0 : index
    %c0_90 = arith.constant 0 : index
    %178 = vector.load %arg4[%c26, %c0_89, %c0_90] : memref<27x128x128xbf16, #tpu.memory_space<vmem>>, vector<1x128x128xbf16>
    %179 = vector.shape_cast %178 : vector<1x128x128xbf16> to vector<128x128xbf16>
    %cst_91 = arith.constant dense<0.000000e+00> : vector<256x128xf32>
    %180 = tpu.matmul %177, %179, %cst_91 {dimension_numbers = #tpu.dot_dimension_numbers<[1], [0], [0], [1], [0, 0, 1, 1], [], []>} : vector<256x128xbf16>, vector<128x128xbf16>, vector<256x128xf32> -> vector<256x128xf32>
    %181 = arith.addf %175, %180 : vector<256x128xf32>
    %182 = arith.truncf %181 : vector<256x128xf32> to vector<256x128xbf16>
    %c0_92 = arith.constant 0 : index
    %c0_93 = arith.constant 0 : index
    %c0_94 = arith.constant 0 : index
    %183 = vector.load %arg5[%c0_92, %c0_93, %c0_94] : memref<1x256x128xbf16, #tpu.memory_space<vmem>>, vector<1x256x128xbf16>
    %184 = vector.shape_cast %183 : vector<1x256x128xbf16> to vector<256x128xbf16>
    %185 = vector.shape_cast %182 : vector<256x128xbf16> to vector<1x256x128xbf16>
    tpu.vector_store %arg5[%c0_92, %c0_93, %c0_94], %185 {strides = array<i32>} : memref<1x256x128xbf16, #tpu.memory_space<vmem>>, vector<1x256x128xbf16>,
    %cst_95 = arith.constant dense<0.000000e+00> : vector<128xf32>
    %186 = vector.multi_reduction <add>, %181, %cst_95 [0] : vector<256x128xf32> to vector<128xf32>
    %187 = vector.shape_cast %186 : vector<128xf32> to vector<1x128xf32>
    %188 = arith.mulf %181, %181 : vector<256x128xf32>
    %cst_96 = arith.constant dense<0.000000e+00> : vector<128xf32>
    %189 = vector.multi_reduction <add>, %188, %cst_96 [0] : vector<256x128xf32> to vector<128xf32>
    %190 = vector.shape_cast %189 : vector<128xf32> to vector<1x128xf32>
    %191 = tpu.concatenate %187, %190 in 0 : vector<1x128xf32>, vector<1x128xf32> -> vector<2x128xf32>
    %c0_97 = arith.constant 0 : index
    %c0_98 = arith.constant 0 : index
    %c0_99 = arith.constant 0 : index
    %192 = vector.load %arg6[%c0_97, %c0_98, %c0_99] : memref<1x2x128xf32, #tpu.memory_space<vmem>>, vector<1x2x128xf32>
    %193 = vector.shape_cast %192 : vector<1x2x128xf32> to vector<2x128xf32>
    %194 = vector.shape_cast %191 : vector<2x128xf32> to vector<1x2x128xf32>
    tpu.vector_store %arg6[%c0_97, %c0_98, %c0_99], %194 {strides = array<i32>} : memref<1x2x128xf32, #tpu.memory_space<vmem>>, vector<1x2x128xf32>,
    return
  }
  func.func @transform_0(%arg0: i32) -> (i32, i32, i32) {
    %c0_i32 = arith.constant 0 : i32
    %c0_i32_0 = arith.constant 0 : i32
    %c0_i32_1 = arith.constant 0 : i32
    return %arg0, %c0_i32, %c0_i32_0 : i32, i32, i32
  }
  func.func @transform_1(%arg0: i32) -> (i32, i32) {
    %c0_i32 = arith.constant 0 : i32
    %c0_i32_0 = arith.constant 0 : i32
    %c0_i32_1 = arith.constant 0 : i32
    return %c0_i32, %c0_i32_0 : i32, i32
  }
  func.func @transform_2(%arg0: i32) -> (i32, i32) {
    %c0_i32 = arith.constant 0 : i32
    %c0_i32_0 = arith.constant 0 : i32
    %c0_i32_1 = arith.constant 0 : i32
    return %c0_i32, %c0_i32_0 : i32, i32
  }
  func.func @transform_3(%arg0: i32) -> (i32, i32, i32) {
    %c0_i32 = arith.constant 0 : i32
    %c0_i32_0 = arith.constant 0 : i32
    %c0_i32_1 = arith.constant 0 : i32
    %c0_i32_2 = arith.constant 0 : i32
    return %c0_i32, %c0_i32_0, %c0_i32_1 : i32, i32, i32
  }
  func.func @transform_4(%arg0: i32) -> (i32, i32, i32) {
    %c0_i32 = arith.constant 0 : i32
    %c0_i32_0 = arith.constant 0 : i32
    %c0_i32_1 = arith.constant 0 : i32
    return %arg0, %c0_i32, %c0_i32_0 : i32, i32, i32
  }
  func.func @transform_5(%arg0: i32) -> (i32, i32, i32) {
    %c0_i32 = arith.constant 0 : i32
    %c0_i32_0 = arith.constant 0 : i32
    %c0_i32_1 = arith.constant 0 : i32
    return %arg0, %c0_i32, %c0_i32_0 : i32, i32, i32
  }
}

module attributes {stable_mosaic.version = 11 : i64} {
  func.func @kernel(%arg0: i32, %arg1: memref<256x128xbf16, #tpu.memory_space<vmem>>, %arg2: memref<1x128xf32, #tpu.memory_space<vmem>>, %arg3: memref<1x128xf32, #tpu.memory_space<vmem>>, %arg4: memref<128x128xbf16, #tpu.memory_space<vmem>>, %arg5: memref<256x128xbf16, #tpu.memory_space<vmem>>, %arg6: memref<1x2x128xf32, #tpu.memory_space<vmem>>) attributes {dimension_semantics = [#tpu.dimension_semantics<parallel>], iteration_bounds = array<i64: 2>, scalar_prefetch = 0 : i64, scratch_operands = 0 : i64, tpu.core_type = #tpu.core_type<tc>, window_params = [{transform_indices = @transform_0, window_bounds = array<i64: 256, 128>}, {pipeline_mode = #tpu.pipeline_mode<synchronous>, transform_indices = @transform_1, window_bounds = array<i64: 1, 128>}, {pipeline_mode = #tpu.pipeline_mode<synchronous>, transform_indices = @transform_2, window_bounds = array<i64: 1, 128>}, {pipeline_mode = #tpu.pipeline_mode<synchronous>, transform_indices = @transform_3, window_bounds = array<i64: 128, 128>}, {transform_indices = @transform_4, window_bounds = array<i64: 256, 128>}, {transform_indices = @transform_5, window_bounds = array<i64: 1, 2, 128>}]} {
    %c0 = arith.constant 0 : index
    %c0_0 = arith.constant 0 : index
    %0 = vector.load %arg1[%c0, %c0_0] : memref<256x128xbf16, #tpu.memory_space<vmem>>, vector<256x128xbf16>
    %1 = arith.extf %0 : vector<256x128xbf16> to vector<256x128xf32>
    %c0_1 = arith.constant 0 : index
    %c0_2 = arith.constant 0 : index
    %2 = vector.load %arg2[%c0_1, %c0_2] : memref<1x128xf32, #tpu.memory_space<vmem>>, vector<1x128xf32>
    %3 = vector.broadcast %2 : vector<1x128xf32> to vector<256x128xf32>
    %4 = arith.mulf %1, %3 : vector<256x128xf32>
    %c0_3 = arith.constant 0 : index
    %c0_4 = arith.constant 0 : index
    %5 = vector.load %arg3[%c0_3, %c0_4] : memref<1x128xf32, #tpu.memory_space<vmem>>, vector<1x128xf32>
    %6 = vector.broadcast %5 : vector<1x128xf32> to vector<256x128xf32>
    %7 = arith.addf %4, %6 : vector<256x128xf32>
    %cst = arith.constant 0.000000e+00 : f32
    %8 = vector.broadcast %cst : f32 to vector<256x128xf32>
    %9 = arith.maximumf %7, %8 : vector<256x128xf32>
    %10 = arith.truncf %9 : vector<256x128xf32> to vector<256x128xbf16>
    %c0_5 = arith.constant 0 : index
    %c0_6 = arith.constant 0 : index
    %11 = vector.load %arg4[%c0_5, %c0_6] : memref<128x128xbf16, #tpu.memory_space<vmem>>, vector<128x128xbf16>
    %cst_7 = arith.constant dense<0.000000e+00> : vector<256x128xf32>
    %12 = tpu.matmul %10, %11, %cst_7 {dimension_numbers = #tpu.dot_dimension_numbers<[1], [0], [0], [1], [0, 0, 1, 1], [], []>} : vector<256x128xbf16>, vector<128x128xbf16>, vector<256x128xf32> -> vector<256x128xf32>
    %13 = arith.truncf %12 : vector<256x128xf32> to vector<256x128xbf16>
    %c0_8 = arith.constant 0 : index
    %c0_9 = arith.constant 0 : index
    %14 = vector.load %arg5[%c0_8, %c0_9] : memref<256x128xbf16, #tpu.memory_space<vmem>>, vector<256x128xbf16>
    tpu.vector_store %arg5[%c0_8, %c0_9], %13 {strides = array<i32>} : memref<256x128xbf16, #tpu.memory_space<vmem>>, vector<256x128xbf16>,
    %cst_10 = arith.constant dense<0.000000e+00> : vector<128xf32>
    %15 = vector.multi_reduction <add>, %12, %cst_10 [0] : vector<256x128xf32> to vector<128xf32>
    %16 = vector.shape_cast %15 : vector<128xf32> to vector<1x128xf32>
    %17 = arith.mulf %12, %12 : vector<256x128xf32>
    %cst_11 = arith.constant dense<0.000000e+00> : vector<128xf32>
    %18 = vector.multi_reduction <add>, %17, %cst_11 [0] : vector<256x128xf32> to vector<128xf32>
    %19 = vector.shape_cast %18 : vector<128xf32> to vector<1x128xf32>
    %20 = tpu.concatenate %16, %19 in 0 : vector<1x128xf32>, vector<1x128xf32> -> vector<2x128xf32>
    %c0_12 = arith.constant 0 : index
    %c0_13 = arith.constant 0 : index
    %c0_14 = arith.constant 0 : index
    %21 = vector.load %arg6[%c0_12, %c0_13, %c0_14] : memref<1x2x128xf32, #tpu.memory_space<vmem>>, vector<1x2x128xf32>
    %22 = vector.shape_cast %21 : vector<1x2x128xf32> to vector<2x128xf32>
    %23 = vector.shape_cast %20 : vector<2x128xf32> to vector<1x2x128xf32>
    tpu.vector_store %arg6[%c0_12, %c0_13, %c0_14], %23 {strides = array<i32>} : memref<1x2x128xf32, #tpu.memory_space<vmem>>, vector<1x2x128xf32>,
    return
  }
  func.func @transform_0(%arg0: i32) -> (i32, i32) {
    %c0_i32 = arith.constant 0 : i32
    %c0_i32_0 = arith.constant 0 : i32
    return %arg0, %c0_i32 : i32, i32
  }
  func.func @transform_1(%arg0: i32) -> (i32, i32) {
    %c0_i32 = arith.constant 0 : i32
    %c0_i32_0 = arith.constant 0 : i32
    %c0_i32_1 = arith.constant 0 : i32
    return %c0_i32, %c0_i32_0 : i32, i32
  }
  func.func @transform_2(%arg0: i32) -> (i32, i32) {
    %c0_i32 = arith.constant 0 : i32
    %c0_i32_0 = arith.constant 0 : i32
    %c0_i32_1 = arith.constant 0 : i32
    return %c0_i32, %c0_i32_0 : i32, i32
  }
  func.func @transform_3(%arg0: i32) -> (i32, i32) {
    %c0_i32 = arith.constant 0 : i32
    %c0_i32_0 = arith.constant 0 : i32
    %c0_i32_1 = arith.constant 0 : i32
    return %c0_i32, %c0_i32_0 : i32, i32
  }
  func.func @transform_4(%arg0: i32) -> (i32, i32) {
    %c0_i32 = arith.constant 0 : i32
    %c0_i32_0 = arith.constant 0 : i32
    return %arg0, %c0_i32 : i32, i32
  }
  func.func @transform_5(%arg0: i32) -> (i32, i32, i32) {
    %c0_i32 = arith.constant 0 : i32
    %c0_i32_0 = arith.constant 0 : i32
    %c0_i32_1 = arith.constant 0 : i32
    return %arg0, %c0_i32, %c0_i32_0 : i32, i32, i32
  }
}

module attributes {stable_mosaic.version = 11 : i64} {
  func.func @_bn_add_relu_kernel(%arg0: i32, %arg1: memref<256x128xbf16, #tpu.memory_space<vmem>>, %arg2: memref<1x128xf32, #tpu.memory_space<vmem>>, %arg3: memref<1x128xf32, #tpu.memory_space<vmem>>, %arg4: memref<256x128xbf16, #tpu.memory_space<vmem>>, %arg5: memref<1x128xf32, #tpu.memory_space<vmem>>, %arg6: memref<1x128xf32, #tpu.memory_space<vmem>>, %arg7: memref<256x128xf32, #tpu.memory_space<vmem>>) attributes {dimension_semantics = [#tpu.dimension_semantics<parallel>], iteration_bounds = array<i64: 2>, scalar_prefetch = 0 : i64, scratch_operands = 0 : i64, tpu.core_type = #tpu.core_type<tc>, window_params = [{transform_indices = @transform_0, window_bounds = array<i64: 256, 128>}, {pipeline_mode = #tpu.pipeline_mode<synchronous>, transform_indices = @transform_1, window_bounds = array<i64: 1, 128>}, {pipeline_mode = #tpu.pipeline_mode<synchronous>, transform_indices = @transform_2, window_bounds = array<i64: 1, 128>}, {transform_indices = @transform_3, window_bounds = array<i64: 256, 128>}, {pipeline_mode = #tpu.pipeline_mode<synchronous>, transform_indices = @transform_4, window_bounds = array<i64: 1, 128>}, {pipeline_mode = #tpu.pipeline_mode<synchronous>, transform_indices = @transform_5, window_bounds = array<i64: 1, 128>}, {transform_indices = @transform_6, window_bounds = array<i64: 256, 128>}]} {
    %c0 = arith.constant 0 : index
    %c0_0 = arith.constant 0 : index
    %0 = vector.load %arg1[%c0, %c0_0] : memref<256x128xbf16, #tpu.memory_space<vmem>>, vector<256x128xbf16>
    %1 = arith.extf %0 : vector<256x128xbf16> to vector<256x128xf32>
    %c0_1 = arith.constant 0 : index
    %c0_2 = arith.constant 0 : index
    %2 = vector.load %arg2[%c0_1, %c0_2] : memref<1x128xf32, #tpu.memory_space<vmem>>, vector<1x128xf32>
    %3 = vector.broadcast %2 : vector<1x128xf32> to vector<256x128xf32>
    %4 = arith.mulf %1, %3 : vector<256x128xf32>
    %c0_3 = arith.constant 0 : index
    %c0_4 = arith.constant 0 : index
    %5 = vector.load %arg3[%c0_3, %c0_4] : memref<1x128xf32, #tpu.memory_space<vmem>>, vector<1x128xf32>
    %6 = vector.broadcast %5 : vector<1x128xf32> to vector<256x128xf32>
    %7 = arith.addf %4, %6 : vector<256x128xf32>
    %c0_5 = arith.constant 0 : index
    %c0_6 = arith.constant 0 : index
    %8 = vector.load %arg4[%c0_5, %c0_6] : memref<256x128xbf16, #tpu.memory_space<vmem>>, vector<256x128xbf16>
    %9 = arith.extf %8 : vector<256x128xbf16> to vector<256x128xf32>
    %c0_7 = arith.constant 0 : index
    %c0_8 = arith.constant 0 : index
    %10 = vector.load %arg5[%c0_7, %c0_8] : memref<1x128xf32, #tpu.memory_space<vmem>>, vector<1x128xf32>
    %11 = vector.broadcast %10 : vector<1x128xf32> to vector<256x128xf32>
    %12 = arith.mulf %9, %11 : vector<256x128xf32>
    %c0_9 = arith.constant 0 : index
    %c0_10 = arith.constant 0 : index
    %13 = vector.load %arg6[%c0_9, %c0_10] : memref<1x128xf32, #tpu.memory_space<vmem>>, vector<1x128xf32>
    %14 = vector.broadcast %13 : vector<1x128xf32> to vector<256x128xf32>
    %15 = arith.addf %12, %14 : vector<256x128xf32>
    %16 = arith.addf %7, %15 : vector<256x128xf32>
    %cst = arith.constant 0.000000e+00 : f32
    %17 = vector.broadcast %cst : f32 to vector<256x128xf32>
    %18 = arith.maximumf %16, %17 : vector<256x128xf32>
    %c0_11 = arith.constant 0 : index
    %c0_12 = arith.constant 0 : index
    %19 = vector.load %arg7[%c0_11, %c0_12] : memref<256x128xf32, #tpu.memory_space<vmem>>, vector<256x128xf32>
    tpu.vector_store %arg7[%c0_11, %c0_12], %18 {strides = array<i32>} : memref<256x128xf32, #tpu.memory_space<vmem>>, vector<256x128xf32>,
    return
  }
  func.func @transform_0(%arg0: i32) -> (i32, i32) {
    %c0_i32 = arith.constant 0 : i32
    %c0_i32_0 = arith.constant 0 : i32
    return %arg0, %c0_i32 : i32, i32
  }
  func.func @transform_1(%arg0: i32) -> (i32, i32) {
    %c0_i32 = arith.constant 0 : i32
    %c0_i32_0 = arith.constant 0 : i32
    %c0_i32_1 = arith.constant 0 : i32
    return %c0_i32, %c0_i32_0 : i32, i32
  }
  func.func @transform_2(%arg0: i32) -> (i32, i32) {
    %c0_i32 = arith.constant 0 : i32
    %c0_i32_0 = arith.constant 0 : i32
    %c0_i32_1 = arith.constant 0 : i32
    return %c0_i32, %c0_i32_0 : i32, i32
  }
  func.func @transform_3(%arg0: i32) -> (i32, i32) {
    %c0_i32 = arith.constant 0 : i32
    %c0_i32_0 = arith.constant 0 : i32
    return %arg0, %c0_i32 : i32, i32
  }
  func.func @transform_4(%arg0: i32) -> (i32, i32) {
    %c0_i32 = arith.constant 0 : i32
    %c0_i32_0 = arith.constant 0 : i32
    %c0_i32_1 = arith.constant 0 : i32
    return %c0_i32, %c0_i32_0 : i32, i32
  }
  func.func @transform_5(%arg0: i32) -> (i32, i32) {
    %c0_i32 = arith.constant 0 : i32
    %c0_i32_0 = arith.constant 0 : i32
    %c0_i32_1 = arith.constant 0 : i32
    return %c0_i32, %c0_i32_0 : i32, i32
  }
  func.func @transform_6(%arg0: i32) -> (i32, i32) {
    %c0_i32 = arith.constant 0 : i32
    %c0_i32_0 = arith.constant 0 : i32
    return %arg0, %c0_i32 : i32, i32
  }
}

</mosaic_0001>

<bundles_post_ra>
// kernel: bottleneck_forward.6
= control target key start
LH: loop header
LB: loop body
LE: loop exit
PB: predicated region body
PF: predicated region fallthrough
CT: control target
= control target key end

     0   :  { %s1413_s18 = smov 0   ;;  %s1681_s0 = inlined_call_operand.vmem [shape: bf16[512,128], index: 0, kind: input, shape index: {}]   ;;  %s1682_s1 = inlined_call_operand.vmem [shape: f32[1,128], index: 1, kind: input, shape index: {}]   ;;  %s1683_s2 = inlined_call_operand.vmem [shape: f32[1,128], index: 2, kind: input, shape index: {}]   ;;  %s1684_s3 = inlined_call_operand.vmem [shape: bf16[128,128], index: 3, kind: input, shape index: {}]   ;;  %s1685_s4 = inlined_call_operand.vmem [shape: bf16[512,128], index: 4, kind: output, shape index: {0}]   ;;  %s1686_s5 = inlined_call_operand.vmem [shape: f32[2,2,128], index: 5, kind: output, shape index: {1}]  }
   0x1 LB: > { %s1419_s19 = sadd.s32 4294967295, %s1381_s18   ;;  %p1015_p0 = scmp.ge.s32.totalorder %s1381_s18, 1  ;;  %s1381_s18 = sphi %s1413_s18, %s16_s18  }
   0x2   : > { %p191_p1 = scmp.lt.s32.totalorder %s1381_s18, 3 }
   0x4   : > { %p192_p2 = pnand %p1015_p0, %p191_p1 }
   0x5   : > { %v1367_v0 = vld [vmem:[%s1684_s3] sm:$0xff] (!%p192_p2)   ;;  %s1016_s22 = sshll.u32 (!%p192_p2), %s1419_s19, 5  ;;  %v1368_v1 = vld [vmem:[%s1684_s3 + $0x8] sm:$0xff] (!%p192_p2)   ;;  %v1369_v2 = vld [vmem:[%s1684_s3 + $0x10] sm:$0xff] (!%p192_p2)   ;;  %p235_p4 = scmp.lt.s32.totalorder (!%p192_p2), %s1419_s19, 1  ;;  %vm921_vm0 = vcmask (!%p192_p2), 1040384  }
   0x6   : > { %195 = sbr.rel (%p192_p2) target bundleno = 331 (0x14b), region = 36  ;;  %p224_p3 = scmp.lt.s32.totalorder (!%p192_p2), %s1016_s22, 63  ;;  %1295 = vmatprep.subr.bf16.mxu0 (!%p192_p2), %v1367_v0  ;;  %1343 = vmatprep.subr.bf16.mxu1 (!%p192_p2), %v1367_v0  ;;  %v1370_v3 = vld [vmem:[%s1684_s3 + $0x18] sm:$0xff] (!%p192_p2)   ;;  %v1450_v5 = vld [vmem:[%s1682_s1] ss:$0 sm:$0xff] (!%p192_p2)  ;;  %v1372_v34 = vld [vmem:[%s1684_s3 + $0x28] sm:$0xff] (!%p192_p2)  }
   0x7   : > { %1296 = vmatpush3.bf16.msra.mxu0 (!%p192_p2), %v1367_v0  ;;  %1351 = vmatpush3.bf16.msra.mxu1 (!%p192_p2), %v1367_v0  ;;  %v1458_v11 = vld [vmem:[%s1683_s2] ss:$0 sm:$0xff] (!%p192_p2)  ;;  %v1373_v49 = vld [vmem:[%s1684_s3 + $0x30] sm:$0xff] (!%p192_p2)   ;;  %v1374_v63 = vld [vmem:[%s1684_s3 + $0x38] sm:$0xff] (!%p192_p2)  }
   0x8   : > { %1297 = vmatprep.subr.bf16.mxu0 (!%p192_p2), %v1368_v1  ;;  %1344 = vmatprep.subr.bf16.mxu1 (!%p192_p2), %v1368_v1  ;;  %v1371_v20 = vld [vmem:[%s1684_s3 + $0x20] sm:$0xff] (!%p192_p2)  }
   0xb   : > { %1298 = vmatpush3.bf16.msra.mxu0 (!%p192_p2), %v1368_v1  ;;  %1352 = vmatpush3.bf16.msra.mxu1 (!%p192_p2), %v1368_v1 }
   0xc   : > { %1299 = vmatprep.subr.bf16.mxu0 (!%p192_p2), %v1369_v2  ;;  %1345 = vmatprep.subr.bf16.mxu1 (!%p192_p2), %v1369_v2 }
   0xd   : > { %s1688_s22 = smov (!%p224_p3, %s1016_s22), 63  ;;  %s1690_s19 = smov (!%p235_p4, %s1419_s19), 1 }
   0xe   : > { %s1017_s27 = sshll.u32 %s1688_s22, 2  ;;  %s1020_s22 = sshll.u32 %s1690_s19, 1 }
   0xf   : > { %s1441_s30 = scalar_lea.vmem %s1681_s0, %s1017_s27  ;;  %1300 = vmatpush3.bf16.msra.mxu0 %v1369_v2  ;;  %1353 = vmatpush3.bf16.msra.mxu1 %v1369_v2  ;;  %s1583_s25 = scalar_lea.vmem %s1685_s4, %s1017_s27 }
  0x10   : > { %v1098_v4 = vld [vmem:[%s1441_s30] sm:$0xff]   ;;  %v1241_v8 = vld [vmem:[%s1441_s30 + $0x8] sm:$0xff]   ;;  %v1242_v9 = vld [vmem:[%s1441_s30 + $0x10] sm:$0xff]   ;;  %1301 = vmatprep.subr.bf16.mxu0 %v1370_v3  ;;  %1346 = vmatprep.subr.bf16.mxu1 %v1370_v3  ;;  %s238_s28 = scalar_lea.vmem %s1686_s5, %s1020_s22 }
  0x11   : > { %v1099_v6 = vunpack.c.l.bf16 %v1098_v4  ;;  %v1100_v7 = vunpack.c.h.bf16 %v1098_v4  ;;  %v1243_v10 = vld [vmem:[%s1441_s30 + $0x18] sm:$0xff]   ;;  %v1103_v12 = vunpack.c.l.bf16 %v1241_v8  ;;  %v1104_v13 = vunpack.c.h.bf16 %v1241_v8  ;;  %v1244_v29 = vld [vmem:[%s1441_s30 + $0x20] sm:$0xff]   ;;  %v1245_v33 = vld [vmem:[%s1441_s30 + $0x28] sm:$0xff]  }
  0x12   : > { %v1107_v14 = vunpack.c.l.bf16 %v1242_v9  ;;  %v1108_v15 = vunpack.c.h.bf16 %v1242_v9  ;;  %v1111_v18 = vunpack.c.l.bf16 %v1243_v10  ;;  %v1112_v19 = vunpack.c.h.bf16 %v1243_v10  ;;  %v1246_v42 = vld [vmem:[%s1441_s30 + $0x30] sm:$0xff]   ;;  %v1487_v48 = vld [vmem:[%s1441_s30 + $0x38] sm:$0xff]   ;;  %v1248_v60 = vld [vmem:[%s1441_s30 + $0x40] sm:$0xff]  }
  0x13   : > { %v311_v16 = vmul.f32 %v1099_v6, %v1450_v5  ;;  %v312_v17 = vmul.f32 %v1100_v7, %v1450_v5  ;;  %v313_v21 = vmul.f32 %v1103_v12, %v1450_v5  ;;  %v314_v22 = vmul.f32 %v1104_v13, %v1450_v5  ;;  %1302 = vmatpush3.bf16.msra.mxu0 %v1370_v3  ;;  %v1250_v9 = vld [vmem:[%s1441_s30 + $0x50] sm:$0xff]  }
  0x14   : > { %v315_v23 = vmul.f32 %v1107_v14, %v1450_v5  ;;  %v316_v24 = vmul.f32 %v1108_v15, %v1450_v5  ;;  %v317_v27 = vmul.f32 %v1111_v18, %v1450_v5  ;;  %v318_v28 = vmul.f32 %v1112_v19, %v1450_v5  ;;  %1354 = vmatpush3.bf16.msra.mxu1 %v1370_v3  ;;  %v1249_v3 = vld [vmem:[%s1441_s30 + $0x48] sm:$0xff]   ;;  %v1251_v19 = vld [vmem:[%s1441_s30 + $0x58] sm:$0xff]  }
  0x15   : > { %v350_v25 = vadd.f32 %v1458_v11, %v311_v16  ;;  %v351_v26 = vadd.f32 %v1458_v11, %v312_v17  ;;  %v352_v32 = vadd.f32 %v1458_v11, %v313_v21  ;;  %1303 = vmatprep.subr.bf16.mxu0 %v1371_v20  ;;  %v353_v35 = vadd.f32 %v1458_v11, %v314_v22 }
  0x16   : > { %v354_v36 = vadd.f32 %v1458_v11, %v315_v23  ;;  %v355_v37 = vadd.f32 %v1458_v11, %v316_v24  ;;  %1347 = vmatprep.subr.bf16.mxu1 %v1371_v20  ;;  %v356_v39 = vadd.f32 %v1458_v11, %v317_v27  ;;  %v357_v40 = vadd.f32 %v1458_v11, %v318_v28 }
  0x17   : > { %v382_v30 = vmax.f32 %v350_v25, 0.0  ;;  %v383_v31 = vmax.f32 %v351_v26, 0.0  ;;  %v1115_v41 = vunpack.c.l.bf16 %v1244_v29  ;;  %v1116_v43 = vunpack.c.h.bf16 %v1244_v29  ;;  %1304 = vmatpush3.bf16.msra.mxu0 %v1371_v20 }
  0x18   : > { %v1119_v44 = vunpack.c.l.bf16 %v1245_v33  ;;  %v384_v45 = vmax.f32 %v352_v32, 0.0  ;;  %v1120_v47 = vunpack.c.h.bf16 %v1245_v33  ;;  %1305 = vmatprep.subr.bf16.mxu0 %v1372_v34  ;;  %v385_v50 = vmax.f32 %v353_v35, 0.0  ;;  %1355 = vmatpush3.bf16.msra.mxu1 %v1371_v20  ;;  %v1252_v32 = vld [vmem:[%s1441_s30 + $0x60] sm:$0xff]  }
  0x19   : > { %v414_v38 = vpack.c.bf16 %v383_v31, %v382_v30  ;;  %v319_v46 = vmul.f32 %v1115_v41, %v1450_v5  ;;  %v386_v51 = vmax.f32 %v354_v36, 0.0  ;;  %v387_v52 = vmax.f32 %v355_v37, 0.0  ;;  %1348 = vmatprep.subr.bf16.mxu1 %v1372_v34 }
  0x1a   : > { %v1123_v53 = vunpack.c.l.bf16 %v1246_v42  ;;  %v388_v54 = vmax.f32 %v356_v39, 0.0  ;;  %v389_v55 = vmax.f32 %v357_v40, 0.0  ;;  %v320_v56 = vmul.f32 %v1116_v43, %v1450_v5 }
  0x1b   : > { %1311 = vmatprep.mubr.bf16.mxu0 %v414_v38  ;;  %v321_v57 = vmul.f32 %v1119_v44, %v1450_v5  ;;  %v1124_v58 = vunpack.c.h.bf16 %v1246_v42  ;;  %v1127_v59 = vunpack.c.l.bf16 %v1487_v48  ;;  %1306 = vmatpush3.bf16.msra.mxu0 %v1372_v34  ;;  %v1497_v61 = vadd.f32 %v1458_v11, %v319_v46 }
  0x1c   : > { %v322_v62 = vmul.f32 %v1120_v47, %v1450_v5  ;;  %1307 = vmatprep.subr.bf16.mxu0 %v1373_v49  ;;  %v415_v0 = vpack.c.bf16 %v385_v50, %v384_v45  ;;  %v416_v1 = vpack.c.bf16 %v387_v52, %v386_v51  ;;  %1356 = vmatpush3.bf16.msra.mxu1 %v1372_v34  ;;  %v1128_v7 = vunpack.c.h.bf16 %v1487_v48  ;;  %v1253_v45 = vld [vmem:[%s1441_s30 + $0x68] sm:$0xff]  }
  0x1d   : > { %v323_v2 = vmul.f32 %v1123_v53, %v1450_v5  ;;  %v1505_v4 = vpack.c.bf16 %v389_v55, %v388_v54  ;;  %v1508_v6 = vadd.f32 %v1458_v11, %v320_v56  ;;  %1349 = vmatprep.subr.bf16.mxu1 %v1373_v49  ;;  %v1131_v8 = vunpack.c.l.bf16 %v1248_v60  ;;  %v1254_v55 = vld [vmem:[%s1441_s30 + $0x70] sm:$0xff]  }
  0x1e   : > { %v1513_v10 = vadd.f32 %v1458_v11, %v321_v57  ;;  %v1516_v12 = vmul.f32 %v1124_v58, %v1450_v5  ;;  %v1519_v13 = vmul.f32 %v1127_v59, %v1450_v5  ;;  %v1132_v14 = vunpack.c.h.bf16 %v1248_v60 }
  0x1f   : > { %1308 = vmatpush3.bf16.msra.mxu0 %v1373_v49  ;;  %v390_v15 = vmax.f32 %v1497_v61, 0.0  ;;  %v1523_v16 = vadd.f32 %v1458_v11, %v322_v62  ;;  %v327_v17 = vmul.f32 %v1131_v8, %v1450_v5  ;;  %v1135_v18 = vunpack.c.l.bf16 %v1249_v3 }
  0x20   : > { %1309 = vmatprep.subr.bf16.mxu0 %v1374_v63  ;;  %1357 = vmatpush3.bf16.msra.mxu1 %v1373_v49  ;;  %v1528_v20 = vadd.f32 %v1458_v11, %v323_v2  ;;  %v328_v21 = vmul.f32 %v1132_v14, %v1450_v5  ;;  %v1136_v22 = vunpack.c.h.bf16 %v1249_v3  ;;  %v1139_v23 = vunpack.c.l.bf16 %v1250_v9 }
  0x21   : > { %v391_v24 = vmax.f32 %v1508_v6, 0.0  ;;  %1350 = vmatprep.subr.bf16.mxu1 %v1374_v63  ;;  %v366_v25 = vadd.f32 %v1458_v11, %v327_v17  ;;  %v329_v26 = vmul.f32 %v1135_v18, %v1450_v5  ;;  %v1140_v27 = vunpack.c.h.bf16 %v1250_v9  ;;  %v1255_v17 = vld [vmem:[%s1441_s30 + $0x78] sm:$0xff]  }
  0x22   : > { %v367_v28 = vadd.f32 %v1458_v11, %v328_v21  ;;  %v330_v29 = vmul.f32 %v1136_v22, %v1450_v5  ;;  %v331_v30 = vmul.f32 %v1139_v23, %v1450_v5  ;;  %v1143_v31 = vunpack.c.l.bf16 %v1251_v19 }
  0x23   : > { %1310 = vmatpush3.bf16.msra.mxu0 %v1374_v63  ;;  %v398_v33 = vmax.f32 %v366_v25, 0.0  ;;  %v368_v34 = vadd.f32 %v1458_v11, %v329_v26  ;;  %v332_v35 = vmul.f32 %v1140_v27, %v1450_v5  ;;  %v1144_v36 = vunpack.c.h.bf16 %v1251_v19 }
  0x24   : > { %1358 = vmatpush3.bf16.msra.mxu1 %v1374_v63  ;;  %v399_v37 = vmax.f32 %v367_v28, 0.0  ;;  %v369_v38 = vadd.f32 %v1458_v11, %v330_v29  ;;  %v370_v39 = vadd.f32 %v1458_v11, %v331_v30  ;;  %v333_v40 = vmul.f32 %v1143_v31, %v1450_v5 }
  0x25   : > { %v400_v41 = vmax.f32 %v368_v34, 0.0  ;;  %v371_v42 = vadd.f32 %v1458_v11, %v332_v35  ;;  %v334_v43 = vmul.f32 %v1144_v36, %v1450_v5  ;;  %v1147_v44 = vunpack.c.l.bf16 %v1252_v32 }
  0x26   : > { %1312 = vmatmul.mubr.bf16.vlgmr.msra.gmra.mrb[0].mxu0 %v415_v0  ;;  %v422_v46 = vpack.c.bf16 %v399_v37, %v398_v33  ;;  %v401_v47 = vmax.f32 %v369_v38, 0.0  ;;  %v402_v49 = vmax.f32 %v370_v39, 0.0  ;;  %v372_v50 = vadd.f32 %v1458_v11, %v333_v40 }
  0x27   : > { %1315 = vmatprep.mubr.bf16.mxu0 %v416_v1  ;;  %v403_v51 = vmax.f32 %v371_v42, 0.0  ;;  %v373_v52 = vadd.f32 %v1458_v11, %v334_v43  ;;  %v1148_v53 = vunpack.c.h.bf16 %v1252_v32  ;;  %v335_v54 = vmul.f32 %v1147_v44, %v1450_v5 }
  0x28   : > { %1327 = vmatprep.mubr.bf16.mxu1 %v422_v46  ;;  %v423_v56 = vpack.c.bf16 %v401_v47, %v400_v41  ;;  %v404_v57 = vmax.f32 %v372_v50, 0.0  ;;  %v1151_v58 = vunpack.c.l.bf16 %v1253_v45  ;;  %v1152_v59 = vunpack.c.h.bf16 %v1253_v45 }
  0x29   : > { %v424_v60 = vpack.c.bf16 %v403_v51, %v402_v49  ;;  %v405_v61 = vmax.f32 %v373_v52, 0.0  ;;  %v336_v62 = vmul.f32 %v1148_v53, %v1450_v5  ;;  %v374_v63 = vadd.f32 %v1458_v11, %v335_v54 }
  0x2a   : > { %1328 = vmatmul.mubr.bf16.vlgmr.msra.gmra.mrb[0].mxu1 %v423_v56  ;;  %v337_v0 = vmul.f32 %v1151_v58, %v1450_v5  ;;  %v338_v1 = vmul.f32 %v1152_v59, %v1450_v5  ;;  %v1155_v2 = vunpack.c.l.bf16 %v1254_v55  ;;  %v1156_v3 = vunpack.c.h.bf16 %v1254_v55 }
  0x2b   : > { %v418_v6 = vpack.c.bf16 %v391_v24, %v390_v15  ;;  %v363_v8 = vadd.f32 %v1458_v11, %v1516_v12  ;;  %1331 = vmatprep.mubr.bf16.mxu1 %v424_v60  ;;  %v375_v9 = vadd.f32 %v1458_v11, %v336_v62  ;;  %v406_v14 = vmax.f32 %v374_v63, 0.0 }
  0x2c   : > { %v392_v18 = vmax.f32 %v1513_v10, 0.0  ;;  %v326_v19 = vmul.f32 %v1128_v7, %v1450_v5  ;;  %v339_v21 = vmul.f32 %v1155_v2, %v1450_v5  ;;  %v340_v22 = vmul.f32 %v1156_v3, %v1450_v5 }
  0x2d   : > { %v393_v15 = vmax.f32 %v1523_v16, 0.0  ;;  %v394_v23 = vmax.f32 %v1528_v20, 0.0  ;;  %v425_v12 = vpack.c.bf16 %v405_v61, %v404_v57  ;;  %v407_v24 = vmax.f32 %v375_v9, 0.0 }
  0x2e   : > { %1316 = vmatmul.mubr.bf16.gmra.mrb[4].mxu0 %v1505_v4  ;;  %v376_v25 = vadd.f32 %v1458_v11, %v337_v0  ;;  %v377_v10 = vadd.f32 %v1458_v11, %v338_v1  ;;  %v1159_v26 = vunpack.c.l.bf16 %v1255_v17  ;;  %v1160_v27 = vunpack.c.h.bf16 %v1255_v17 }
  0x2f   : > { %1319 = vmatprep.mubr.bf16.mxu0 %v418_v6  ;;  %v395_v48 = vmax.f32 %v363_v8, 0.0  ;;  %v426_v7 = vpack.c.bf16 %v407_v24, %v406_v14  ;;  %v378_v28 = vadd.f32 %v1458_v11, %v339_v21  ;;  %v379_v29 = vadd.f32 %v1458_v11, %v340_v22 }
  0x30   : > { %v419_v16 = vpack.c.bf16 %v393_v15, %v392_v18  ;;  %v364_v20 = vadd.f32 %v1458_v11, %v1519_v13  ;;  %v365_v30 = vadd.f32 %v1458_v11, %v326_v19  ;;  %v408_v4 = vmax.f32 %v376_v25, 0.0 }
  0x31   : > { %v409_v31 = vmax.f32 %v377_v10, 0.0  ;;  %v341_v32 = vmul.f32 %v1159_v26, %v1450_v5  ;;  %v342_v33 = vmul.f32 %v1160_v27, %v1450_v5  ;;  %v420_v34 = vpack.c.bf16 %v395_v48, %v394_v23 }
  0x32   : > { %1332 = vmatmul.mubr.bf16.gmra.mrb[4].mxu1 %v425_v12  ;;  %v410_v35 = vmax.f32 %v378_v28, 0.0  ;;  %v411_v36 = vmax.f32 %v379_v29, 0.0  ;;  %v396_v37 = vmax.f32 %v364_v20, 0.0  ;;  %v397_v38 = vmax.f32 %v365_v30, 0.0 }
  0x33   : > { %1335 = vmatprep.mubr.bf16.mxu1 %v426_v7  ;;  %v427_v39 = vpack.c.bf16 %v409_v31, %v408_v4  ;;  %v380_v13 = vadd.f32 %v1458_v11, %v341_v32  ;;  %v381_v40 = vadd.f32 %v1458_v11, %v342_v33 }
  0x34   : > { %v428_v41 = vpack.c.bf16 %v411_v36, %v410_v35  ;;  %v421_v42 = vpack.c.bf16 %v397_v38, %v396_v37 }
  0x35   : > { %v412_v43 = vmax.f32 %v380_v13, 0.0  ;;  %v413_v44 = vmax.f32 %v381_v40, 0.0 }
  0x36   : > { %1320 = vmatmul.mubr.bf16.gmra.mrb[8].mxu0 %v419_v16 }
  0x37   : > { %1323 = vmatprep.mubr.bf16.mxu0 %v420_v34  ;;  %v429_v5 = vpack.c.bf16 %v413_v44, %v412_v43 }
  0x3a   : > { %1336 = vmatmul.mubr.bf16.gmra.mrb[8].mxu1 %v427_v39 }
  0x3b   : > { %1339 = vmatprep.mubr.bf16.mxu1 %v428_v41 }
  0x3e   : > { %1324 = vmatmul.mubr.bf16.gmra.mrb[12].mxu0 %v421_v42 }
  0x42   : > { %1340 = vmatmul.mubr.bf16.gmra.mrb[12].mxu1 %v429_v5 }
  0xf9   : > { %v1313_v45 = vpop.f32.mrb[0].mxu0 }
  0xfa   : > { %v528_v46 = vpop.f32.mrb[1].mxu0  ;;  %v854_v56 = vmul.f32 %v1313_v45, %v1313_v45 }
  0xfb   : > { %v1314_v11 = vpop.f32.mrb[2].mxu0  ;;  %v852_v50 = vmul.f32 %v528_v46, %v528_v46 }
  0xfc   : > { %v1169_v47 = vpack.c.bf16 %v1314_v11, %v1313_v45  ;;  %v531_v49 = vpop.f32.mrb[3].mxu0  ;;  %v855_v62 = vmul.f32 %v1314_v11, %v1314_v11 }
  0xfd   : > { %v1164_v51 = vpack.c.bf16 %v531_v49, %v528_v46  ;;  %v815_v52 = vadd.f32 %v531_v49, %v528_v46  ;;  %v853_v53 = vmul.f32 %v531_v49, %v531_v49  ;;  %v1585_v54 = vpop.f32.mrb[0].mxu1 }
  0xfe   : > { %1256 = vst [vmem:[%s1583_s25 + $0x8] sm:$0xff] %v1169_v47   ;;  %v1588_v55 = vpop.f32.mrb[1].mxu1 }
  0xff   : > { %1165 = vst [vmem:[%s1583_s25] sm:$0xff] %v1164_v51   ;;  %v816_v57 = vadd.f32 %v1313_v45, %v815_v52  ;;  %v884_v58 = vadd.f32 %v853_v53, %v852_v50  ;;  %v1591_v59 = vpop.f32.mrb[2].mxu1 }
 0x100   : > { %v1209_v60 = vpack.c.bf16 %v1591_v59, %v1585_v54  ;;  %v1595_v61 = vpop.f32.mrb[3].mxu1 }
 0x101   : > { %v885_v63 = vadd.f32 %v884_v58, %v854_v56  ;;  %v1317_v0 = vpop.f32.mrb[4].mxu0  ;;  %v817_v1 = vadd.f32 %v1314_v11, %v816_v57  ;;  %v1204_v2 = vpack.c.bf16 %v1595_v61, %v1588_v55 }
 0x102   : > { %v544_v3 = vpop.f32.mrb[5].mxu0  ;;  %1264 = vst [vmem:[%s1583_s25 + $0x48] sm:$0xff] %v1209_v60   ;;  %v858_v24 = vmul.f32 %v1317_v0, %v1317_v0 }
 0x103   : > { %v818_v6 = vadd.f32 %v817_v1, %v544_v3  ;;  %v856_v8 = vmul.f32 %v544_v3, %v544_v3  ;;  %v886_v9 = vadd.f32 %v885_v63, %v855_v62  ;;  %v1318_v14 = vpop.f32.mrb[6].mxu0  ;;  %1263 = vst [vmem:[%s1583_s25 + $0x40] sm:$0xff] %v1204_v2  }
 0x104   : > { %v1179_v17 = vpack.c.bf16 %v1318_v14, %v1317_v0  ;;  %v547_v18 = vpop.f32.mrb[7].mxu0  ;;  %v859_v7 = vmul.f32 %v1318_v14, %v1318_v14 }
 0x105   : > { %v887_v19 = vadd.f32 %v886_v9, %v856_v8  ;;  %v1174_v21 = vpack.c.bf16 %v547_v18, %v544_v3  ;;  %v819_v22 = vadd.f32 %v818_v6, %v547_v18  ;;  %v857_v15 = vmul.f32 %v547_v18, %v547_v18  ;;  %v1601_v23 = vpop.f32.mrb[4].mxu1 }
 0x106   : > { %1258 = vst [vmem:[%s1583_s25 + $0x18] sm:$0xff] %v1179_v17   ;;  %v1604_v12 = vpop.f32.mrb[5].mxu1  ;;  %v868_v17 = vmul.f32 %v1588_v55, %v1588_v55 }
 0x107   : > { %1257 = vst [vmem:[%s1583_s25 + $0x10] sm:$0xff] %v1174_v21   ;;  %v820_v25 = vadd.f32 %v1317_v0, %v819_v22  ;;  %v888_v10 = vadd.f32 %v887_v19, %v857_v15  ;;  %v1607_v26 = vpop.f32.mrb[6].mxu1 }
 0x108   : > { %v1219_v27 = vpack.c.bf16 %v1607_v26, %v1601_v23  ;;  %v1611_v48 = vpop.f32.mrb[7].mxu1 }
 0x109   : > { %v889_v28 = vadd.f32 %v888_v10, %v858_v24  ;;  %v1321_v29 = vpop.f32.mrb[8].mxu0  ;;  %v821_v16 = vadd.f32 %v1318_v14, %v820_v25  ;;  %v1214_v20 = vpack.c.bf16 %v1611_v48, %v1604_v12 }
 0x10a   : > { %v560_v30 = vpop.f32.mrb[9].mxu0  ;;  %1266 = vst [vmem:[%s1583_s25 + $0x58] sm:$0xff] %v1219_v27   ;;  %v862_v41 = vmul.f32 %v1321_v29, %v1321_v29 }
 0x10b   : > { %v822_v4 = vadd.f32 %v821_v16, %v560_v30  ;;  %v860_v31 = vmul.f32 %v560_v30, %v560_v30  ;;  %v890_v32 = vadd.f32 %v889_v28, %v859_v7  ;;  %v1322_v33 = vpop.f32.mrb[10].mxu0  ;;  %1265 = vst [vmem:[%s1583_s25 + $0x50] sm:$0xff] %v1214_v20   ;;  %v869_v28 = vmul.f32 %v1595_v61, %v1595_v61 }
 0x10c   : > { %v1189_v34 = vpack.c.bf16 %v1322_v33, %v1321_v29  ;;  %v563_v35 = vpop.f32.mrb[11].mxu0  ;;  %v863_v46 = vmul.f32 %v1322_v33, %v1322_v33 }
 0x10d   : > { %v891_v36 = vadd.f32 %v890_v32, %v860_v31  ;;  %v1184_v37 = vpack.c.bf16 %v563_v35, %v560_v30  ;;  %v823_v38 = vadd.f32 %v822_v4, %v563_v35  ;;  %v861_v39 = vmul.f32 %v563_v35, %v563_v35  ;;  %v1617_v13 = vpop.f32.mrb[8].mxu1 }
 0x10e   : > { %1260 = vst [vmem:[%s1583_s25 + $0x28] sm:$0xff] %v1189_v34   ;;  %v1620_v40 = vpop.f32.mrb[9].mxu1  ;;  %v871_v30 = vmul.f32 %v1591_v59, %v1591_v59  ;;  %v872_v31 = vmul.f32 %v1604_v12, %v1604_v12  ;;  %v873_v35 = vmul.f32 %v1611_v48, %v1611_v48 }
 0x10f   : > { %1259 = vst [vmem:[%s1583_s25 + $0x20] sm:$0xff] %v1184_v37   ;;  %v824_v42 = vadd.f32 %v1321_v29, %v823_v38  ;;  %v892_v43 = vadd.f32 %v891_v36, %v861_v39  ;;  %v1623_v44 = vpop.f32.mrb[10].mxu1  ;;  %v870_v29 = vmul.f32 %v1585_v54, %v1585_v54 }
 0x110   : > { %v1229_v5 = vpack.c.bf16 %v1623_v44, %v1617_v13  ;;  %v1627_v45 = vpop.f32.mrb[11].mxu1 }
 0x111   : > { %v893_v11 = vadd.f32 %v892_v43, %v862_v41  ;;  %v1325_v47 = vpop.f32.mrb[12].mxu0  ;;  %v825_v49 = vadd.f32 %v1322_v33, %v824_v42  ;;  %v1224_v50 = vpack.c.bf16 %v1627_v45, %v1620_v40 }
 0x112   : > { %v576_v51 = vpop.f32.mrb[13].mxu0  ;;  %1268 = vst [vmem:[%s1583_s25 + $0x68] sm:$0xff] %v1229_v5   ;;  %v866_v6 = vmul.f32 %v1325_v47, %v1325_v47  ;;  %v877_v5 = vmul.f32 %v1627_v45, %v1627_v45 }
 0x113   : > { %v826_v52 = vadd.f32 %v825_v49, %v576_v51  ;;  %v864_v53 = vmul.f32 %v576_v51, %v576_v51  ;;  %v894_v56 = vadd.f32 %v893_v11, %v863_v46  ;;  %v1326_v57 = vpop.f32.mrb[14].mxu0  ;;  %1267 = vst [vmem:[%s1583_s25 + $0x60] sm:$0xff] %v1224_v50  }
 0x114   : > { %v1199_v58 = vpack.c.bf16 %v1326_v57, %v1325_v47  ;;  %v579_v60 = vpop.f32.mrb[15].mxu0  ;;  %v867_v21 = vmul.f32 %v1326_v57, %v1326_v57 }
 0x115   : > { %v895_v62 = vadd.f32 %v894_v56, %v864_v53  ;;  %v1194_v63 = vpack.c.bf16 %v579_v60, %v576_v51  ;;  %v827_v0 = vadd.f32 %v826_v52, %v579_v60  ;;  %v865_v1 = vmul.f32 %v579_v60, %v579_v60  ;;  %v1341_v2 = vpop.f32.mrb[12].mxu1 }
 0x116   : > { %1262 = vst [vmem:[%s1583_s25 + $0x38] sm:$0xff] %v1199_v58   ;;  %v640_v3 = vpop.f32.mrb[13].mxu1  ;;  %v882_v56 = vmul.f32 %v1341_v2, %v1341_v2 }
 0x117   : > { %1261 = vst [vmem:[%s1583_s25 + $0x30] sm:$0xff] %v1194_v63   ;;  %v828_v8 = vadd.f32 %v1325_v47, %v827_v0  ;;  %v896_v9 = vadd.f32 %v895_v62, %v865_v1  ;;  %v1342_v14 = vpop.f32.mrb[14].mxu1  ;;  %v880_v49 = vmul.f32 %v640_v3, %v640_v3 }
 0x118   : > { %v1239_v18 = vpack.c.bf16 %v1342_v14, %v1341_v2  ;;  %v643_v19 = vpop.f32.mrb[15].mxu1  ;;  %v883_v60 = vmul.f32 %v1342_v14, %v1342_v14 }
 0x119   : > { %v897_v22 = vadd.f32 %v896_v9, %v866_v6  ;;  %v829_v15 = vadd.f32 %v1326_v57, %v828_v8  ;;  %v1234_v24 = vpack.c.bf16 %v643_v19, %v640_v3 }
 0x11a   : > { %1270 = vst [vmem:[%s1583_s25 + $0x78] sm:$0xff] %v1239_v18  }
 0x11b   : > { %v830_v25 = vadd.f32 %v829_v15, %v1588_v55  ;;  %v898_v10 = vadd.f32 %v897_v22, %v867_v21  ;;  %1269 = vst [vmem:[%s1583_s25 + $0x70] sm:$0xff] %v1234_v24  }
 0x11d   : > { %v899_v27 = vadd.f32 %v898_v10, %v868_v17  ;;  %v831_v7 = vadd.f32 %v830_v25, %v1595_v61 }
 0x11f   : > { %v832_v16 = vadd.f32 %v1585_v54, %v831_v7  ;;  %v900_v20 = vadd.f32 %v899_v27, %v869_v28  ;;  %v874_v54 = vmul.f32 %v1601_v23, %v1601_v23 }
 0x121   : > { %v901_v4 = vadd.f32 %v900_v20, %v870_v29  ;;  %v833_v55 = vadd.f32 %v1591_v59, %v832_v16  ;;  %v875_v59 = vmul.f32 %v1607_v26, %v1607_v26 }
 0x123   : > { %v834_v32 = vadd.f32 %v833_v55, %v1604_v12  ;;  %v902_v33 = vadd.f32 %v901_v4, %v871_v30  ;;  %v876_v12 = vmul.f32 %v1620_v40, %v1620_v40 }
 0x125   : > { %v903_v34 = vadd.f32 %v902_v33, %v872_v31  ;;  %v835_v61 = vadd.f32 %v834_v32, %v1611_v48 }
 0x127   : > { %v836_v36 = vadd.f32 %v1601_v23, %v835_v61  ;;  %v904_v37 = vadd.f32 %v903_v34, %v873_v35  ;;  %v878_v23 = vmul.f32 %v1617_v13, %v1617_v13 }
 0x129   : > { %v905_v38 = vadd.f32 %v904_v37, %v874_v54  ;;  %v837_v39 = vadd.f32 %v1607_v26, %v836_v36  ;;  %v879_v26 = vmul.f32 %v1623_v44, %v1623_v44 }
 0x12b   : > { %v838_v41 = vadd.f32 %v837_v39, %v1620_v40  ;;  %v906_v42 = vadd.f32 %v905_v38, %v875_v59 }
 0x12d   : > { %v907_v43 = vadd.f32 %v906_v42, %v876_v12  ;;  %v839_v48 = vadd.f32 %v838_v41, %v1627_v45  ;;  %v881_v45 = vmul.f32 %v643_v19, %v643_v19 }
 0x12f   : > { %v840_v46 = vadd.f32 %v1617_v13, %v839_v48  ;;  %v908_v11 = vadd.f32 %v907_v43, %v877_v5 }
 0x131   : > { %v909_v47 = vadd.f32 %v908_v11, %v878_v23  ;;  %v841_v40 = vadd.f32 %v1623_v44, %v840_v46 }
 0x133   : > { %v842_v50 = vadd.f32 %v841_v40, %v640_v3  ;;  %v910_v51 = vadd.f32 %v909_v47, %v879_v26 }
 0x135   : > { %v911_v52 = vadd.f32 %v910_v51, %v880_v49  ;;  %v843_v53 = vadd.f32 %v842_v50, %v643_v19 }
 0x137   : > { %v844_v57 = vadd.f32 %v1341_v2, %v843_v53  ;;  %v912_v58 = vadd.f32 %v911_v52, %v881_v45 }
 0x139   : > { %v845_v13 = vadd.f32 %v1342_v14, %v844_v57  ;;  %v913_v62 = vadd.f32 %v912_v58, %v882_v56 }
 0x13b   : > { %v846_v63 = vrot.slane %v845_v13, 4  ;;  %v914_v0 = vadd.f32 %v913_v62, %v883_v60 }
 0x13d   : > { %v847_v1 = vadd.f32 %v846_v63, %v845_v13  ;;  %v915_v6 = vrot.slane %v914_v0, 4 }
 0x13f   : > { %v848_v8 = vrot.slane %v847_v1, 2  ;;  %v916_v44 = vadd.f32 %v915_v6, %v914_v0 }
 0x141   : > { %v849_v3 = vadd.f32 %v848_v8, %v847_v1  ;;  %v917_v9 = vrot.slane %v916_v44, 2 }
 0x143   : > { %v850_v17 = vrot.slane %v849_v3, 1  ;;  %v918_v18 = vadd.f32 %v917_v9, %v916_v44 }
 0x145   : > { %v919_v19 = vrot.slane %v918_v18, 1  ;;  %v851_v2 = vadd.f32 %v850_v17, %v849_v3 }
 0x147   : > { %v920_v14 = vadd.f32 %v919_v19, %v918_v18 }
 0x149   : > { %v922_v21 = vsel %vm921_vm0, %v851_v2, %v920_v14 }
 0x14a   : > { %923 = vst [vmem:[%s238_s28] sm:$0x3] %v922_v21 }
 0x14b PF: > { %s16_s18 = sadd.s32 1, %s1381_s18  }
 0x14c   : > { %p13_p5 = scmp.ge.s32.totalorder %s16_s18, 4  }
 0x14e   :  { %15 = sbr.rel (!%p13_p5) target bundleno = 1 (0x1), region = 78 }

// kernel: bottleneck_forward.7
= control target key start
LH: loop header
LB: loop body
LE: loop exit
PB: predicated region body
PF: predicated region fallthrough
CT: control target
= control target key end

     0   :  { %s951_s21 = smov 0   ;;  %s1193_s0 = inlined_call_operand.vmem [shape: bf16[512,128], index: 0, kind: input, shape index: {}]   ;;  %s1194_s1 = inlined_call_operand.vmem [shape: f32[1,128], index: 1, kind: input, shape index: {}]   ;;  %s1195_s2 = inlined_call_operand.vmem [shape: f32[1,128], index: 2, kind: input, shape index: {}]   ;;  %s1196_s3 = inlined_call_operand.vmem [shape: bf16[512,128], index: 3, kind: input, shape index: {}]   ;;  %s1197_s4 = inlined_call_operand.vmem [shape: f32[1,128], index: 4, kind: input, shape index: {}]   ;;  %s1198_s5 = inlined_call_operand.vmem [shape: f32[1,128], index: 5, kind: input, shape index: {}]   ;;  %s1199_s6 = inlined_call_operand.vmem [shape: f32[512,128], index: 6, kind: output, shape index: {}]  }
   0x1 LB: > { %s725_s22 = sadd.s32 4294967295, %s914_s21   ;;  %p729_p0 = scmp.ge.s32.totalorder %s914_s21, 1  ;;  %s914_s21 = sphi %s951_s21, %s16_s21  }
   0x2   : > { %p224_p1 = scmp.lt.s32.totalorder %s914_s21, 3 }
   0x4   : > { %p225_p2 = pnand %p729_p0, %p224_p1 }
   0x5   : > { %s730_s23 = sshll.u32 (!%p225_p2), %s725_s22, 5  ;;  %v975_v0 = vld [vmem:[%s1194_s1] ss:$0 sm:$0xff] (!%p225_p2) }
   0x6   : > { %228 = sbr.rel (%p225_p2) target bundleno = 88 (0x58), region = 44  ;;  %p260_p3 = scmp.lt.s32.totalorder (!%p225_p2), %s730_s23, 63  ;;  %v980_v1 = vld [vmem:[%s1197_s4] ss:$0 sm:$0xff] (!%p225_p2) }
   0x7   : > { %v989_v10 = vld [vmem:[%s1195_s2] ss:$0 sm:$0xff] (!%p225_p2) }
   0x8   : > { %v994_v11 = vld [vmem:[%s1198_s5] ss:$0 sm:$0xff] (!%p225_p2) }
   0xd   : > { %s1201_s23 = smov (!%p260_p3, %s730_s23), 63 }
   0xe   : > { %s731_s24 = sshll.u32 %s1201_s23, 2  ;;  %s735_s15 = sshll.u32 %s1201_s23, 3 }
   0xf   : > { %s965_s27 = scalar_lea.vmem %s1193_s0, %s731_s24  ;;  %s970_s30 = scalar_lea.vmem %s1196_s3, %s731_s24 }
  0x10   : > { %v743_v2 = vld [vmem:[%s965_s27] sm:$0xff]   ;;  %v870_v4 = vld [vmem:[%s965_s27 + $0x8] sm:$0xff]   ;;  %v871_v24 = vld [vmem:[%s965_s27 + $0x10] sm:$0xff]   ;;  %s1018_s18 = scalar_lea.vmem %s1199_s6, %s735_s15 }
  0x11   : > { %v807_v3 = vld [vmem:[%s970_s30] sm:$0xff]   ;;  %v744_v5 = vunpack.c.l.bf16 %v743_v2  ;;  %v745_v7 = vunpack.c.h.bf16 %v743_v2  ;;  %v885_v9 = vld [vmem:[%s970_s30 + $0x8] sm:$0xff]   ;;  %v748_v12 = vunpack.c.l.bf16 %v870_v4  ;;  %v749_v14 = vunpack.c.h.bf16 %v870_v4  ;;  %v886_v25 = vld [vmem:[%s970_s30 + $0x10] sm:$0xff]  }
  0x12   : > { %v808_v6 = vunpack.c.l.bf16 %v807_v3  ;;  %v809_v8 = vunpack.c.h.bf16 %v807_v3  ;;  %v812_v13 = vunpack.c.l.bf16 %v885_v9  ;;  %v813_v15 = vunpack.c.h.bf16 %v885_v9  ;;  %v872_v42 = vld [vmem:[%s965_s27 + $0x18] sm:$0xff]   ;;  %v873_v52 = vld [vmem:[%s965_s27 + $0x20] sm:$0xff]  }
  0x13   : > { %v348_v16 = vmul.f32 %v744_v5, %v975_v0  ;;  %v349_v18 = vmul.f32 %v745_v7, %v975_v0  ;;  %v350_v20 = vmul.f32 %v748_v12, %v975_v0  ;;  %v351_v22 = vmul.f32 %v749_v14, %v975_v0  ;;  %v887_v43 = vld [vmem:[%s970_s30 + $0x18] sm:$0xff]   ;;  %v888_v57 = vld [vmem:[%s970_s30 + $0x20] sm:$0xff]   ;;  %v874_v14 = vld [vmem:[%s965_s27 + $0x28] sm:$0xff]  }
  0x14   : > { %v490_v17 = vmul.f32 %v808_v6, %v980_v1  ;;  %v491_v19 = vmul.f32 %v809_v8, %v980_v1  ;;  %v492_v21 = vmul.f32 %v812_v13, %v980_v1  ;;  %v493_v23 = vmul.f32 %v813_v15, %v980_v1  ;;  %v889_v15 = vld [vmem:[%s970_s30 + $0x28] sm:$0xff]  }
  0x15   : > { %v387_v26 = vadd.f32 %v989_v10, %v348_v16  ;;  %v388_v28 = vadd.f32 %v989_v10, %v349_v18  ;;  %v389_v30 = vadd.f32 %v989_v10, %v350_v20  ;;  %v390_v32 = vadd.f32 %v989_v10, %v351_v22 }
  0x16   : > { %v529_v27 = vadd.f32 %v994_v11, %v490_v17  ;;  %v530_v29 = vadd.f32 %v994_v11, %v491_v19  ;;  %v531_v31 = vadd.f32 %v994_v11, %v492_v21  ;;  %v532_v33 = vadd.f32 %v994_v11, %v493_v23 }
  0x17   : > { %v752_v36 = vunpack.c.l.bf16 %v871_v24  ;;  %v816_v37 = vunpack.c.l.bf16 %v886_v25  ;;  %v753_v40 = vunpack.c.h.bf16 %v871_v24  ;;  %v817_v41 = vunpack.c.h.bf16 %v886_v25 }
  0x18   : > { %v561_v34 = vadd.f32 %v529_v27, %v387_v26  ;;  %v562_v35 = vadd.f32 %v530_v29, %v388_v28  ;;  %v563_v38 = vadd.f32 %v531_v31, %v389_v30  ;;  %v564_v39 = vadd.f32 %v532_v33, %v390_v32  ;;  %v875_v32 = vld [vmem:[%s965_s27 + $0x30] sm:$0xff]  }
  0x19   : > { %v352_v46 = vmul.f32 %v752_v36, %v975_v0  ;;  %v494_v47 = vmul.f32 %v816_v37, %v980_v1  ;;  %v353_v50 = vmul.f32 %v753_v40, %v975_v0  ;;  %v495_v51 = vmul.f32 %v817_v41, %v980_v1  ;;  %v890_v37 = vld [vmem:[%s970_s30 + $0x30] sm:$0xff]  }
  0x1a   : > { %v593_v44 = vmax.f32 %v561_v34, 0.0  ;;  %v594_v45 = vmax.f32 %v562_v35, 0.0  ;;  %v595_v48 = vmax.f32 %v563_v38, 0.0  ;;  %v596_v49 = vmax.f32 %v564_v39, 0.0 }
  0x1b   : > { %v391_v53 = vadd.f32 %v989_v10, %v352_v46  ;;  %v533_v54 = vadd.f32 %v994_v11, %v494_v47  ;;  %v756_v55 = vunpack.c.l.bf16 %v872_v42  ;;  %v820_v56 = vunpack.c.l.bf16 %v887_v43  ;;  %v876_v46 = vld [vmem:[%s965_s27 + $0x38] sm:$0xff]  }
  0x1c   : > { %625 = vst [vmem:[%s1018_s18] sm:$0xff] %v593_v44  ;;  %626 = vst [vmem:[%s1018_s18 + $0x8] sm:$0xff] %v594_v45  ;;  %v392_v58 = vadd.f32 %v989_v10, %v353_v50  ;;  %v534_v59 = vadd.f32 %v994_v11, %v495_v51  ;;  %v757_v60 = vunpack.c.h.bf16 %v872_v42  ;;  %v821_v61 = vunpack.c.h.bf16 %v887_v43 }
  0x1d   : > { %627 = vst [vmem:[%s1018_s18 + $0x10] sm:$0xff] %v595_v48  ;;  %628 = vst [vmem:[%s1018_s18 + $0x18] sm:$0xff] %v596_v49  ;;  %v565_v62 = vadd.f32 %v533_v54, %v391_v53  ;;  %v354_v63 = vmul.f32 %v756_v55, %v975_v0  ;;  %v496_v2 = vmul.f32 %v820_v56, %v980_v1  ;;  %v760_v3 = vunpack.c.l.bf16 %v873_v52  ;;  %v891_v55 = vld [vmem:[%s970_s30 + $0x38] sm:$0xff]  }
  0x1e   : > { %v566_v4 = vadd.f32 %v534_v59, %v392_v58  ;;  %v355_v5 = vmul.f32 %v757_v60, %v975_v0  ;;  %v497_v6 = vmul.f32 %v821_v61, %v980_v1  ;;  %v824_v7 = vunpack.c.l.bf16 %v888_v57 }
  0x1f   : > { %v597_v8 = vmax.f32 %v565_v62, 0.0  ;;  %v393_v9 = vadd.f32 %v989_v10, %v354_v63  ;;  %v535_v12 = vadd.f32 %v994_v11, %v496_v2  ;;  %v356_v13 = vmul.f32 %v760_v3, %v975_v0 }
  0x20   : > { %v598_v16 = vmax.f32 %v566_v4, 0.0  ;;  %v394_v17 = vadd.f32 %v989_v10, %v355_v5  ;;  %v536_v18 = vadd.f32 %v994_v11, %v497_v6  ;;  %v498_v19 = vmul.f32 %v824_v7, %v980_v1  ;;  %v877_v6 = vld [vmem:[%s965_s27 + $0x40] sm:$0xff]  }
  0x21   : > { %629 = vst [vmem:[%s1018_s18 + $0x20] sm:$0xff] %v597_v8  ;;  %v567_v20 = vadd.f32 %v535_v12, %v393_v9  ;;  %v395_v21 = vadd.f32 %v989_v10, %v356_v13  ;;  %v761_v22 = vunpack.c.h.bf16 %v873_v52  ;;  %v825_v23 = vunpack.c.h.bf16 %v888_v57  ;;  %v892_v13 = vld [vmem:[%s970_s30 + $0x40] sm:$0xff]  }
  0x22   : > { %630 = vst [vmem:[%s1018_s18 + $0x28] sm:$0xff] %v598_v16  ;;  %v568_v24 = vadd.f32 %v536_v18, %v394_v17  ;;  %v537_v25 = vadd.f32 %v994_v11, %v498_v19  ;;  %v764_v26 = vunpack.c.l.bf16 %v874_v14  ;;  %v828_v27 = vunpack.c.l.bf16 %v889_v15 }
  0x23   : > { %v599_v28 = vmax.f32 %v567_v20, 0.0  ;;  %v357_v29 = vmul.f32 %v761_v22, %v975_v0  ;;  %v499_v30 = vmul.f32 %v825_v23, %v980_v1  ;;  %v765_v31 = vunpack.c.h.bf16 %v874_v14 }
  0x24   : > { %v600_v33 = vmax.f32 %v568_v24, 0.0  ;;  %v569_v34 = vadd.f32 %v537_v25, %v395_v21  ;;  %v358_v35 = vmul.f32 %v764_v26, %v975_v0  ;;  %v500_v36 = vmul.f32 %v828_v27, %v980_v1  ;;  %v878_v26 = vld [vmem:[%s965_s27 + $0x48] sm:$0xff]  }
  0x25   : > { %631 = vst [vmem:[%s1018_s18 + $0x30] sm:$0xff] %v599_v28  ;;  %v396_v38 = vadd.f32 %v989_v10, %v357_v29  ;;  %v538_v39 = vadd.f32 %v994_v11, %v499_v30  ;;  %v359_v40 = vmul.f32 %v765_v31, %v975_v0  ;;  %v829_v41 = vunpack.c.h.bf16 %v889_v15  ;;  %v893_v27 = vld [vmem:[%s970_s30 + $0x48] sm:$0xff]  }
  0x26   : > { %632 = vst [vmem:[%s1018_s18 + $0x38] sm:$0xff] %v600_v33  ;;  %v601_v42 = vmax.f32 %v569_v34, 0.0  ;;  %v397_v43 = vadd.f32 %v989_v10, %v358_v35  ;;  %v539_v44 = vadd.f32 %v994_v11, %v500_v36  ;;  %v768_v45 = vunpack.c.l.bf16 %v875_v32 }
  0x27   : > { %v570_v47 = vadd.f32 %v538_v39, %v396_v38  ;;  %v398_v48 = vadd.f32 %v989_v10, %v359_v40  ;;  %v501_v49 = vmul.f32 %v829_v41, %v980_v1  ;;  %v832_v50 = vunpack.c.l.bf16 %v890_v37  ;;  %v879_v40 = vld [vmem:[%s965_s27 + $0x50] sm:$0xff]  }
  0x28   : > { %633 = vst [vmem:[%s1018_s18 + $0x40] sm:$0xff] %v601_v42  ;;  %v571_v51 = vadd.f32 %v539_v44, %v397_v43  ;;  %v360_v52 = vmul.f32 %v768_v45, %v975_v0  ;;  %v769_v53 = vunpack.c.h.bf16 %v875_v32  ;;  %v833_v54 = vunpack.c.h.bf16 %v890_v37  ;;  %v894_v45 = vld [vmem:[%s970_s30 + $0x50] sm:$0xff]  }
  0x29   : > { %v602_v56 = vmax.f32 %v570_v47, 0.0  ;;  %v540_v57 = vadd.f32 %v994_v11, %v501_v49  ;;  %v502_v58 = vmul.f32 %v832_v50, %v980_v1  ;;  %v772_v59 = vunpack.c.l.bf16 %v876_v46 }
  0x2a   : > { %v603_v60 = vmax.f32 %v571_v51, 0.0  ;;  %v399_v61 = vadd.f32 %v989_v10, %v360_v52  ;;  %v361_v62 = vmul.f32 %v769_v53, %v975_v0  ;;  %v503_v63 = vmul.f32 %v833_v54, %v980_v1 }
  0x2b   : > { %634 = vst [vmem:[%s1018_s18 + $0x48] sm:$0xff] %v602_v56  ;;  %v572_v2 = vadd.f32 %v540_v57, %v398_v48  ;;  %v541_v3 = vadd.f32 %v994_v11, %v502_v58  ;;  %v362_v4 = vmul.f32 %v772_v59, %v975_v0  ;;  %v836_v5 = vunpack.c.l.bf16 %v891_v55 }
  0x2c   : > { %635 = vst [vmem:[%s1018_s18 + $0x50] sm:$0xff] %v603_v60  ;;  %v400_v7 = vadd.f32 %v989_v10, %v361_v62  ;;  %v542_v8 = vadd.f32 %v994_v11, %v503_v63  ;;  %v773_v9 = vunpack.c.h.bf16 %v876_v46  ;;  %v837_v12 = vunpack.c.h.bf16 %v891_v55  ;;  %v880_v62 = vld [vmem:[%s965_s27 + $0x58] sm:$0xff]  }
  0x2d   : > { %v604_v14 = vmax.f32 %v572_v2, 0.0  ;;  %v573_v15 = vadd.f32 %v541_v3, %v399_v61  ;;  %v401_v16 = vadd.f32 %v989_v10, %v362_v4  ;;  %v504_v17 = vmul.f32 %v836_v5, %v980_v1  ;;  %v895_v5 = vld [vmem:[%s970_s30 + $0x58] sm:$0xff]  }
  0x2e   : > { %v574_v18 = vadd.f32 %v542_v8, %v400_v7  ;;  %v363_v19 = vmul.f32 %v773_v9, %v975_v0  ;;  %v505_v20 = vmul.f32 %v837_v12, %v980_v1  ;;  %v776_v21 = vunpack.c.l.bf16 %v877_v6 }
  0x2f   : > { %636 = vst [vmem:[%s1018_s18 + $0x58] sm:$0xff] %v604_v14  ;;  %v605_v22 = vmax.f32 %v573_v15, 0.0  ;;  %v543_v23 = vadd.f32 %v994_v11, %v504_v17  ;;  %v840_v24 = vunpack.c.l.bf16 %v892_v13  ;;  %v777_v25 = vunpack.c.h.bf16 %v877_v6 }
  0x30   : > { %v606_v28 = vmax.f32 %v574_v18, 0.0  ;;  %v402_v29 = vadd.f32 %v989_v10, %v363_v19  ;;  %v544_v30 = vadd.f32 %v994_v11, %v505_v20  ;;  %v364_v31 = vmul.f32 %v776_v21, %v975_v0  ;;  %v881_v20 = vld [vmem:[%s965_s27 + $0x60] sm:$0xff]  }
  0x31   : > { %637 = vst [vmem:[%s1018_s18 + $0x60] sm:$0xff] %v605_v22  ;;  %v575_v32 = vadd.f32 %v543_v23, %v401_v16  ;;  %v506_v33 = vmul.f32 %v840_v24, %v980_v1  ;;  %v365_v34 = vmul.f32 %v777_v25, %v975_v0  ;;  %v841_v35 = vunpack.c.h.bf16 %v892_v13  ;;  %v896_v25 = vld [vmem:[%s970_s30 + $0x60] sm:$0xff]  }
  0x32   : > { %638 = vst [vmem:[%s1018_s18 + $0x68] sm:$0xff] %v606_v28  ;;  %v576_v36 = vadd.f32 %v544_v30, %v402_v29  ;;  %v403_v37 = vadd.f32 %v989_v10, %v364_v31  ;;  %v780_v38 = vunpack.c.l.bf16 %v878_v26  ;;  %v844_v39 = vunpack.c.l.bf16 %v893_v27 }
  0x33   : > { %v607_v41 = vmax.f32 %v575_v32, 0.0  ;;  %v545_v42 = vadd.f32 %v994_v11, %v506_v33  ;;  %v404_v43 = vadd.f32 %v989_v10, %v365_v34  ;;  %v507_v44 = vmul.f32 %v841_v35, %v980_v1  ;;  %v882_v34 = vld [vmem:[%s965_s27 + $0x68] sm:$0xff]  }
  0x34   : > { %v608_v46 = vmax.f32 %v576_v36, 0.0  ;;  %v366_v47 = vmul.f32 %v780_v38, %v975_v0  ;;  %v508_v48 = vmul.f32 %v844_v39, %v980_v1  ;;  %v781_v49 = vunpack.c.h.bf16 %v878_v26 }
  0x35   : > { %639 = vst [vmem:[%s1018_s18 + $0x70] sm:$0xff] %v607_v41  ;;  %v577_v50 = vadd.f32 %v545_v42, %v403_v37  ;;  %v546_v51 = vadd.f32 %v994_v11, %v507_v44  ;;  %v845_v52 = vunpack.c.h.bf16 %v893_v27  ;;  %v784_v53 = vunpack.c.l.bf16 %v879_v40 }
  0x36   : > { %640 = vst [vmem:[%s1018_s18 + $0x78] sm:$0xff] %v608_v46  ;;  %v405_v54 = vadd.f32 %v989_v10, %v366_v47  ;;  %v547_v55 = vadd.f32 %v994_v11, %v508_v48  ;;  %v367_v56 = vmul.f32 %v781_v49, %v975_v0  ;;  %v848_v57 = vunpack.c.l.bf16 %v894_v45 }
  0x37   : > { %v609_v58 = vmax.f32 %v577_v50, 0.0  ;;  %v578_v59 = vadd.f32 %v546_v51, %v404_v43  ;;  %v509_v60 = vmul.f32 %v845_v52, %v980_v1  ;;  %v368_v61 = vmul.f32 %v784_v53, %v975_v0  ;;  %v897_v43 = vld [vmem:[%s970_s30 + $0x68] sm:$0xff]  }
  0x38   : > { %v579_v63 = vadd.f32 %v547_v55, %v405_v54  ;;  %v406_v2 = vadd.f32 %v989_v10, %v367_v56  ;;  %v510_v3 = vmul.f32 %v848_v57, %v980_v1  ;;  %v785_v4 = vunpack.c.h.bf16 %v879_v40  ;;  %v883_v56 = vld [vmem:[%s965_s27 + $0x70] sm:$0xff]  }
  0x39   : > { %641 = vst [vmem:[%s1018_s18 + $0x80] sm:$0xff] %v609_v58  ;;  %v610_v6 = vmax.f32 %v578_v59, 0.0  ;;  %v548_v7 = vadd.f32 %v994_v11, %v509_v60  ;;  %v407_v8 = vadd.f32 %v989_v10, %v368_v61  ;;  %v849_v9 = vunpack.c.h.bf16 %v894_v45  ;;  %v898_v57 = vld [vmem:[%s970_s30 + $0x70] sm:$0xff]  }
  0x3a   : > { %v611_v12 = vmax.f32 %v579_v63, 0.0  ;;  %v549_v13 = vadd.f32 %v994_v11, %v510_v3  ;;  %v369_v14 = vmul.f32 %v785_v4, %v975_v0  ;;  %v788_v15 = vunpack.c.l.bf16 %v880_v62 }
  0x3b   : > { %642 = vst [vmem:[%s1018_s18 + $0x88] sm:$0xff] %v610_v6  ;;  %v580_v16 = vadd.f32 %v548_v7, %v406_v2  ;;  %v511_v17 = vmul.f32 %v849_v9, %v980_v1  ;;  %v852_v18 = vunpack.c.l.bf16 %v895_v5  ;;  %v789_v19 = vunpack.c.h.bf16 %v880_v62 }
  0x3c   : > { %643 = vst [vmem:[%s1018_s18 + $0x90] sm:$0xff] %v611_v12  ;;  %v581_v21 = vadd.f32 %v549_v13, %v407_v8  ;;  %v408_v22 = vadd.f32 %v989_v10, %v369_v14  ;;  %v370_v23 = vmul.f32 %v788_v15, %v975_v0  ;;  %v853_v24 = vunpack.c.h.bf16 %v895_v5  ;;  %v884_v14 = vld [vmem:[%s965_s27 + $0x78] sm:$0xff]  }
  0x3d   : > { %v612_v26 = vmax.f32 %v580_v16, 0.0  ;;  %v550_v27 = vadd.f32 %v994_v11, %v511_v17  ;;  %v512_v28 = vmul.f32 %v852_v18, %v980_v1  ;;  %v371_v29 = vmul.f32 %v789_v19, %v975_v0  ;;  %v899_v15 = vld [vmem:[%s970_s30 + $0x78] sm:$0xff]  }
  0x3e   : > { %v613_v30 = vmax.f32 %v581_v21, 0.0  ;;  %v409_v31 = vadd.f32 %v989_v10, %v370_v23  ;;  %v513_v32 = vmul.f32 %v853_v24, %v980_v1  ;;  %v792_v33 = vunpack.c.l.bf16 %v881_v20 }
  0x3f   : > { %644 = vst [vmem:[%s1018_s18 + $0x98] sm:$0xff] %v612_v26  ;;  %v582_v35 = vadd.f32 %v550_v27, %v408_v22  ;;  %v551_v36 = vadd.f32 %v994_v11, %v512_v28  ;;  %v410_v37 = vadd.f32 %v989_v10, %v371_v29  ;;  %v856_v38 = vunpack.c.l.bf16 %v896_v25 }
  0x40   : > { %645 = vst [vmem:[%s1018_s18 + $0xa0] sm:$0xff] %v613_v30  ;;  %v552_v39 = vadd.f32 %v994_v11, %v513_v32  ;;  %v372_v40 = vmul.f32 %v792_v33, %v975_v0  ;;  %v793_v41 = vunpack.c.h.bf16 %v881_v20  ;;  %v857_v42 = vunpack.c.h.bf16 %v896_v25 }
  0x41   : > { %v614_v44 = vmax.f32 %v582_v35, 0.0  ;;  %v583_v45 = vadd.f32 %v551_v36, %v409_v31  ;;  %v514_v46 = vmul.f32 %v856_v38, %v980_v1  ;;  %v796_v47 = vunpack.c.l.bf16 %v882_v34 }
  0x42   : > { %v584_v48 = vadd.f32 %v552_v39, %v410_v37  ;;  %v411_v49 = vadd.f32 %v989_v10, %v372_v40  ;;  %v373_v50 = vmul.f32 %v793_v41, %v975_v0  ;;  %v515_v51 = vmul.f32 %v857_v42, %v980_v1 }
  0x43   : > { %646 = vst [vmem:[%s1018_s18 + $0xa8] sm:$0xff] %v614_v44  ;;  %v615_v52 = vmax.f32 %v583_v45, 0.0  ;;  %v553_v53 = vadd.f32 %v994_v11, %v514_v46  ;;  %v374_v54 = vmul.f32 %v796_v47, %v975_v0  ;;  %v860_v55 = vunpack.c.l.bf16 %v897_v43 }
  0x44   : > { %v616_v58 = vmax.f32 %v584_v48, 0.0  ;;  %v412_v59 = vadd.f32 %v989_v10, %v373_v50  ;;  %v554_v60 = vadd.f32 %v994_v11, %v515_v51  ;;  %v797_v61 = vunpack.c.h.bf16 %v882_v34 }
  0x45   : > { %647 = vst [vmem:[%s1018_s18 + $0xb0] sm:$0xff] %v615_v52  ;;  %v585_v62 = vadd.f32 %v553_v53, %v411_v49  ;;  %v413_v63 = vadd.f32 %v989_v10, %v374_v54  ;;  %v516_v2 = vmul.f32 %v860_v55, %v980_v1  ;;  %v861_v3 = vunpack.c.h.bf16 %v897_v43 }
  0x46   : > { %648 = vst [vmem:[%s1018_s18 + $0xb8] sm:$0xff] %v616_v58  ;;  %v586_v4 = vadd.f32 %v554_v60, %v412_v59  ;;  %v375_v5 = vmul.f32 %v797_v61, %v975_v0  ;;  %v800_v6 = vunpack.c.l.bf16 %v883_v56  ;;  %v864_v7 = vunpack.c.l.bf16 %v898_v57 }
  0x47   : > { %v617_v8 = vmax.f32 %v585_v62, 0.0  ;;  %v555_v9 = vadd.f32 %v994_v11, %v516_v2  ;;  %v517_v12 = vmul.f32 %v861_v3, %v980_v1  ;;  %v801_v13 = vunpack.c.h.bf16 %v883_v56 }
  0x48   : > { %v618_v16 = vmax.f32 %v586_v4, 0.0  ;;  %v414_v17 = vadd.f32 %v989_v10, %v375_v5  ;;  %v376_v18 = vmul.f32 %v800_v6, %v975_v0  ;;  %v518_v19 = vmul.f32 %v864_v7, %v980_v1 }
  0x49   : > { %649 = vst [vmem:[%s1018_s18 + $0xc0] sm:$0xff] %v617_v8  ;;  %v587_v20 = vadd.f32 %v555_v9, %v413_v63  ;;  %v556_v21 = vadd.f32 %v994_v11, %v517_v12  ;;  %v377_v22 = vmul.f32 %v801_v13, %v975_v0  ;;  %v865_v23 = vunpack.c.h.bf16 %v898_v57 }
  0x4a   : > { %650 = vst [vmem:[%s1018_s18 + $0xc8] sm:$0xff] %v618_v16  ;;  %v415_v24 = vadd.f32 %v989_v10, %v376_v18  ;;  %v557_v25 = vadd.f32 %v994_v11, %v518_v19  ;;  %v804_v26 = vunpack.c.l.bf16 %v884_v14  ;;  %v868_v27 = vunpack.c.l.bf16 %v899_v15 }
  0x4b   : > { %v619_v28 = vmax.f32 %v587_v20, 0.0  ;;  %v588_v29 = vadd.f32 %v556_v21, %v414_v17  ;;  %v416_v30 = vadd.f32 %v989_v10, %v377_v22  ;;  %v519_v31 = vmul.f32 %v865_v23, %v980_v1 }
  0x4c   : > { %v589_v32 = vadd.f32 %v557_v25, %v415_v24  ;;  %v378_v33 = vmul.f32 %v804_v26, %v975_v0  ;;  %v520_v34 = vmul.f32 %v868_v27, %v980_v1  ;;  %v805_v35 = vunpack.c.h.bf16 %v884_v14 }
  0x4d   : > { %651 = vst [vmem:[%s1018_s18 + $0xd0] sm:$0xff] %v619_v28  ;;  %v620_v36 = vmax.f32 %v588_v29, 0.0  ;;  %v558_v37 = vadd.f32 %v994_v11, %v519_v31  ;;  %v869_v38 = vunpack.c.h.bf16 %v899_v15 }
  0x4e   : > { %v621_v39 = vmax.f32 %v589_v32, 0.0  ;;  %v417_v40 = vadd.f32 %v989_v10, %v378_v33  ;;  %v559_v41 = vadd.f32 %v994_v11, %v520_v34  ;;  %v379_v42 = vmul.f32 %v805_v35, %v975_v0 }
  0x4f   : > { %652 = vst [vmem:[%s1018_s18 + $0xd8] sm:$0xff] %v620_v36  ;;  %v590_v43 = vadd.f32 %v558_v37, %v416_v30  ;;  %v521_v44 = vmul.f32 %v869_v38, %v980_v1 }
  0x50   : > { %653 = vst [vmem:[%s1018_s18 + $0xe0] sm:$0xff] %v621_v39  ;;  %v591_v45 = vadd.f32 %v559_v41, %v417_v40  ;;  %v418_v46 = vadd.f32 %v989_v10, %v379_v42 }
  0x51   : > { %v622_v47 = vmax.f32 %v590_v43, 0.0  ;;  %v560_v48 = vadd.f32 %v994_v11, %v521_v44 }
  0x52   : > { %v623_v49 = vmax.f32 %v591_v45, 0.0 }
  0x53   : > { %654 = vst [vmem:[%s1018_s18 + $0xe8] sm:$0xff] %v622_v47  ;;  %v592_v50 = vadd.f32 %v560_v48, %v418_v46 }
  0x54   : > { %655 = vst [vmem:[%s1018_s18 + $0xf0] sm:$0xff] %v623_v49 }
  0x55   : > { %v624_v51 = vmax.f32 %v592_v50, 0.0 }
  0x57   : > { %656 = vst [vmem:[%s1018_s18 + $0xf8] sm:$0xff] %v624_v51 }
  0x58 PF: > { %s16_s21 = sadd.s32 1, %s914_s21  }
  0x59   : > { %p13_p4 = scmp.ge.s32.totalorder %s16_s21, 4  }
  0x5b   :  { %15 = sbr.rel (!%p13_p4) target bundleno = 1 (0x1), region = 77 }

// kernel: bottleneck_forward.4
= control target key start
LH: loop header
LB: loop body
LE: loop exit
PB: predicated region body
PF: predicated region fallthrough
CT: control target
= control target key end

     0   :  { %s1838_s18 = smov 0   ;;  %s2184_s0 = inlined_call_operand.vmem [shape: bf16[512,128], index: 0, kind: input, shape index: {}]   ;;  %s2185_s1 = inlined_call_operand.vmem [shape: bf16[128,256], index: 1, kind: input, shape index: {}]   ;;  %s2186_s2 = inlined_call_operand.vmem [shape: bf16[512,128], index: 2, kind: output, shape index: {0}]   ;;  %s2187_s3 = inlined_call_operand.vmem [shape: bf16[512,128], index: 3, kind: output, shape index: {1}]   ;;  %s2188_s4 = inlined_call_operand.vmem [shape: f32[2,2,128], index: 4, kind: output, shape index: {2}]   ;;  %s2189_s5 = inlined_call_operand.vmem [shape: f32[2,2,128], index: 5, kind: output, shape index: {3}]  }
   0x1 LB: > { %s1844_s19 = sadd.s32 4294967295, %s1805_s18   ;;  %p1373_p0 = scmp.ge.s32.totalorder %s1805_s18, 1  ;;  %s1805_s18 = sphi %s1838_s18, %s16_s18  }
   0x2   : > { %p195_p1 = scmp.lt.s32.totalorder %s1805_s18, 3 }
   0x4   : > { %p196_p2 = pnand %p1373_p0, %p195_p1 }
   0x5   : > { %v1759_v0 = vld [vmem:[%s2185_s1 + $0x4] ss:$8 sps:$4 sm:$0xff] (!%p196_p2)   ;;  %s1374_s22 = sshll.u32 (!%p196_p2), %s1844_s19, 5  ;;  %v1761_v1 = vld [vmem:[%s2185_s1] ss:$8 sps:$4 sm:$0xff] (!%p196_p2)   ;;  %v1807_v2 = vmov (!%p196_p2), 0  }
   0x6   : > { %199 = sbr.rel (%p196_p2) target bundleno = 360 (0x168), region = 28  ;;  %519 = vmatprep.mubr.bf16.mxu0 (!%p196_p2), %v1807_v2  ;;  %p237_p3 = scmp.lt.s32.totalorder (!%p196_p2), %s1374_s22, 63  ;;  %599 = vmatprep.mubr.bf16.mxu1 (!%p196_p2), %v1807_v2  ;;  %v1762_v3 = vld [vmem:[%s2185_s1 + $0x14] ss:$8 sps:$4 sm:$0xff] (!%p196_p2)   ;;  %v1764_v4 = vld [vmem:[%s2185_s1 + $0x10] ss:$8 sps:$4 sm:$0xff] (!%p196_p2)  }
   0x7   : > { %487 = vmatprep.subr.bf16.mxu0 (!%p196_p2), %v1759_v0  ;;  %1734 = vmatprep.subr.bf16.mxu1 (!%p196_p2), %v1759_v0  ;;  %v1765_v5 = vld [vmem:[%s2185_s1 + $0x24] ss:$8 sps:$4 sm:$0xff] (!%p196_p2)   ;;  %v1767_v6 = vld [vmem:[%s2185_s1 + $0x20] ss:$8 sps:$4 sm:$0xff] (!%p196_p2)   ;;  %v1768_v7 = vld [vmem:[%s2185_s1 + $0x34] ss:$8 sps:$4 sm:$0xff] (!%p196_p2)  }
   0x8   : > { %488 = vmatpush1.bf16.msra.mxu0 (!%p196_p2), %v1761_v1  ;;  %1742 = vmatpush1.bf16.msra.mxu1 (!%p196_p2), %v1761_v1  ;;  %v1770_v8 = vld [vmem:[%s2185_s1 + $0x30] ss:$8 sps:$4 sm:$0xff] (!%p196_p2)   ;;  %v1771_v9 = vld [vmem:[%s2185_s1 + $0x44] ss:$8 sps:$4 sm:$0xff] (!%p196_p2)   ;;  %v1773_v10 = vld [vmem:[%s2185_s1 + $0x40] ss:$8 sps:$4 sm:$0xff] (!%p196_p2)  }
   0x9   : > { %489 = vmatprep.subr.bf16.mxu0 (!%p196_p2), %v1762_v3  ;;  %1735 = vmatprep.subr.bf16.mxu1 (!%p196_p2), %v1762_v3  ;;  %v1774_v11 = vld [vmem:[%s2185_s1 + $0x54] ss:$8 sps:$4 sm:$0xff] (!%p196_p2)   ;;  %v1776_v12 = vld [vmem:[%s2185_s1 + $0x50] ss:$8 sps:$4 sm:$0xff] (!%p196_p2)   ;;  %v1777_v13 = vld [vmem:[%s2185_s1 + $0x64] ss:$8 sps:$4 sm:$0xff] (!%p196_p2)  }
   0xa   : > { %v1779_v14 = vld [vmem:[%s2185_s1 + $0x60] ss:$8 sps:$4 sm:$0xff] (!%p196_p2)   ;;  %v1780_v15 = vld [vmem:[%s2185_s1 + $0x74] ss:$8 sps:$4 sm:$0xff] (!%p196_p2)   ;;  %v1782_v16 = vld [vmem:[%s2185_s1 + $0x70] ss:$8 sps:$4 sm:$0xff] (!%p196_p2)  }
   0xb   : > { %p254_p4 = scmp.lt.s32.totalorder (!%p196_p2), %s1844_s19, 1  ;;  %vm1106_vm0 = vcmask (!%p196_p2), 1040384  }
   0xc   : > { %490 = vmatpush1.bf16.msra.mxu0 (!%p196_p2), %v1764_v4  ;;  %1743 = vmatpush1.bf16.msra.mxu1 (!%p196_p2), %v1764_v4 }
   0xd   : > { %s2191_s22 = smov (!%p237_p3, %s1374_s22), 63  ;;  %491 = vmatprep.subr.bf16.mxu0 %v1765_v5  ;;  %1736 = vmatprep.subr.bf16.mxu1 %v1765_v5  ;;  %s2193_s19 = smov (!%p254_p4, %s1844_s19), 1 }
   0xe   : > { %s1866_s6 = sshll.u32 %s2191_s22, 2 }
   0xf   : > { %s1878_s13 = scalar_lea.vmem %s2184_s0, %s1866_s6  ;;  %s1945_s12 = scalar_lea.vmem %s2186_s2, %s1866_s6 }
  0x10   : > { %492 = vmatpush1.bf16.msra.mxu0 %v1767_v6  ;;  %1744 = vmatpush1.bf16.msra.mxu1 %v1767_v6  ;;  %v1783_v17 = vld [vmem:[%s1878_s13] sm:$0xff]   ;;  %v1784_v19 = vld [vmem:[%s1878_s13 + $0x8] sm:$0xff]   ;;  %v1785_v21 = vld [vmem:[%s1878_s13 + $0x10] sm:$0xff]   ;;  %s1953_s15 = scalar_lea.vmem %s2187_s3, %s1866_s6  ;;  %s1380_s6 = sshll.u32 %s2193_s19, 1 }
  0x11   : > { %493 = vmatprep.subr.bf16.mxu0 %v1768_v7  ;;  %1737 = vmatprep.subr.bf16.mxu1 %v1768_v7  ;;  %v1787_v18 = vld [vmem:[%s1878_s13 + $0x40] sm:$0xff]   ;;  %v1789_v20 = vld [vmem:[%s1878_s13 + $0x48] sm:$0xff]   ;;  %v1791_v22 = vld [vmem:[%s1878_s13 + $0x50] sm:$0xff]   ;;  %s257_s20 = scalar_lea.vmem %s2188_s4, %s1380_s6  ;;  %s261_s23 = scalar_lea.vmem %s2189_s5, %s1380_s6 }
  0x12   : > { %v1786_v23 = vld [vmem:[%s1878_s13 + $0x18] sm:$0xff]   ;;  %v1788_v25 = vld [vmem:[%s1878_s13 + $0x20] sm:$0xff]   ;;  %v1790_v27 = vld [vmem:[%s1878_s13 + $0x28] sm:$0xff]  }
  0x13   : > { %v1793_v24 = vld [vmem:[%s1878_s13 + $0x58] sm:$0xff]   ;;  %v1795_v26 = vld [vmem:[%s1878_s13 + $0x60] sm:$0xff]   ;;  %v1796_v28 = vld [vmem:[%s1878_s13 + $0x68] sm:$0xff]  }
  0x14   : > { %494 = vmatpush1.bf16.msra.mxu0 %v1770_v8  ;;  %1745 = vmatpush1.bf16.msra.mxu1 %v1770_v8  ;;  %v1792_v29 = vld [vmem:[%s1878_s13 + $0x30] sm:$0xff]   ;;  %v1794_v31 = vld [vmem:[%s1878_s13 + $0x38] sm:$0xff]  }
  0x15   : > { %495 = vmatprep.subr.bf16.mxu0 %v1771_v9  ;;  %1738 = vmatprep.subr.bf16.mxu1 %v1771_v9  ;;  %v1797_v30 = vld [vmem:[%s1878_s13 + $0x70] sm:$0xff]   ;;  %v1798_v32 = vld [vmem:[%s1878_s13 + $0x78] sm:$0xff]  }
  0x18   : > { %496 = vmatpush1.bf16.msra.mxu0 %v1773_v10  ;;  %1746 = vmatpush1.bf16.msra.mxu1 %v1773_v10 }
  0x19   : > { %497 = vmatprep.subr.bf16.mxu0 %v1774_v11  ;;  %1739 = vmatprep.subr.bf16.mxu1 %v1774_v11 }
  0x1c   : > { %498 = vmatpush1.bf16.msra.mxu0 %v1776_v12  ;;  %1747 = vmatpush1.bf16.msra.mxu1 %v1776_v12 }
  0x1d   : > { %499 = vmatprep.subr.bf16.mxu0 %v1777_v13  ;;  %1740 = vmatprep.subr.bf16.mxu1 %v1777_v13 }
  0x20   : > { %500 = vmatpush1.bf16.msra.mxu0 %v1779_v14  ;;  %1748 = vmatpush1.bf16.msra.mxu1 %v1779_v14 }
  0x21   : > { %501 = vmatprep.subr.bf16.mxu0 %v1780_v15  ;;  %1741 = vmatprep.subr.bf16.mxu1 %v1780_v15 }
  0x24   : > { %502 = vmatpush1.bf16.msra.mxu0 %v1782_v16  ;;  %1749 = vmatpush1.bf16.msra.mxu1 %v1782_v16 }
  0x27   : > { %520 = vmatmul.mubr.bf16.vlgmr.msra.gmra.mrb[0].mxu0 %v1783_v17  ;;  %600 = vmatmul.mubr.bf16.vlgmr.msra.gmra.mrb[0].mxu1 %v1787_v18 }
  0x28   : > { %529 = vmatprep.mubr.bf16.mxu0 %v1807_v2  ;;  %609 = vmatprep.mubr.bf16.mxu1 %v1807_v2 }
  0x2f   : > { %530 = vmatmul.mubr.bf16.gmra.mrb[4].mxu0 %v1784_v19  ;;  %610 = vmatmul.mubr.bf16.gmra.mrb[4].mxu1 %v1789_v20 }
  0x30   : > { %539 = vmatprep.mubr.bf16.mxu0 %v1807_v2  ;;  %619 = vmatprep.mubr.bf16.mxu1 %v1807_v2 }
  0x37   : > { %540 = vmatmul.mubr.bf16.gmra.mrb[8].mxu0 %v1785_v21  ;;  %620 = vmatmul.mubr.bf16.gmra.mrb[8].mxu1 %v1791_v22 }
  0x38   : > { %549 = vmatprep.mubr.bf16.mxu0 %v1807_v2  ;;  %629 = vmatprep.mubr.bf16.mxu1 %v1807_v2 }
  0x3f   : > { %550 = vmatmul.mubr.bf16.gmra.mrb[12].mxu0 %v1786_v23  ;;  %630 = vmatmul.mubr.bf16.gmra.mrb[12].mxu1 %v1793_v24 }
  0x40   : > { %559 = vmatprep.mubr.bf16.mxu0 %v1807_v2  ;;  %639 = vmatprep.mubr.bf16.mxu1 %v1807_v2 }
  0x47   : > { %560 = vmatmul.mubr.bf16.gmra.mrb[16].mxu0 %v1788_v25  ;;  %640 = vmatmul.mubr.bf16.gmra.mrb[16].mxu1 %v1795_v26 }
  0x48   : > { %569 = vmatprep.mubr.bf16.mxu0 %v1807_v2  ;;  %649 = vmatprep.mubr.bf16.mxu1 %v1807_v2 }
  0x4f   : > { %570 = vmatmul.mubr.bf16.gmra.mrb[20].mxu0 %v1790_v27  ;;  %650 = vmatmul.mubr.bf16.gmra.mrb[20].mxu1 %v1796_v28 }
  0x50   : > { %579 = vmatprep.mubr.bf16.mxu0 %v1807_v2  ;;  %659 = vmatprep.mubr.bf16.mxu1 %v1807_v2 }
  0x57   : > { %580 = vmatmul.mubr.bf16.gmra.mrb[24].mxu0 %v1792_v29  ;;  %660 = vmatmul.mubr.bf16.gmra.mrb[24].mxu1 %v1797_v30 }
  0x58   : > { %589 = vmatprep.mubr.bf16.mxu0 %v1807_v2  ;;  %669 = vmatprep.mubr.bf16.mxu1 %v1807_v2 }
  0x5f   : > { %590 = vmatmul.mubr.bf16.gmra.mrb[28].mxu0 %v1794_v31  ;;  %670 = vmatmul.mubr.bf16.gmra.mrb[28].mxu1 %v1798_v32 }
  0xfa   : > { %v521_v33 = vpop.f32.mrb[0].mxu0  ;;  %v1937_v34 = vpop.f32.mrb[0].mxu1 }
  0xfb   : > { %v523_v35 = vpop.f32.mrb[1].mxu0  ;;  %v1939_v36 = vpop.f32.mrb[1].mxu1  ;;  %v1037_v37 = vmul.f32 %v521_v33, %v521_v33 }
  0xfc   : > { %v525_v38 = vpop.f32.mrb[2].mxu0  ;;  %v1947_v39 = vpop.f32.mrb[2].mxu1  ;;  %v1146_v46 = vmul.f32 %v523_v35, %v523_v35 }
  0xfd   : > { %v1547_v40 = vpack.c.bf16 %v525_v38, %v521_v33  ;;  %v1000_v41 = vadd.f32 %v525_v38, %v521_v33  ;;  %v1038_v42 = vmul.f32 %v525_v38, %v525_v38  ;;  %v527_v43 = vpop.f32.mrb[3].mxu0  ;;  %v1587_v44 = vpack.c.bf16 %v1947_v39, %v1937_v34  ;;  %v1957_v45 = vpop.f32.mrb[3].mxu1 }
  0xfe   : > { %v1627_v47 = vpack.c.bf16 %v527_v43, %v523_v35  ;;  %v1109_v48 = vadd.f32 %v527_v43, %v523_v35  ;;  %v1147_v49 = vmul.f32 %v527_v43, %v527_v43  ;;  %v1667_v51 = vpack.c.bf16 %v1957_v45, %v1939_v36 }
  0xff   : > { %1548 = vst [vmem:[%s1945_s12] sm:$0xff] %v1547_v40   ;;  %v1069_v50 = vadd.f32 %v1038_v42, %v1037_v37  ;;  %1711 = vst [vmem:[%s1945_s12 + $0x40] sm:$0xff] %v1587_v44  }
 0x100   : > { %1628 = vst [vmem:[%s1953_s15] sm:$0xff] %v1627_v47   ;;  %v1178_v52 = vadd.f32 %v1147_v49, %v1146_v46  ;;  %1726 = vst [vmem:[%s1953_s15 + $0x40] sm:$0xff] %v1667_v51  }
 0x102   : > { %v531_v53 = vpop.f32.mrb[4].mxu0  ;;  %v1965_v54 = vpop.f32.mrb[4].mxu1 }
 0x103   : > { %v1001_v55 = vadd.f32 %v1000_v41, %v531_v53  ;;  %v1039_v56 = vmul.f32 %v531_v53, %v531_v53  ;;  %v533_v57 = vpop.f32.mrb[5].mxu0  ;;  %v1967_v58 = vpop.f32.mrb[5].mxu1 }
 0x104   : > { %v1110_v59 = vadd.f32 %v1109_v48, %v533_v57  ;;  %v1148_v60 = vmul.f32 %v533_v57, %v533_v57  ;;  %v535_v61 = vpop.f32.mrb[6].mxu0  ;;  %v1969_v62 = vpop.f32.mrb[6].mxu1 }
 0x105   : > { %v1070_v63 = vadd.f32 %v1069_v50, %v1039_v56  ;;  %v1552_v0 = vpack.c.bf16 %v535_v61, %v531_v53  ;;  %v1002_v1 = vadd.f32 %v1001_v55, %v535_v61  ;;  %v1040_v2 = vmul.f32 %v535_v61, %v535_v61  ;;  %v537_v3 = vpop.f32.mrb[7].mxu0  ;;  %v1971_v4 = vpop.f32.mrb[7].mxu1 }
 0x106   : > { %v1179_v5 = vadd.f32 %v1178_v52, %v1148_v60  ;;  %v1632_v6 = vpack.c.bf16 %v537_v3, %v533_v57  ;;  %v1111_v7 = vadd.f32 %v1110_v59, %v537_v3  ;;  %v1149_v8 = vmul.f32 %v537_v3, %v537_v3 }
 0x107   : > { %1704 = vst [vmem:[%s1945_s12 + $0x8] sm:$0xff] %v1552_v0   ;;  %v1071_v9 = vadd.f32 %v1070_v63, %v1040_v2  ;;  %v1592_v10 = vpack.c.bf16 %v1969_v62, %v1965_v54  ;;  %v1672_v11 = vpack.c.bf16 %v1971_v4, %v1967_v58 }
 0x108   : > { %1719 = vst [vmem:[%s1953_s15 + $0x8] sm:$0xff] %v1632_v6   ;;  %v1180_v12 = vadd.f32 %v1179_v5, %v1149_v8 }
 0x109   : > { %1712 = vst [vmem:[%s1945_s12 + $0x48] sm:$0xff] %v1592_v10   ;;  %1727 = vst [vmem:[%s1953_s15 + $0x48] sm:$0xff] %v1672_v11  }
 0x10a   : > { %v541_v13 = vpop.f32.mrb[8].mxu0  ;;  %v1981_v14 = vpop.f32.mrb[8].mxu1 }
 0x10b   : > { %v1003_v15 = vadd.f32 %v1002_v1, %v541_v13  ;;  %v1041_v16 = vmul.f32 %v541_v13, %v541_v13  ;;  %v543_v17 = vpop.f32.mrb[9].mxu0  ;;  %v1983_v18 = vpop.f32.mrb[9].mxu1 }
 0x10c   : > { %v1112_v19 = vadd.f32 %v1111_v7, %v543_v17  ;;  %v1150_v20 = vmul.f32 %v543_v17, %v543_v17  ;;  %v545_v21 = vpop.f32.mrb[10].mxu0  ;;  %v1985_v22 = vpop.f32.mrb[10].mxu1 }
 0x10d   : > { %v1072_v23 = vadd.f32 %v1071_v9, %v1041_v16  ;;  %v1557_v24 = vpack.c.bf16 %v545_v21, %v541_v13  ;;  %v1004_v25 = vadd.f32 %v1003_v15, %v545_v21  ;;  %v1042_v26 = vmul.f32 %v545_v21, %v545_v21  ;;  %v547_v27 = vpop.f32.mrb[11].mxu0  ;;  %v1987_v28 = vpop.f32.mrb[11].mxu1 }
 0x10e   : > { %v1181_v29 = vadd.f32 %v1180_v12, %v1150_v20  ;;  %v1637_v30 = vpack.c.bf16 %v547_v27, %v543_v17  ;;  %v1113_v31 = vadd.f32 %v1112_v19, %v547_v27  ;;  %v1151_v32 = vmul.f32 %v547_v27, %v547_v27 }
 0x10f   : > { %1705 = vst [vmem:[%s1945_s12 + $0x10] sm:$0xff] %v1557_v24   ;;  %v1073_v33 = vadd.f32 %v1072_v23, %v1042_v26  ;;  %v1597_v35 = vpack.c.bf16 %v1985_v22, %v1981_v14  ;;  %v1677_v37 = vpack.c.bf16 %v1987_v28, %v1983_v18 }
 0x110   : > { %1720 = vst [vmem:[%s1953_s15 + $0x10] sm:$0xff] %v1637_v30   ;;  %v1182_v38 = vadd.f32 %v1181_v29, %v1151_v32 }
 0x111   : > { %1713 = vst [vmem:[%s1945_s12 + $0x50] sm:$0xff] %v1597_v35   ;;  %1728 = vst [vmem:[%s1953_s15 + $0x50] sm:$0xff] %v1677_v37  }
 0x112   : > { %v551_v40 = vpop.f32.mrb[12].mxu0  ;;  %v1997_v41 = vpop.f32.mrb[12].mxu1 }
 0x113   : > { %v1005_v42 = vadd.f32 %v1004_v25, %v551_v40  ;;  %v1043_v43 = vmul.f32 %v551_v40, %v551_v40  ;;  %v553_v44 = vpop.f32.mrb[13].mxu0  ;;  %v1999_v46 = vpop.f32.mrb[13].mxu1 }
 0x114   : > { %v1114_v47 = vadd.f32 %v1113_v31, %v553_v44  ;;  %v1152_v48 = vmul.f32 %v553_v44, %v553_v44  ;;  %v555_v49 = vpop.f32.mrb[14].mxu0  ;;  %v2001_v50 = vpop.f32.mrb[14].mxu1 }
 0x115   : > { %v1074_v51 = vadd.f32 %v1073_v33, %v1043_v43  ;;  %v1562_v52 = vpack.c.bf16 %v555_v49, %v551_v40  ;;  %v1006_v53 = vadd.f32 %v1005_v42, %v555_v49  ;;  %v1044_v55 = vmul.f32 %v555_v49, %v555_v49  ;;  %v557_v56 = vpop.f32.mrb[15].mxu0  ;;  %v2003_v57 = vpop.f32.mrb[15].mxu1 }
 0x116   : > { %v1183_v59 = vadd.f32 %v1182_v38, %v1152_v48  ;;  %v1642_v60 = vpack.c.bf16 %v557_v56, %v553_v44  ;;  %v1115_v61 = vadd.f32 %v1114_v47, %v557_v56  ;;  %v1153_v63 = vmul.f32 %v557_v56, %v557_v56 }
 0x117   : > { %1706 = vst [vmem:[%s1945_s12 + $0x18] sm:$0xff] %v1562_v52   ;;  %v1075_v0 = vadd.f32 %v1074_v51, %v1044_v55  ;;  %v1602_v1 = vpack.c.bf16 %v2001_v50, %v1997_v41  ;;  %v1682_v2 = vpack.c.bf16 %v2003_v57, %v1999_v46 }
 0x118   : > { %1721 = vst [vmem:[%s1953_s15 + $0x18] sm:$0xff] %v1642_v60   ;;  %v1184_v3 = vadd.f32 %v1183_v59, %v1153_v63 }
 0x119   : > { %1714 = vst [vmem:[%s1945_s12 + $0x58] sm:$0xff] %v1602_v1   ;;  %1729 = vst [vmem:[%s1953_s15 + $0x58] sm:$0xff] %v1682_v2  }
 0x11a   : > { %v561_v5 = vpop.f32.mrb[16].mxu0  ;;  %v2013_v6 = vpop.f32.mrb[16].mxu1 }
 0x11b   : > { %v1007_v7 = vadd.f32 %v1006_v53, %v561_v5  ;;  %v1045_v8 = vmul.f32 %v561_v5, %v561_v5  ;;  %v563_v9 = vpop.f32.mrb[17].mxu0  ;;  %v2015_v10 = vpop.f32.mrb[17].mxu1 }
 0x11c   : > { %v1116_v11 = vadd.f32 %v1115_v61, %v563_v9  ;;  %v1154_v12 = vmul.f32 %v563_v9, %v563_v9  ;;  %v565_v13 = vpop.f32.mrb[18].mxu0  ;;  %v2017_v15 = vpop.f32.mrb[18].mxu1 }
 0x11d   : > { %v1076_v16 = vadd.f32 %v1075_v0, %v1045_v8  ;;  %v1567_v17 = vpack.c.bf16 %v565_v13, %v561_v5  ;;  %v1008_v19 = vadd.f32 %v1007_v7, %v565_v13  ;;  %v1046_v20 = vmul.f32 %v565_v13, %v565_v13  ;;  %v567_v21 = vpop.f32.mrb[19].mxu0  ;;  %v2019_v23 = vpop.f32.mrb[19].mxu1 }
 0x11e   : > { %v1185_v24 = vadd.f32 %v1184_v3, %v1154_v12  ;;  %v1647_v25 = vpack.c.bf16 %v567_v21, %v563_v9  ;;  %v1117_v26 = vadd.f32 %v1116_v11, %v567_v21  ;;  %v1155_v27 = vmul.f32 %v567_v21, %v567_v21 }
 0x11f   : > { %1707 = vst [vmem:[%s1945_s12 + $0x20] sm:$0xff] %v1567_v17   ;;  %v1077_v29 = vadd.f32 %v1076_v16, %v1046_v20  ;;  %v1607_v30 = vpack.c.bf16 %v2017_v15, %v2013_v6  ;;  %v1687_v31 = vpack.c.bf16 %v2019_v23, %v2015_v10 }
 0x120   : > { %1722 = vst [vmem:[%s1953_s15 + $0x20] sm:$0xff] %v1647_v25   ;;  %v1186_v32 = vadd.f32 %v1185_v24, %v1155_v27 }
 0x121   : > { %1715 = vst [vmem:[%s1945_s12 + $0x60] sm:$0xff] %v1607_v30   ;;  %1730 = vst [vmem:[%s1953_s15 + $0x60] sm:$0xff] %v1687_v31  }
 0x122   : > { %v571_v33 = vpop.f32.mrb[20].mxu0  ;;  %v2029_v35 = vpop.f32.mrb[20].mxu1 }
 0x123   : > { %v1009_v37 = vadd.f32 %v1008_v19, %v571_v33  ;;  %v1047_v38 = vmul.f32 %v571_v33, %v571_v33  ;;  %v573_v40 = vpop.f32.mrb[21].mxu0  ;;  %v2031_v42 = vpop.f32.mrb[21].mxu1 }
 0x124   : > { %v1118_v43 = vadd.f32 %v1117_v26, %v573_v40  ;;  %v1156_v44 = vmul.f32 %v573_v40, %v573_v40  ;;  %v575_v47 = vpop.f32.mrb[22].mxu0  ;;  %v2033_v48 = vpop.f32.mrb[22].mxu1 }
 0x125   : > { %v1078_v49 = vadd.f32 %v1077_v29, %v1047_v38  ;;  %v1572_v51 = vpack.c.bf16 %v575_v47, %v571_v33  ;;  %v1010_v52 = vadd.f32 %v1009_v37, %v575_v47  ;;  %v1048_v53 = vmul.f32 %v575_v47, %v575_v47  ;;  %v577_v55 = vpop.f32.mrb[23].mxu0  ;;  %v2035_v56 = vpop.f32.mrb[23].mxu1 }
 0x126   : > { %v1187_v59 = vadd.f32 %v1186_v32, %v1156_v44  ;;  %v1652_v60 = vpack.c.bf16 %v577_v55, %v573_v40  ;;  %v1119_v61 = vadd.f32 %v1118_v43, %v577_v55  ;;  %v1157_v63 = vmul.f32 %v577_v55, %v577_v55 }
 0x127   : > { %1708 = vst [vmem:[%s1945_s12 + $0x28] sm:$0xff] %v1572_v51   ;;  %v1079_v0 = vadd.f32 %v1078_v49, %v1048_v53  ;;  %v1612_v1 = vpack.c.bf16 %v2033_v48, %v2029_v35  ;;  %v1692_v2 = vpack.c.bf16 %v2035_v56, %v2031_v42 }
 0x128   : > { %1723 = vst [vmem:[%s1953_s15 + $0x28] sm:$0xff] %v1652_v60   ;;  %v1188_v3 = vadd.f32 %v1187_v59, %v1157_v63 }
 0x129   : > { %1716 = vst [vmem:[%s1945_s12 + $0x68] sm:$0xff] %v1612_v1   ;;  %1731 = vst [vmem:[%s1953_s15 + $0x68] sm:$0xff] %v1692_v2  }
 0x12a   : > { %v581_v5 = vpop.f32.mrb[24].mxu0  ;;  %v2045_v7 = vpop.f32.mrb[24].mxu1 }
 0x12b   : > { %v1011_v8 = vadd.f32 %v1010_v52, %v581_v5  ;;  %v1049_v9 = vmul.f32 %v581_v5, %v581_v5  ;;  %v583_v11 = vpop.f32.mrb[25].mxu0  ;;  %v2047_v12 = vpop.f32.mrb[25].mxu1 }
 0x12c   : > { %v1120_v13 = vadd.f32 %v1119_v61, %v583_v11  ;;  %v1158_v16 = vmul.f32 %v583_v11, %v583_v11  ;;  %v585_v17 = vpop.f32.mrb[26].mxu0  ;;  %v2049_v19 = vpop.f32.mrb[26].mxu1 }
 0x12d   : > { %v1080_v20 = vadd.f32 %v1079_v0, %v1049_v9  ;;  %v1577_v21 = vpack.c.bf16 %v585_v17, %v581_v5  ;;  %v1012_v24 = vadd.f32 %v1011_v8, %v585_v17  ;;  %v1050_v25 = vmul.f32 %v585_v17, %v585_v17  ;;  %v587_v26 = vpop.f32.mrb[27].mxu0  ;;  %v2051_v27 = vpop.f32.mrb[27].mxu1 }
 0x12e   : > { %v1189_v29 = vadd.f32 %v1188_v3, %v1158_v16  ;;  %v1657_v30 = vpack.c.bf16 %v587_v26, %v583_v11  ;;  %v1121_v31 = vadd.f32 %v1120_v13, %v587_v26  ;;  %v1159_v32 = vmul.f32 %v587_v26, %v587_v26 }
 0x12f   : > { %1709 = vst [vmem:[%s1945_s12 + $0x30] sm:$0xff] %v1577_v21   ;;  %v1081_v33 = vadd.f32 %v1080_v20, %v1050_v25  ;;  %v1617_v37 = vpack.c.bf16 %v2049_v19, %v2045_v7  ;;  %v1697_v38 = vpack.c.bf16 %v2051_v27, %v2047_v12  ;;  %v1053_v13 = vmul.f32 %v1937_v34, %v1937_v34 }
 0x130   : > { %1724 = vst [vmem:[%s1953_s15 + $0x30] sm:$0xff] %v1657_v30   ;;  %v1190_v40 = vadd.f32 %v1189_v29, %v1159_v32  ;;  %v1162_v21 = vmul.f32 %v1939_v36, %v1939_v36  ;;  %v1054_v29 = vmul.f32 %v1947_v39, %v1947_v39 }
 0x131   : > { %1717 = vst [vmem:[%s1945_s12 + $0x70] sm:$0xff] %v1617_v37   ;;  %1732 = vst [vmem:[%s1953_s15 + $0x70] sm:$0xff] %v1697_v38  }
 0x132   : > { %v591_v43 = vpop.f32.mrb[28].mxu0  ;;  %v2061_v44 = vpop.f32.mrb[28].mxu1 }
 0x133   : > { %v1013_v47 = vadd.f32 %v1012_v24, %v591_v43  ;;  %v1051_v49 = vmul.f32 %v591_v43, %v591_v43  ;;  %v593_v51 = vpop.f32.mrb[29].mxu0  ;;  %v2063_v52 = vpop.f32.mrb[29].mxu1 }
 0x134   : > { %v1122_v53 = vadd.f32 %v1121_v31, %v593_v51  ;;  %v1160_v55 = vmul.f32 %v593_v51, %v593_v51  ;;  %v595_v59 = vpop.f32.mrb[30].mxu0  ;;  %v2065_v60 = vpop.f32.mrb[30].mxu1  ;;  %v1163_v31 = vmul.f32 %v1957_v45, %v1957_v45 }
 0x135   : > { %v1082_v61 = vadd.f32 %v1081_v33, %v1051_v49  ;;  %v1582_v63 = vpack.c.bf16 %v595_v59, %v591_v43  ;;  %v1014_v0 = vadd.f32 %v1013_v47, %v595_v59  ;;  %v1052_v1 = vmul.f32 %v595_v59, %v595_v59  ;;  %v597_v2 = vpop.f32.mrb[31].mxu0  ;;  %v2067_v3 = vpop.f32.mrb[31].mxu1 }
 0x136   : > { %v1191_v5 = vadd.f32 %v1190_v40, %v1160_v55  ;;  %v1662_v8 = vpack.c.bf16 %v597_v2, %v593_v51  ;;  %v1123_v9 = vadd.f32 %v1122_v53, %v597_v2  ;;  %v1161_v11 = vmul.f32 %v597_v2, %v597_v2 }
 0x137   : > { %1710 = vst [vmem:[%s1945_s12 + $0x38] sm:$0xff] %v1582_v63   ;;  %v1015_v16 = vadd.f32 %v1014_v0, %v1937_v34  ;;  %v1083_v17 = vadd.f32 %v1082_v61, %v1052_v1  ;;  %v1622_v20 = vpack.c.bf16 %v2065_v60, %v2061_v44  ;;  %v1702_v26 = vpack.c.bf16 %v2067_v3, %v2063_v52 }
 0x138   : > { %1725 = vst [vmem:[%s1953_s15 + $0x38] sm:$0xff] %v1662_v8   ;;  %v1124_v24 = vadd.f32 %v1123_v9, %v1939_v36  ;;  %v1192_v25 = vadd.f32 %v1191_v5, %v1161_v11  ;;  %v1055_v36 = vmul.f32 %v1965_v54, %v1965_v54  ;;  %v1164_v40 = vmul.f32 %v1967_v58, %v1967_v58 }
 0x139   : > { %v1016_v30 = vadd.f32 %v1015_v16, %v1947_v39  ;;  %v1084_v34 = vadd.f32 %v1083_v17, %v1053_v13  ;;  %1718 = vst [vmem:[%s1945_s12 + $0x78] sm:$0xff] %v1622_v20   ;;  %1733 = vst [vmem:[%s1953_s15 + $0x78] sm:$0xff] %v1702_v26   ;;  %v1056_v47 = vmul.f32 %v1969_v62, %v1969_v62 }
 0x13a   : > { %v1125_v32 = vadd.f32 %v1124_v24, %v1957_v45  ;;  %v1193_v33 = vadd.f32 %v1192_v25, %v1162_v21  ;;  %v1165_v51 = vmul.f32 %v1971_v4, %v1971_v4  ;;  %v1061_v25 = vmul.f32 %v2013_v6, %v2013_v6 }
 0x13b   : > { %v1017_v37 = vadd.f32 %v1016_v30, %v1965_v54  ;;  %v1085_v38 = vadd.f32 %v1084_v34, %v1054_v29  ;;  %v1057_v54 = vmul.f32 %v1981_v14, %v1981_v14  ;;  %v1170_v29 = vmul.f32 %v2015_v10, %v2015_v10 }
 0x13c   : > { %v1126_v39 = vadd.f32 %v1125_v32, %v1967_v58  ;;  %v1194_v43 = vadd.f32 %v1193_v33, %v1163_v31  ;;  %v1166_v58 = vmul.f32 %v1983_v18, %v1983_v18  ;;  %v1062_v31 = vmul.f32 %v2017_v15, %v2017_v15 }
 0x13d   : > { %v1018_v49 = vadd.f32 %v1017_v37, %v1969_v62  ;;  %v1086_v45 = vadd.f32 %v1085_v38, %v1055_v36  ;;  %v1058_v62 = vmul.f32 %v1985_v22, %v1985_v22  ;;  %v1171_v33 = vmul.f32 %v2019_v23, %v2019_v23 }
 0x13e   : > { %v1127_v53 = vadd.f32 %v1126_v39, %v1971_v4  ;;  %v1195_v55 = vadd.f32 %v1194_v43, %v1164_v40  ;;  %v1167_v4 = vmul.f32 %v1987_v28, %v1987_v28  ;;  %v1063_v37 = vmul.f32 %v2029_v35, %v2029_v35 }
 0x13f   : > { %v1087_v59 = vadd.f32 %v1086_v45, %v1056_v47  ;;  %v1019_v61 = vadd.f32 %v1018_v49, %v1981_v14  ;;  %v1059_v14 = vmul.f32 %v1997_v41, %v1997_v41  ;;  %v1172_v40 = vmul.f32 %v2031_v42, %v2031_v42 }
 0x140   : > { %v1196_v63 = vadd.f32 %v1195_v55, %v1165_v51  ;;  %v1128_v0 = vadd.f32 %v1127_v53, %v1983_v18  ;;  %v1168_v18 = vmul.f32 %v1999_v46, %v1999_v46  ;;  %v1064_v43 = vmul.f32 %v2033_v48, %v2033_v48 }
 0x141   : > { %v1020_v1 = vadd.f32 %v1019_v61, %v1985_v22  ;;  %v1088_v2 = vadd.f32 %v1087_v59, %v1057_v54  ;;  %v1060_v22 = vmul.f32 %v2001_v50, %v2001_v50  ;;  %v1173_v49 = vmul.f32 %v2035_v56, %v2035_v56 }
 0x142   : > { %v1129_v5 = vadd.f32 %v1128_v0, %v1987_v28  ;;  %v1197_v8 = vadd.f32 %v1196_v63, %v1166_v58  ;;  %v1169_v28 = vmul.f32 %v2003_v57, %v2003_v57  ;;  %v1065_v51 = vmul.f32 %v2045_v7, %v2045_v7 }
 0x143   : > { %v1021_v9 = vadd.f32 %v1020_v1, %v1997_v41  ;;  %v1089_v11 = vadd.f32 %v1088_v2, %v1058_v62  ;;  %v1174_v55 = vmul.f32 %v2047_v12, %v2047_v12  ;;  %v1066_v59 = vmul.f32 %v2049_v19, %v2049_v19 }
 0x144   : > { %v1130_v13 = vadd.f32 %v1129_v5, %v1999_v46  ;;  %v1198_v16 = vadd.f32 %v1197_v8, %v1167_v4  ;;  %v1176_v63 = vmul.f32 %v2063_v52, %v2063_v52  ;;  %v1068_v4 = vmul.f32 %v2065_v60, %v2065_v60 }
 0x145   : > { %v1022_v17 = vadd.f32 %v1021_v9, %v2001_v50  ;;  %v1090_v20 = vadd.f32 %v1089_v11, %v1059_v14 }
 0x146   : > { %v1131_v21 = vadd.f32 %v1130_v13, %v2003_v57  ;;  %v1199_v24 = vadd.f32 %v1198_v16, %v1168_v18 }
 0x147   : > { %v1023_v41 = vadd.f32 %v1022_v17, %v2013_v6  ;;  %v1091_v26 = vadd.f32 %v1090_v20, %v1060_v22 }
 0x148   : > { %v1132_v46 = vadd.f32 %v1131_v21, %v2015_v10  ;;  %v1200_v30 = vadd.f32 %v1199_v24, %v1169_v28 }
 0x149   : > { %v1092_v50 = vadd.f32 %v1091_v26, %v1061_v25  ;;  %v1024_v34 = vadd.f32 %v1023_v41, %v2017_v15 }
 0x14a   : > { %v1201_v57 = vadd.f32 %v1200_v30, %v1170_v29  ;;  %v1133_v32 = vadd.f32 %v1132_v46, %v2019_v23 }
 0x14b   : > { %v1093_v6 = vadd.f32 %v1092_v50, %v1062_v31  ;;  %v1025_v36 = vadd.f32 %v1024_v34, %v2029_v35 }
 0x14c   : > { %v1202_v10 = vadd.f32 %v1201_v57, %v1171_v33  ;;  %v1134_v38 = vadd.f32 %v1133_v32, %v2031_v42 }
 0x14d   : > { %v1094_v39 = vadd.f32 %v1093_v6, %v1063_v37  ;;  %v1026_v15 = vadd.f32 %v1025_v36, %v2033_v48 }
 0x14e   : > { %v1203_v47 = vadd.f32 %v1202_v10, %v1172_v40  ;;  %v1135_v23 = vadd.f32 %v1134_v38, %v2035_v56  ;;  %v1067_v56 = vmul.f32 %v2061_v44, %v2061_v44 }
 0x14f   : > { %v1095_v45 = vadd.f32 %v1094_v39, %v1064_v43  ;;  %v1027_v35 = vadd.f32 %v1026_v15, %v2045_v7  ;;  %v1175_v7 = vmul.f32 %v2051_v27, %v2051_v27 }
 0x150   : > { %v1204_v53 = vadd.f32 %v1203_v47, %v1173_v49  ;;  %v1136_v42 = vadd.f32 %v1135_v23, %v2047_v12 }
 0x151   : > { %v1096_v54 = vadd.f32 %v1095_v45, %v1065_v51  ;;  %v1028_v48 = vadd.f32 %v1027_v35, %v2049_v19 }
 0x152   : > { %v1205_v61 = vadd.f32 %v1204_v53, %v1174_v55  ;;  %v1137_v58 = vadd.f32 %v1136_v42, %v2051_v27  ;;  %v1177_v27 = vmul.f32 %v2067_v3, %v2067_v3 }
 0x153   : > { %v1097_v12 = vadd.f32 %v1096_v54, %v1066_v59  ;;  %v1029_v0 = vadd.f32 %v1028_v48, %v2061_v44 }
 0x154   : > { %v1206_v62 = vadd.f32 %v1205_v61, %v1175_v7  ;;  %v1138_v1 = vadd.f32 %v1137_v58, %v2063_v52 }
 0x155   : > { %v1098_v19 = vadd.f32 %v1097_v12, %v1067_v56  ;;  %v1030_v2 = vadd.f32 %v1029_v0, %v2065_v60 }
 0x156   : > { %v1207_v5 = vadd.f32 %v1206_v62, %v1176_v63  ;;  %v1139_v8 = vadd.f32 %v1138_v1, %v2067_v3 }
 0x157   : > { %v1031_v14 = vrot.slane %v1030_v2, 4  ;;  %v1099_v9 = vadd.f32 %v1098_v19, %v1068_v4 }
 0x158   : > { %v1140_v44 = vrot.slane %v1139_v8, 4  ;;  %v1208_v11 = vadd.f32 %v1207_v5, %v1177_v27 }
 0x159   : > { %v1032_v18 = vadd.f32 %v1031_v14, %v1030_v2  ;;  %v1100_v52 = vrot.slane %v1099_v9, 4 }
 0x15a   : > { %v1141_v13 = vadd.f32 %v1140_v44, %v1139_v8  ;;  %v1209_v16 = vrot.slane %v1208_v11, 4 }
 0x15b   : > { %v1033_v22 = vrot.slane %v1032_v18, 2  ;;  %v1101_v17 = vadd.f32 %v1100_v52, %v1099_v9 }
 0x15c   : > { %v1142_v20 = vrot.slane %v1141_v13, 2  ;;  %v1210_v60 = vadd.f32 %v1209_v16, %v1208_v11 }
 0x15d   : > { %v1034_v28 = vadd.f32 %v1033_v22, %v1032_v18  ;;  %v1102_v21 = vrot.slane %v1101_v17, 2 }
 0x15e   : > { %v1143_v24 = vadd.f32 %v1142_v20, %v1141_v13  ;;  %v1211_v41 = vrot.slane %v1210_v60, 2 }
 0x15f   : > { %v1035_v25 = vrot.slane %v1034_v28, 1  ;;  %v1103_v3 = vadd.f32 %v1102_v21, %v1101_v17 }
 0x160   : > { %v1144_v26 = vrot.slane %v1143_v24, 1  ;;  %v1212_v46 = vadd.f32 %v1211_v41, %v1210_v60 }
 0x161   : > { %v1104_v29 = vrot.slane %v1103_v3, 1  ;;  %v1036_v50 = vadd.f32 %v1035_v25, %v1034_v28 }
 0x162   : > { %v1213_v30 = vrot.slane %v1212_v46, 1  ;;  %v1145_v31 = vadd.f32 %v1144_v26, %v1143_v24 }
 0x163   : > { %v1105_v34 = vadd.f32 %v1104_v29, %v1103_v3 }
 0x164   : > { %v1214_v57 = vadd.f32 %v1213_v30, %v1212_v46 }
 0x165   : > { %v1107_v32 = vsel %vm1106_vm0, %v1036_v50, %v1105_v34 }
 0x166   : > { %1108 = vst [vmem:[%s257_s20] sm:$0x3] %v1107_v32  ;;  %v1215_v33 = vsel %vm1106_vm0, %v1145_v31, %v1214_v57 }
 0x167   : > { %1216 = vst [vmem:[%s261_s23] sm:$0x3] %v1215_v33 }
 0x168 PF: > { %s16_s18 = sadd.s32 1, %s1805_s18  }
 0x169   : > { %p13_p5 = scmp.ge.s32.totalorder %s16_s18, 4  }
 0x16b   :  { %15 = sbr.rel (!%p13_p5) target bundleno = 1 (0x1), region = 94 }

// kernel: bottleneck_forward.5
= control target key start
LH: loop header
LB: loop body
LE: loop exit
PB: predicated region body
PF: predicated region fallthrough
CT: control target
= control target key end

     0   :  { %s13241_s18 = smov 0   ;;  %s15844_s0 = inlined_call_operand.vmem [shape: bf16[2,256,128], index: 0, kind: input, shape index: {}]   ;;  %s15845_s1 = inlined_call_operand.vmem [shape: f32[1,128], index: 1, kind: input, shape index: {}]   ;;  %s15846_s2 = inlined_call_operand.vmem [shape: f32[1,128], index: 2, kind: input, shape index: {}]   ;;  %s15847_s3 = inlined_call_operand.vmem [shape: bf16[27,128,128], index: 3, kind: input, shape index: {}]   ;;  %s15848_s4 = inlined_call_operand.vmem [shape: bf16[2,256,128], index: 4, kind: output, shape index: {0}]   ;;  %s15849_s5 = inlined_call_operand.vmem [shape: f32[2,2,128], index: 5, kind: output, shape index: {1}]  }
   0x1 LB: > { %s9077_s19 = sadd.s32 4294967295, %s13208_s18   ;;  %p9081_p0 = scmp.ge.s32.totalorder %s13208_s18, 1  ;;  %s13208_s18 = sphi %s13241_s18, %s16_s18  }
   0x2   : > { %p190_p1 = scmp.lt.s32.totalorder %s13208_s18, 3 }
   0x4   : > { %p191_p2 = pnand %p9081_p0, %p190_p1 }
   0x6   : > { %194 = sbr.rel (%p191_p2) target bundleno = 1238 (0x4d6), region = 36 }
   0xd   : > { %v12973_v0 = vld [vmem:[%s15847_s3 + $0x40] sm:$0xff]   ;;  %v15850_v2 = vmov 0   ;;  %v12975_v4 = vld [vmem:[%s15847_s3 + $0x48] sm:$0xff]   ;;  %p13262_p3 = scmp.lt.s32.totalorder %s9077_s19, 1  ;;  %v12977_v7 = vld [vmem:[%s15847_s3 + $0x50] sm:$0xff]   ;;  %vm699_vm3 = vcmask 1040384  }
   0xe   : > { %v12974_v1 = vld [vmem:[%s15847_s3 + $0x340] sm:$0xff]   ;;  %v13257_v3 = vcombine.low %v15850_v2, %v15850_v2  ;;  %10820 = vmatprep.subr.bf16.mxu1 %v12973_v0  ;;  %v12976_v5 = vld [vmem:[%s15847_s3 + $0x348] sm:$0xff]   ;;  %v12978_v9 = vld [vmem:[%s15847_s3 + $0x350] sm:$0xff]   ;;  %v13279_v10 = vcombine.high %v15850_v2, %v15850_v2  ;;  %vm895_vm0 = vsmask.f32 3328  ;;  %vm734_vm5 = vcmask 1044480  }
   0xf   : > { %10821 = vmatpush3.bf16.msra.mxu1 %v12973_v0  ;;  %11444 = vmatprep.subr.bf16.mxu0 %v12974_v1  ;;  %v12979_v13 = vld [vmem:[%s15847_s3 + $0x58] sm:$0xff]   ;;  %s16347_s19 = smov (!%p13262_p3, %s9077_s19), 1  ;;  %v12981_v17 = vld [vmem:[%s15847_s3 + $0x60] sm:$0xff]   ;;  %vm896_vm1 = vsmask.f32 7440  ;;  %v12983_v21 = vld [vmem:[%s15847_s3 + $0x68] sm:$0xff]  }
  0x10   : > { %v899_v6 = vshrl.u32 %v13257_v3, 16  ;;  %10822 = vmatprep.subr.bf16.mxu1 %v12975_v4  ;;  %11445 = vmatpush3.bf16.msra.mxu0 %v12974_v1  ;;  %v902_v8 = vshll.u32 %v13257_v3, 16  ;;  %16039 = vst [vmem:[#allocation2_spill] sm:$0xff] %v13279_v10  ;;  %v12980_v14 = vld [vmem:[%s15847_s3 + $0x358] sm:$0xff]   ;;  %v908_v16 = vshll.u32 %v13279_v10, 16  ;;  %v12982_v18 = vld [vmem:[%s15847_s3 + $0x360] sm:$0xff]   ;;  %vm13309_vm2 = vmor %vm895_vm0, %vm896_vm1 }
  0x11   : > { %11446 = vmatprep.subr.bf16.mxu0 %v12976_v5  ;;  %s9964_s16 = sshll.u32 %s16347_s19, 7  ;;  %v12984_v23 = vld [vmem:[%s15847_s3 + $0x368] sm:$0xff]   ;;  %v13329_v28 = vld [vmem:[%s15845_s1] ss:$0 sm:$0xff]  ;;  %v12985_v33 = vld [vmem:[%s15847_s3 + $0x70] sm:$0xff]   ;;  %vm1714_vm9 = vcmask 1042432  }
  0x12   : > { %v901_v11 = vrot.slane %v899_v6, 4  ;;  %v904_v12 = vrot.slane %v902_v8, 5  ;;  %v910_v20 = vrot.slane %v908_v16, 5  ;;  %s13304_s21 = scalar_lea.vmem %s15844_s0, %s9964_s16  ;;  %v13337_v34 = vld [vmem:[%s15846_s2] ss:$0 sm:$0xff]  ;;  %v12986_v35 = vld [vmem:[%s15847_s3 + $0x370] sm:$0xff]   ;;  %s15765_s29 = scalar_lea.vmem %s15848_s4, %s9964_s16 }
  0x13   : > { %10823 = vmatpush3.bf16.msra.mxu1 %v12975_v4  ;;  %v9999_v26 = vld [vmem:[%s13304_s21] sm:$0xff]   ;;  %v10142_v27 = vld [vmem:[%s13304_s21 + $0x8] sm:$0xff]   ;;  %vm700_vm4 = vsmask.f32 256  ;;  %v10143_v43 = vld [vmem:[%s13304_s21 + $0x10] sm:$0xff]   ;;  %vm1715_vm10 = vcmask 1046532  }
  0x14   : > { %10824 = vmatprep.subr.bf16.mxu1 %v12977_v7  ;;  %11447 = vmatpush3.bf16.msra.mxu0 %v12976_v5  ;;  %v905_v15 = vor.u32 %v904_v12, %v901_v11  ;;  %v10000_v29 = vunpack.c.l.bf16 %v9999_v26  ;;  %v10001_v30 = vunpack.c.h.bf16 %v9999_v26  ;;  %v10004_v31 = vunpack.c.l.bf16 %v10142_v27  ;;  %v12987_v44 = vld [vmem:[%s15847_s3 + $0x78] sm:$0xff]   ;;  %v13363_v62 = vld [vmem:[%s13304_s21 + $0x20] sm:$0xff]   ;;  %vm13378_vm7 = vmand %vm699_vm3, %vm700_vm4  ;;  %s9086_s16 = sshll.u32 %s16347_s19, 1 }
  0x15   : > { %11448 = vmatprep.subr.bf16.mxu0 %v12978_v9  ;;  %v10005_v32 = vunpack.c.h.bf16 %v10142_v27  ;;  %vm735_vm6 = vsmask.f32 4352  ;;  %v10008_v46 = vunpack.c.l.bf16 %v10143_v43  ;;  %v10009_v47 = vunpack.c.h.bf16 %v10143_v43  ;;  %v10144_v48 = vld [vmem:[%s13304_s21 + $0x18] sm:$0xff]   ;;  %v12989_v63 = vld [vmem:[%s15847_s3] sm:$0xff]   ;;  %v12992_v26 = vld [vmem:[%s15847_s3 + $0x8] sm:$0xff]   ;;  %s235_s7 = scalar_lea.vmem %s15849_s5, %s9086_s16 }
  0x16   : > { %v906_v19 = vrot.slane %v905_v15, 4  ;;  %v308_v36 = vmul.f32 %v10000_v29, %v13329_v28  ;;  %v309_v37 = vmul.f32 %v10001_v30, %v13329_v28  ;;  %v310_v38 = vmul.f32 %v10004_v31, %v13329_v28  ;;  %v12988_v49 = vld [vmem:[%s15847_s3 + $0x378] sm:$0xff]   ;;  %v13371_v0 = vld [vmem:[%s15847_s3 + $0x380] sm:$0xff]   ;;  %vm13391_vm8 = vmand %vm734_vm5, %vm735_vm6 }
  0x17   : > { %10825 = vmatpush3.bf16.msra.mxu1 %v12977_v7  ;;  %v311_v39 = vmul.f32 %v10005_v32, %v13329_v28  ;;  %v10012_v53 = vunpack.c.l.bf16 %v10144_v48  ;;  %v312_v55 = vmul.f32 %v10008_v46, %v13329_v28  ;;  %v313_v56 = vmul.f32 %v10009_v47, %v13329_v28  ;;  %v12997_v2 = vld [vmem:[%s15847_s3 + $0x3a8] sm:$0xff]   ;;  %vm13800_vm11 = vmor %vm1714_vm9, %vm1715_vm10  ;;  %v13096_v22 = vld [vmem:[%s15847_s3 + $0x538] sm:$0xff]  }
  0x18   : > { %10826 = vmatprep.subr.bf16.mxu1 %v12979_v13  ;;  %11449 = vmatpush3.bf16.msra.mxu0 %v12978_v9  ;;  %v13318_v24 = vsel %vm13309_vm2, %v906_v19, %v910_v20  ;;  %v347_v40 = vadd.f32 %v13337_v34, %v308_v36  ;;  %v348_v41 = vadd.f32 %v13337_v34, %v309_v37  ;;  %v10013_v57 = vunpack.c.h.bf16 %v10144_v48 }
  0x19   : > { %11450 = vmatprep.subr.bf16.mxu0 %v12980_v14  ;;  %v13322_v25 = vcombine.low %v13318_v24, %v13318_v24  ;;  %v349_v42 = vadd.f32 %v13337_v34, %v310_v38  ;;  %v350_v45 = vadd.f32 %v13337_v34, %v311_v39  ;;  %v314_v61 = vmul.f32 %v10012_v53, %v13329_v28 }
  0x1a   : > { %v379_v50 = vmax.f32 %v347_v40, 0.0  ;;  %v380_v51 = vmax.f32 %v348_v41, 0.0  ;;  %v351_v4 = vadd.f32 %v13337_v34, %v312_v55  ;;  %v352_v5 = vadd.f32 %v13337_v34, %v313_v56  ;;  %v12995_v40 = vld [vmem:[%s15847_s3 + $0x10] sm:$0xff]  }
  0x1b   : > { %10827 = vmatpush3.bf16.msra.mxu1 %v12979_v13  ;;  %16042 = vst [vmem:[#allocation3_spill] sm:$0xff] %v13322_v25  ;;  %10836 = vmatprep.mubr.bf16.mxu1 %v13322_v25  ;;  %v381_v52 = vmax.f32 %v349_v42, 0.0  ;;  %v382_v54 = vmax.f32 %v350_v45, 0.0  ;;  %v10016_v6 = vunpack.c.l.bf16 %v13363_v62  ;;  %v315_v27 = vmul.f32 %v10013_v57, %v13329_v28 }
  0x1c   : > { %10828 = vmatprep.subr.bf16.mxu1 %v12981_v17  ;;  %11451 = vmatpush3.bf16.msra.mxu0 %v12980_v14  ;;  %v411_v58 = vpack.c.bf16 %v379_v50, %v379_v50  ;;  %v412_v59 = vpack.c.bf16 %v380_v51, %v380_v51  ;;  %v384_v19 = vmax.f32 %v352_v5, 0.0  ;;  %v13387_v29 = vadd.f32 %v13337_v34, %v314_v61  ;;  %v12998_v61 = vld [vmem:[%s15847_s3 + $0x18] sm:$0xff]  }
  0x1d   : > { %11452 = vmatprep.subr.bf16.mxu0 %v12982_v18  ;;  %v413_v60 = vpack.c.bf16 %v381_v52, %v381_v52  ;;  %v414_v1 = vpack.c.bf16 %v382_v54, %v382_v54  ;;  %v13402_v38 = vadd.f32 %v13337_v34, %v315_v27 }
  0x1e   : > { %v444_v7 = vshrl.u32 %v411_v58, 16  ;;  %v447_v8 = vshll.u32 %v411_v58, 16  ;;  %v451_v9 = vshrl.u32 %v412_v59, 16  ;;  %v454_v11 = vshll.u32 %v412_v59, 16 }
  0x1f   : > { %10829 = vmatpush3.bf16.msra.mxu1 %v12981_v17  ;;  %v458_v12 = vshrl.u32 %v413_v60, 16  ;;  %v461_v13 = vshll.u32 %v413_v60, 16  ;;  %v465_v14 = vshrl.u32 %v414_v1, 16  ;;  %v468_v15 = vshll.u32 %v414_v1, 16 }
  0x20   : > { %10830 = vmatprep.subr.bf16.mxu1 %v12983_v21  ;;  %11453 = vmatpush3.bf16.msra.mxu0 %v12982_v18  ;;  %v446_v16 = vrot.slane %v444_v7, 7  ;;  %v453_v17 = vrot.slane %v451_v9, 7  ;;  %v383_v18 = vmax.f32 %v351_v4, 0.0  ;;  %v385_v39 = vmax.f32 %v13387_v29, 0.0 }
  0x21   : > { %11454 = vmatprep.subr.bf16.mxu0 %v12984_v23  ;;  %v460_v20 = vrot.slane %v458_v12, 7  ;;  %v316_v29 = vmul.f32 %v10016_v6, %v13329_v28 }
  0x22   : > { %v449_v30 = vor.u32 %v447_v8, %v446_v16  ;;  %v456_v31 = vor.u32 %v454_v11, %v453_v17 }
  0x23   : > { %10831 = vmatpush3.bf16.msra.mxu1 %v12983_v21  ;;  %v463_v36 = vor.u32 %v461_v13, %v460_v20  ;;  %v13001_v20 = vld [vmem:[%s15847_s3 + $0x20] sm:$0xff]  }
  0x24   : > { %10832 = vmatprep.subr.bf16.mxu1 %v12985_v33  ;;  %11455 = vmatpush3.bf16.msra.mxu0 %v12984_v23  ;;  %v467_v23 = vrot.slane %v465_v14, 7  ;;  %v702_v41 = vsel %vm13378_vm7, 0, %v449_v30  ;;  %v703_v42 = vsel %vm13378_vm7, 0, %v456_v31 }
  0x25   : > { %11456 = vmatprep.subr.bf16.mxu0 %v12986_v35  ;;  %v704_v45 = vsel %vm13378_vm7, 0, %v463_v36  ;;  %v13419_v46 = vsel %vm13391_vm8, %v702_v41, 0  ;;  %v13423_v47 = vsel %vm13391_vm8, %v703_v42, 0 }
  0x26   : > { %v470_v37 = vor.u32 %v468_v15, %v467_v23  ;;  %16047 = vst [vmem:[#allocation4_spill] sm:$0xff] %v13419_v46  ;;  %16048 = vst [vmem:[#allocation5_spill] sm:$0xff] %v13423_v47  ;;  %v13433_v50 = vcombine.low %v13419_v46, %v13419_v46  ;;  %v13437_v51 = vcombine.high %v13419_v46, %v13419_v46 }
  0x27   : > { %10833 = vmatpush3.bf16.msra.mxu1 %v12985_v33  ;;  %v13396_v33 = vpack.c.bf16 %v383_v18, %v383_v18  ;;  %v13441_v52 = vcombine.low %v13423_v47, %v13423_v47  ;;  %v13445_v53 = vcombine.high %v13423_v47, %v13423_v47 }
  0x28   : > { %10834 = vmatprep.subr.bf16.mxu1 %v12987_v44  ;;  %11457 = vmatpush3.bf16.msra.mxu0 %v12986_v35  ;;  %v13398_v35 = vpack.c.bf16 %v384_v19, %v384_v19  ;;  %v705_v48 = vsel %vm13378_vm7, 0, %v470_v37  ;;  %v913_v57 = vshrl.u32 %v13433_v50, 16  ;;  %v916_v58 = vshll.u32 %v13433_v50, 16 }
  0x29   : > { %11458 = vmatprep.subr.bf16.mxu0 %v12988_v49  ;;  %v472_v43 = vshrl.u32 %v13396_v33, 16  ;;  %v13457_v56 = vsel %vm13391_vm8, %v705_v48, 0  ;;  %v922_v59 = vshll.u32 %v13437_v51, 16  ;;  %v927_v60 = vshrl.u32 %v13441_v52, 16 }
  0x2a   : > { %16050 = vst [vmem:[#allocation7_spill] sm:$0xff] %v13457_v56  ;;  %v936_v1 = vshll.u32 %v13445_v53, 16  ;;  %v915_v7 = vrot.slane %v913_v57, 4  ;;  %v918_v8 = vrot.slane %v916_v58, 5  ;;  %v13474_v18 = vcombine.low %v13457_v56, %v13457_v56 }
  0x2b   : > { %10835 = vmatpush3.bf16.msra.mxu1 %v12987_v44  ;;  %v475_v44 = vshll.u32 %v13396_v33, 16  ;;  %v924_v9 = vrot.slane %v922_v59, 5  ;;  %v929_v11 = vrot.slane %v927_v60, 4  ;;  %v13478_v19 = vcombine.high %v13457_v56, %v13457_v56 }
  0x2c   : > { %11459 = vmatpush3.bf16.msra.mxu0 %v12988_v49  ;;  %10868 = vmatprep.subr.bf16.mxu1 %v12989_v63  ;;  %v13429_v49 = vsel %vm13391_vm8, %v704_v45, 0  ;;  %v938_v13 = vrot.slane %v936_v1, 5  ;;  %v919_v16 = vor.u32 %v918_v8, %v915_v7  ;;  %v474_v27 = vrot.slane %v472_v43, 7 }
  0x2d   : > { %11492 = vmatprep.subr.bf16.mxu0 %v13371_v0  ;;  %16049 = vst [vmem:[#allocation6_spill] sm:$0xff] %v13429_v49  ;;  %v13449_v54 = vcombine.low %v13429_v49, %v13429_v49  ;;  %v13453_v55 = vcombine.high %v13429_v49, %v13429_v49  ;;  %v479_v30 = vshrl.u32 %v13398_v35, 16  ;;  %v955_v36 = vshrl.u32 %v13474_v18, 16 }
  0x2e   : > { %10837 = vmatmul.mubr.bf16.vlgmr.msra.gmra.mrb[0].mxu1 %v13322_v25  ;;  %v920_v31 = vrot.slane %v919_v16, 4  ;;  %v958_v37 = vshll.u32 %v13474_v18, 16  ;;  %v477_v45 = vor.u32 %v475_v44, %v474_v27  ;;  %v482_v7 = vshll.u32 %v13398_v35, 16 }
  0x2f   : > { %10869 = vmatpush3.bf16.msra.mxu1 %v12989_v63  ;;  %10840 = vmatprep.mubr.bf16.mxu1 %v13322_v25  ;;  %v930_v63 = vshll.u32 %v13441_v52, 16  ;;  %v941_v4 = vshrl.u32 %v13449_v54, 16  ;;  %v944_v5 = vshll.u32 %v13449_v54, 16  ;;  %v950_v17 = vshll.u32 %v13453_v55, 16 }
  0x30   : > { %10870 = vmatprep.subr.bf16.mxu1 %v12992_v26  ;;  %v925_v48 = vsel %vm13309_vm2, %v920_v31, %v924_v9  ;;  %v957_v57 = vrot.slane %v955_v36, 4  ;;  %v960_v58 = vrot.slane %v958_v37, 5  ;;  %v481_v43 = vrot.slane %v479_v30, 7 }
  0x31   : > { %v932_v12 = vrot.slane %v930_v63, 5  ;;  %v943_v14 = vrot.slane %v941_v4, 4  ;;  %v946_v15 = vrot.slane %v944_v5, 5  ;;  %v952_v33 = vrot.slane %v950_v17, 5  ;;  %v13005_v17 = vld [vmem:[%s15847_s3 + $0x30] sm:$0xff]  }
  0x32   : > { %v13494_v63 = vcombine.low %v13318_v24, %v925_v48  ;;  %v961_v5 = vor.u32 %v960_v58, %v957_v57  ;;  %v706_v8 = vsel %vm13378_vm7, 0, %v477_v45  ;;  %v386_v9 = vmax.f32 %v13402_v38, 0.0 }
  0x33   : > { %10871 = vmatpush3.bf16.msra.mxu1 %v12992_v26  ;;  %v933_v23 = vor.u32 %v932_v12, %v929_v11  ;;  %v947_v26 = vor.u32 %v946_v15, %v943_v14  ;;  %v417_v11 = vpack.c.bf16 %v385_v39, %v385_v39  ;;  %v10017_v12 = vunpack.c.h.bf16 %v13363_v62 }
  0x34   : > { %10872 = vmatprep.subr.bf16.mxu1 %v12995_v40  ;;  %16051 = vst [vmem:[#allocation8_spill] sm:$0xff] %v13494_v63  ;;  %v962_v35 = vrot.slane %v961_v5, 4  ;;  %v13515_v14 = vsel %vm13391_vm8, %v706_v8, 0  ;;  %v418_v15 = vpack.c.bf16 %v386_v9, %v386_v9 }
  0x35   : > { %v934_v41 = vrot.slane %v933_v23, 4  ;;  %v948_v42 = vrot.slane %v947_v26, 4  ;;  %16054 = vst [vmem:[#allocation11_spill] sm:$0xff] %v13515_v14  ;;  %v13523_v38 = vcombine.low %v13515_v14, %v13515_v14  ;;  %v13527_v39 = vcombine.high %v13515_v14, %v13515_v14 }
  0x36   : > { %10841 = vmatmul.mubr.bf16.gmra.mrb[4].mxu1 %v13322_v25  ;;  %v486_v16 = vshrl.u32 %v417_v11, 16  ;;  %v489_v6 = vshll.u32 %v417_v11, 16  ;;  %v317_v26 = vmul.f32 %v10017_v12, %v13329_v28  ;;  %v493_v57 = vshrl.u32 %v418_v15, 16  ;;  %v13570_v11 = vld [vmem:[%s13304_s21 + $0x28] sm:$0xff]  }
  0x37   : > { %10873 = vmatpush3.bf16.msra.mxu1 %v12995_v40  ;;  %v964_v40 = vshll.u32 %v13478_v19, 16  ;;  %v939_v59 = vsel %vm13309_vm2, %v934_v41, %v938_v13  ;;  %v953_v60 = vsel %vm13309_vm2, %v948_v42, %v952_v33  ;;  %10844 = vmatprep.mubr.bf16.mxu1 %v13494_v63  ;;  %v484_v13 = vor.u32 %v482_v7, %v481_v43  ;;  %v13007_v43 = vld [vmem:[%s15847_s3 + $0x38] sm:$0xff]  }
  0x38   : > { %10874 = vmatprep.subr.bf16.mxu1 %v12998_v61  ;;  %v13496_v4 = vcombine.low %v939_v59, %v953_v60  ;;  %v13498_v44 = vcombine.low %v925_v48, %v939_v59  ;;  %v969_v31 = vshrl.u32 %v13523_v38, 16  ;;  %v972_v33 = vshll.u32 %v13523_v38, 16  ;;  %v12993_v48 = vld [vmem:[%s15847_s3 + $0x390] sm:$0xff]  }
  0x39   : > { %v966_v1 = vrot.slane %v964_v40, 5  ;;  %v707_v62 = vsel %vm13378_vm7, 0, %v484_v13  ;;  %v978_v41 = vshll.u32 %v13527_v39, 16  ;;  %v488_v42 = vrot.slane %v486_v16, 7 }
  0x3a   : > { %16052 = vst [vmem:[#allocation9_spill] sm:$0xff] %v13496_v4  ;;  %16053 = vst [vmem:[#allocation10_spill] sm:$0xff] %v13498_v44  ;;  %11460 = vmatprep.mubr.bf16.mxu0 %v13498_v44  ;;  %v13544_v30 = vsel %vm13391_vm8, %v707_v62, 0  ;;  %v971_v40 = vrot.slane %v969_v31, 4  ;;  %v974_v45 = vrot.slane %v972_v33, 5  ;;  %v496_v58 = vshll.u32 %v418_v15, 16 }
  0x3b   : > { %10875 = vmatpush3.bf16.msra.mxu1 %v12998_v61  ;;  %v13003_v61 = vld [vmem:[%s15847_s3 + $0x28] sm:$0xff]   ;;  %v967_v23 = vsel %vm13309_vm2, %v962_v35, %v966_v1  ;;  %16056 = vst [vmem:[#allocation13_spill] sm:$0xff] %v13544_v30  ;;  %v13550_v36 = vcombine.low %v13544_v30, %v13544_v30  ;;  %v13554_v37 = vcombine.high %v13544_v30, %v13544_v30  ;;  %v980_v59 = vrot.slane %v978_v41, 5  ;;  %v12994_v31 = vld [vmem:[%s15847_s3 + $0x398] sm:$0xff]  }
  0x3c   : > { %10876 = vmatprep.subr.bf16.mxu1 %v13001_v20  ;;  %v13537_v27 = vcombine.low %v953_v60, %v967_v23  ;;  %v975_v7 = vor.u32 %v974_v45, %v971_v40  ;;  %v491_v8 = vor.u32 %v489_v6, %v488_v42  ;;  %v495_v9 = vrot.slane %v493_v57, 7  ;;  %v13009_v45 = vld [vmem:[%s15847_s3 + $0x80] sm:$0xff]  }
  0x3d   : > { %v983_v60 = vshrl.u32 %v13550_v36, 16  ;;  %v986_v1 = vshll.u32 %v13550_v36, 16  ;;  %v992_v5 = vshll.u32 %v13554_v37, 16 }
  0x3e   : > { %10845 = vmatmul.mubr.bf16.gmra.mrb[8].mxu1 %v13496_v4  ;;  %16055 = vst [vmem:[#allocation12_spill] sm:$0xff] %v13537_v27  ;;  %11461 = vmatmul.mubr.bf16.vlgmr.msra.gmra.mrb[0].mxu0 %v13537_v27  ;;  %v976_v15 = vrot.slane %v975_v7, 4  ;;  %v498_v16 = vor.u32 %v496_v58, %v495_v9  ;;  %v708_v62 = vsel %vm13378_vm7, 0, %v491_v8 }
  0x3f   : > { %10877 = vmatpush3.bf16.msra.mxu1 %v13001_v20  ;;  %v12991_v20 = vld [vmem:[%s15847_s3 + $0x388] sm:$0xff]   ;;  %11493 = vmatpush3.bf16.msra.mxu0 %v13371_v0  ;;  %v985_v12 = vrot.slane %v983_v60, 4  ;;  %v988_v35 = vrot.slane %v986_v1, 5  ;;  %v994_v13 = vrot.slane %v992_v5, 5  ;;  %v356_v0 = vadd.f32 %v13337_v34, %v317_v26 }
  0x40   : > { %10878 = vmatprep.subr.bf16.mxu1 %v13003_v61  ;;  %11494 = vmatprep.subr.bf16.mxu0 %v12991_v20  ;;  %v13580_v33 = vsel %vm13391_vm8, %v708_v62, 0  ;;  %v10020_v26 = vunpack.c.l.bf16 %v13570_v11  ;;  %v981_v42 = vsel %vm13309_vm2, %v976_v15, %v980_v59  ;;  %v709_v40 = vsel %vm13378_vm7, 0, %v498_v16 }
  0x41   : > { %16057 = vst [vmem:[#allocation14_spill] sm:$0xff] %v13580_v33  ;;  %v388_v41 = vmax.f32 %v356_v0, 0.0  ;;  %v13598_v58 = vcombine.low %v967_v23, %v981_v42  ;;  %v13602_v59 = vsel %vm13391_vm8, %v709_v40, 0 }
  0x42   : > { %16059 = vst [vmem:[#allocation16_spill] sm:$0xff] %v13602_v59  ;;  %v13609_v8 = vcombine.low %v13602_v59, %v13602_v59  ;;  %v13615_v9 = vcombine.high %v13602_v59, %v13602_v59 }
  0x43   : > { %10879 = vmatpush3.bf16.msra.mxu1 %v13003_v61  ;;  %v355_v61 = vadd.f32 %v13337_v34, %v316_v29  ;;  %11495 = vmatpush3.bf16.msra.mxu0 %v12991_v20  ;;  %v989_v29 = vor.u32 %v988_v35, %v985_v12  ;;  %v13593_v20 = vcombine.high %v13580_v33, %v13580_v33 }
  0x44   : > { %10880 = vmatprep.subr.bf16.mxu1 %v13005_v17  ;;  %11496 = vmatprep.subr.bf16.mxu0 %v12993_v48  ;;  %16058 = vst [vmem:[#allocation15_spill] sm:$0xff] %v13598_v58  ;;  %v2418_v62 = vshll.u32 %v13615_v9, 16 }
  0x45   : > { %v387_v6 = vmax.f32 %v355_v61, 0.0  ;;  %v990_v57 = vrot.slane %v989_v29, 4  ;;  %v1006_v7 = vshll.u32 %v13593_v20, 16  ;;  %v420_v61 = vpack.c.bf16 %v388_v41, %v388_v41  ;;  %10848 = vmatprep.mubr.bf16.mxu1 %v13598_v58 }
  0x47   : > { %10881 = vmatpush3.bf16.msra.mxu1 %v13005_v17  ;;  %v13589_v17 = vcombine.low %v13580_v33, %v13580_v33  ;;  %v419_v60 = vpack.c.bf16 %v387_v6, %v387_v6  ;;  %v995_v23 = vsel %vm13309_vm2, %v990_v57, %v994_v13  ;;  %11497 = vmatpush3.bf16.msra.mxu0 %v12993_v48  ;;  %v1008_v16 = vrot.slane %v1006_v7, 5  ;;  %v13628_v57 = vld [vmem:[%s13304_s21 + $0x30] sm:$0xff]  }
  0x48   : > { %10882 = vmatprep.subr.bf16.mxu1 %v13007_v43  ;;  %v13618_v35 = vcombine.low %v981_v42, %v995_v23  ;;  %11498 = vmatprep.subr.bf16.mxu0 %v12994_v31  ;;  %v2409_v13 = vshrl.u32 %v13609_v8, 16  ;;  %v2412_v48 = vshll.u32 %v13609_v8, 16  ;;  %v507_v42 = vshrl.u32 %v420_v61, 16 }
  0x49   : > { %v997_v1 = vshrl.u32 %v13589_v17, 16  ;;  %v1000_v5 = vshll.u32 %v13589_v17, 16  ;;  %v500_v12 = vshrl.u32 %v419_v60, 16  ;;  %v503_v41 = vshll.u32 %v419_v60, 16 }
  0x4a   : > { %16060 = vst [vmem:[#allocation17_spill] sm:$0xff] %v13618_v35  ;;  %11464 = vmatprep.mubr.bf16.mxu0 %v13618_v35  ;;  %v510_v40 = vshll.u32 %v420_v61, 16  ;;  %v2420_v7 = vrot.slane %v2418_v62, 5  ;;  %v509_v27 = vrot.slane %v507_v42, 7  ;;  %v318_v60 = vmul.f32 %v10020_v26, %v13329_v28 }
  0x4b   : > { %10883 = vmatpush3.bf16.msra.mxu1 %v13007_v43  ;;  %v999_v0 = vrot.slane %v997_v1, 4  ;;  %v1002_v15 = vrot.slane %v1000_v5, 5  ;;  %v12996_v43 = vld [vmem:[%s15847_s3 + $0x3a0] sm:$0xff]   ;;  %v502_v6 = vrot.slane %v500_v12, 7  ;;  %v2411_v1 = vrot.slane %v2409_v13, 4  ;;  %11499 = vmatpush3.bf16.msra.mxu0 %v12994_v31 }
  0x4c   : > { %10916 = vmatprep.subr.bf16.mxu1 %v13009_v45  ;;  %v2414_v5 = vrot.slane %v2412_v48, 5  ;;  %v10021_v45 = vunpack.c.h.bf16 %v13570_v11  ;;  %11500 = vmatprep.subr.bf16.mxu0 %v12996_v43  ;;  %v10025_v13 = vunpack.c.h.bf16 %v13628_v57  ;;  %v512_v31 = vor.u32 %v510_v40, %v509_v27 }
  0x4d   : > { %v1003_v29 = vor.u32 %v1002_v15, %v999_v0  ;;  %v505_v12 = vor.u32 %v503_v41, %v502_v6  ;;  %v10024_v15 = vunpack.c.l.bf16 %v13628_v57  ;;  %v357_v62 = vadd.f32 %v13337_v34, %v318_v60 }
  0x4e   : > { %v2415_v0 = vor.u32 %v2414_v5, %v2411_v1  ;;  %v319_v61 = vmul.f32 %v10021_v45, %v13329_v28  ;;  %v711_v42 = vsel %vm13378_vm7, 0, %v512_v31 }
  0x4f   : > { %v1004_v63 = vrot.slane %v1003_v29, 4  ;;  %v710_v48 = vsel %vm13378_vm7, 0, %v505_v12  ;;  %11501 = vmatpush3.bf16.msra.mxu0 %v12996_v43  ;;  %v13669_v40 = vsel %vm13391_vm8, %v711_v42, 0  ;;  %v320_v1 = vmul.f32 %v10024_v15, %v13329_v28  ;;  %v10148_v15 = vld [vmem:[%s13304_s21 + $0x38] sm:$0xff]  }
  0x50   : > { %v2416_v29 = vrot.slane %v2415_v0, 4  ;;  %v13647_v26 = vsel %vm13391_vm8, %v710_v48, 0  ;;  %v358_v41 = vadd.f32 %v13337_v34, %v319_v61  ;;  %11502 = vmatprep.subr.bf16.mxu0 %v12997_v2  ;;  %16064 = vst [vmem:[#allocation21_spill] sm:$0xff] %v13669_v40  ;;  %v13678_v45 = vcombine.low %v13669_v40, %v13669_v40 }
  0x51   : > { %v1009_v11 = vsel %vm13309_vm2, %v1004_v63, %v1008_v16  ;;  %16062 = vst [vmem:[#allocation19_spill] sm:$0xff] %v13647_v26  ;;  %v13654_v63 = vcombine.low %v13647_v26, %v13647_v26  ;;  %v13658_v27 = vcombine.high %v13647_v26, %v13647_v26  ;;  %v12999_v16 = vld [vmem:[%s15847_s3 + $0x3b0] sm:$0xff]   ;;  %v359_v10 = vadd.f32 %v13337_v34, %v320_v1 }
  0x52   : > { %v13643_v6 = vcombine.low %v995_v23, %v1009_v11  ;;  %v389_v23 = vmax.f32 %v357_v62, 0.0  ;;  %v13665_v43 = vsel %vm13309_vm2, %v2416_v29, %v2420_v7  ;;  %v390_v57 = vmax.f32 %v358_v41, 0.0 }
  0x53   : > { %16063 = vst [vmem:[#allocation20_spill] sm:$0xff] %v13665_v43  ;;  %v13674_v5 = vcombine.low %v1009_v11, %v13665_v43  ;;  %v13682_v7 = vcombine.high %v13669_v40, %v13669_v40  ;;  %v1011_v12 = vshrl.u32 %v13654_v63, 16  ;;  %v1014_v60 = vshll.u32 %v13654_v63, 16  ;;  %11503 = vmatpush3.bf16.msra.mxu0 %v12997_v2  ;;  %v13000_v11 = vld [vmem:[%s15847_s3 + $0x3b8] sm:$0xff]  }
  0x54   : > { %16061 = vst [vmem:[#allocation18_spill] sm:$0xff] %v13643_v6  ;;  %10849 = vmatmul.mubr.bf16.gmra.mrb[12].mxu1 %v13643_v6  ;;  %v1020_v0 = vshll.u32 %v13658_v27, 16  ;;  %v421_v61 = vpack.c.bf16 %v389_v23, %v389_v23  ;;  %v422_v31 = vpack.c.bf16 %v390_v57, %v390_v57  ;;  %v1025_v62 = vshrl.u32 %v13678_v45, 16  ;;  %11504 = vmatprep.subr.bf16.mxu0 %v12999_v16 }
  0x55   : > { %16065 = vst [vmem:[#allocation22_spill] sm:$0xff] %v13674_v5  ;;  %11465 = vmatmul.mubr.bf16.gmra.mrb[4].mxu0 %v13674_v5  ;;  %v1013_v48 = vrot.slane %v1011_v12, 4  ;;  %v1028_v29 = vshll.u32 %v13678_v45, 16  ;;  %v1034_v41 = vshll.u32 %v13682_v7, 16  ;;  %v1016_v42 = vrot.slane %v1014_v60, 5  ;;  %v13700_v60 = vld [vmem:[%s15847_s3 + $0x3c0] sm:$0xff]  }
  0x56   : > { %v1022_v35 = vrot.slane %v1020_v0, 5  ;;  %v514_v23 = vshrl.u32 %v421_v61, 16  ;;  %v517_v57 = vshll.u32 %v421_v61, 16  ;;  %v1027_v2 = vrot.slane %v1025_v62, 4 }
  0x57   : > { %v1030_v44 = vrot.slane %v1028_v29, 5  ;;  %v1036_v25 = vrot.slane %v1034_v41, 5  ;;  %v521_v43 = vshrl.u32 %v422_v31, 16  ;;  %v1017_v6 = vor.u32 %v1016_v42, %v1013_v48  ;;  %11505 = vmatpush3.bf16.msra.mxu0 %v12999_v16 }
  0x58   : > { %v516_v58 = vrot.slane %v514_v23, 7  ;;  %v524_v4 = vshll.u32 %v422_v31, 16  ;;  %v321_v12 = vmul.f32 %v10025_v13, %v13329_v28  ;;  %v10028_v40 = vunpack.c.l.bf16 %v10148_v15  ;;  %11506 = vmatprep.subr.bf16.mxu0 %v13000_v11 }
  0x59   : > { %v1031_v5 = vor.u32 %v1030_v44, %v1027_v2  ;;  %v523_v59 = vrot.slane %v521_v43, 7  ;;  %v1018_v0 = vrot.slane %v1017_v6, 4  ;;  %v10029_v62 = vunpack.c.h.bf16 %v10148_v15 }
  0x5a   : > { %v519_v61 = vor.u32 %v517_v57, %v516_v58  ;;  %v360_v48 = vadd.f32 %v13337_v34, %v321_v12  ;;  %v391_v13 = vmax.f32 %v359_v10, 0.0  ;;  %v322_v44 = vmul.f32 %v10028_v40, %v13329_v28 }
  0x5b   : > { %v1032_v31 = vrot.slane %v1031_v5, 4  ;;  %v526_v29 = vor.u32 %v524_v4, %v523_v59  ;;  %v1023_v16 = vsel %vm13309_vm2, %v1018_v0, %v1022_v35  ;;  %v323_v41 = vmul.f32 %v10029_v62, %v13329_v28  ;;  %11507 = vmatpush3.bf16.msra.mxu0 %v13000_v11 }
  0x5c   : > { %v712_v43 = vsel %vm13378_vm7, 0, %v519_v61  ;;  %v392_v1 = vmax.f32 %v360_v48, 0.0  ;;  %v423_v4 = vpack.c.bf16 %v391_v13, %v391_v13  ;;  %11540 = vmatprep.subr.bf16.mxu0 %v13700_v60  ;;  %v361_v26 = vadd.f32 %v13337_v34, %v322_v44 }
  0x5d   : > { %v1037_v58 = vsel %vm13309_vm2, %v1032_v31, %v1036_v25  ;;  %v713_v6 = vsel %vm13378_vm7, 0, %v526_v29  ;;  %v13715_v10 = vsel %vm13391_vm8, %v712_v43, 0 }
  0x5e   : > { %16066 = vst [vmem:[#allocation23_spill] sm:$0xff] %v13715_v10  ;;  %v13718_v59 = vcombine.low %v1023_v16, %v1037_v58  ;;  %v13722_v35 = vsel %vm13391_vm8, %v713_v6, 0  ;;  %v13726_v28 = vcombine.low %v13715_v10, %v13715_v10  ;;  %v13730_v25 = vcombine.high %v13715_v10, %v13715_v10 }
  0x5f   : > { %16068 = vst [vmem:[#allocation25_spill] sm:$0xff] %v13722_v35  ;;  %v13734_v40 = vcombine.low %v13722_v35, %v13722_v35  ;;  %v13738_v5 = vcombine.high %v13722_v35, %v13722_v35  ;;  %v424_v15 = vpack.c.bf16 %v392_v1, %v392_v1  ;;  %v528_v11 = vshrl.u32 %v423_v4, 16 }
  0x60   : > { %16067 = vst [vmem:[#allocation24_spill] sm:$0xff] %v13718_v59  ;;  %11468 = vmatprep.mubr.bf16.mxu0 %v13718_v59  ;;  %v1039_v42 = vshrl.u32 %v13726_v28, 16  ;;  %v1042_v23 = vshll.u32 %v13726_v28, 16  ;;  %v1048_v57 = vshll.u32 %v13730_v25, 16  ;;  %v531_v2 = vshll.u32 %v423_v4, 16 }
  0x61   : > { %v1053_v12 = vshrl.u32 %v13734_v40, 16  ;;  %v1056_v0 = vshll.u32 %v13734_v40, 16  ;;  %v1062_v61 = vshll.u32 %v13738_v5, 16  ;;  %v530_v48 = vrot.slane %v528_v11, 7 }
  0x62   : > { %v1041_v62 = vrot.slane %v1039_v42, 4  ;;  %v1044_v31 = vrot.slane %v1042_v23, 5  ;;  %v1050_v29 = vrot.slane %v1048_v57, 5  ;;  %v535_v13 = vshrl.u32 %v424_v15, 16 }
  0x63   : > { %v1055_v43 = vrot.slane %v1053_v12, 4  ;;  %v1058_v1 = vrot.slane %v1056_v0, 5  ;;  %v1064_v6 = vrot.slane %v1062_v61, 5  ;;  %v533_v59 = vor.u32 %v531_v2, %v530_v48 }
  0x64   : > { %v1045_v35 = vor.u32 %v1044_v31, %v1041_v62  ;;  %v537_v10 = vrot.slane %v535_v13, 7  ;;  %v538_v4 = vshll.u32 %v424_v15, 16  ;;  %v362_v11 = vadd.f32 %v13337_v34, %v323_v41 }
  0x65   : > { %v1059_v30 = vor.u32 %v1058_v1, %v1055_v43  ;;  %v714_v33 = vsel %vm13378_vm7, 0, %v533_v59  ;;  %v13752_v42 = vcombine.low %v13318_v24, %v1023_v16  ;;  %v393_v12 = vmax.f32 %v361_v26, 0.0 }
  0x66   : > { %v1046_v23 = vrot.slane %v1045_v35, 4  ;;  %v540_v57 = vor.u32 %v538_v4, %v537_v10  ;;  %v13756_v2 = vsel %vm13391_vm8, %v714_v33, 0  ;;  %v394_v34 = vmax.f32 %v362_v11, 0.0 }
  0x67   : > { %16069 = vst [vmem:[#allocation26_spill] sm:$0xff] %v13752_v42  ;;  %16070 = vst [vmem:[#allocation27_spill] sm:$0xff] %v13756_v2  ;;  %v1060_v0 = vrot.slane %v1059_v30, 4  ;;  %v13760_v44 = vcombine.low %v13756_v2, %v13756_v2  ;;  %v13764_v59 = vcombine.high %v13756_v2, %v13756_v2  ;;  %10852 = vmatprep.mubr.bf16.mxu1 %v13752_v42  ;;  %v9191_v30 = vrot.slane %v13433_v50, 9 }
  0x68   : > { %v1051_v16 = vsel %vm13309_vm2, %v1046_v23, %v1050_v29  ;;  %v715_v33 = vsel %vm13378_vm7, 0, %v540_v57  ;;  %v425_v41 = vpack.c.bf16 %v393_v12, %v393_v12  ;;  %v426_v29 = vpack.c.bf16 %v394_v34, %v394_v34 }
  0x69   : > { %v1065_v26 = vsel %vm13309_vm2, %v1060_v0, %v1064_v6  ;;  %v13774_v10 = vcombine.low %v1037_v58, %v1051_v16  ;;  %v13778_v35 = vsel %vm13391_vm8, %v715_v33, 0  ;;  %v1067_v15 = vshrl.u32 %v13760_v44, 16 }
  0x6a   : > { %16072 = vst [vmem:[#allocation29_spill] sm:$0xff] %v13778_v35  ;;  %v13781_v61 = vcombine.low %v1051_v16, %v1065_v26  ;;  %v13785_v48 = vcombine.low %v13778_v35, %v13778_v35  ;;  %v13789_v50 = vcombine.high %v13778_v35, %v13778_v35  ;;  %v1070_v62 = vshll.u32 %v13760_v44, 16 }
  0x6b   : > { %16071 = vst [vmem:[#allocation28_spill] sm:$0xff] %v13774_v10  ;;  %v1069_v58 = vrot.slane %v1067_v15, 4  ;;  %v1076_v31 = vshll.u32 %v13764_v59, 16  ;;  %v542_v13 = vshrl.u32 %v425_v41, 16  ;;  %10853 = vmatmul.mubr.bf16.gmra.mrb[16].mxu1 %v13774_v10  ;;  %v545_v57 = vshll.u32 %v425_v41, 16 }
  0x6c   : > { %16073 = vst [vmem:[#allocation30_spill] sm:$0xff] %v13781_v61  ;;  %11469 = vmatmul.mubr.bf16.gmra.mrb[8].mxu0 %v13781_v61  ;;  %v1072_v43 = vrot.slane %v1070_v62, 5  ;;  %v1081_v1 = vshrl.u32 %v13785_v48, 16  ;;  %v1084_v6 = vshll.u32 %v13785_v48, 16  ;;  %v1090_v4 = vshll.u32 %v13789_v50, 16 }
  0x6d   : > { %v1078_v11 = vrot.slane %v1076_v31, 5  ;;  %v544_v23 = vrot.slane %v542_v13, 7  ;;  %v549_v12 = vshrl.u32 %v426_v29, 16  ;;  %v552_v61 = vshll.u32 %v426_v29, 16 }
  0x6e   : > { %v1073_v0 = vor.u32 %v1072_v43, %v1069_v58  ;;  %v1083_v16 = vrot.slane %v1081_v1, 4  ;;  %v1086_v33 = vrot.slane %v1084_v6, 5  ;;  %v1092_v34 = vrot.slane %v1090_v4, 5 }
  0x6f   : > { %v547_v62 = vor.u32 %v545_v57, %v544_v23  ;;  %v551_v42 = vrot.slane %v549_v12, 7  ;;  %v1723_v10 = vrot.slane %v13437_v51, 5  ;;  %v9192_v41 = vrot.slane %v13441_v52, 9 }
  0x70   : > { %v1074_v35 = vrot.slane %v1073_v0, 4  ;;  %v1087_v31 = vor.u32 %v1086_v33, %v1083_v16  ;;  %v1727_v58 = vrot.slane %v13445_v53, 5  ;;  %v9193_v6 = vrot.slane %v13449_v54, 9 }
  0x71   : > { %v554_v13 = vor.u32 %v552_v61, %v551_v42  ;;  %v716_v43 = vsel %vm13378_vm7, 0, %v547_v62  ;;  %v13811_v1 = vsel %vm13800_vm11, %v9191_v30, %v1723_v10  ;;  %v9194_v61 = vrot.slane %v13474_v18, 9 }
  0x72   : > { %16076 = vst [vmem:[#allocation31_spill] sm:$0xff] %v13811_v1  ;;  %v1079_v29 = vsel %vm13309_vm2, %v1074_v35, %v1078_v11  ;;  %v1088_v51 = vrot.slane %v1087_v31, 4  ;;  %v13818_v4 = vsel %vm13391_vm8, %v716_v43, 0  ;;  %v1728_v52 = vsel %vm13800_vm11, %v9192_v41, %v1727_v58 }
  0x73   : > { %16077 = vst [vmem:[#allocation32_spill] sm:$0xff] %v13818_v4  ;;  %v13822_v53 = vcombine.low %v1065_v26, %v1079_v29  ;;  %v717_v42 = vsel %vm13378_vm7, 0, %v554_v13  ;;  %v13828_v30 = vcombine.low %v13818_v4, %v13818_v4  ;;  %v13832_v54 = vcombine.high %v13818_v4, %v13818_v4 }
  0x74   : > { %v1093_v10 = vsel %vm13309_vm2, %v1088_v51, %v1092_v34  ;;  %v13838_v35 = vsel %vm13391_vm8, %v717_v42, 0  ;;  %v1731_v26 = vrot.slane %v13453_v55, 5  ;;  %v1735_v18 = vrot.slane %v13478_v19, 5 }
  0x75   : > { %16078 = vst [vmem:[#allocation33_spill] sm:$0xff] %v13822_v53  ;;  %16079 = vst [vmem:[#allocation34_spill] sm:$0xff] %v13838_v35  ;;  %v13842_v11 = vcombine.low %v1079_v29, %v1093_v10  ;;  %v1095_v23 = vshrl.u32 %v13828_v30, 16  ;;  %v1098_v57 = vshll.u32 %v13828_v30, 16  ;;  %v1104_v12 = vshll.u32 %v13832_v54, 16  ;;  %10856 = vmatprep.mubr.bf16.mxu1 %v13822_v53 }
  0x76   : > { %v13850_v0 = vcombine.low %v13838_v35, %v13838_v35  ;;  %v13854_v16 = vcombine.high %v13838_v35, %v13838_v35  ;;  %v1732_v55 = vsel %vm13800_vm11, %v9193_v6, %v1731_v26  ;;  %v1736_v43 = vsel %vm13800_vm11, %v9194_v61, %v1735_v18 }
  0x77   : > { %16080 = vst [vmem:[#allocation35_spill] sm:$0xff] %v13842_v11  ;;  %11472 = vmatprep.mubr.bf16.mxu0 %v13842_v11  ;;  %v1097_v33 = vrot.slane %v1095_v23, 4  ;;  %v1100_v34 = vrot.slane %v1098_v57, 5  ;;  %v1106_v62 = vrot.slane %v1104_v12, 5  ;;  %v13860_v31 = vcombine.low %v1728_v52, %v1732_v55  ;;  %v10149_v12 = vld [vmem:[%s13304_s21 + $0x40] sm:$0xff]  }
  0x78   : > { %v2423_v41 = vshrl.u32 %v13850_v0, 16  ;;  %v2426_v58 = vshll.u32 %v13850_v0, 16  ;;  %v2432_v13 = vshll.u32 %v13854_v16, 16  ;;  %v13868_v19 = vcombine.low %v13811_v1, %v1728_v52 }
  0x79   : > { %16081 = vst [vmem:[#allocation36_spill] sm:$0xff] %v13860_v31  ;;  %v1101_v6 = vor.u32 %v1100_v34, %v1097_v33  ;;  %v13870_v29 = vcombine.low %v1732_v55, %v1736_v43  ;;  %v9195_v51 = vrot.slane %v13523_v38, 9  ;;  %v1739_v57 = vrot.slane %v13527_v39, 5 }
  0x7a   : > { %16082 = vst [vmem:[#allocation37_spill] sm:$0xff] %v13868_v19  ;;  %v2425_v42 = vrot.slane %v2423_v41, 4  ;;  %v2428_v26 = vrot.slane %v2426_v58, 5  ;;  %v2434_v23 = vrot.slane %v2432_v13, 5  ;;  %v9196_v53 = vrot.slane %v13550_v36, 9 }
  0x7b   : > { %16083 = vst [vmem:[#allocation38_spill] sm:$0xff] %v13870_v29  ;;  %v1102_v11 = vrot.slane %v1101_v6, 4  ;;  %v1743_v61 = vrot.slane %v13554_v37, 5  ;;  %v9197_v18 = vrot.slane %v13589_v17, 9  ;;  %v1740_v55 = vsel %vm13800_vm11, %v9195_v51, %v1739_v57  ;;  %v10150_v37 = vld [vmem:[%s13304_s21 + $0x48] sm:$0xff]  }
  0x7c   : > { %v2429_v52 = vor.u32 %v2428_v26, %v2425_v42  ;;  %v1747_v38 = vrot.slane %v13593_v20, 5  ;;  %v9327_v33 = vrot.slane %v13609_v8, 9  ;;  %v13886_v41 = vcombine.low %v1736_v43, %v1740_v55  ;;  %v13917_v42 = vld [vmem:[%s15845_s1] ss:$0 sm:$0xff] }
  0x7d   : > { %v1107_v34 = vsel %vm13309_vm2, %v1102_v11, %v1106_v62  ;;  %v1744_v39 = vsel %vm13800_vm11, %v9196_v53, %v1743_v61  ;;  %v2737_v36 = vrot.slane %v13615_v9, 5  ;;  %v10032_v53 = vunpack.c.l.bf16 %v10149_v12 }
  0x7e   : > { %16084 = vst [vmem:[#allocation39_spill] sm:$0xff] %v13886_v41  ;;  %v13890_v17 = vcombine.low %v1093_v10, %v1107_v34  ;;  %v2430_v58 = vrot.slane %v2429_v52, 4  ;;  %v13892_v13 = vcombine.low %v1740_v55, %v1744_v39  ;;  %v1748_v20 = vsel %vm13800_vm11, %v9197_v18, %v1747_v38  ;;  %v10151_v52 = vld [vmem:[%s13304_s21 + $0x50] sm:$0xff]   ;;  %v13931_v55 = vld [vmem:[%s15846_s2] ss:$0 sm:$0xff] }
  0x7f   : > { %v13896_v8 = vcombine.low %v1744_v39, %v1748_v20  ;;  %v13900_v11 = vsel %vm13800_vm11, %v9327_v33, %v2737_v36  ;;  %v10033_v62 = vunpack.c.h.bf16 %v10149_v12  ;;  %v10036_v43 = vunpack.c.l.bf16 %v10150_v37 }
  0x80   : > { %16085 = vst [vmem:[#allocation40_spill] sm:$0xff] %v13890_v17  ;;  %16086 = vst [vmem:[#allocation41_spill] sm:$0xff] %v13892_v13  ;;  %v13904_v9 = vsel %vm13309_vm2, %v2430_v58, %v2434_v23  ;;  %10857 = vmatmul.mubr.bf16.gmra.mrb[20].mxu1 %v13890_v17  ;;  %v13908_v10 = vcombine.low %v1748_v20, %v13900_v11  ;;  %v9198_v6 = vrot.slane %v13654_v63, 9  ;;  %v1751_v57 = vrot.slane %v13658_v27, 5 }
  0x81   : > { %16087 = vst [vmem:[#allocation42_spill] sm:$0xff] %v13896_v8  ;;  %16088 = vst [vmem:[#allocation43_spill] sm:$0xff] %v13900_v11  ;;  %v13912_v51 = vcombine.low %v1107_v34, %v13904_v9  ;;  %v324_v26 = vmul.f32 %v13917_v42, %v10032_v53  ;;  %v325_v23 = vmul.f32 %v13917_v42, %v10033_v62  ;;  %v9199_v61 = vrot.slane %v13678_v45, 9 }
  0x82   : > { %16089 = vst [vmem:[#allocation44_spill] sm:$0xff] %v13904_v9  ;;  %16090 = vst [vmem:[#allocation45_spill] sm:$0xff] %v13908_v10  ;;  %v326_v12 = vmul.f32 %v13917_v42, %v10036_v43  ;;  %v1755_v63 = vrot.slane %v13682_v7, 5  ;;  %v9200_v18 = vrot.slane %v13726_v28, 9  ;;  %v13937_v33 = vsel %vm13800_vm11, %v9198_v6, %v1751_v57  ;;  %v13941_v7 = vld [vmem:[%s13304_s21 + $0x58] sm:$0xff]  }
  0x83   : > { %16091 = vst [vmem:[#allocation46_spill] sm:$0xff] %v13912_v51  ;;  %11473 = vmatmul.mubr.bf16.gmra.mrb[12].mxu0 %v13912_v51  ;;  %v363_v38 = vadd.f32 %v13931_v55, %v324_v26  ;;  %v364_v27 = vadd.f32 %v13931_v55, %v325_v23  ;;  %16092 = vst [vmem:[#allocation47_spill] sm:$0xff] %v13937_v33  ;;  %v1759_v45 = vrot.slane %v13730_v25, 5  ;;  %v9201_v39 = vrot.slane %v13734_v40, 9 }
  0x84   : > { %11508 = vmatprep.mubr.bf16.mxu0 %v13868_v19  ;;  %v365_v28 = vadd.f32 %v13931_v55, %v326_v12  ;;  %v1756_v34 = vsel %vm13800_vm11, %v9199_v61, %v1755_v63  ;;  %v1763_v36 = vrot.slane %v13738_v5, 5  ;;  %v10037_v26 = vunpack.c.h.bf16 %v10150_v37  ;;  %v13004_v12 = vld [vmem:[%s15847_s3 + $0x3c8] sm:$0xff]  }
  0x85   : > { %v395_v58 = vmax.f32 %v363_v38, 0.0  ;;  %v396_v20 = vmax.f32 %v364_v27, 0.0  ;;  %v13950_v53 = vcombine.low %v13937_v33, %v1756_v34  ;;  %v1760_v25 = vsel %vm13800_vm11, %v9200_v18, %v1759_v45 }
  0x86   : > { %v397_v62 = vmax.f32 %v365_v28, 0.0  ;;  %v13956_v43 = vsel %vm13800_vm11, %v9201_v39, %v1763_v36  ;;  %v13958_v6 = vcombine.low %v1756_v34, %v1760_v25  ;;  %v10040_v57 = vunpack.c.l.bf16 %v10151_v52 }
  0x87   : > { %16093 = vst [vmem:[#allocation48_spill] sm:$0xff] %v13950_v53  ;;  %v427_v23 = vpack.c.bf16 %v395_v58, %v395_v58  ;;  %v428_v40 = vpack.c.bf16 %v396_v20, %v396_v20  ;;  %v13961_v5 = vcombine.low %v1760_v25, %v13956_v43  ;;  %v327_v63 = vmul.f32 %v13917_v42, %v10037_v26 }
  0x88   : > { %16094 = vst [vmem:[#allocation49_spill] sm:$0xff] %v13958_v6  ;;  %v429_v61 = vpack.c.bf16 %v397_v62, %v397_v62  ;;  %v10041_v18 = vunpack.c.h.bf16 %v10151_v52  ;;  %v10044_v38 = vunpack.c.l.bf16 %v13941_v7  ;;  %v328_v36 = vmul.f32 %v13917_v42, %v10040_v57 }
  0x89   : > { %16095 = vst [vmem:[#allocation50_spill] sm:$0xff] %v13961_v5  ;;  %v556_v27 = vshrl.u32 %v427_v23, 16  ;;  %v559_v45 = vshll.u32 %v427_v23, 16  ;;  %v563_v28 = vshrl.u32 %v428_v40, 16  ;;  %v566_v37 = vshll.u32 %v428_v40, 16  ;;  %v13006_v23 = vld [vmem:[%s15847_s3 + $0x3d0] sm:$0xff]  }
  0x8a   : > { %v570_v34 = vshrl.u32 %v429_v61, 16  ;;  %v573_v39 = vshll.u32 %v429_v61, 16  ;;  %v366_v58 = vadd.f32 %v13931_v55, %v327_v63  ;;  %v329_v62 = vmul.f32 %v13917_v42, %v10041_v18 }
  0x8b   : > { %11509 = vmatmul.mubr.bf16.vlgmr.msra.gmra.mrb[0].mxu0 %v13870_v29  ;;  %v558_v20 = vrot.slane %v556_v27, 7  ;;  %v565_v25 = vrot.slane %v563_v28, 7  ;;  %v330_v52 = vmul.f32 %v13917_v42, %v10044_v38  ;;  %v367_v40 = vadd.f32 %v13931_v55, %v328_v36 }
  0x8c   : > { %11541 = vmatpush3.bf16.msra.mxu0 %v13700_v60  ;;  %11512 = vmatprep.mubr.bf16.mxu0 %v13892_v13  ;;  %v572_v26 = vrot.slane %v570_v34, 7  ;;  %v398_v57 = vmax.f32 %v366_v58, 0.0  ;;  %v368_v18 = vadd.f32 %v13931_v55, %v329_v62 }
  0x8d   : > { %11542 = vmatprep.subr.bf16.mxu0 %v13004_v12  ;;  %v561_v63 = vor.u32 %v559_v45, %v558_v20  ;;  %v568_v27 = vor.u32 %v566_v37, %v565_v25  ;;  %v13982_v38 = vadd.f32 %v13931_v55, %v330_v52  ;;  %v399_v28 = vmax.f32 %v367_v40, 0.0 }
  0x8e   : > { %v575_v60 = vor.u32 %v573_v39, %v572_v26  ;;  %v430_v34 = vpack.c.bf16 %v398_v57, %v398_v57  ;;  %v400_v58 = vmax.f32 %v368_v18, 0.0  ;;  %v13008_v26 = vld [vmem:[%s15847_s3 + $0x3d8] sm:$0xff]  }
  0x8f   : > { %v718_v29 = vsel %vm13378_vm7, 0, %v561_v63  ;;  %v719_v36 = vsel %vm13378_vm7, 0, %v568_v27  ;;  %v401_v45 = vmax.f32 %v13982_v38, 0.0  ;;  %v431_v25 = vpack.c.bf16 %v399_v28, %v399_v28 }
  0x90   : > { %11543 = vmatpush3.bf16.msra.mxu0 %v13004_v12  ;;  %v13992_v37 = vsel %vm13391_vm8, %v718_v29, 0  ;;  %v720_v39 = vsel %vm13378_vm7, 0, %v575_v60  ;;  %v13998_v20 = vsel %vm13391_vm8, %v719_v36, 0  ;;  %v577_v27 = vshrl.u32 %v430_v34, 16  ;;  %v13010_v36 = vld [vmem:[%s15847_s3 + $0x3e0] sm:$0xff]  }
  0x91   : > { %16096 = vst [vmem:[#allocation51_spill] sm:$0xff] %v13992_v37  ;;  %16097 = vst [vmem:[#allocation52_spill] sm:$0xff] %v13998_v20  ;;  %v14002_v62 = vcombine.low %v13992_v37, %v13992_v37  ;;  %v14006_v52 = vcombine.high %v13992_v37, %v13992_v37  ;;  %v14010_v29 = vsel %vm13391_vm8, %v720_v39, 0  ;;  %v14014_v12 = vcombine.low %v13998_v20, %v13998_v20 }
  0x92   : > { %16098 = vst [vmem:[#allocation53_spill] sm:$0xff] %v14010_v29  ;;  %11544 = vmatprep.subr.bf16.mxu0 %v13006_v23  ;;  %v14021_v40 = vcombine.high %v13998_v20, %v13998_v20  ;;  %v14025_v57 = vcombine.low %v14010_v29, %v14010_v29  ;;  %v14029_v63 = vcombine.high %v14010_v29, %v14010_v29  ;;  %v579_v35 = vrot.slane %v577_v27, 7 }
  0x93   : > { %11513 = vmatmul.mubr.bf16.gmra.mrb[4].mxu0 %v13908_v10  ;;  %v1109_v18 = vshrl.u32 %v14002_v62, 16  ;;  %v1112_v38 = vshll.u32 %v14002_v62, 16  ;;  %v1118_v60 = vshll.u32 %v14006_v52, 16  ;;  %v1123_v28 = vshrl.u32 %v14014_v12, 16 }
  0x94   : > { %v1126_v39 = vshll.u32 %v14014_v12, 16  ;;  %v1132_v61 = vshll.u32 %v14021_v40, 16  ;;  %v1137_v13 = vshrl.u32 %v14025_v57, 16  ;;  %v1140_v10 = vshll.u32 %v14025_v57, 16  ;;  %11516 = vmatprep.mubr.bf16.mxu0 %v13950_v53  ;;  %11545 = vmatpush3.bf16.msra.mxu0 %v13006_v23  ;;  %v13012_v23 = vld [vmem:[%s15847_s3 + $0x3e8] sm:$0xff]  }
  0x95   : > { %v1111_v19 = vrot.slane %v1109_v18, 4  ;;  %v1114_v51 = vrot.slane %v1112_v38, 5  ;;  %v1120_v11 = vrot.slane %v1118_v60, 5  ;;  %v1125_v9 = vrot.slane %v1123_v28, 4  ;;  %11546 = vmatprep.subr.bf16.mxu0 %v13008_v26 }
  0x96   : > { %v1128_v17 = vrot.slane %v1126_v39, 5  ;;  %v1134_v6 = vrot.slane %v1132_v61, 5  ;;  %v1139_v8 = vrot.slane %v1137_v13, 4  ;;  %v1142_v33 = vrot.slane %v1140_v10, 5 }
  0x97   : > { %v1115_v41 = vor.u32 %v1114_v51, %v1111_v19  ;;  %v1146_v31 = vshll.u32 %v14029_v63, 16  ;;  %v580_v1 = vshll.u32 %v430_v34, 16  ;;  %v584_v37 = vshrl.u32 %v431_v25, 16 }
  0x98   : > { %v1129_v20 = vor.u32 %v1128_v17, %v1125_v9  ;;  %v1143_v29 = vor.u32 %v1142_v33, %v1139_v8  ;;  %v587_v4 = vshll.u32 %v431_v25, 16  ;;  %11547 = vmatpush3.bf16.msra.mxu0 %v13008_v26  ;;  %v432_v61 = vpack.c.bf16 %v400_v58, %v400_v58 }
  0x99   : > { %v1116_v18 = vrot.slane %v1115_v41, 4  ;;  %v1148_v38 = vrot.slane %v1146_v31, 5  ;;  %v582_v60 = vor.u32 %v580_v1, %v579_v35  ;;  %11548 = vmatprep.subr.bf16.mxu0 %v13010_v36  ;;  %v586_v10 = vrot.slane %v584_v37, 7 }
  0x9a   : > { %v1130_v13 = vrot.slane %v1129_v20, 4  ;;  %v1144_v19 = vrot.slane %v1143_v29, 4  ;;  %v433_v51 = vpack.c.bf16 %v401_v45, %v401_v45  ;;  %v591_v9 = vshrl.u32 %v432_v61, 16 }
  0x9b   : > { %v14050_v17 = vsel %vm13309_vm2, %v1116_v18, %v1120_v11  ;;  %11517 = vmatmul.mubr.bf16.gmra.mrb[8].mxu0 %v13961_v5  ;;  %v721_v8 = vsel %vm13378_vm7, 0, %v582_v60  ;;  %v594_v33 = vshll.u32 %v432_v61, 16  ;;  %v589_v41 = vor.u32 %v587_v4, %v586_v10  ;;  %v13016_v10 = vld [vmem:[%s15847_s3 + $0x3f8] sm:$0xff]  }
  0x9c   : > { %16099 = vst [vmem:[#allocation54_spill] sm:$0xff] %v14050_v17  ;;  %v14057_v1 = vcombine.low %v13318_v24, %v14050_v17  ;;  %v14061_v35 = vsel %vm13309_vm2, %v1130_v13, %v1134_v6  ;;  %v14065_v31 = vsel %vm13309_vm2, %v1144_v19, %v1148_v38  ;;  %11549 = vmatpush3.bf16.msra.mxu0 %v13010_v36  ;;  %v14073_v34 = vsel %vm13391_vm8, %v721_v8, 0  ;;  %v13014_v6 = vld [vmem:[%s15847_s3 + $0x3f0] sm:$0xff]  }
  0x9d   : > { %16101 = vst [vmem:[#allocation56_spill] sm:$0xff] %v14061_v35  ;;  %16102 = vst [vmem:[#allocation57_spill] sm:$0xff] %v14065_v31  ;;  %v14069_v11 = vcombine.low %v14061_v35, %v14065_v31  ;;  %v593_v58 = vrot.slane %v591_v9, 7  ;;  %v598_v45 = vshrl.u32 %v433_v51, 16  ;;  %11550 = vmatprep.subr.bf16.mxu0 %v13012_v23  ;;  %v722_v4 = vsel %vm13378_vm7, 0, %v589_v41 }
  0x9e   : > { %16100 = vst [vmem:[#allocation55_spill] sm:$0xff] %v14057_v1  ;;  %16104 = vst [vmem:[#allocation59_spill] sm:$0xff] %v14073_v34  ;;  %10860 = vmatprep.mubr.bf16.mxu1 %v14057_v1  ;;  %v14083_v37 = vcombine.low %v14073_v34, %v14073_v34  ;;  %v14087_v20 = vcombine.high %v14073_v34, %v14073_v34  ;;  %v601_v25 = vshll.u32 %v433_v51, 16  ;;  %v14092_v29 = vsel %vm13391_vm8, %v722_v4, 0 }
  0x9f   : > { %16103 = vst [vmem:[#allocation58_spill] sm:$0xff] %v14069_v11  ;;  %10861 = vmatmul.mubr.bf16.gmra.mrb[24].mxu1 %v14069_v11  ;;  %16105 = vst [vmem:[#allocation60_spill] sm:$0xff] %v14092_v29  ;;  %v596_v26 = vor.u32 %v594_v33, %v593_v58  ;;  %v600_v27 = vrot.slane %v598_v45, 7  ;;  %v16106_v28 = vrot.slane %v13764_v59, 5  ;;  %v16107_v36 = vrot.slane %v13760_v44, 9 }
  0xa0   : > { %v14102_v18 = vcombine.low %v14092_v29, %v14092_v29  ;;  %v14106_v38 = vcombine.high %v14092_v29, %v14092_v29  ;;  %v1151_v60 = vshrl.u32 %v14083_v37, 16  ;;  %v1154_v61 = vshll.u32 %v14083_v37, 16  ;;  %11551 = vmatpush3.bf16.msra.mxu0 %v13012_v23 }
  0xa1   : > { %v1768_v39 = vsel %vm13800_vm11, %v16107_v36, %v16106_v28  ;;  %v1160_v59 = vshll.u32 %v14087_v20, 16  ;;  %v603_v13 = vor.u32 %v601_v25, %v600_v27  ;;  %v723_v44 = vsel %vm13378_vm7, 0, %v596_v26  ;;  %11552 = vmatprep.subr.bf16.mxu0 %v13014_v6 }
  0xa2   : > { %v9203_v19 = vrot.slane %v13785_v48, 9  ;;  %v1153_v51 = vrot.slane %v1151_v60, 4  ;;  %v1156_v8 = vrot.slane %v1154_v61, 5  ;;  %v1165_v9 = vshrl.u32 %v14102_v18, 16  ;;  %v14145_v61 = vld [vmem:[%s15847_s3 + $0x400] sm:$0xff]  }
  0xa3   : > { %v1168_v33 = vshll.u32 %v14102_v18, 16  ;;  %v1162_v23 = vrot.slane %v1160_v59, 5  ;;  %v1174_v41 = vshll.u32 %v14106_v38, 16  ;;  %v724_v58 = vsel %vm13378_vm7, 0, %v603_v13 }
  0xa4   : > { %v14124_v48 = vsel %vm13391_vm8, %v723_v44, 0  ;;  %v1157_v45 = vor.u32 %v1156_v8, %v1153_v51  ;;  %v1167_v4 = vrot.slane %v1165_v9, 4  ;;  %v14128_v26 = vsel %vm13391_vm8, %v724_v58, 0  ;;  %11553 = vmatpush3.bf16.msra.mxu0 %v13014_v6 }
  0xa5   : > { %v1170_v25 = vrot.slane %v1168_v33, 5  ;;  %v1176_v27 = vrot.slane %v1174_v41, 5  ;;  %v14132_v28 = vcombine.low %v14124_v48, %v14124_v48  ;;  %v14136_v36 = vcombine.high %v14124_v48, %v14124_v48  ;;  %11554 = vmatprep.subr.bf16.mxu0 %v13016_v10 }
  0xa6   : > { %v14140_v60 = vcombine.low %v14128_v26, %v14128_v26  ;;  %v1158_v6 = vrot.slane %v1157_v45, 4  ;;  %v14149_v13 = vcombine.high %v14128_v26, %v14128_v26  ;;  %v1771_v44 = vrot.slane %v13789_v50, 5 }
  0xa7   : > { %v1171_v59 = vor.u32 %v1170_v25, %v1167_v4  ;;  %v1179_v51 = vshrl.u32 %v14132_v28, 16  ;;  %v1182_v8 = vshll.u32 %v14132_v28, 16  ;;  %v1188_v9 = vshll.u32 %v14136_v36, 16 }
  0xa8   : > { %v1193_v33 = vshrl.u32 %v14140_v60, 16  ;;  %v14158_v41 = vsel %vm13309_vm2, %v1158_v6, %v1162_v23  ;;  %v1196_v45 = vshll.u32 %v14140_v60, 16  ;;  %v1202_v4 = vshll.u32 %v14149_v13, 16  ;;  %11555 = vmatpush3.bf16.msra.mxu0 %v13016_v10 }
  0xa9   : > { %16108 = vst [vmem:[#allocation61_spill] sm:$0xff] %v14158_v41  ;;  %v1172_v58 = vrot.slane %v1171_v59, 4  ;;  %v1181_v25 = vrot.slane %v1179_v51, 4  ;;  %v1184_v50 = vrot.slane %v1182_v8, 5  ;;  %v1190_v1 = vrot.slane %v1188_v9, 5  ;;  %11588 = vmatprep.subr.bf16.mxu0 %v14145_v61 }
  0xaa   : > { %v1195_v5 = vrot.slane %v1193_v33, 4  ;;  %v1198_v31 = vrot.slane %v1196_v45, 5  ;;  %v1204_v17 = vrot.slane %v1202_v4, 5  ;;  %v1772_v23 = vsel %vm13800_vm11, %v9203_v19, %v1771_v44 }
  0xab   : > { %v14165_v53 = vsel %vm13309_vm2, %v1172_v58, %v1176_v27  ;;  %v1185_v10 = vor.u32 %v1184_v50, %v1181_v25  ;;  %v14174_v59 = vcombine.low %v13956_v43, %v1768_v39  ;;  %v14176_v51 = vcombine.low %v1768_v39, %v1772_v23 }
  0xac   : > { %16109 = vst [vmem:[#allocation62_spill] sm:$0xff] %v14165_v53  ;;  %v14171_v6 = vcombine.low %v14158_v41, %v14165_v53  ;;  %v1199_v8 = vor.u32 %v1198_v31, %v1195_v5  ;;  %v9204_v9 = vrot.slane %v13828_v30, 9  ;;  %v1775_v27 = vrot.slane %v13832_v54, 5 }
  0xad   : > { %16111 = vst [vmem:[#allocation64_spill] sm:$0xff] %v14176_v51  ;;  %v9328_v33 = vrot.slane %v13850_v0, 9  ;;  %v1186_v19 = vrot.slane %v1185_v10, 4  ;;  %11520 = vmatprep.mubr.bf16.mxu0 %v14176_v51  ;;  %v2741_v44 = vrot.slane %v13854_v16, 5  ;;  %v9205_v58 = vrot.slane %v14002_v62, 9 }
  0xae   : > { %16110 = vst [vmem:[#allocation63_spill] sm:$0xff] %v14171_v6  ;;  %10864 = vmatprep.mubr.bf16.mxu1 %v14171_v6  ;;  %v1779_v43 = vrot.slane %v14006_v52, 5  ;;  %v1200_v39 = vrot.slane %v1199_v8, 4  ;;  %v1776_v5 = vsel %vm13800_vm11, %v9204_v9, %v1775_v27  ;;  %v9206_v30 = vrot.slane %v14014_v12, 9  ;;  %v10153_v8 = vld [vmem:[%s13304_s21 + $0x60] sm:$0xff]  }
  0xaf   : > { %v1783_v54 = vrot.slane %v14021_v40, 5  ;;  %v14192_v0 = vsel %vm13309_vm2, %v1186_v19, %v1190_v1  ;;  %v14194_v31 = vcombine.low %v1772_v23, %v1776_v5  ;;  %v14198_v16 = vsel %vm13800_vm11, %v9328_v33, %v2741_v44  ;;  %v10155_v19 = vld [vmem:[%s13304_s21 + $0x70] sm:$0xff]  }
  0xb0   : > { %16112 = vst [vmem:[#allocation65_spill] sm:$0xff] %v14192_v0  ;;  %16113 = vst [vmem:[#allocation66_spill] sm:$0xff] %v14198_v16  ;;  %v14202_v62 = vsel %vm13800_vm11, %v9205_v58, %v1779_v43  ;;  %v14206_v52 = vsel %vm13309_vm2, %v1200_v39, %v1204_v17  ;;  %v14209_v12 = vcombine.low %v1776_v5, %v14198_v16  ;;  %v9207_v1 = vrot.slane %v14025_v57, 9 }
  0xb1   : > { %16114 = vst [vmem:[#allocation67_spill] sm:$0xff] %v14206_v52  ;;  %v1784_v40 = vsel %vm13800_vm11, %v9206_v30, %v1783_v54  ;;  %v14216_v45 = vcombine.low %v14192_v0, %v14206_v52  ;;  %v1787_v25 = vrot.slane %v14029_v63, 5  ;;  %v9208_v17 = vrot.slane %v14083_v37, 9 }
  0xb2   : > { %16115 = vst [vmem:[#allocation68_spill] sm:$0xff] %v14209_v12  ;;  %v14219_v4 = vcombine.low %v14202_v62, %v1784_v40  ;;  %11521 = vmatmul.mubr.bf16.gmra.mrb[12].mxu0 %v14209_v12  ;;  %v1791_v50 = vrot.slane %v14087_v20, 5  ;;  %v9209_v23 = vrot.slane %v14102_v18, 9  ;;  %v1795_v57 = vrot.slane %v14106_v38, 5  ;;  %v10154_v18 = vld [vmem:[%s13304_s21 + $0x68] sm:$0xff]  }
  0xb3   : > { %16116 = vst [vmem:[#allocation69_spill] sm:$0xff] %v14216_v45  ;;  %v9210_v10 = vrot.slane %v14132_v28, 9  ;;  %10865 = vmatmul.mubr.bf16.gmra.mrb[28].mxu1 %v14216_v45  ;;  %v1788_v63 = vsel %vm13800_vm11, %v9207_v1, %v1787_v25  ;;  %v1799_v37 = vrot.slane %v14136_v36, 5  ;;  %v10045_v9 = vunpack.c.h.bf16 %v13941_v7  ;;  %v13192_v45 = vld [vmem:[%s15845_s1] ss:$0 sm:$0xff] }
  0xb4   : > { %16117 = vst [vmem:[#allocation70_spill] sm:$0xff] %v14219_v4  ;;  %11524 = vmatprep.mubr.bf16.mxu0 %v14219_v4  ;;  %v9211_v20 = vrot.slane %v14140_v60, 9  ;;  %10884 = vmatprep.mubr.bf16.mxu1 %v13257_v3  ;;  %v1792_v38 = vsel %vm13800_vm11, %v9208_v17, %v1791_v50  ;;  %v14240_v28 = vcombine.low %v1784_v40, %v1788_v63  ;;  %v1803_v33 = vrot.slane %v14149_v13, 5 }
  0xb5   : > { %v1796_v27 = vsel %vm13800_vm11, %v9209_v23, %v1795_v57  ;;  %v1800_v7 = vsel %vm13800_vm11, %v9210_v10, %v1799_v37  ;;  %v331_v60 = vmul.f32 %v13917_v42, %v10045_v9  ;;  %v14251_v44 = vcombine.low %v1788_v63, %v1792_v38  ;;  %v14276_v23 = vld [vmem:[%s13304_s21 + $0x78] sm:$0xff]   ;;  %v13011_v57 = vld [vmem:[%s15847_s3 + $0x88] sm:$0xff]  }
  0xb6   : > { %v14248_v36 = vcombine.low %v1792_v38, %v1796_v27  ;;  %v14253_v58 = vcombine.low %v1796_v27, %v1800_v7  ;;  %v14257_v43 = vsel %vm13800_vm11, %v9211_v20, %v1803_v33  ;;  %v16120_v39 = vmov 0   ;;  %v16123_v38 = vld [vmem:[#allocation13_spill] sm:$0xff] }
  0xb7   : > { %16118 = vst [vmem:[#allocation71_spill] sm:$0xff] %v14251_v44  ;;  %v14261_v13 = vcombine.low %v16120_v39, %v13419_v46  ;;  %v370_v5 = vadd.f32 %v13931_v55, %v331_v60  ;;  %v14265_v30 = vcombine.low %v1800_v7, %v14257_v43  ;;  %v10048_v54 = vunpack.c.l.bf16 %v10153_v8 }
  0xb8   : > { %16119 = vst [vmem:[#allocation72_spill] sm:$0xff] %v14253_v58  ;;  %v10049_v40 = vunpack.c.h.bf16 %v10153_v8  ;;  %v14269_v1 = vcombine.low %v13423_v47, %v13429_v49  ;;  %v10052_v25 = vunpack.c.l.bf16 %v10154_v18  ;;  %v10053_v17 = vunpack.c.h.bf16 %v10154_v18  ;;  %v16122_v18 = vld [vmem:[#allocation14_spill] sm:$0xff]  ;;  %v16154_v49 = vld [vmem:[#allocation53_spill] sm:$0xff] }
  0xb9   : > { %16121 = vst [vmem:[#allocation73_spill] sm:$0xff] %v14261_v13  ;;  %v14273_v50 = vcombine.low %v13457_v56, %v13515_v14  ;;  %v402_v10 = vmax.f32 %v370_v5, 0.0  ;;  %v332_v63 = vmul.f32 %v13917_v42, %v10048_v54  ;;  %v10056_v37 = vunpack.c.l.bf16 %v10155_v19  ;;  %v16155_v56 = vld [vmem:[#allocation52_spill] sm:$0xff] }
  0xba   : > { %v333_v8 = vmul.f32 %v13917_v42, %v10049_v40  ;;  %11525 = vmatmul.mubr.bf16.gmra.mrb[16].mxu0 %v14251_v44  ;;  %v334_v9 = vmul.f32 %v13917_v42, %v10052_v25  ;;  %v335_v20 = vmul.f32 %v13917_v42, %v10053_v17  ;;  %v14288_v27 = vcombine.low %v16123_v38, %v16122_v18  ;;  %v13191_v40 = vld [vmem:[%s15847_s3 + $0x80] sm:$0xff]  }
  0xbb   : > { %v10057_v33 = vunpack.c.h.bf16 %v10155_v19  ;;  %10885 = vmatmul.mubr.bf16.vlgmr.msra.gmra.mrb[0].mxu1 %v13257_v3  ;;  %11528 = vmatprep.mubr.bf16.mxu0 %v14253_v58  ;;  %v434_v7 = vpack.c.bf16 %v402_v10, %v402_v10  ;;  %v371_v60 = vadd.f32 %v13931_v55, %v332_v63  ;;  %v10060_v54 = vunpack.c.l.bf16 %v14276_v23  ;;  %v13013_v19 = vld [vmem:[%s15847_s3 + $0x90] sm:$0xff]  }
  0xbc   : > { %v372_v5 = vadd.f32 %v13931_v55, %v333_v8  ;;  %10917 = vmatpush3.bf16.msra.mxu1 %v13191_v40  ;;  %10888 = vmatprep.mubr.bf16.mxu1 %v13257_v3  ;;  %v373_v25 = vadd.f32 %v13931_v55, %v334_v9  ;;  %v374_v17 = vadd.f32 %v13931_v55, %v335_v20  ;;  %v16134_v18 = vunpack.c.h.bf16 %v14276_v23  ;;  %v16137_v23 = vld [vmem:[#allocation19_spill] sm:$0xff] }
  0xbd   : > { %v336_v10 = vmul.f32 %v13917_v42, %v10056_v37  ;;  %10918 = vmatprep.subr.bf16.mxu1 %v13011_v57  ;;  %v605_v8 = vshrl.u32 %v434_v7, 16  ;;  %v608_v58 = vshll.u32 %v434_v7, 16  ;;  %v403_v44 = vmax.f32 %v371_v60, 0.0 }
  0xbe   : > { %v404_v4 = vmax.f32 %v372_v5, 0.0  ;;  %v405_v40 = vmax.f32 %v373_v25, 0.0  ;;  %v406_v12 = vmax.f32 %v374_v17, 0.0  ;;  %v337_v51 = vmul.f32 %v13917_v42, %v10057_v33  ;;  %v13015_v33 = vld [vmem:[%s15847_s3 + $0x98] sm:$0xff]  }
  0xbf   : > { %v375_v52 = vadd.f32 %v13931_v55, %v336_v10  ;;  %v607_v53 = vrot.slane %v605_v8, 7  ;;  %v435_v0 = vpack.c.bf16 %v403_v44, %v403_v44  ;;  %v14309_v20 = vmul.f32 %v13917_v42, %v10060_v54 }
  0xc0   : > { %v436_v9 = vpack.c.bf16 %v404_v4, %v404_v4  ;;  %10919 = vmatpush3.bf16.msra.mxu1 %v13011_v57  ;;  %v437_v37 = vpack.c.bf16 %v405_v40, %v405_v40  ;;  %v438_v63 = vpack.c.bf16 %v406_v12, %v406_v12  ;;  %v376_v41 = vadd.f32 %v13931_v55, %v337_v51 }
  0xc1   : > { %v407_v7 = vmax.f32 %v375_v52, 0.0  ;;  %v610_v60 = vor.u32 %v608_v58, %v607_v53  ;;  %10920 = vmatprep.subr.bf16.mxu1 %v13013_v19  ;;  %v612_v5 = vshrl.u32 %v435_v0, 16  ;;  %v615_v25 = vshll.u32 %v435_v0, 16  ;;  %v13017_v0 = vld [vmem:[%s15847_s3 + $0xa0] sm:$0xff]  }
  0xc2   : > { %v619_v17 = vshrl.u32 %v436_v9, 16  ;;  %v622_v44 = vshll.u32 %v436_v9, 16  ;;  %v626_v4 = vshrl.u32 %v437_v37, 16  ;;  %v629_v10 = vshll.u32 %v437_v37, 16 }
  0xc3   : > { %v633_v42 = vshrl.u32 %v438_v63, 16  ;;  %10889 = vmatmul.mubr.bf16.gmra.mrb[4].mxu1 %v13257_v3  ;;  %v725_v12 = vsel %vm13378_vm7, 0, %v610_v60  ;;  %v614_v51 = vrot.slane %v612_v5, 7  ;;  %v636_v53 = vshll.u32 %v438_v63, 16 }
  0xc4   : > { %v621_v52 = vrot.slane %v619_v17, 7  ;;  %v14323_v58 = vsel %vm13391_vm8, %v725_v12, 0  ;;  %10892 = vmatprep.mubr.bf16.mxu1 %v14261_v13  ;;  %10921 = vmatpush3.bf16.msra.mxu1 %v13013_v19  ;;  %v628_v57 = vrot.slane %v626_v4, 7  ;;  %v408_v8 = vmax.f32 %v376_v41, 0.0 }
  0xc5   : > { %v635_v54 = vrot.slane %v633_v42, 7  ;;  %v14328_v40 = vcombine.low %v14323_v58, %v14323_v58  ;;  %v14332_v63 = vcombine.high %v14323_v58, %v14323_v58  ;;  %v617_v9 = vor.u32 %v615_v25, %v614_v51  ;;  %10922 = vmatprep.subr.bf16.mxu1 %v13015_v33  ;;  %v13019_v51 = vld [vmem:[%s15847_s3 + $0xa8] sm:$0xff]  }
  0xc6   : > { %v624_v37 = vor.u32 %v622_v44, %v621_v52  ;;  %v631_v60 = vor.u32 %v629_v10, %v628_v57  ;;  %v439_v17 = vpack.c.bf16 %v407_v7, %v407_v7  ;;  %v14334_v12 = vpack.c.bf16 %v408_v8, %v408_v8 }
  0xc7   : > { %v638_v5 = vor.u32 %v636_v53, %v635_v54  ;;  %v9329_v19 = vrot.slane %v14328_v40, 9  ;;  %v2745_v41 = vrot.slane %v14332_v63, 5  ;;  %v726_v4 = vsel %vm13378_vm7, 0, %v617_v9 }
  0xc8   : > { %v727_v42 = vsel %vm13378_vm7, 0, %v624_v37  ;;  %v14344_v25 = vsel %vm13391_vm8, %v726_v4, 0  ;;  %v728_v7 = vsel %vm13378_vm7, 0, %v631_v60  ;;  %10923 = vmatpush3.bf16.msra.mxu1 %v13015_v33  ;;  %v339_v6 = vmul.f32 %v13192_v45, %v16134_v18 }
  0xc9   : > { %16124 = vst [vmem:[#allocation74_spill] sm:$0xff] %v14344_v25  ;;  %v14348_v44 = vsel %vm13391_vm8, %v727_v42, 0  ;;  %v729_v10 = vsel %vm13378_vm7, 0, %v638_v5  ;;  %v14359_v52 = vsel %vm13800_vm11, %v9329_v19, %v2745_v41  ;;  %v14363_v53 = vcombine.low %v14344_v25, %v14344_v25  ;;  %10924 = vmatprep.subr.bf16.mxu1 %v13017_v0 }
  0xca   : > { %16125 = vst [vmem:[#allocation75_spill] sm:$0xff] %v14348_v44  ;;  %16126 = vst [vmem:[#allocation76_spill] sm:$0xff] %v14359_v52  ;;  %v14367_v57 = vcombine.high %v14344_v25, %v14344_v25  ;;  %v14371_v54 = vcombine.low %v14348_v44, %v14348_v44  ;;  %v14375_v33 = vcombine.low %v14257_v43, %v14359_v52  ;;  %v14383_v9 = vsel %vm13391_vm8, %v728_v7, 0 }
  0xcb   : > { %16127 = vst [vmem:[#allocation77_spill] sm:$0xff] %v14363_v53  ;;  %v14379_v8 = vcombine.high %v14348_v44, %v14348_v44  ;;  %16130 = vst [vmem:[#allocation80_spill] sm:$0xff] %v14383_v9  ;;  %v14387_v37 = vsel %vm13391_vm8, %v729_v10, 0  ;;  %10893 = vmatmul.mubr.bf16.gmra.mrb[8].mxu1 %v14269_v1  ;;  %v9517_v60 = vrot.slane %v14363_v53, 9  ;;  %v14395_v19 = vcombine.low %v14383_v9, %v14383_v9 }
  0xcc   : > { %16128 = vst [vmem:[#allocation78_spill] sm:$0xff] %v14367_v57  ;;  %16129 = vst [vmem:[#allocation79_spill] sm:$0xff] %v14375_v33  ;;  %v4498_v5 = vrot.slane %v14367_v57, 5  ;;  %v9518_v43 = vrot.slane %v14371_v54, 9  ;;  %11529 = vmatmul.mubr.bf16.gmra.mrb[20].mxu0 %v14375_v33  ;;  %v14401_v4 = vcombine.high %v14383_v9, %v14383_v9  ;;  %v14405_v42 = vcombine.low %v14387_v37, %v14387_v37 }
  0xcd   : > { %16131 = vst [vmem:[#allocation81_spill] sm:$0xff] %v14387_v37  ;;  %v4502_v41 = vrot.slane %v14379_v8, 5  ;;  %v14409_v7 = vcombine.high %v14387_v37, %v14387_v37  ;;  %10896 = vmatprep.mubr.bf16.mxu1 %v14273_v50  ;;  %v9519_v13 = vrot.slane %v14395_v19, 9  ;;  %v640_v57 = vshrl.u32 %v439_v17, 16  ;;  %10925 = vmatpush3.bf16.msra.mxu1 %v13017_v0 }
  0xce   : > { %v14414_v10 = vsel %vm13800_vm11, %v9517_v60, %v4498_v5  ;;  %v643_v33 = vshll.u32 %v439_v17, 16  ;;  %v4506_v25 = vrot.slane %v14401_v4, 5  ;;  %v9520_v35 = vrot.slane %v14405_v42, 9  ;;  %10926 = vmatprep.subr.bf16.mxu1 %v13019_v51  ;;  %v13021_v60 = vld [vmem:[%s15847_s3 + $0xb0] sm:$0xff]  }
  0xcf   : > { %16132 = vst [vmem:[#allocation82_spill] sm:$0xff] %v14414_v10  ;;  %v4503_v53 = vsel %vm13800_vm11, %v9518_v43, %v4502_v41  ;;  %v4510_v52 = vrot.slane %v14409_v7, 5  ;;  %v642_v16 = vrot.slane %v640_v57, 7  ;;  %v647_v0 = vshrl.u32 %v14334_v12, 16 }
  0xd0   : > { %v14426_v5 = vcombine.low %v14414_v10, %v4503_v53  ;;  %v650_v17 = vshll.u32 %v14334_v12, 16  ;;  %v4507_v43 = vsel %vm13800_vm11, %v9519_v13, %v4506_v25  ;;  %v377_v57 = vadd.f32 %v13931_v55, %v14309_v20  ;;  %v13023_v55 = vld [vmem:[%s15847_s3 + $0xb8] sm:$0xff]  }
  0xd1   : > { %v4511_v41 = vsel %vm13800_vm11, %v9520_v35, %v4510_v52  ;;  %v14442_v10 = vcombine.low %v4503_v53, %v4507_v43  ;;  %v645_v13 = vor.u32 %v643_v33, %v642_v16  ;;  %v649_v25 = vrot.slane %v647_v0, 7  ;;  %10927 = vmatpush3.bf16.msra.mxu1 %v13019_v51  ;;  %v13193_v35 = vld [vmem:[%s15846_s2] ss:$0 sm:$0xff] }
  0xd2   : > { %16133 = vst [vmem:[#allocation83_spill] sm:$0xff] %v14426_v5  ;;  %11532 = vmatprep.mubr.bf16.mxu0 %v14426_v5  ;;  %v14444_v12 = vcombine.low %v4507_v43, %v4511_v41  ;;  %v378_v52 = vadd.f32 %v13193_v35, %v339_v6  ;;  %v409_v14 = vmax.f32 %v377_v57, 0.0  ;;  %v14451_v45 = vcombine.low %v16120_v39, %v16137_v23  ;;  %v16141_v43 = vld [vmem:[#allocation21_spill] sm:$0xff] }
  0xd3   : > { %16135 = vst [vmem:[#allocation84_spill] sm:$0xff] %v14442_v10  ;;  %10928 = vmatprep.subr.bf16.mxu1 %v13021_v60  ;;  %10897 = vmatmul.mubr.bf16.gmra.mrb[12].mxu1 %v14288_v27  ;;  %v652_v16 = vor.u32 %v650_v17, %v649_v25  ;;  %v730_v18 = vsel %vm13378_vm7, 0, %v645_v13  ;;  %v16140_v17 = vld [vmem:[#allocation23_spill] sm:$0xff]  ;;  %v16143_v5 = vld [vmem:[#allocation25_spill] sm:$0xff]  ;;  %v14567_v46 = vcombine.low %v16155_v56, %v16154_v49  ;;  %v2446_v47 = vshll.u32 %v14332_v63, 16 }
  0xd4   : > { %16136 = vst [vmem:[#allocation85_spill] sm:$0xff] %v14444_v12  ;;  %16138 = vst [vmem:[#allocation86_spill] sm:$0xff] %v14451_v45  ;;  %11533 = vmatmul.mubr.bf16.gmra.mrb[24].mxu0 %v14444_v12  ;;  %v14462_v6 = vsel %vm13391_vm8, %v730_v18, 0  ;;  %v410_v20 = vmax.f32 %v378_v52, 0.0  ;;  %v441_v51 = vpack.c.bf16 %v409_v14, %v409_v14  ;;  %10900 = vmatprep.mubr.bf16.mxu1 %v14451_v45  ;;  %v14486_v52 = vld [vmem:[%s15847_s3 + $0xc0] sm:$0xff]   ;;  %v4149_v63 = vshll.u32 %v14379_v8, 16 }
  0xd5   : > { %16139 = vst [vmem:[#allocation87_spill] sm:$0xff] %v14462_v6  ;;  %v731_v53 = vsel %vm13378_vm7, 0, %v652_v16  ;;  %v14469_v33 = vcombine.low %v14462_v6, %v14462_v6  ;;  %v14473_v0 = vcombine.high %v14462_v6, %v14462_v6  ;;  %v14477_v57 = vcombine.low %v16141_v43, %v16140_v17  ;;  %10929 = vmatpush3.bf16.msra.mxu1 %v13021_v60 }
  0xd6   : > { %v14481_v14 = vsel %vm13391_vm8, %v731_v53, 0  ;;  %v442_v13 = vpack.c.bf16 %v410_v20, %v410_v20  ;;  %v654_v25 = vshrl.u32 %v441_v51, 16  ;;  %v657_v35 = vshll.u32 %v441_v51, 16  ;;  %10930 = vmatprep.subr.bf16.mxu1 %v13023_v55 }
  0xd7   : > { %16142 = vst [vmem:[#allocation88_spill] sm:$0xff] %v14481_v14  ;;  %v14490_v16 = vcombine.low %v14481_v14, %v14481_v14  ;;  %v14494_v60 = vcombine.high %v14481_v14, %v14481_v14  ;;  %v9521_v18 = vrot.slane %v14469_v33, 9  ;;  %v4514_v20 = vrot.slane %v14473_v0, 5 }
  0xd8   : > { %v656_v53 = vrot.slane %v654_v25, 7  ;;  %v661_v51 = vshrl.u32 %v442_v13, 16  ;;  %v664_v12 = vshll.u32 %v442_v13, 16  ;;  %v14500_v45 = vcombine.low %v16143_v5, %v13756_v2 }
  0xd9   : > { %v4515_v10 = vsel %vm13800_vm11, %v9521_v18, %v4514_v20  ;;  %v9522_v17 = vrot.slane %v14490_v16, 9  ;;  %v4518_v23 = vrot.slane %v14494_v60, 5  ;;  %10931 = vmatpush3.bf16.msra.mxu1 %v13023_v55  ;;  %v2448_v49 = vrot.slane %v2446_v47, 5 }
  0xda   : > { %v14506_v43 = vcombine.low %v4511_v41, %v4515_v10  ;;  %v659_v38 = vor.u32 %v657_v35, %v656_v53  ;;  %v663_v11 = vrot.slane %v661_v51, 7  ;;  %10964 = vmatprep.subr.bf16.mxu1 %v14486_v52  ;;  %v16150_v35 = vld [vmem:[#allocation51_spill] sm:$0xff]  ;;  %v4171_v8 = vshll.u32 %v14405_v42, 16 }
  0xdb   : > { %v4519_v13 = vsel %vm13800_vm11, %v9522_v17, %v4518_v23  ;;  %10901 = vmatmul.mubr.bf16.gmra.mrb[16].mxu1 %v14477_v57  ;;  %v14542_v21 = vcombine.low %v16120_v39, %v16150_v35 }
  0xdc   : > { %16144 = vst [vmem:[#allocation89_spill] sm:$0xff] %v14506_v43  ;;  %v14512_v25 = vcombine.low %v4515_v10, %v4519_v13  ;;  %v666_v2 = vor.u32 %v664_v12, %v663_v11  ;;  %v732_v18 = vsel %vm13378_vm7, 0, %v659_v38  ;;  %10904 = vmatprep.mubr.bf16.mxu1 %v14500_v45  ;;  %v16148_v10 = vld [vmem:[#allocation32_spill] sm:$0xff]  ;;  %v16149_v12 = vld [vmem:[#allocation29_spill] sm:$0xff] }
  0xdd   : > { %v14519_v41 = vsel %vm13391_vm8, %v732_v18, 0  ;;  %v14538_v17 = vcombine.low %v16149_v12, %v16148_v10  ;;  %16151 = vst [vmem:[#allocation93_spill] sm:$0xff] %v14542_v21  ;;  %v16152_v18 = vld [vmem:[#allocation2_spill] sm:$0xff]  ;;  %v2440_v12 = vshll.u32 %v14328_v40, 16 }
  0xde   : > { %16145 = vst [vmem:[#allocation90_spill] sm:$0xff] %v14512_v25  ;;  %16146 = vst [vmem:[#allocation91_spill] sm:$0xff] %v14519_v41  ;;  %11536 = vmatprep.mubr.bf16.mxu0 %v14512_v25  ;;  %v733_v55 = vsel %vm13378_vm7, 0, %v666_v2  ;;  %v14526_v23 = vcombine.low %v14519_v41, %v14519_v41  ;;  %v14530_v11 = vcombine.high %v14519_v41, %v14519_v41  ;;  %v9190_v2 = vrot.slane %v13257_v3, 9 }
  0xdf   : > { %v14534_v38 = vsel %vm13391_vm8, %v733_v55, 0  ;;  %v1719_v55 = vrot.slane %v16152_v18, 5  ;;  %v2437_v25 = vshrl.u32 %v14328_v40, 16  ;;  %v14577_v40 = vcombine.low %v14073_v34, %v14092_v29 }
  0xe0   : > { %16147 = vst [vmem:[#allocation92_spill] sm:$0xff] %v14534_v38  ;;  %v9523_v20 = vrot.slane %v14526_v23, 9  ;;  %v4522_v53 = vrot.slane %v14530_v11, 5  ;;  %v14549_v51 = vcombine.low %v14534_v38, %v14534_v38  ;;  %v14553_v32 = vcombine.high %v14534_v38, %v14534_v38 }
  0xe1   : > { %v2439_v18 = vrot.slane %v2437_v25, 4  ;;  %v4143_v25 = vshll.u32 %v14371_v54, 16  ;;  %v4163_v34 = vshll.u32 %v14401_v4, 16  ;;  %v4173_v4 = vrot.slane %v4171_v8, 5 }
  0xe2   : > { %v4523_v43 = vsel %vm13800_vm11, %v9523_v20, %v4522_v53  ;;  %v9610_v35 = vrot.slane %v14549_v51, 9  ;;  %v5351_v10 = vrot.slane %v14553_v32, 5  ;;  %v4140_v53 = vshrl.u32 %v14371_v54, 16 }
  0xe3   : > { %v14562_v5 = vcombine.low %v4519_v13, %v4523_v43  ;;  %10905 = vmatmul.mubr.bf16.gmra.mrb[20].mxu1 %v14538_v17  ;;  %v2442_v13 = vrot.slane %v2440_v12, 5  ;;  %v4145_v29 = vrot.slane %v4143_v25, 5  ;;  %v4151_v12 = vrot.slane %v4149_v63, 5 }
  0xe4   : > { %v14572_v20 = vsel %vm13800_vm11, %v9610_v35, %v5351_v10  ;;  %10908 = vmatprep.mubr.bf16.mxu1 %v14542_v21  ;;  %v4142_v10 = vrot.slane %v4140_v53, 4  ;;  %v4154_v35 = vshrl.u32 %v14395_v19, 16  ;;  %v4157_v21 = vshll.u32 %v14395_v19, 16 }
  0xe5   : > { %16153 = vst [vmem:[#allocation2_spill] sm:$0xff] %v14562_v5  ;;  %16156 = vst [vmem:[#allocation94_spill] sm:$0xff] %v14572_v20  ;;  %v14581_v5 = vcombine.low %v4523_v43, %v14572_v20  ;;  %v2443_v56 = vor.u32 %v2442_v13, %v2439_v18  ;;  %v4168_v43 = vshrl.u32 %v14405_v42, 16  ;;  %v4165_v13 = vrot.slane %v4163_v34, 5 }
  0xe6   : > { %v4156_v54 = vrot.slane %v4154_v35, 4  ;;  %v4159_v20 = vrot.slane %v4157_v21, 5  ;;  %v4146_v18 = vor.u32 %v4145_v29, %v4142_v10  ;;  %v4177_v19 = vshll.u32 %v14409_v7, 16  ;;  %v13020_v10 = vld [vmem:[%s15847_s3 + $0x408] sm:$0xff]   ;;  %v16158_v35 = vld [vmem:[#allocation16_spill] sm:$0xff] }
  0xe7   : > { %16157 = vst [vmem:[#allocation95_spill] sm:$0xff] %v14581_v5  ;;  %11537 = vmatmul.mubr.bf16.gmra.mrb[28].mxu0 %v14581_v5  ;;  %v2444_v47 = vrot.slane %v2443_v56, 4  ;;  %v4170_v53 = vrot.slane %v4168_v43, 4  ;;  %v4182_v5 = vshrl.u32 %v14469_v33, 16  ;;  %v14601_v56 = vsel %vm13800_vm11, %v9190_v2, %v1719_v55 }
  0xe8   : > { %11556 = vmatprep.mubr.bf16.mxu0 %v14269_v1  ;;  %v4160_v63 = vor.u32 %v4159_v20, %v4156_v54  ;;  %v4147_v42 = vrot.slane %v4146_v18, 4  ;;  %v4179_v29 = vrot.slane %v4177_v19, 5  ;;  %v4185_v34 = vshll.u32 %v14469_v33, 16 }
  0xe9   : > { %v14595_v25 = vsel %vm13309_vm2, %v2444_v47, %v2448_v49  ;;  %v4174_v21 = vor.u32 %v4173_v4, %v4170_v53  ;;  %v4184_v49 = vrot.slane %v4182_v5, 4  ;;  %v4191_v20 = vshll.u32 %v14473_v0, 16 }
  0xea   : > { %v4161_v7 = vrot.slane %v4160_v63, 4  ;;  %v14611_v15 = vcombine.low %v16158_v35, %v16120_v39  ;;  %v14615_v2 = vcombine.low %v14124_v48, %v14128_v26  ;;  %v14619_v33 = vsel %vm13309_vm2, %v4147_v42, %v4151_v12 }
  0xeb   : > { %10909 = vmatmul.mubr.bf16.gmra.mrb[24].mxu1 %v14567_v46  ;;  %16159 = vst [vmem:[#allocation16_spill] sm:$0xff] %v14619_v33  ;;  %v4187_v55 = vrot.slane %v4185_v34, 5  ;;  %v4175_v0 = vrot.slane %v4174_v21, 4  ;;  %v4193_v43 = vrot.slane %v4191_v20, 5  ;;  %v4196_v47 = vshrl.u32 %v14490_v16, 16 }
  0xec   : > { %10912 = vmatprep.mubr.bf16.mxu1 %v14577_v40  ;;  %v14623_v5 = vsel %vm13309_vm2, %v4161_v7, %v4165_v13  ;;  %v14629_v54 = vcombine.low %v14601_v56, %v14601_v56  ;;  %v4199_v18 = vshll.u32 %v14490_v16, 16  ;;  %v4205_v12 = vshll.u32 %v14494_v60, 16  ;;  %v13022_v13 = vld [vmem:[%s15847_s3 + $0x410] sm:$0xff]  }
  0xed   : > { %16160 = vst [vmem:[#allocation96_spill] sm:$0xff] %v14623_v5  ;;  %v4188_v8 = vor.u32 %v4187_v55, %v4184_v49  ;;  %v14640_v53 = vsel %vm13309_vm2, %v4175_v0, %v4179_v29  ;;  %v4198_v19 = vrot.slane %v4196_v47, 4  ;;  %v4210_v63 = vshrl.u32 %v14526_v23, 16 }
  0xee   : > { %16161 = vst [vmem:[#allocation97_spill] sm:$0xff] %v14640_v53  ;;  %v4213_v4 = vshll.u32 %v14526_v23, 16  ;;  %v4201_v60 = vrot.slane %v4199_v18, 5  ;;  %v4207_v42 = vrot.slane %v4205_v12, 5  ;;  %v5069_v21 = vshrl.u32 %v14549_v51, 16 }
  0xef   : > { %11557 = vmatmul.mubr.bf16.vlgmr.msra.gmra.mrb[0].mxu0 %v14273_v50  ;;  %v4189_v16 = vrot.slane %v4188_v8, 4  ;;  %v4212_v34 = vrot.slane %v4210_v63, 4  ;;  %v5072_v49 = vshll.u32 %v14549_v51, 16  ;;  %v5078_v55 = vshll.u32 %v14553_v32, 16  ;;  %v13024_v51 = vld [vmem:[%s15847_s3 + $0x418] sm:$0xff]   ;;  %v13026_v32 = vld [vmem:[%s15847_s3 + $0x420] sm:$0xff]  }
  0xf0   : > { %11589 = vmatpush3.bf16.msra.mxu0 %v14145_v61  ;;  %11560 = vmatprep.mubr.bf16.mxu0 %v14288_v27  ;;  %v4219_v61 = vshll.u32 %v14530_v11, 16  ;;  %v4215_v7 = vrot.slane %v4213_v4, 5  ;;  %v4202_v20 = vor.u32 %v4201_v60, %v4198_v19  ;;  %v5071_v0 = vrot.slane %v5069_v21, 4  ;;  %v13027_v19 = vld [vmem:[%s15847_s3 + $0xc8] sm:$0xff]   ;;  %v13029_v60 = vld [vmem:[%s15847_s3 + $0xd0] sm:$0xff]  }
  0xf1   : > { %11590 = vmatprep.subr.bf16.mxu0 %v13020_v10  ;;  %v14650_v29 = vsel %vm13309_vm2, %v4189_v16, %v4193_v43  ;;  %v5074_v47 = vrot.slane %v5072_v49, 5  ;;  %v5080_v43 = vrot.slane %v5078_v55, 5  ;;  %v13032_v49 = vld [vmem:[%s15847_s3 + $0x438] sm:$0xff]   ;;  %v13035_v55 = vld [vmem:[%s15847_s3 + $0xe8] sm:$0xff]  }
  0xf2   : > { %16162 = vst [vmem:[#allocation98_spill] sm:$0xff] %v14650_v29  ;;  %v4221_v23 = vrot.slane %v4219_v61, 5  ;;  %v4216_v11 = vor.u32 %v4215_v7, %v4212_v34  ;;  %v4203_v8 = vrot.slane %v4202_v20, 4  ;;  %v16166_v61 = vld [vmem:[#allocation31_spill] sm:$0xff]  ;;  %v13031_v34 = vld [vmem:[%s15847_s3 + $0xd8] sm:$0xff]   ;;  %v16168_v7 = vld [vmem:[#allocation34_spill] sm:$0xff] }
  0xf3   : > { %10913 = vmatmul.mubr.bf16.gmra.mrb[28].mxu1 %v14615_v2  ;;  %v5075_v12 = vor.u32 %v5074_v47, %v5071_v0  ;;  %v14700_v21 = vcombine.low %v16168_v7, %v16120_v39  ;;  %v13033_v20 = vld [vmem:[%s15847_s3 + $0xe0] sm:$0xff]   ;;  %v16170_v0 = vld [vmem:[#allocation39_spill] sm:$0xff]  ;;  %v13037_v47 = vld [vmem:[%s15847_s3 + $0xf0] sm:$0xff]  }
  0xf4   : > { %11591 = vmatpush3.bf16.msra.mxu0 %v13020_v10  ;;  %10932 = vmatprep.mubr.bf16.mxu1 %v14629_v54  ;;  %v4217_v18 = vrot.slane %v4216_v11, 4  ;;  %v14663_v10 = vsel %vm13309_vm2, %v4203_v8, %v4207_v42  ;;  %v13030_v42 = vld [vmem:[%s15847_s3 + $0x430] sm:$0xff]  }
  0xf5   : > { %11592 = vmatprep.subr.bf16.mxu0 %v13022_v13  ;;  %16163 = vst [vmem:[#allocation99_spill] sm:$0xff] %v14663_v10  ;;  %v5076_v4 = vrot.slane %v5075_v12, 4  ;;  %v16169_v11 = vld [vmem:[#allocation36_spill] sm:$0xff]  ;;  %v14734_v12 = vcombine.low %v14323_v58, %v16120_v39 }
  0xf6   : > { %v14671_v63 = vsel %vm13309_vm2, %v4217_v18, %v4221_v23  ;;  %v13034_v23 = vld [vmem:[%s15847_s3 + $0x440] sm:$0xff]   ;;  %v13039_v18 = vld [vmem:[%s15847_s3 + $0xf8] sm:$0xff]  }
  0xf7   : > { %11561 = vmatmul.mubr.bf16.gmra.mrb[4].mxu0 %v14611_v15  ;;  %16164 = vst [vmem:[#allocation100_spill] sm:$0xff] %v14671_v63  ;;  %v14675_v16 = vsel %vm13309_vm2, %v5076_v4, %v5080_v43  ;;  %v16172_v43 = vld [vmem:[#allocation42_spill] sm:$0xff]  ;;  %v14749_v4 = vcombine.low %v14387_v37, %v14462_v6  ;;  %v13046_v6 = vld [vmem:[%s15847_s3 + $0x470] sm:$0xff]  }
  0xf8   : > { %11564 = vmatprep.mubr.bf16.mxu0 %v14477_v57  ;;  %11593 = vmatpush3.bf16.msra.mxu0 %v13022_v13  ;;  %16165 = vst [vmem:[#allocation101_spill] sm:$0xff] %v14675_v16  ;;  %v13028_v13 = vld [vmem:[%s15847_s3 + $0x428] sm:$0xff]  }
  0xf9   : > { %11594 = vmatprep.subr.bf16.mxu0 %v13024_v51 }
  0xfb   : > { %10933 = vmatmul.mubr.bf16.vlgmr.msra.gmra.mrb[0].mxu1 %v14629_v54 }
  0xfc   : > { %11595 = vmatpush3.bf16.msra.mxu0 %v13024_v51  ;;  %10965 = vmatpush3.bf16.msra.mxu1 %v14486_v52  ;;  %v14693_v52 = vcombine.low %v14601_v56, %v16166_v61  ;;  %v16171_v51 = vld [vmem:[#allocation47_spill] sm:$0xff]  ;;  %v14765_v61 = vcombine.low %v14534_v38, %v16120_v39  ;;  %v16186_v38 = vld [vmem:[#allocation5_spill] sm:$0xff] }
  0xfd   : > { %11596 = vmatprep.subr.bf16.mxu0 %v13026_v32  ;;  %10936 = vmatprep.mubr.bf16.mxu1 %v14629_v54  ;;  %v14727_v8 = vcombine.low %v14601_v56, %v16171_v51  ;;  %16174 = vst [vmem:[#allocation47_spill] sm:$0xff] %v14749_v4 }
  0xfe   : > { %10966 = vmatprep.subr.bf16.mxu1 %v13027_v19  ;;  %16167 = vst [vmem:[#allocation31_spill] sm:$0xff] %v14693_v52  ;;  %16177 = vst [vmem:[#allocation102_spill] sm:$0xff] %v14765_v61 }
  0xff   : > { %11565 = vmatmul.mubr.bf16.gmra.mrb[8].mxu0 %v14500_v45 }
 0x100   : > { %11568 = vmatprep.mubr.bf16.mxu0 %v14538_v17  ;;  %11597 = vmatpush3.bf16.msra.mxu0 %v13026_v32  ;;  %v14739_v32 = vcombine.low %v14348_v44, %v14383_v9  ;;  %v16189_v9 = vld [vmem:[#allocation44_spill] sm:$0xff] }
 0x101   : > { %11598 = vmatprep.subr.bf16.mxu0 %v13028_v13  ;;  %10967 = vmatpush3.bf16.msra.mxu1 %v13027_v19  ;;  %v13041_v19 = vld [vmem:[%s15847_s3 + $0x100] sm:$0xff]   ;;  %v14820_v37 = vcombine.low %v16189_v9, %v13318_v24  ;;  %v16191_v9 = vld [vmem:[#allocation7_spill] sm:$0xff] }
 0x102   : > { %10968 = vmatprep.subr.bf16.mxu1 %v13029_v60  ;;  %16173 = vst [vmem:[#allocation34_spill] sm:$0xff] %v14739_v32 }
 0x103   : > { %10937 = vmatmul.mubr.bf16.gmra.mrb[4].mxu1 %v14629_v54 }
 0x104   : > { %11599 = vmatpush3.bf16.msra.mxu0 %v13028_v13  ;;  %10940 = vmatprep.mubr.bf16.mxu1 %v14693_v52  ;;  %v16175_v13 = vld [vmem:[#allocation49_spill] sm:$0xff] }
 0x105   : > { %11600 = vmatprep.subr.bf16.mxu0 %v13030_v42  ;;  %10969 = vmatpush3.bf16.msra.mxu1 %v13029_v60  ;;  %v14754_v60 = vcombine.low %v14481_v14, %v14519_v41  ;;  %v16184_v52 = vld [vmem:[#allocation33_spill] sm:$0xff]  ;;  %v16185_v41 = vld [vmem:[#allocation40_spill] sm:$0xff] }
 0x106   : > { %10970 = vmatprep.subr.bf16.mxu1 %v13031_v34  ;;  %v13047_v14 = vld [vmem:[%s15847_s3 + $0x118] sm:$0xff]  }
 0x107   : > { %11569 = vmatmul.mubr.bf16.gmra.mrb[12].mxu0 %v14700_v21  ;;  %16176 = vst [vmem:[#allocation49_spill] sm:$0xff] %v14754_v60 }
 0x108   : > { %11572 = vmatprep.mubr.bf16.mxu0 %v14567_v46  ;;  %11601 = vmatpush3.bf16.msra.mxu0 %v13030_v42  ;;  %v14761_v42 = vcombine.low %v14601_v56, %v14202_v62  ;;  %v13036_v62 = vld [vmem:[%s15847_s3 + $0x448] sm:$0xff]  }
 0x109   : > { %11602 = vmatprep.subr.bf16.mxu0 %v13032_v49  ;;  %10971 = vmatpush3.bf16.msra.mxu1 %v13031_v34  ;;  %v16178_v34 = vld [vmem:[#allocation9_spill] sm:$0xff] }
 0x10a   : > { %10972 = vmatprep.subr.bf16.mxu1 %v13033_v20 }
 0x10b   : > { %10941 = vmatmul.mubr.bf16.gmra.mrb[8].mxu1 %v16169_v11 }
 0x10c   : > { %10944 = vmatprep.mubr.bf16.mxu1 %v16170_v0  ;;  %11603 = vmatpush3.bf16.msra.mxu0 %v13032_v49  ;;  %v16179_v49 = vld [vmem:[#allocation15_spill] sm:$0xff] }
 0x10d   : > { %11636 = vmatprep.subr.bf16.mxu0 %v13034_v23  ;;  %10973 = vmatpush3.bf16.msra.mxu1 %v13033_v20  ;;  %v16180_v20 = vld [vmem:[#allocation18_spill] sm:$0xff] }
 0x10e   : > { %10974 = vmatprep.subr.bf16.mxu1 %v13035_v55 }
 0x10f   : > { %11573 = vmatmul.mubr.bf16.gmra.mrb[16].mxu0 %v14577_v40 }
 0x110   : > { %11576 = vmatprep.mubr.bf16.mxu0 %v14615_v2 }
 0x111   : > { %10975 = vmatpush3.bf16.msra.mxu1 %v13035_v55  ;;  %v13038_v55 = vld [vmem:[%s15847_s3 + $0x450] sm:$0xff]  }
 0x112   : > { %10976 = vmatprep.subr.bf16.mxu1 %v13037_v47 }
 0x113   : > { %10945 = vmatmul.mubr.bf16.gmra.mrb[12].mxu1 %v16172_v43 }
 0x114   : > { %10948 = vmatprep.mubr.bf16.mxu1 %v14727_v8 }
 0x115   : > { %10977 = vmatpush3.bf16.msra.mxu1 %v13037_v47  ;;  %v16181_v47 = vld [vmem:[#allocation20_spill] sm:$0xff] }
 0x116   : > { %10978 = vmatprep.subr.bf16.mxu1 %v13039_v18  ;;  %v14783_v51 = vcombine.low %v16181_v47, %v13318_v24  ;;  %v13042_v47 = vld [vmem:[%s15847_s3 + $0x460] sm:$0xff]   ;;  %16190 = vst [vmem:[#allocation20_spill] sm:$0xff] %v14820_v37 }
 0x117   : > { %11577 = vmatmul.mubr.bf16.gmra.mrb[20].mxu0 %v14734_v12 }
 0x118   : > { %11580 = vmatprep.mubr.bf16.mxu0 %v14739_v32  ;;  %16182 = vst [vmem:[#allocation9_spill] sm:$0xff] %v14783_v51 }
 0x119   : > { %10979 = vmatpush3.bf16.msra.mxu1 %v13039_v18  ;;  %v16183_v18 = vld [vmem:[#allocation28_spill] sm:$0xff] }
 0x11a   : > { %11012 = vmatprep.subr.bf16.mxu1 %v13041_v19 }
 0x11b   : > { %10949 = vmatmul.mubr.bf16.gmra.mrb[16].mxu1 %v16175_v13 }
 0x11c   : > { %10952 = vmatprep.mubr.bf16.mxu1 %v14174_v59 }
 0x11f   : > { %11581 = vmatmul.mubr.bf16.gmra.mrb[24].mxu0 %v14749_v4 }
 0x120   : > { %11584 = vmatprep.mubr.bf16.mxu0 %v14754_v60 }
 0x123   : > { %10953 = vmatmul.mubr.bf16.gmra.mrb[20].mxu1 %v14194_v31 }
 0x124   : > { %10956 = vmatprep.mubr.bf16.mxu1 %v14761_v42 }
 0x127   : > { %11585 = vmatmul.mubr.bf16.gmra.mrb[28].mxu0 %v14765_v61  ;;  %v13045_v61 = vld [vmem:[%s15847_s3 + $0x110] sm:$0xff]  }
 0x128   : > { %11604 = vmatprep.mubr.bf16.mxu0 %v16178_v34 }
 0x12b   : > { %10957 = vmatmul.mubr.bf16.gmra.mrb[24].mxu1 %v14240_v28 }
 0x12c   : > { %10960 = vmatprep.mubr.bf16.mxu1 %v14248_v36 }
 0x12f   : > { %11605 = vmatmul.mubr.bf16.vlgmr.msra.gmra.mrb[0].mxu0 %v16179_v49 }
 0x130   : > { %11637 = vmatpush3.bf16.msra.mxu0 %v13034_v23  ;;  %11608 = vmatprep.mubr.bf16.mxu0 %v16180_v20  ;;  %v13040_v23 = vld [vmem:[%s15847_s3 + $0x458] sm:$0xff]  }
 0x131   : > { %11638 = vmatprep.subr.bf16.mxu0 %v13036_v62 }
 0x133   : > { %10961 = vmatmul.mubr.bf16.gmra.mrb[28].mxu1 %v14265_v30 }
 0x134   : > { %11639 = vmatpush3.bf16.msra.mxu0 %v13036_v62  ;;  %10980 = vmatprep.mubr.bf16.mxu1 %v13257_v3  ;;  %v13043_v62 = vld [vmem:[%s15847_s3 + $0x108] sm:$0xff]  }
 0x135   : > { %11640 = vmatprep.subr.bf16.mxu0 %v13038_v55 }
 0x137   : > { %11609 = vmatmul.mubr.bf16.gmra.mrb[4].mxu0 %v14783_v51  ;;  %v13050_v51 = vld [vmem:[%s15847_s3 + $0x480] sm:$0xff]  }
 0x138   : > { %11612 = vmatprep.mubr.bf16.mxu0 %v16183_v18  ;;  %11641 = vmatpush3.bf16.msra.mxu0 %v13038_v55  ;;  %v13044_v55 = vld [vmem:[%s15847_s3 + $0x468] sm:$0xff]  }
 0x139   : > { %11642 = vmatprep.subr.bf16.mxu0 %v13040_v23 }
 0x13b   : > { %10981 = vmatmul.mubr.bf16.vlgmr.msra.gmra.mrb[0].mxu1 %v13257_v3 }
 0x13c   : > { %11643 = vmatpush3.bf16.msra.mxu0 %v13040_v23  ;;  %11013 = vmatpush3.bf16.msra.mxu1 %v13041_v19  ;;  %v16187_v23 = vld [vmem:[#allocation4_spill] sm:$0xff] }
 0x13d   : > { %11644 = vmatprep.subr.bf16.mxu0 %v13042_v47  ;;  %10984 = vmatprep.mubr.bf16.mxu1 %v13257_v3  ;;  %v14810_v19 = vcombine.low %v16187_v23, %v16186_v38  ;;  %v13048_v38 = vld [vmem:[%s15847_s3 + $0x478] sm:$0xff]  }
 0x13e   : > { %11014 = vmatprep.subr.bf16.mxu1 %v13043_v62 }
 0x13f   : > { %11613 = vmatmul.mubr.bf16.gmra.mrb[8].mxu0 %v16184_v52  ;;  %16188 = vst [vmem:[#allocation15_spill] sm:$0xff] %v14810_v19 }
 0x140   : > { %11616 = vmatprep.mubr.bf16.mxu0 %v16185_v41  ;;  %11645 = vmatpush3.bf16.msra.mxu0 %v13042_v47  ;;  %v13049_v47 = vld [vmem:[%s15847_s3 + $0x120] sm:$0xff]  }
 0x141   : > { %11646 = vmatprep.subr.bf16.mxu0 %v13044_v55  ;;  %11015 = vmatpush3.bf16.msra.mxu1 %v13043_v62  ;;  %v16192_v62 = vld [vmem:[#allocation6_spill] sm:$0xff] }
 0x142   : > { %11016 = vmatprep.subr.bf16.mxu1 %v13045_v61  ;;  %v14833_v23 = vcombine.low %v16192_v62, %v16191_v9  ;;  %v16201_v62 = vld [vmem:[#allocation69_spill] sm:$0xff] }
 0x143   : > { %10985 = vmatmul.mubr.bf16.gmra.mrb[4].mxu1 %v13257_v3 }
 0x144   : > { %11647 = vmatpush3.bf16.msra.mxu0 %v13044_v55  ;;  %10988 = vmatprep.mubr.bf16.mxu1 %v14810_v19  ;;  %16193 = vst [vmem:[#allocation28_spill] sm:$0xff] %v14833_v23  ;;  %v16194_v55 = vld [vmem:[#allocation58_spill] sm:$0xff]  ;;  %v16195_v19 = vld [vmem:[#allocation13_spill] sm:$0xff] }
 0x145   : > { %11648 = vmatprep.subr.bf16.mxu0 %v13046_v6  ;;  %11017 = vmatpush3.bf16.msra.mxu1 %v13045_v61  ;;  %v16196_v61 = vld [vmem:[#allocation11_spill] sm:$0xff] }
 0x146   : > { %11018 = vmatprep.subr.bf16.mxu1 %v13047_v14  ;;  %v14838_v44 = vcombine.low %v16196_v61, %v16195_v19  ;;  %v16199_v19 = vld [vmem:[#allocation14_spill] sm:$0xff]  ;;  %v16202_v61 = vld [vmem:[#allocation21_spill] sm:$0xff] }
 0x147   : > { %11617 = vmatmul.mubr.bf16.gmra.mrb[12].mxu0 %v14820_v37  ;;  %v13051_v37 = vld [vmem:[%s15847_s3 + $0x128] sm:$0xff]   ;;  %v14854_v9 = vcombine.low %v16199_v19, %v16158_v35  ;;  %v14871_v35 = vcombine.low %v14619_v33, %v14623_v5  ;;  %v14894_v33 = vcombine.low %v14663_v10, %v14671_v63  ;;  %v16216_v10 = vld [vmem:[#allocation53_spill] sm:$0xff] }
 0x148   : > { %11620 = vmatprep.mubr.bf16.mxu0 %v16194_v55  ;;  %11649 = vmatpush3.bf16.msra.mxu0 %v13046_v6  ;;  %16197 = vst [vmem:[#allocation33_spill] sm:$0xff] %v14838_v44  ;;  %v13053_v6 = vld [vmem:[%s15847_s3 + $0x130] sm:$0xff]   ;;  %v16205_v19 = vld [vmem:[#allocation23_spill] sm:$0xff] }
 0x149   : > { %11650 = vmatprep.subr.bf16.mxu0 %v13048_v38  ;;  %11019 = vmatpush3.bf16.msra.mxu1 %v13047_v14  ;;  %v16198_v14 = vld [vmem:[#allocation63_spill] sm:$0xff]  ;;  %16200 = vst [vmem:[#allocation40_spill] sm:$0xff] %v14854_v9 }
 0x14a   : > { %11020 = vmatprep.subr.bf16.mxu1 %v13049_v47  ;;  %v16215_v63 = vld [vmem:[#allocation59_spill] sm:$0xff] }
 0x14b   : > { %10989 = vmatmul.mubr.bf16.gmra.mrb[8].mxu1 %v14833_v23  ;;  %v16203_v23 = vld [vmem:[#allocation19_spill] sm:$0xff] }
 0x14c   : > { %10992 = vmatprep.mubr.bf16.mxu1 %v14838_v44  ;;  %11651 = vmatpush3.bf16.msra.mxu0 %v13048_v38  ;;  %v14859_v20 = vcombine.low %v16203_v23, %v16202_v61  ;;  %v13055_v38 = vld [vmem:[%s15847_s3 + $0x138] sm:$0xff]   ;;  %v16207_v44 = vld [vmem:[#allocation27_spill] sm:$0xff] }
 0x14d   : > { %11684 = vmatprep.subr.bf16.mxu0 %v13050_v51  ;;  %11021 = vmatpush3.bf16.msra.mxu1 %v13049_v47  ;;  %v14866_v47 = vcombine.low %v14595_v25, %v13318_v24  ;;  %v16204_v23 = vld [vmem:[#allocation25_spill] sm:$0xff] }
 0x14e   : > { %11022 = vmatprep.subr.bf16.mxu1 %v13051_v37  ;;  %v14880_v61 = vcombine.low %v16205_v19, %v16204_v23  ;;  %v16209_v23 = vld [vmem:[#allocation32_spill] sm:$0xff] }
 0x14f   : > { %11621 = vmatmul.mubr.bf16.gmra.mrb[16].mxu0 %v16198_v14 }
 0x150   : > { %11624 = vmatprep.mubr.bf16.mxu0 %v16201_v62 }
 0x151   : > { %11023 = vmatpush3.bf16.msra.mxu1 %v13051_v37  ;;  %v13057_v37 = vld [vmem:[%s15847_s3 + $0x140] sm:$0xff]  }
 0x152   : > { %11024 = vmatprep.subr.bf16.mxu1 %v13053_v6 }
 0x153   : > { %10993 = vmatmul.mubr.bf16.gmra.mrb[12].mxu1 %v14854_v9  ;;  %v16206_v9 = vld [vmem:[#allocation29_spill] sm:$0xff] }
 0x154   : > { %10996 = vmatprep.mubr.bf16.mxu1 %v14859_v20  ;;  %v14885_v5 = vcombine.low %v16207_v44, %v16206_v9  ;;  %v14900_v44 = vcombine.low %v16209_v23, %v16168_v7  ;;  %v16211_v9 = vld [vmem:[#allocation52_spill] sm:$0xff]  ;;  %v14916_v7 = vcombine.low %v16216_v10, %v16215_v63  ;;  %v14931_v10 = vcombine.low %v14128_v26, %v14323_v58  ;;  %v16221_v63 = vld [vmem:[#allocation43_spill] sm:$0xff]  ;;  %v13056_v26 = vld [vmem:[%s15847_s3 + $0x498] sm:$0xff]  }
 0x155   : > { %11025 = vmatpush3.bf16.msra.mxu1 %v13053_v6  ;;  %v14889_v6 = vcombine.low %v14640_v53, %v14650_v29  ;;  %v14909_v29 = vcombine.low %v14675_v16, %v13318_v24  ;;  %v16218_v23 = vld [vmem:[#allocation60_spill] sm:$0xff]  ;;  %v13058_v58 = vld [vmem:[%s15847_s3 + $0x4a0] sm:$0xff]  }
 0x156   : > { %11026 = vmatprep.subr.bf16.mxu1 %v13055_v38  ;;  %16208 = vst [vmem:[#allocation5_spill] sm:$0xff] %v14885_v5  ;;  %16210 = vst [vmem:[#allocation4_spill] sm:$0xff] %v14900_v44  ;;  %v16226_v53 = vld [vmem:[#allocation10_spill] sm:$0xff] }
 0x157   : > { %11625 = vmatmul.mubr.bf16.gmra.mrb[20].mxu0 %v14866_v47  ;;  %16214 = vst [vmem:[#allocation7_spill] sm:$0xff] %v14909_v29  ;;  %16217 = vst [vmem:[#allocation6_spill] sm:$0xff] %v14916_v7 }
 0x158   : > { %11628 = vmatprep.mubr.bf16.mxu0 %v14871_v35  ;;  %16220 = vst [vmem:[#allocation13_spill] sm:$0xff] %v14931_v10 }
 0x159   : > { %11027 = vmatpush3.bf16.msra.mxu1 %v13055_v38  ;;  %v16212_v38 = vld [vmem:[#allocation51_spill] sm:$0xff] }
 0x15a   : > { %11060 = vmatprep.subr.bf16.mxu1 %v13057_v37  ;;  %v14905_v19 = vcombine.low %v16212_v38, %v16211_v9  ;;  %v14921_v9 = vcombine.low %v16218_v23, %v14124_v48  ;;  %v13052_v38 = vld [vmem:[%s15847_s3 + $0x488] sm:$0xff]   ;;  %v13054_v48 = vld [vmem:[%s15847_s3 + $0x490] sm:$0xff]   ;;  %v14939_v23 = vcombine.low %v16221_v63, %v14601_v56  ;;  %v13063_v63 = vld [vmem:[%s15847_s3 + $0x158] sm:$0xff]  }
 0x15b   : > { %10997 = vmatmul.mubr.bf16.gmra.mrb[16].mxu1 %v14880_v61 }
 0x15c   : > { %11000 = vmatprep.mubr.bf16.mxu1 %v14885_v5  ;;  %16213 = vst [vmem:[#allocation44_spill] sm:$0xff] %v14905_v19  ;;  %16219 = vst [vmem:[#allocation58_spill] sm:$0xff] %v14921_v9 }
 0x15d   : > { %16222 = vst [vmem:[#allocation11_spill] sm:$0xff] %v14939_v23 }
 0x15f   : > { %11629 = vmatmul.mubr.bf16.gmra.mrb[24].mxu0 %v14889_v6 }
 0x160   : > { %11632 = vmatprep.mubr.bf16.mxu0 %v14894_v33 }
 0x163   : > { %11001 = vmatmul.mubr.bf16.gmra.mrb[20].mxu1 %v14900_v44 }
 0x164   : > { %11004 = vmatprep.mubr.bf16.mxu1 %v14905_v19  ;;  %v16247_v19 = vld [vmem:[#allocation62_spill] sm:$0xff] }
 0x167   : > { %11633 = vmatmul.mubr.bf16.gmra.mrb[28].mxu0 %v14909_v29  ;;  %v16223_v29 = vld [vmem:[#allocation3_spill] sm:$0xff] }
 0x168   : > { %11652 = vmatprep.mubr.bf16.mxu0 %v16169_v11 }
 0x16b   : > { %11005 = vmatmul.mubr.bf16.gmra.mrb[24].mxu1 %v14916_v7  ;;  %v16246_v7 = vld [vmem:[#allocation65_spill] sm:$0xff] }
 0x16c   : > { %11008 = vmatprep.mubr.bf16.mxu1 %v14921_v9  ;;  %v16245_v9 = vld [vmem:[#allocation86_spill] sm:$0xff] }
 0x16f   : > { %11653 = vmatmul.mubr.bf16.vlgmr.msra.gmra.mrb[0].mxu0 %v16170_v0 }
 0x170   : > { %11685 = vmatpush3.bf16.msra.mxu0 %v13050_v51  ;;  %11656 = vmatprep.mubr.bf16.mxu0 %v16172_v43  ;;  %v13059_v51 = vld [vmem:[%s15847_s3 + $0x148] sm:$0xff]   ;;  %v16236_v43 = vld [vmem:[#allocation89_spill] sm:$0xff] }
 0x171   : > { %11686 = vmatprep.subr.bf16.mxu0 %v13052_v38 }
 0x173   : > { %11009 = vmatmul.mubr.bf16.gmra.mrb[28].mxu1 %v14931_v10  ;;  %v16240_v10 = vld [vmem:[#allocation94_spill] sm:$0xff] }
 0x174   : > { %11687 = vmatpush3.bf16.msra.mxu0 %v13052_v38  ;;  %11028 = vmatprep.mubr.bf16.mxu1 %v16223_v29  ;;  %v13060_v38 = vld [vmem:[%s15847_s3 + $0x4a8] sm:$0xff]   ;;  %v15021_v11 = vcombine.low %v16240_v10, %v14601_v56 }
 0x175   : > { %11688 = vmatprep.subr.bf16.mxu0 %v13054_v48  ;;  %v13068_v10 = vld [vmem:[%s15847_s3 + $0x4c8] sm:$0xff]  }
 0x176   : > { %16241 = vst [vmem:[#allocation69_spill] sm:$0xff] %v15021_v11 }
 0x177   : > { %11657 = vmatmul.mubr.bf16.gmra.mrb[4].mxu0 %v14939_v23  ;;  %v16234_v23 = vld [vmem:[#allocation30_spill] sm:$0xff] }
 0x178   : > { %11660 = vmatprep.mubr.bf16.mxu0 %v16175_v13  ;;  %11689 = vmatpush3.bf16.msra.mxu0 %v13054_v48  ;;  %v13061_v48 = vld [vmem:[%s15847_s3 + $0x150] sm:$0xff]  }
 0x179   : > { %11690 = vmatprep.subr.bf16.mxu0 %v13056_v26 }
 0x17b   : > { %11029 = vmatmul.mubr.bf16.vlgmr.msra.gmra.mrb[0].mxu1 %v16223_v29 }
 0x17c   : > { %11691 = vmatpush3.bf16.msra.mxu0 %v13056_v26  ;;  %11061 = vmatpush3.bf16.msra.mxu1 %v13057_v37  ;;  %v13062_v37 = vld [vmem:[%s15847_s3 + $0x4b0] sm:$0xff]   ;;  %v16224_v26 = vld [vmem:[#allocation66_spill] sm:$0xff] }
 0x17d   : > { %11692 = vmatprep.subr.bf16.mxu0 %v13058_v58  ;;  %11032 = vmatprep.mubr.bf16.mxu1 %v16223_v29  ;;  %v14972_v16 = vcombine.low %v16224_v26, %v14601_v56  ;;  %v16228_v26 = vld [vmem:[#allocation17_spill] sm:$0xff] }
 0x17e   : > { %11062 = vmatprep.subr.bf16.mxu1 %v13059_v51 }
 0x17f   : > { %11661 = vmatmul.mubr.bf16.gmra.mrb[8].mxu0 %v14174_v59  ;;  %16225 = vst [vmem:[#allocation63_spill] sm:$0xff] %v14972_v16 }
 0x180   : > { %11664 = vmatprep.mubr.bf16.mxu0 %v14194_v31  ;;  %11693 = vmatpush3.bf16.msra.mxu0 %v13058_v58  ;;  %v13064_v58 = vld [vmem:[%s15847_s3 + $0x4b8] sm:$0xff]  }
 0x181   : > { %11694 = vmatprep.subr.bf16.mxu0 %v13060_v38  ;;  %11063 = vmatpush3.bf16.msra.mxu1 %v13059_v51  ;;  %v13065_v51 = vld [vmem:[%s15847_s3 + $0x160] sm:$0xff]  }
 0x182   : > { %11064 = vmatprep.subr.bf16.mxu1 %v13061_v48 }
 0x183   : > { %11033 = vmatmul.mubr.bf16.gmra.mrb[4].mxu1 %v16223_v29 }
 0x184   : > { %11695 = vmatpush3.bf16.msra.mxu0 %v13060_v38  ;;  %11036 = vmatprep.mubr.bf16.mxu1 %v16226_v53  ;;  %v13066_v53 = vld [vmem:[%s15847_s3 + $0x4c0] sm:$0xff]   ;;  %v13067_v38 = vld [vmem:[%s15847_s3 + $0x168] sm:$0xff]  }
 0x185   : > { %11696 = vmatprep.subr.bf16.mxu0 %v13062_v37  ;;  %11065 = vmatpush3.bf16.msra.mxu1 %v13061_v48  ;;  %v16227_v48 = vld [vmem:[#allocation12_spill] sm:$0xff] }
 0x186   : > { %11066 = vmatprep.subr.bf16.mxu1 %v13063_v63 }
 0x187   : > { %11665 = vmatmul.mubr.bf16.gmra.mrb[12].mxu0 %v14972_v16  ;;  %v13073_v16 = vld [vmem:[%s15847_s3 + $0x180] sm:$0xff]  }
 0x188   : > { %11668 = vmatprep.mubr.bf16.mxu0 %v14240_v28  ;;  %11697 = vmatpush3.bf16.msra.mxu0 %v13062_v37  ;;  %v13069_v37 = vld [vmem:[%s15847_s3 + $0x170] sm:$0xff]  }
 0x189   : > { %11698 = vmatprep.subr.bf16.mxu0 %v13064_v58  ;;  %11067 = vmatpush3.bf16.msra.mxu1 %v13063_v63  ;;  %v13071_v63 = vld [vmem:[%s15847_s3 + $0x178] sm:$0xff]  }
 0x18a   : > { %11068 = vmatprep.subr.bf16.mxu1 %v13065_v51 }
 0x18b   : > { %11037 = vmatmul.mubr.bf16.gmra.mrb[8].mxu1 %v16227_v48  ;;  %v16229_v48 = vld [vmem:[#allocation76_spill] sm:$0xff] }
 0x18c   : > { %11040 = vmatprep.mubr.bf16.mxu1 %v16228_v26  ;;  %11699 = vmatpush3.bf16.msra.mxu0 %v13064_v58  ;;  %v15002_v58 = vcombine.low %v16229_v48, %v14601_v56  ;;  %v16232_v26 = vld [vmem:[#allocation24_spill] sm:$0xff]  ;;  %v16235_v48 = vld [vmem:[#allocation35_spill] sm:$0xff] }
 0x18d   : > { %11732 = vmatprep.subr.bf16.mxu0 %v13066_v53  ;;  %11069 = vmatpush3.bf16.msra.mxu1 %v13065_v51  ;;  %v16231_v51 = vld [vmem:[#allocation22_spill] sm:$0xff] }
 0x18e   : > { %11070 = vmatprep.subr.bf16.mxu1 %v13067_v38  ;;  %16230 = vst [vmem:[#allocation14_spill] sm:$0xff] %v15002_v58 }
 0x18f   : > { %11669 = vmatmul.mubr.bf16.gmra.mrb[16].mxu0 %v14248_v36 }
 0x190   : > { %11672 = vmatprep.mubr.bf16.mxu0 %v14265_v30 }
 0x191   : > { %11071 = vmatpush3.bf16.msra.mxu1 %v13067_v38  ;;  %v16233_v38 = vld [vmem:[#allocation84_spill] sm:$0xff] }
 0x192   : > { %11072 = vmatprep.subr.bf16.mxu1 %v13069_v37 }
 0x193   : > { %11041 = vmatmul.mubr.bf16.gmra.mrb[12].mxu1 %v16231_v51  ;;  %v16237_v51 = vld [vmem:[#allocation2_spill] sm:$0xff] }
 0x194   : > { %11044 = vmatprep.mubr.bf16.mxu1 %v16232_v26  ;;  %v16239_v26 = vld [vmem:[#allocation54_spill] sm:$0xff] }
 0x195   : > { %11073 = vmatpush3.bf16.msra.mxu1 %v13069_v37  ;;  %v16238_v37 = vld [vmem:[#allocation56_spill] sm:$0xff] }
 0x196   : > { %11074 = vmatprep.subr.bf16.mxu1 %v13071_v63  ;;  %v15017_v0 = vcombine.low %v16239_v26, %v16238_v37  ;;  %v15033_v26 = vcombine.low %v16247_v19, %v16246_v7  ;;  %v16248_v37 = vld [vmem:[#allocation67_spill] sm:$0xff]  ;;  %v13070_v19 = vld [vmem:[%s15847_s3 + $0x4d0] sm:$0xff]   ;;  %v13072_v7 = vld [vmem:[%s15847_s3 + $0x4d8] sm:$0xff]  }
 0x197   : > { %11673 = vmatmul.mubr.bf16.gmra.mrb[20].mxu0 %v15002_v58  ;;  %v16242_v58 = vld [vmem:[#allocation46_spill] sm:$0xff] }
 0x198   : > { %11676 = vmatprep.mubr.bf16.mxu0 %v16233_v38 }
 0x199   : > { %11075 = vmatpush3.bf16.msra.mxu1 %v13071_v63  ;;  %v16243_v63 = vld [vmem:[#allocation61_spill] sm:$0xff] }
 0x19a   : > { %11108 = vmatprep.subr.bf16.mxu1 %v13073_v16 }
 0x19b   : > { %11045 = vmatmul.mubr.bf16.gmra.mrb[16].mxu1 %v16234_v23 }
 0x19c   : > { %11048 = vmatprep.mubr.bf16.mxu1 %v16235_v48  ;;  %v16244_v48 = vld [vmem:[#allocation57_spill] sm:$0xff] }
 0x19d   : > { %v15028_v23 = vcombine.low %v16244_v48, %v16243_v63  ;;  %v15043_v48 = vcombine.low %v16248_v37, %v14595_v25  ;;  %v16250_v25 = vld [vmem:[#allocation93_spill] sm:$0xff]  ;;  %v13075_v63 = vld [vmem:[%s15847_s3 + $0x188] sm:$0xff]   ;;  %v13077_v37 = vld [vmem:[%s15847_s3 + $0x190] sm:$0xff]  }
 0x19f   : > { %11677 = vmatmul.mubr.bf16.gmra.mrb[24].mxu0 %v16236_v43  ;;  %16249 = vst [vmem:[#allocation21_spill] sm:$0xff] %v15043_v48 }
 0x1a0   : > { %11680 = vmatprep.mubr.bf16.mxu0 %v16237_v51 }
 0x1a3   : > { %11049 = vmatmul.mubr.bf16.gmra.mrb[20].mxu1 %v16242_v58 }
 0x1a4   : > { %11052 = vmatprep.mubr.bf16.mxu1 %v15017_v0 }
 0x1a7   : > { %11681 = vmatmul.mubr.bf16.gmra.mrb[28].mxu0 %v15021_v11 }
 0x1a8   : > { %11700 = vmatprep.mubr.bf16.mxu0 %v16245_v9 }
 0x1ab   : > { %11053 = vmatmul.mubr.bf16.gmra.mrb[24].mxu1 %v15028_v23 }
 0x1ac   : > { %11056 = vmatprep.mubr.bf16.mxu1 %v15033_v26 }
 0x1af   : > { %11701 = vmatmul.mubr.bf16.vlgmr.msra.gmra.mrb[0].mxu0 %v14477_v57 }
 0x1b0   : > { %11733 = vmatpush3.bf16.msra.mxu0 %v13066_v53  ;;  %11704 = vmatprep.mubr.bf16.mxu0 %v14500_v45  ;;  %v13074_v53 = vld [vmem:[%s15847_s3 + $0x4e0] sm:$0xff]  }
 0x1b1   : > { %11734 = vmatprep.subr.bf16.mxu0 %v13068_v10 }
 0x1b3   : > { %11057 = vmatmul.mubr.bf16.gmra.mrb[28].mxu1 %v15043_v48 }
 0x1b4   : > { %11735 = vmatpush3.bf16.msra.mxu0 %v13068_v10  ;;  %11076 = vmatprep.mubr.bf16.mxu1 %v14629_v54  ;;  %v13076_v10 = vld [vmem:[%s15847_s3 + $0x4e8] sm:$0xff]  }
 0x1b5   : > { %11736 = vmatprep.subr.bf16.mxu0 %v13070_v19 }
 0x1b7   : > { %11705 = vmatmul.mubr.bf16.gmra.mrb[4].mxu0 %v14538_v17 }
 0x1b8   : > { %11708 = vmatprep.mubr.bf16.mxu0 %v16250_v25  ;;  %11737 = vmatpush3.bf16.msra.mxu0 %v13070_v19  ;;  %v13079_v19 = vld [vmem:[%s15847_s3 + $0x198] sm:$0xff]  }
 0x1b9   : > { %11738 = vmatprep.subr.bf16.mxu0 %v13072_v7  ;;  %v16253_v25 = vld [vmem:[#allocation37_spill] sm:$0xff] }
 0x1bb   : > { %11077 = vmatmul.mubr.bf16.vlgmr.msra.gmra.mrb[0].mxu1 %v14629_v54 }
 0x1bc   : > { %11739 = vmatpush3.bf16.msra.mxu0 %v13072_v7  ;;  %11109 = vmatpush3.bf16.msra.mxu1 %v13073_v16  ;;  %v13078_v16 = vld [vmem:[%s15847_s3 + $0x4f0] sm:$0xff]   ;;  %v16251_v7 = vld [vmem:[#allocation74_spill] sm:$0xff] }
 0x1bd   : > { %11740 = vmatprep.subr.bf16.mxu0 %v13074_v53  ;;  %11080 = vmatprep.mubr.bf16.mxu1 %v14629_v54  ;;  %v15081_v11 = vcombine.low %v16120_v39, %v16251_v7  ;;  %v13082_v39 = vld [vmem:[%s15847_s3 + $0x500] sm:$0xff]  }
 0x1be   : > { %11110 = vmatprep.subr.bf16.mxu1 %v13075_v63 }
 0x1bf   : > { %11709 = vmatmul.mubr.bf16.gmra.mrb[8].mxu0 %v14567_v46  ;;  %16252 = vst [vmem:[#allocation19_spill] sm:$0xff] %v15081_v11 }
 0x1c0   : > { %11712 = vmatprep.mubr.bf16.mxu0 %v14577_v40  ;;  %11741 = vmatpush3.bf16.msra.mxu0 %v13074_v53  ;;  %v13080_v53 = vld [vmem:[%s15847_s3 + $0x4f8] sm:$0xff]  }
 0x1c1   : > { %11742 = vmatprep.subr.bf16.mxu0 %v13076_v10  ;;  %11111 = vmatpush3.bf16.msra.mxu1 %v13075_v63  ;;  %v13081_v63 = vld [vmem:[%s15847_s3 + $0x1a0] sm:$0xff]  }
 0x1c2   : > { %11112 = vmatprep.subr.bf16.mxu1 %v13077_v37 }
 0x1c3   : > { %11081 = vmatmul.mubr.bf16.gmra.mrb[4].mxu1 %v14629_v54 }
 0x1c4   : > { %11743 = vmatpush3.bf16.msra.mxu0 %v13076_v10  ;;  %11084 = vmatprep.mubr.bf16.mxu1 %v16253_v25  ;;  %v13083_v25 = vld [vmem:[%s15847_s3 + $0x1a8] sm:$0xff]   ;;  %v16254_v10 = vld [vmem:[#allocation38_spill] sm:$0xff] }
 0x1c5   : > { %11744 = vmatprep.subr.bf16.mxu0 %v13078_v16  ;;  %11113 = vmatpush3.bf16.msra.mxu1 %v13077_v37  ;;  %v16255_v37 = vld [vmem:[#allocation41_spill] sm:$0xff] }
 0x1c6   : > { %11114 = vmatprep.subr.bf16.mxu1 %v13079_v19 }
 0x1c7   : > { %11713 = vmatmul.mubr.bf16.gmra.mrb[12].mxu0 %v14615_v2 }
 0x1c8   : > { %11716 = vmatprep.mubr.bf16.mxu0 %v15081_v11  ;;  %11745 = vmatpush3.bf16.msra.mxu0 %v13078_v16  ;;  %v13085_v16 = vld [vmem:[%s15847_s3 + $0x1b0] sm:$0xff]  }
 0x1c9   : > { %11746 = vmatprep.subr.bf16.mxu0 %v13080_v53  ;;  %11115 = vmatpush3.bf16.msra.mxu1 %v13079_v19  ;;  %v13087_v19 = vld [vmem:[%s15847_s3 + $0x1b8] sm:$0xff]  }
 0x1ca   : > { %11116 = vmatprep.subr.bf16.mxu1 %v13081_v63 }
 0x1cb   : > { %11085 = vmatmul.mubr.bf16.gmra.mrb[8].mxu1 %v16254_v10  ;;  %v16256_v10 = vld [vmem:[#allocation45_spill] sm:$0xff] }
 0x1cc   : > { %11088 = vmatprep.mubr.bf16.mxu1 %v16255_v37  ;;  %11747 = vmatpush3.bf16.msra.mxu0 %v13080_v53  ;;  %v16257_v53 = vld [vmem:[#allocation48_spill] sm:$0xff] }
 0x1cd   : > { %11780 = vmatprep.subr.bf16.mxu0 %v13082_v39  ;;  %11117 = vmatpush3.bf16.msra.mxu1 %v13081_v63  ;;  %v13089_v63 = vld [vmem:[%s15847_s3 + $0x1c0] sm:$0xff]   ;;  %v16259_v37 = vld [vmem:[#allocation64_spill] sm:$0xff] }
 0x1ce   : > { %11118 = vmatprep.subr.bf16.mxu1 %v13083_v25 }
 0x1cf   : > { %11717 = vmatmul.mubr.bf16.gmra.mrb[16].mxu0 %v14739_v32 }
 0x1d0   : > { %11720 = vmatprep.mubr.bf16.mxu0 %v14749_v4  ;;  %v16262_v4 = vld [vmem:[#allocation26_spill] sm:$0xff] }
 0x1d1   : > { %11119 = vmatpush3.bf16.msra.mxu1 %v13083_v25  ;;  %v16258_v25 = vld [vmem:[#allocation50_spill] sm:$0xff] }
 0x1d2   : > { %11120 = vmatprep.subr.bf16.mxu1 %v13085_v16 }
 0x1d3   : > { %11089 = vmatmul.mubr.bf16.gmra.mrb[12].mxu1 %v16256_v10  ;;  %v16261_v10 = vld [vmem:[#allocation70_spill] sm:$0xff] }
 0x1d4   : > { %11092 = vmatprep.mubr.bf16.mxu1 %v16257_v53  ;;  %v16267_v53 = vld [vmem:[#allocation55_spill] sm:$0xff] }
 0x1d5   : > { %11121 = vmatpush3.bf16.msra.mxu1 %v13085_v16  ;;  %v16260_v16 = vld [vmem:[#allocation68_spill] sm:$0xff] }
 0x1d6   : > { %11122 = vmatprep.subr.bf16.mxu1 %v13087_v19 }
 0x1d7   : > { %11721 = vmatmul.mubr.bf16.gmra.mrb[20].mxu0 %v14754_v60  ;;  %v16263_v60 = vld [vmem:[#allocation71_spill] sm:$0xff] }
 0x1d8   : > { %11724 = vmatprep.mubr.bf16.mxu0 %v13257_v3 }
 0x1d9   : > { %11123 = vmatpush3.bf16.msra.mxu1 %v13087_v19  ;;  %v16264_v19 = vld [vmem:[#allocation72_spill] sm:$0xff] }
 0x1da   : > { %11156 = vmatprep.subr.bf16.mxu1 %v13089_v63 }
 0x1db   : > { %11093 = vmatmul.mubr.bf16.gmra.mrb[16].mxu1 %v16258_v25  ;;  %v16266_v25 = vld [vmem:[#allocation79_spill] sm:$0xff] }
 0x1dc   : > { %11096 = vmatprep.mubr.bf16.mxu1 %v16259_v37  ;;  %v13084_v37 = vld [vmem:[%s15847_s3 + $0x508] sm:$0xff]  }
 0x1df   : > { %11725 = vmatmul.mubr.bf16.gmra.mrb[24].mxu0 %v13257_v3 }
 0x1e0   : > { %11728 = vmatprep.mubr.bf16.mxu0 %v13257_v3 }
 0x1e3   : > { %11097 = vmatmul.mubr.bf16.gmra.mrb[20].mxu1 %v16260_v16  ;;  %v16265_v16 = vld [vmem:[#allocation77_spill] sm:$0xff] }
 0x1e4   : > { %11100 = vmatprep.mubr.bf16.mxu1 %v16261_v10  ;;  %v13086_v10 = vld [vmem:[%s15847_s3 + $0x510] sm:$0xff]  }
 0x1e7   : > { %11729 = vmatmul.mubr.bf16.gmra.mrb[28].mxu0 %v13257_v3 }
 0x1e8   : > { %11748 = vmatprep.mubr.bf16.mxu0 %v16262_v4  ;;  %v4126_v4 = vshrl.u32 %v16265_v16, 16 }
 0x1eb   : > { %11101 = vmatmul.mubr.bf16.gmra.mrb[24].mxu1 %v16263_v60  ;;  %v4129_v60 = vshll.u32 %v16265_v16, 16  ;;  %v16268_v16 = vld [vmem:[#allocation78_spill] sm:$0xff] }
 0x1ec   : > { %11104 = vmatprep.mubr.bf16.mxu1 %v16264_v19  ;;  %v4128_v19 = vrot.slane %v4126_v4, 4  ;;  %v4135_v48 = vshll.u32 %v16268_v16, 16  ;;  %v13101_v16 = vld [vmem:[%s15847_s3 + $0x1f0] sm:$0xff]  }
 0x1ed   : > { %v4131_v32 = vrot.slane %v4129_v60, 5 }
 0x1ee   : > { %v4137_v60 = vrot.slane %v4135_v48, 5  ;;  %v13094_v48 = vld [vmem:[%s15847_s3 + $0x530] sm:$0xff]  }
 0x1ef   : > { %11749 = vmatmul.mubr.bf16.vlgmr.msra.gmra.mrb[0].mxu0 %v16183_v18  ;;  %v4132_v11 = vor.u32 %v4131_v32, %v4128_v19  ;;  %v13092_v32 = vld [vmem:[%s15847_s3 + $0x528] sm:$0xff]  }
 0x1f0   : > { %11781 = vmatpush3.bf16.msra.mxu0 %v13082_v39  ;;  %11752 = vmatprep.mubr.bf16.mxu0 %v16184_v52  ;;  %v13088_v39 = vld [vmem:[%s15847_s3 + $0x518] sm:$0xff]  }
 0x1f1   : > { %11782 = vmatprep.subr.bf16.mxu0 %v13084_v37  ;;  %v4133_v4 = vrot.slane %v4132_v11, 4 }
 0x1f3   : > { %11105 = vmatmul.mubr.bf16.gmra.mrb[28].mxu1 %v16266_v25  ;;  %v13091_v25 = vld [vmem:[%s15847_s3 + $0x1c8] sm:$0xff]   ;;  %v15161_v11 = vsel %vm13309_vm2, %v4133_v4, %v4137_v60  ;;  %v13105_v4 = vld [vmem:[%s15847_s3 + $0x200] sm:$0xff]   ;;  %v13102_v60 = vld [vmem:[%s15847_s3 + $0x550] sm:$0xff]  }
 0x1f4   : > { %11783 = vmatpush3.bf16.msra.mxu0 %v13084_v37  ;;  %11124 = vmatprep.mubr.bf16.mxu1 %v13257_v3  ;;  %v13090_v37 = vld [vmem:[%s15847_s3 + $0x520] sm:$0xff]   ;;  %v15172_v19 = vcombine.low %v13318_v24, %v15161_v11 }
 0x1f5   : > { %11784 = vmatprep.subr.bf16.mxu0 %v13086_v10  ;;  %v13098_v24 = vld [vmem:[%s15847_s3 + $0x540] sm:$0xff]  }
 0x1f7   : > { %11753 = vmatmul.mubr.bf16.gmra.mrb[4].mxu0 %v16185_v41 }
 0x1f8   : > { %11756 = vmatprep.mubr.bf16.mxu0 %v16267_v53  ;;  %11785 = vmatpush3.bf16.msra.mxu0 %v13086_v10  ;;  %v13093_v10 = vld [vmem:[%s15847_s3 + $0x1d0] sm:$0xff]  }
 0x1f9   : > { %11786 = vmatprep.subr.bf16.mxu0 %v13088_v39 }
 0x1fb   : > { %11125 = vmatmul.mubr.bf16.vlgmr.msra.gmra.mrb[0].mxu1 %v13257_v3 }
 0x1fc   : > { %11787 = vmatpush3.bf16.msra.mxu0 %v13088_v39  ;;  %11157 = vmatpush3.bf16.msra.mxu1 %v13089_v63  ;;  %v13095_v63 = vld [vmem:[%s15847_s3 + $0x1d8] sm:$0xff]   ;;  %v13099_v39 = vld [vmem:[%s15847_s3 + $0x1e8] sm:$0xff]  }
 0x1fd   : > { %11788 = vmatprep.subr.bf16.mxu0 %v13090_v37  ;;  %11128 = vmatprep.mubr.bf16.mxu1 %v13257_v3 }
 0x1fe   : > { %11158 = vmatprep.subr.bf16.mxu1 %v13091_v25 }
 0x1ff   : > { %11757 = vmatmul.mubr.bf16.gmra.mrb[8].mxu0 %v16194_v55 }
 0x200   : > { %11760 = vmatprep.mubr.bf16.mxu0 %v16198_v14  ;;  %11789 = vmatpush3.bf16.msra.mxu0 %v13090_v37  ;;  %v13103_v37 = vld [vmem:[%s15847_s3 + $0x1f8] sm:$0xff]  }
 0x201   : > { %11790 = vmatprep.subr.bf16.mxu0 %v13092_v32  ;;  %11159 = vmatpush3.bf16.msra.mxu1 %v13091_v25  ;;  %v13097_v25 = vld [vmem:[%s15847_s3 + $0x1e0] sm:$0xff]  }
 0x202   : > { %11160 = vmatprep.subr.bf16.mxu1 %v13093_v10 }
 0x203   : > { %11129 = vmatmul.mubr.bf16.gmra.mrb[4].mxu1 %v13257_v3 }
 0x204   : > { %11791 = vmatpush3.bf16.msra.mxu0 %v13092_v32  ;;  %11132 = vmatprep.mubr.bf16.mxu1 %v14269_v1  ;;  %v13104_v32 = vld [vmem:[%s15847_s3 + $0x558] sm:$0xff]  }
 0x205   : > { %11792 = vmatprep.subr.bf16.mxu0 %v13094_v48  ;;  %11161 = vmatpush3.bf16.msra.mxu1 %v13093_v10  ;;  %v13106_v10 = vld [vmem:[%s15847_s3 + $0x560] sm:$0xff]  }
 0x206   : > { %11162 = vmatprep.subr.bf16.mxu1 %v13095_v63 }
 0x207   : > { %11761 = vmatmul.mubr.bf16.gmra.mrb[12].mxu0 %v16201_v62 }
 0x208   : > { %11764 = vmatprep.mubr.bf16.mxu0 %v15172_v19  ;;  %11793 = vmatpush3.bf16.msra.mxu0 %v13094_v48  ;;  %v13107_v48 = vld [vmem:[%s15847_s3 + $0x208] sm:$0xff]  }
 0x209   : > { %11794 = vmatprep.subr.bf16.mxu0 %v13096_v22  ;;  %11163 = vmatpush3.bf16.msra.mxu1 %v13095_v63  ;;  %v13108_v63 = vld [vmem:[%s15847_s3 + $0x568] sm:$0xff]  }
 0x20a   : > { %11164 = vmatprep.subr.bf16.mxu1 %v13097_v25 }
 0x20b   : > { %11133 = vmatmul.mubr.bf16.gmra.mrb[8].mxu1 %v14273_v50 }
 0x20c   : > { %11136 = vmatprep.mubr.bf16.mxu1 %v14288_v27  ;;  %11795 = vmatpush3.bf16.msra.mxu0 %v13096_v22  ;;  %v13109_v22 = vld [vmem:[%s15847_s3 + $0x210] sm:$0xff]  }
 0x20d   : > { %11828 = vmatprep.subr.bf16.mxu0 %v13098_v24  ;;  %11165 = vmatpush3.bf16.msra.mxu1 %v13097_v25  ;;  %v13110_v25 = vld [vmem:[%s15847_s3 + $0x570] sm:$0xff]  }
 0x20e   : > { %11166 = vmatprep.subr.bf16.mxu1 %v13099_v39 }
 0x20f   : > { %11765 = vmatmul.mubr.bf16.gmra.mrb[16].mxu0 %v14871_v35 }
 0x210   : > { %11768 = vmatprep.mubr.bf16.mxu0 %v14889_v6 }
 0x211   : > { %11167 = vmatpush3.bf16.msra.mxu1 %v13099_v39  ;;  %v16269_v39 = vld [vmem:[#allocation82_spill] sm:$0xff] }
 0x212   : > { %11168 = vmatprep.subr.bf16.mxu1 %v13101_v16 }
 0x213   : > { %11137 = vmatmul.mubr.bf16.gmra.mrb[12].mxu1 %v14611_v15  ;;  %v13100_v15 = vld [vmem:[%s15847_s3 + $0x548] sm:$0xff]  }
 0x214   : > { %11140 = vmatprep.mubr.bf16.mxu1 %v14477_v57 }
 0x215   : > { %11169 = vmatpush3.bf16.msra.mxu1 %v13101_v16  ;;  %v15256_v16 = vcombine.low %v14601_v56, %v16269_v39  ;;  %v13114_v56 = vld [vmem:[%s15847_s3 + $0x580] sm:$0xff]   ;;  %v13120_v39 = vld [vmem:[%s15847_s3 + $0x598] sm:$0xff]  }
 0x216   : > { %11170 = vmatprep.subr.bf16.mxu1 %v13103_v37 }
 0x217   : > { %11769 = vmatmul.mubr.bf16.gmra.mrb[20].mxu0 %v14894_v33 }
 0x218   : > { %11772 = vmatprep.mubr.bf16.mxu0 %v16223_v29 }
 0x219   : > { %11171 = vmatpush3.bf16.msra.mxu1 %v13103_v37  ;;  %v13112_v37 = vld [vmem:[%s15847_s3 + $0x578] sm:$0xff]  }
 0x21a   : > { %11204 = vmatprep.subr.bf16.mxu1 %v13105_v4 }
 0x21b   : > { %11141 = vmatmul.mubr.bf16.gmra.mrb[16].mxu1 %v14500_v45 }
 0x21c   : > { %11144 = vmatprep.mubr.bf16.mxu1 %v14538_v17 }
 0x21f   : > { %11773 = vmatmul.mubr.bf16.gmra.mrb[24].mxu0 %v16223_v29 }
 0x220   : > { %11776 = vmatprep.mubr.bf16.mxu0 %v16223_v29 }
 0x223   : > { %11145 = vmatmul.mubr.bf16.gmra.mrb[20].mxu1 %v14700_v21 }
 0x224   : > { %11148 = vmatprep.mubr.bf16.mxu1 %v14567_v46 }
 0x227   : > { %11777 = vmatmul.mubr.bf16.gmra.mrb[28].mxu0 %v16223_v29 }
 0x228   : > { %11796 = vmatprep.mubr.bf16.mxu0 %v14727_v8 }
 0x22b   : > { %11149 = vmatmul.mubr.bf16.gmra.mrb[24].mxu1 %v14577_v40 }
 0x22c   : > { %11152 = vmatprep.mubr.bf16.mxu1 %v14615_v2 }
 0x22f   : > { %11797 = vmatmul.mubr.bf16.vlgmr.msra.gmra.mrb[0].mxu0 %v16175_v13 }
 0x230   : > { %11829 = vmatpush3.bf16.msra.mxu0 %v13098_v24  ;;  %11800 = vmatprep.mubr.bf16.mxu0 %v14174_v59  ;;  %v13111_v24 = vld [vmem:[%s15847_s3 + $0x218] sm:$0xff]  }
 0x231   : > { %11830 = vmatprep.subr.bf16.mxu0 %v13100_v15 }
 0x233   : > { %11153 = vmatmul.mubr.bf16.gmra.mrb[28].mxu1 %v14734_v12 }
 0x234   : > { %11831 = vmatpush3.bf16.msra.mxu0 %v13100_v15  ;;  %11172 = vmatprep.mubr.bf16.mxu1 %v16223_v29  ;;  %v13115_v15 = vld [vmem:[%s15847_s3 + $0x228] sm:$0xff]  }
 0x235   : > { %11832 = vmatprep.subr.bf16.mxu0 %v13102_v60 }
 0x237   : > { %11801 = vmatmul.mubr.bf16.gmra.mrb[4].mxu0 %v14194_v31 }
 0x238   : > { %11804 = vmatprep.mubr.bf16.mxu0 %v14761_v42  ;;  %11833 = vmatpush3.bf16.msra.mxu0 %v13102_v60  ;;  %v16270_v60 = vld [vmem:[#allocation18_spill] sm:$0xff] }
 0x239   : > { %11834 = vmatprep.subr.bf16.mxu0 %v13104_v32 }
 0x23b   : > { %11173 = vmatmul.mubr.bf16.vlgmr.msra.gmra.mrb[0].mxu1 %v16223_v29 }
 0x23c   : > { %11835 = vmatpush3.bf16.msra.mxu0 %v13104_v32  ;;  %11205 = vmatpush3.bf16.msra.mxu1 %v13105_v4  ;;  %v13113_v4 = vld [vmem:[%s15847_s3 + $0x220] sm:$0xff]   ;;  %v13117_v32 = vld [vmem:[%s15847_s3 + $0x230] sm:$0xff]  }
 0x23d   : > { %11836 = vmatprep.subr.bf16.mxu0 %v13106_v10  ;;  %11176 = vmatprep.mubr.bf16.mxu1 %v16223_v29 }
 0x23e   : > { %11206 = vmatprep.subr.bf16.mxu1 %v13107_v48 }
 0x23f   : > { %11805 = vmatmul.mubr.bf16.gmra.mrb[8].mxu0 %v14240_v28 }
 0x240   : > { %11808 = vmatprep.mubr.bf16.mxu0 %v14248_v36  ;;  %11837 = vmatpush3.bf16.msra.mxu0 %v13106_v10  ;;  %v13119_v10 = vld [vmem:[%s15847_s3 + $0x238] sm:$0xff]  }
 0x241   : > { %11838 = vmatprep.subr.bf16.mxu0 %v13108_v63  ;;  %11207 = vmatpush3.bf16.msra.mxu1 %v13107_v48  ;;  %v16271_v48 = vld [vmem:[#allocation9_spill] sm:$0xff] }
 0x242   : > { %11208 = vmatprep.subr.bf16.mxu1 %v13109_v22 }
 0x243   : > { %11177 = vmatmul.mubr.bf16.gmra.mrb[4].mxu1 %v16223_v29 }
 0x244   : > { %11839 = vmatpush3.bf16.msra.mxu0 %v13108_v63  ;;  %11180 = vmatprep.mubr.bf16.mxu1 %v16178_v34  ;;  %v13121_v63 = vld [vmem:[%s15847_s3 + $0x240] sm:$0xff]  }
 0x245   : > { %11840 = vmatprep.subr.bf16.mxu0 %v13110_v25  ;;  %11209 = vmatpush3.bf16.msra.mxu1 %v13109_v22  ;;  %v16272_v22 = vld [vmem:[#allocation20_spill] sm:$0xff] }
 0x246   : > { %11210 = vmatprep.subr.bf16.mxu1 %v13111_v24 }
 0x247   : > { %11809 = vmatmul.mubr.bf16.gmra.mrb[12].mxu0 %v14265_v30 }
 0x248   : > { %11812 = vmatprep.mubr.bf16.mxu0 %v15256_v16  ;;  %11841 = vmatpush3.bf16.msra.mxu0 %v13110_v25  ;;  %v13116_v25 = vld [vmem:[%s15847_s3 + $0x588] sm:$0xff]  }
 0x249   : > { %11842 = vmatprep.subr.bf16.mxu0 %v13112_v37  ;;  %11211 = vmatpush3.bf16.msra.mxu1 %v13111_v24  ;;  %v13118_v24 = vld [vmem:[%s15847_s3 + $0x590] sm:$0xff]  }
 0x24a   : > { %11212 = vmatprep.subr.bf16.mxu1 %v13113_v4 }
 0x24b   : > { %11181 = vmatmul.mubr.bf16.gmra.mrb[8].mxu1 %v16179_v49 }
 0x24c   : > { %11184 = vmatprep.mubr.bf16.mxu1 %v16270_v60  ;;  %11843 = vmatpush3.bf16.msra.mxu0 %v13112_v37  ;;  %v16273_v37 = vld [vmem:[#allocation44_spill] sm:$0xff] }
 0x24d   : > { %11876 = vmatprep.subr.bf16.mxu0 %v13114_v56  ;;  %11213 = vmatpush3.bf16.msra.mxu1 %v13113_v4  ;;  %v13122_v4 = vld [vmem:[%s15847_s3 + $0x5a0] sm:$0xff]  }
 0x24e   : > { %11214 = vmatprep.subr.bf16.mxu1 %v13115_v15 }
 0x24f   : > { %11813 = vmatmul.mubr.bf16.gmra.mrb[16].mxu0 %v16233_v38 }
 0x250   : > { %11816 = vmatprep.mubr.bf16.mxu0 %v16236_v43 }
 0x251   : > { %11215 = vmatpush3.bf16.msra.mxu1 %v13115_v15  ;;  %v13124_v15 = vld [vmem:[%s15847_s3 + $0x5a8] sm:$0xff]  }
 0x252   : > { %11216 = vmatprep.subr.bf16.mxu1 %v13117_v32 }
 0x253   : > { %11185 = vmatmul.mubr.bf16.gmra.mrb[12].mxu1 %v16271_v48  ;;  %v16275_v48 = vld [vmem:[#allocation58_spill] sm:$0xff] }
 0x254   : > { %11188 = vmatprep.mubr.bf16.mxu1 %v16183_v18 }
 0x255   : > { %11217 = vmatpush3.bf16.msra.mxu1 %v13117_v32  ;;  %v13125_v32 = vld [vmem:[%s15847_s3 + $0x250] sm:$0xff]  }
 0x256   : > { %11218 = vmatprep.subr.bf16.mxu1 %v13119_v10 }
 0x257   : > { %11817 = vmatmul.mubr.bf16.gmra.mrb[20].mxu0 %v16237_v51 }
 0x258   : > { %11820 = vmatprep.mubr.bf16.mxu0 %v14629_v54 }
 0x259   : > { %11219 = vmatpush3.bf16.msra.mxu1 %v13119_v10  ;;  %v16274_v10 = vld [vmem:[#allocation6_spill] sm:$0xff] }
 0x25a   : > { %11252 = vmatprep.subr.bf16.mxu1 %v13121_v63 }
 0x25b   : > { %11189 = vmatmul.mubr.bf16.gmra.mrb[16].mxu1 %v16184_v52 }
 0x25c   : > { %11192 = vmatprep.mubr.bf16.mxu1 %v16185_v41 }
 0x25f   : > { %11821 = vmatmul.mubr.bf16.gmra.mrb[24].mxu0 %v14629_v54 }
 0x260   : > { %11824 = vmatprep.mubr.bf16.mxu0 %v14629_v54 }
 0x263   : > { %11193 = vmatmul.mubr.bf16.gmra.mrb[20].mxu1 %v16272_v22 }
 0x264   : > { %11196 = vmatprep.mubr.bf16.mxu1 %v16194_v55 }
 0x267   : > { %11825 = vmatmul.mubr.bf16.gmra.mrb[28].mxu0 %v14629_v54 }
 0x268   : > { %11844 = vmatprep.mubr.bf16.mxu0 %v14859_v20 }
 0x26b   : > { %11197 = vmatmul.mubr.bf16.gmra.mrb[24].mxu1 %v16198_v14 }
 0x26c   : > { %11200 = vmatprep.mubr.bf16.mxu1 %v16201_v62 }
 0x26f   : > { %11845 = vmatmul.mubr.bf16.vlgmr.msra.gmra.mrb[0].mxu0 %v14880_v61 }
 0x270   : > { %11877 = vmatpush3.bf16.msra.mxu0 %v13114_v56  ;;  %11848 = vmatprep.mubr.bf16.mxu0 %v14885_v5  ;;  %v13123_v56 = vld [vmem:[%s15847_s3 + $0x248] sm:$0xff]   ;;  %v13133_v5 = vld [vmem:[%s15847_s3 + $0x270] sm:$0xff]  }
 0x271   : > { %11878 = vmatprep.subr.bf16.mxu0 %v13116_v25 }
 0x273   : > { %11201 = vmatmul.mubr.bf16.gmra.mrb[28].mxu1 %v14866_v47 }
 0x274   : > { %11879 = vmatpush3.bf16.msra.mxu0 %v13116_v25  ;;  %11220 = vmatprep.mubr.bf16.mxu1 %v14629_v54  ;;  %v13127_v25 = vld [vmem:[%s15847_s3 + $0x258] sm:$0xff]  }
 0x275   : > { %11880 = vmatprep.subr.bf16.mxu0 %v13118_v24 }
 0x277   : > { %11849 = vmatmul.mubr.bf16.gmra.mrb[4].mxu0 %v14900_v44  ;;  %v16282_v44 = vld [vmem:[#allocation39_spill] sm:$0xff] }
 0x278   : > { %11852 = vmatprep.mubr.bf16.mxu0 %v16273_v37  ;;  %11881 = vmatpush3.bf16.msra.mxu0 %v13118_v24  ;;  %v16276_v24 = vld [vmem:[#allocation75_spill] sm:$0xff] }
 0x279   : > { %11882 = vmatprep.subr.bf16.mxu0 %v13120_v39 }
 0x27b   : > { %11221 = vmatmul.mubr.bf16.vlgmr.msra.gmra.mrb[0].mxu1 %v14629_v54 }
 0x27c   : > { %11883 = vmatpush3.bf16.msra.mxu0 %v13120_v39  ;;  %11253 = vmatpush3.bf16.msra.mxu1 %v13121_v63  ;;  %v13126_v63 = vld [vmem:[%s15847_s3 + $0x5b0] sm:$0xff]   ;;  %v15340_v39 = vcombine.low %v16251_v7, %v16276_v24  ;;  %v13130_v7 = vld [vmem:[%s15847_s3 + $0x5c0] sm:$0xff]  }
 0x27d   : > { %11884 = vmatprep.subr.bf16.mxu0 %v13122_v4  ;;  %11224 = vmatprep.mubr.bf16.mxu1 %v14629_v54  ;;  %v16281_v24 = vld [vmem:[#allocation80_spill] sm:$0xff] }
 0x27e   : > { %11254 = vmatprep.subr.bf16.mxu1 %v13123_v56  ;;  %16277 = vst [vmem:[#allocation25_spill] sm:$0xff] %v15340_v39 }
 0x27f   : > { %11853 = vmatmul.mubr.bf16.gmra.mrb[8].mxu0 %v16274_v10  ;;  %v16279_v10 = vld [vmem:[#allocation13_spill] sm:$0xff] }
 0x280   : > { %11856 = vmatprep.mubr.bf16.mxu0 %v16275_v48  ;;  %11885 = vmatpush3.bf16.msra.mxu0 %v13122_v4  ;;  %v16278_v48 = vld [vmem:[#allocation36_spill] sm:$0xff]  ;;  %v13128_v4 = vld [vmem:[%s15847_s3 + $0x5b8] sm:$0xff]  }
 0x281   : > { %11886 = vmatprep.subr.bf16.mxu0 %v13124_v15  ;;  %11255 = vmatpush3.bf16.msra.mxu1 %v13123_v56  ;;  %v13129_v56 = vld [vmem:[%s15847_s3 + $0x260] sm:$0xff]  }
 0x282   : > { %11256 = vmatprep.subr.bf16.mxu1 %v13125_v32 }
 0x283   : > { %11225 = vmatmul.mubr.bf16.gmra.mrb[4].mxu1 %v14629_v54 }
 0x284   : > { %11887 = vmatpush3.bf16.msra.mxu0 %v13124_v15  ;;  %11228 = vmatprep.mubr.bf16.mxu1 %v16278_v48  ;;  %v13131_v15 = vld [vmem:[%s15847_s3 + $0x268] sm:$0xff]  }
 0x285   : > { %11888 = vmatprep.subr.bf16.mxu0 %v13126_v63  ;;  %11257 = vmatpush3.bf16.msra.mxu1 %v13125_v32  ;;  %v16280_v32 = vld [vmem:[#allocation81_spill] sm:$0xff] }
 0x286   : > { %11258 = vmatprep.subr.bf16.mxu1 %v13127_v25  ;;  %v15359_v37 = vcombine.low %v16281_v24, %v16280_v32  ;;  %v16287_v32 = vld [vmem:[#allocation91_spill] sm:$0xff]  ;;  %v13137_v24 = vld [vmem:[%s15847_s3 + $0x280] sm:$0xff]  }
 0x287   : > { %11857 = vmatmul.mubr.bf16.gmra.mrb[12].mxu0 %v16279_v10  ;;  %v16283_v10 = vld [vmem:[#allocation88_spill] sm:$0xff] }
 0x288   : > { %11860 = vmatprep.mubr.bf16.mxu0 %v15340_v39  ;;  %11889 = vmatpush3.bf16.msra.mxu0 %v13126_v63  ;;  %v16284_v39 = vld [vmem:[#allocation87_spill] sm:$0xff] }
 0x289   : > { %11890 = vmatprep.subr.bf16.mxu0 %v13128_v4  ;;  %11259 = vmatpush3.bf16.msra.mxu1 %v13127_v25  ;;  %v15364_v63 = vcombine.low %v16284_v39, %v16283_v10  ;;  %v16285_v25 = vld [vmem:[#allocation42_spill] sm:$0xff]  ;;  %v13135_v10 = vld [vmem:[%s15847_s3 + $0x278] sm:$0xff]   ;;  %v16286_v39 = vld [vmem:[#allocation92_spill] sm:$0xff] }
 0x28a   : > { %11260 = vmatprep.subr.bf16.mxu1 %v13129_v56 }
 0x28b   : > { %11229 = vmatmul.mubr.bf16.gmra.mrb[8].mxu1 %v16282_v44 }
 0x28c   : > { %11232 = vmatprep.mubr.bf16.mxu1 %v16285_v25  ;;  %11891 = vmatpush3.bf16.msra.mxu0 %v13128_v4  ;;  %v15377_v4 = vcombine.low %v16287_v32, %v16286_v39  ;;  %v16292_v39 = vld [vmem:[#allocation30_spill] sm:$0xff]  ;;  %v16293_v32 = vld [vmem:[#allocation35_spill] sm:$0xff] }
 0x28d   : > { %11924 = vmatprep.subr.bf16.mxu0 %v13130_v7  ;;  %11261 = vmatpush3.bf16.msra.mxu1 %v13129_v56  ;;  %v16289_v56 = vld [vmem:[#allocation11_spill] sm:$0xff] }
 0x28e   : > { %11262 = vmatprep.subr.bf16.mxu1 %v13131_v15  ;;  %16288 = vst [vmem:[#allocation23_spill] sm:$0xff] %v15377_v4 }
 0x28f   : > { %11861 = vmatmul.mubr.bf16.gmra.mrb[16].mxu0 %v15359_v37 }
 0x290   : > { %11864 = vmatprep.mubr.bf16.mxu0 %v15364_v63 }
 0x291   : > { %11263 = vmatpush3.bf16.msra.mxu1 %v13131_v15  ;;  %v16291_v15 = vld [vmem:[#allocation24_spill] sm:$0xff] }
 0x292   : > { %11264 = vmatprep.subr.bf16.mxu1 %v13133_v5 }
 0x293   : > { %11233 = vmatmul.mubr.bf16.gmra.mrb[12].mxu1 %v16289_v56  ;;  %v13134_v56 = vld [vmem:[%s15847_s3 + $0x5d0] sm:$0xff]  }
 0x294   : > { %11236 = vmatprep.mubr.bf16.mxu1 %v16175_v13 }
 0x295   : > { %11265 = vmatpush3.bf16.msra.mxu1 %v13133_v5  ;;  %v16290_v5 = vld [vmem:[#allocation63_spill] sm:$0xff] }
 0x296   : > { %11266 = vmatprep.subr.bf16.mxu1 %v13135_v10 }
 0x297   : > { %11865 = vmatmul.mubr.bf16.gmra.mrb[20].mxu0 %v15377_v4  ;;  %v13136_v4 = vld [vmem:[%s15847_s3 + $0x5d8] sm:$0xff]  }
 0x298   : > { %11868 = vmatprep.mubr.bf16.mxu0 %v13257_v3 }
 0x299   : > { %11267 = vmatpush3.bf16.msra.mxu1 %v13135_v10  ;;  %v13132_v10 = vld [vmem:[%s15847_s3 + $0x5c8] sm:$0xff]  }
 0x29a   : > { %11300 = vmatprep.subr.bf16.mxu1 %v13137_v24 }
 0x29b   : > { %11237 = vmatmul.mubr.bf16.gmra.mrb[16].mxu1 %v14174_v59 }
 0x29c   : > { %11240 = vmatprep.mubr.bf16.mxu1 %v14194_v31 }
 0x29f   : > { %11869 = vmatmul.mubr.bf16.gmra.mrb[24].mxu0 %v13257_v3 }
 0x2a0   : > { %11872 = vmatprep.mubr.bf16.mxu0 %v13257_v3 }
 0x2a3   : > { %11241 = vmatmul.mubr.bf16.gmra.mrb[20].mxu1 %v16290_v5  ;;  %v16294_v5 = vld [vmem:[#allocation14_spill] sm:$0xff] }
 0x2a4   : > { %11244 = vmatprep.mubr.bf16.mxu1 %v14240_v28 }
 0x2a7   : > { %11873 = vmatmul.mubr.bf16.gmra.mrb[28].mxu0 %v13257_v3 }
 0x2a8   : > { %11892 = vmatprep.mubr.bf16.mxu0 %v16291_v15  ;;  %v16295_v15 = vld [vmem:[#allocation73_spill] sm:$0xff] }
 0x2ab   : > { %11245 = vmatmul.mubr.bf16.gmra.mrb[24].mxu1 %v14248_v36 }
 0x2ac   : > { %11248 = vmatprep.mubr.bf16.mxu1 %v14265_v30 }
 0x2af   : > { %11893 = vmatmul.mubr.bf16.vlgmr.msra.gmra.mrb[0].mxu0 %v16292_v39  ;;  %v13141_v39 = vld [vmem:[%s15847_s3 + $0x290] sm:$0xff]  }
 0x2b0   : > { %11925 = vmatpush3.bf16.msra.mxu0 %v13130_v7  ;;  %11896 = vmatprep.mubr.bf16.mxu0 %v16293_v32  ;;  %v13138_v7 = vld [vmem:[%s15847_s3 + $0x5e0] sm:$0xff]   ;;  %v13144_v32 = vld [vmem:[%s15847_s3 + $0x5f8] sm:$0xff]  }
 0x2b1   : > { %11926 = vmatprep.subr.bf16.mxu0 %v13132_v10 }
 0x2b3   : > { %11249 = vmatmul.mubr.bf16.gmra.mrb[28].mxu1 %v16294_v5 }
 0x2b4   : > { %11927 = vmatpush3.bf16.msra.mxu0 %v13132_v10  ;;  %11268 = vmatprep.mubr.bf16.mxu1 %v16295_v15  ;;  %v13139_v10 = vld [vmem:[%s15847_s3 + $0x288] sm:$0xff]   ;;  %v16297_v15 = vld [vmem:[#allocation21_spill] sm:$0xff] }
 0x2b5   : > { %11928 = vmatprep.subr.bf16.mxu0 %v13134_v56 }
 0x2b7   : > { %11897 = vmatmul.mubr.bf16.gmra.mrb[4].mxu0 %v16242_v58  ;;  %v13140_v58 = vld [vmem:[%s15847_s3 + $0x5e8] sm:$0xff]  }
 0x2b8   : > { %11900 = vmatprep.mubr.bf16.mxu0 %v15017_v0  ;;  %11929 = vmatpush3.bf16.msra.mxu0 %v13134_v56  ;;  %v13145_v56 = vld [vmem:[%s15847_s3 + $0x2a0] sm:$0xff]  }
 0x2b9   : > { %11930 = vmatprep.subr.bf16.mxu0 %v13136_v4 }
 0x2bb   : > { %11269 = vmatmul.mubr.bf16.vlgmr.msra.gmra.mrb[0].mxu1 %v14269_v1  ;;  %v13142_v1 = vld [vmem:[%s15847_s3 + $0x5f0] sm:$0xff]  }
 0x2bc   : > { %11931 = vmatpush3.bf16.msra.mxu0 %v13136_v4  ;;  %11301 = vmatpush3.bf16.msra.mxu1 %v13137_v24  ;;  %v16296_v4 = vld [vmem:[#allocation16_spill] sm:$0xff] }
 0x2bd   : > { %11932 = vmatprep.subr.bf16.mxu0 %v13138_v7  ;;  %11272 = vmatprep.mubr.bf16.mxu1 %v14273_v50  ;;  %v13143_v50 = vld [vmem:[%s15847_s3 + $0x298] sm:$0xff]   ;;  %v15436_v24 = vcombine.low %v15161_v11, %v16296_v4 }
 0x2be   : > { %11302 = vmatprep.subr.bf16.mxu1 %v13139_v10  ;;  %v16298_v11 = vld [vmem:[#allocation97_spill] sm:$0xff] }
 0x2bf   : > { %11901 = vmatmul.mubr.bf16.gmra.mrb[8].mxu0 %v15028_v23  ;;  %v13151_v4 = vld [vmem:[%s15847_s3 + $0x2b8] sm:$0xff]  }
 0x2c0   : > { %11904 = vmatprep.mubr.bf16.mxu0 %v15033_v26  ;;  %11933 = vmatpush3.bf16.msra.mxu0 %v13138_v7  ;;  %v16299_v7 = vld [vmem:[#allocation96_spill] sm:$0xff] }
 0x2c1   : > { %11934 = vmatprep.subr.bf16.mxu0 %v13140_v58  ;;  %11303 = vmatpush3.bf16.msra.mxu1 %v13139_v10  ;;  %v15455_v10 = vcombine.low %v16299_v7, %v16298_v11  ;;  %v16304_v11 = vld [vmem:[#allocation101_spill] sm:$0xff]  ;;  %v16305_v7 = vld [vmem:[#allocation100_spill] sm:$0xff] }
 0x2c2   : > { %11304 = vmatprep.subr.bf16.mxu1 %v13141_v39 }
 0x2c3   : > { %11273 = vmatmul.mubr.bf16.gmra.mrb[4].mxu1 %v14288_v27  ;;  %v13146_v27 = vld [vmem:[%s15847_s3 + $0x600] sm:$0xff]   ;;  %16300 = vst [vmem:[#allocation29_spill] sm:$0xff] %v15455_v10 }
 0x2c4   : > { %11935 = vmatpush3.bf16.msra.mxu0 %v13140_v58  ;;  %11276 = vmatprep.mubr.bf16.mxu1 %v16245_v9  ;;  %v13147_v9 = vld [vmem:[%s15847_s3 + $0x2a8] sm:$0xff]  }
 0x2c5   : > { %11936 = vmatprep.subr.bf16.mxu0 %v13142_v1  ;;  %11305 = vmatpush3.bf16.msra.mxu1 %v13141_v39  ;;  %v16301_v58 = vld [vmem:[#allocation99_spill] sm:$0xff]  ;;  %v16302_v39 = vld [vmem:[#allocation98_spill] sm:$0xff] }
 0x2c6   : > { %11306 = vmatprep.subr.bf16.mxu1 %v13143_v50 }
 0x2c7   : > { %11905 = vmatmul.mubr.bf16.gmra.mrb[12].mxu0 %v16297_v15 }
 0x2c8   : > { %11908 = vmatprep.mubr.bf16.mxu0 %v15436_v24  ;;  %11937 = vmatpush3.bf16.msra.mxu0 %v13142_v1  ;;  %v15460_v1 = vcombine.low %v16302_v39, %v16301_v58  ;;  %v13153_v58 = vld [vmem:[%s15847_s3 + $0x2c0] sm:$0xff]   ;;  %v16309_v39 = vld [vmem:[#allocation48_spill] sm:$0xff] }
 0x2c9   : > { %11938 = vmatprep.subr.bf16.mxu0 %v13144_v32  ;;  %11307 = vmatpush3.bf16.msra.mxu1 %v13143_v50  ;;  %v13149_v50 = vld [vmem:[%s15847_s3 + $0x2b0] sm:$0xff]  }
 0x2ca   : > { %11308 = vmatprep.subr.bf16.mxu1 %v13145_v56  ;;  %16303 = vst [vmem:[#allocation27_spill] sm:$0xff] %v15460_v1 }
 0x2cb   : > { %11277 = vmatmul.mubr.bf16.gmra.mrb[8].mxu1 %v14477_v57 }
 0x2cc   : > { %11280 = vmatprep.mubr.bf16.mxu1 %v14500_v45  ;;  %11939 = vmatpush3.bf16.msra.mxu0 %v13144_v32  ;;  %v15473_v32 = vcombine.low %v16305_v7, %v16304_v11  ;;  %v13148_v11 = vld [vmem:[%s15847_s3 + $0x608] sm:$0xff]   ;;  %v16312_v7 = vld [vmem:[#allocation50_spill] sm:$0xff] }
 0x2cd   : > { %11972 = vmatprep.subr.bf16.mxu0 %v13146_v27  ;;  %11309 = vmatpush3.bf16.msra.mxu1 %v13145_v56  ;;  %v16307_v56 = vld [vmem:[#allocation93_spill] sm:$0xff] }
 0x2ce   : > { %11310 = vmatprep.subr.bf16.mxu1 %v13147_v9  ;;  %16306 = vst [vmem:[#allocation32_spill] sm:$0xff] %v15473_v32 }
 0x2cf   : > { %11909 = vmatmul.mubr.bf16.gmra.mrb[16].mxu0 %v15455_v10  ;;  %v16316_v10 = vld [vmem:[#allocation68_spill] sm:$0xff] }
 0x2d0   : > { %11912 = vmatprep.mubr.bf16.mxu0 %v15460_v1  ;;  %v13152_v1 = vld [vmem:[%s15847_s3 + $0x618] sm:$0xff]  }
 0x2d1   : > { %11311 = vmatpush3.bf16.msra.mxu1 %v13147_v9  ;;  %v16308_v9 = vld [vmem:[#allocation19_spill] sm:$0xff] }
 0x2d2   : > { %11312 = vmatprep.subr.bf16.mxu1 %v13149_v50 }
 0x2d3   : > { %11281 = vmatmul.mubr.bf16.gmra.mrb[12].mxu1 %v14538_v17 }
 0x2d4   : > { %11284 = vmatprep.mubr.bf16.mxu1 %v16307_v56  ;;  %v16313_v56 = vld [vmem:[#allocation64_spill] sm:$0xff] }
 0x2d5   : > { %11313 = vmatpush3.bf16.msra.mxu1 %v13149_v50  ;;  %v16310_v50 = vld [vmem:[#allocation34_spill] sm:$0xff] }
 0x2d6   : > { %11314 = vmatprep.subr.bf16.mxu1 %v13151_v4 }
 0x2d7   : > { %11913 = vmatmul.mubr.bf16.gmra.mrb[20].mxu0 %v15473_v32  ;;  %v16314_v32 = vld [vmem:[#allocation49_spill] sm:$0xff] }
 0x2d8   : > { %11916 = vmatprep.mubr.bf16.mxu0 %v16223_v29 }
 0x2d9   : > { %11315 = vmatpush3.bf16.msra.mxu1 %v13151_v4  ;;  %v16311_v4 = vld [vmem:[#allocation47_spill] sm:$0xff] }
 0x2da   : > { %11348 = vmatprep.subr.bf16.mxu1 %v13153_v58 }
 0x2db   : > { %11285 = vmatmul.mubr.bf16.gmra.mrb[16].mxu1 %v14567_v46 }
 0x2dc   : > { %11288 = vmatprep.mubr.bf16.mxu1 %v14577_v40 }
 0x2df   : > { %11917 = vmatmul.mubr.bf16.gmra.mrb[24].mxu0 %v16223_v29 }
 0x2e0   : > { %11920 = vmatprep.mubr.bf16.mxu0 %v16223_v29 }
 0x2e3   : > { %11289 = vmatmul.mubr.bf16.gmra.mrb[20].mxu1 %v14615_v2 }
 0x2e4   : > { %11292 = vmatprep.mubr.bf16.mxu1 %v16308_v9  ;;  %v13150_v9 = vld [vmem:[%s15847_s3 + $0x610] sm:$0xff]  }
 0x2e7   : > { %11921 = vmatmul.mubr.bf16.gmra.mrb[28].mxu0 %v16223_v29 }
 0x2e8   : > { %11940 = vmatprep.mubr.bf16.mxu0 %v16309_v39  ;;  %v16315_v39 = vld [vmem:[#allocation8_spill] sm:$0xff] }
 0x2eb   : > { %11293 = vmatmul.mubr.bf16.gmra.mrb[24].mxu1 %v16310_v50 }
 0x2ec   : > { %11296 = vmatprep.mubr.bf16.mxu1 %v16311_v4 }
 0x2ef   : > { %11941 = vmatmul.mubr.bf16.vlgmr.msra.gmra.mrb[0].mxu0 %v16312_v7  ;;  %v13154_v7 = vld [vmem:[%s15847_s3 + $0x620] sm:$0xff]  }
 0x2f0   : > { %11973 = vmatpush3.bf16.msra.mxu0 %v13146_v27  ;;  %11944 = vmatprep.mubr.bf16.mxu0 %v16313_v56  ;;  %v16317_v27 = vld [vmem:[#allocation70_spill] sm:$0xff]  ;;  %v13157_v56 = vld [vmem:[%s15847_s3 + $0x2d0] sm:$0xff]  }
 0x2f1   : > { %11974 = vmatprep.subr.bf16.mxu0 %v13148_v11 }
 0x2f3   : > { %11297 = vmatmul.mubr.bf16.gmra.mrb[28].mxu1 %v16314_v32 }
 0x2f4   : > { %11975 = vmatpush3.bf16.msra.mxu0 %v13148_v11  ;;  %11316 = vmatprep.mubr.bf16.mxu1 %v16315_v39  ;;  %v13155_v11 = vld [vmem:[%s15847_s3 + $0x2c8] sm:$0xff]   ;;  %v16319_v39 = vld [vmem:[#allocation72_spill] sm:$0xff] }
 0x2f5   : > { %11976 = vmatprep.subr.bf16.mxu0 %v13150_v9 }
 0x2f7   : > { %11945 = vmatmul.mubr.bf16.gmra.mrb[4].mxu0 %v16316_v10  ;;  %v13156_v10 = vld [vmem:[%s15847_s3 + $0x628] sm:$0xff]  }
 0x2f8   : > { %11948 = vmatprep.mubr.bf16.mxu0 %v16317_v27  ;;  %11977 = vmatpush3.bf16.msra.mxu0 %v13150_v9  ;;  %v16318_v9 = vld [vmem:[#allocation71_spill] sm:$0xff]  ;;  %v13161_v27 = vld [vmem:[%s15847_s3 + $0x2e0] sm:$0xff]  }
 0x2f9   : > { %11978 = vmatprep.subr.bf16.mxu0 %v13152_v1 }
 0x2fb   : > { %11317 = vmatmul.mubr.bf16.vlgmr.msra.gmra.mrb[0].mxu1 %v16178_v34  ;;  %v13158_v34 = vld [vmem:[%s15847_s3 + $0x630] sm:$0xff]  }
 0x2fc   : > { %11979 = vmatpush3.bf16.msra.mxu0 %v13152_v1  ;;  %11349 = vmatpush3.bf16.msra.mxu1 %v13153_v58  ;;  %v16320_v1 = vld [vmem:[#allocation26_spill] sm:$0xff]  ;;  %v13160_v58 = vld [vmem:[%s15847_s3 + $0x638] sm:$0xff]  }
 0x2fd   : > { %11980 = vmatprep.subr.bf16.mxu0 %v13154_v7  ;;  %11320 = vmatprep.mubr.bf16.mxu1 %v16179_v49  ;;  %v13159_v49 = vld [vmem:[%s15847_s3 + $0x2d8] sm:$0xff]  }
 0x2fe   : > { %11350 = vmatprep.subr.bf16.mxu1 %v13155_v11 }
 0x2ff   : > { %11949 = vmatmul.mubr.bf16.gmra.mrb[8].mxu0 %v16318_v9  ;;  %v16323_v9 = vld [vmem:[#allocation85_spill] sm:$0xff] }
 0x300   : > { %11952 = vmatprep.mubr.bf16.mxu0 %v16319_v39  ;;  %11981 = vmatpush3.bf16.msra.mxu0 %v13154_v7  ;;  %v16321_v7 = vld [vmem:[#allocation79_spill] sm:$0xff]  ;;  %v16324_v39 = vld [vmem:[#allocation90_spill] sm:$0xff] }
 0x301   : > { %11982 = vmatprep.subr.bf16.mxu0 %v13156_v10  ;;  %11351 = vmatpush3.bf16.msra.mxu1 %v13155_v11  ;;  %v16322_v11 = vld [vmem:[#allocation83_spill] sm:$0xff] }
 0x302   : > { %11352 = vmatprep.subr.bf16.mxu1 %v13157_v56 }
 0x303   : > { %11321 = vmatmul.mubr.bf16.gmra.mrb[4].mxu1 %v16270_v60  ;;  %v13162_v60 = vld [vmem:[%s15847_s3 + $0x640] sm:$0xff]  }
 0x304   : > { %11983 = vmatpush3.bf16.msra.mxu0 %v13156_v10  ;;  %11324 = vmatprep.mubr.bf16.mxu1 %v16320_v1  ;;  %v13163_v10 = vld [vmem:[%s15847_s3 + $0x2e8] sm:$0xff]  }
 0x305   : > { %11984 = vmatprep.subr.bf16.mxu0 %v13158_v34  ;;  %11353 = vmatpush3.bf16.msra.mxu1 %v13157_v56  ;;  %v13165_v56 = vld [vmem:[%s15847_s3 + $0x2f0] sm:$0xff]   ;;  %v16325_v1 = vld [vmem:[#allocation95_spill] sm:$0xff] }
 0x306   : > { %11354 = vmatprep.subr.bf16.mxu1 %v13159_v49 }
 0x307   : > { %11953 = vmatmul.mubr.bf16.gmra.mrb[12].mxu0 %v16321_v7  ;;  %v13186_v7 = vld [vmem:[%s15847_s3 + $0x6a8] sm:$0xff]  }
 0x308   : > { %11956 = vmatprep.mubr.bf16.mxu0 %v16322_v11  ;;  %11985 = vmatpush3.bf16.msra.mxu0 %v13158_v34  ;;  %v13167_v34 = vld [vmem:[%s15847_s3 + $0x2f8] sm:$0xff]   ;;  %v13196_v11 = vld [vmem:[%s15847_s3 + $0x350] sm:$0xff]  }
 0x309   : > { %11986 = vmatprep.subr.bf16.mxu0 %v13160_v58  ;;  %11355 = vmatpush3.bf16.msra.mxu1 %v13159_v49  ;;  %v13169_v49 = vld [vmem:[%s15847_s3 + $0x300] sm:$0xff]  }
 0x30a   : > { %11356 = vmatprep.subr.bf16.mxu1 %v13161_v27 }
 0x30b   : > { %11325 = vmatmul.mubr.bf16.gmra.mrb[8].mxu1 %v16183_v18 }
 0x30c   : > { %11328 = vmatprep.mubr.bf16.mxu1 %v16184_v52  ;;  %11987 = vmatpush3.bf16.msra.mxu0 %v13160_v58  ;;  %v13168_v58 = vld [vmem:[%s15847_s3 + $0x658] sm:$0xff]  }
 0x30d   : > { %12020 = vmatprep.subr.bf16.mxu0 %v13162_v60  ;;  %11357 = vmatpush3.bf16.msra.mxu1 %v13161_v27  ;;  %v16327_v27 = vld [vmem:[#allocation102_spill] sm:$0xff] }
 0x30e   : > { %11358 = vmatprep.subr.bf16.mxu1 %v13163_v10 }
 0x30f   : > { %11957 = vmatmul.mubr.bf16.gmra.mrb[16].mxu0 %v16323_v9  ;;  %v13201_v9 = vld [vmem:[%s15847_s3 + $0x378] sm:$0xff]  }
 0x310   : > { %11960 = vmatprep.mubr.bf16.mxu0 %v16324_v39  ;;  %v16335_v39 = vld [vmem:[#allocation7_spill] sm:$0xff] }
 0x311   : > { %11359 = vmatpush3.bf16.msra.mxu1 %v13163_v10  ;;  %v16332_v10 = vld [vmem:[#allocation5_spill] sm:$0xff] }
 0x312   : > { %11360 = vmatprep.subr.bf16.mxu1 %v13165_v56 }
 0x313   : > { %11329 = vmatmul.mubr.bf16.gmra.mrb[12].mxu1 %v16185_v41 }
 0x314   : > { %11332 = vmatprep.mubr.bf16.mxu1 %v16267_v53  ;;  %v13164_v53 = vld [vmem:[%s15847_s3 + $0x648] sm:$0xff]  }
 0x315   : > { %11361 = vmatpush3.bf16.msra.mxu1 %v13165_v56  ;;  %v16334_v56 = vld [vmem:[#allocation44_spill] sm:$0xff] }
 0x316   : > { %11362 = vmatprep.subr.bf16.mxu1 %v13167_v34 }
 0x317   : > { %11961 = vmatmul.mubr.bf16.gmra.mrb[20].mxu0 %v16325_v1  ;;  %v16340_v1 = vld [vmem:[#allocation23_spill] sm:$0xff] }
 0x318   : > { %11964 = vmatprep.mubr.bf16.mxu0 %v14629_v54 }
 0x319   : > { %11363 = vmatpush3.bf16.msra.mxu1 %v13167_v34  ;;  %v16338_v34 = vld [vmem:[#allocation13_spill] sm:$0xff] }
 0x31a   : > { %11396 = vmatprep.subr.bf16.mxu1 %v13169_v49 }
 0x31b   : > { %11333 = vmatmul.mubr.bf16.gmra.mrb[16].mxu1 %v16194_v55 }
 0x31c   : > { %11336 = vmatprep.mubr.bf16.mxu1 %v16198_v14 }
 0x31f   : > { %11965 = vmatmul.mubr.bf16.gmra.mrb[24].mxu0 %v14629_v54 }
 0x320   : > { %11968 = vmatprep.mubr.bf16.mxu0 %v14629_v54 }
 0x323   : > { %11337 = vmatmul.mubr.bf16.gmra.mrb[20].mxu1 %v16201_v62 }
 0x324   : > { %11340 = vmatprep.mubr.bf16.mxu1 %v15172_v19  ;;  %v13166_v19 = vld [vmem:[%s15847_s3 + $0x650] sm:$0xff]  }
 0x327   : > { %11969 = vmatmul.mubr.bf16.gmra.mrb[28].mxu0 %v14629_v54 }
 0x328   : > { %11988 = vmatprep.mubr.bf16.mxu0 %v14477_v57  ;;  %v16326_v57 = vld [vmem:[#allocation31_spill] sm:$0xff] }
 0x32b   : > { %11341 = vmatmul.mubr.bf16.gmra.mrb[24].mxu1 %v14871_v35 }
 0x32c   : > { %11344 = vmatprep.mubr.bf16.mxu1 %v14889_v6 }
 0x32f   : > { %11989 = vmatmul.mubr.bf16.vlgmr.msra.gmra.mrb[0].mxu0 %v14500_v45  ;;  %v13170_v45 = vld [vmem:[%s15847_s3 + $0x660] sm:$0xff]  }
 0x330   : > { %12021 = vmatpush3.bf16.msra.mxu0 %v13162_v60  ;;  %11992 = vmatprep.mubr.bf16.mxu0 %v14538_v17  ;;  %v13171_v17 = vld [vmem:[%s15847_s3 + $0x308] sm:$0xff]   ;;  %v16331_v60 = vld [vmem:[#allocation40_spill] sm:$0xff] }
 0x331   : > { %12022 = vmatprep.subr.bf16.mxu0 %v13164_v53 }
 0x333   : > { %11345 = vmatmul.mubr.bf16.gmra.mrb[28].mxu1 %v14894_v33 }
 0x334   : > { %12023 = vmatpush3.bf16.msra.mxu0 %v13164_v53  ;;  %11364 = vmatprep.mubr.bf16.mxu1 %v16326_v57  ;;  %v16341_v53 = vld [vmem:[#allocation63_spill] sm:$0xff] }
 0x335   : > { %12024 = vmatprep.subr.bf16.mxu0 %v13166_v19 }
 0x337   : > { %11993 = vmatmul.mubr.bf16.gmra.mrb[4].mxu0 %v14700_v21  ;;  %v13173_v21 = vld [vmem:[%s15847_s3 + $0x310] sm:$0xff]  }
 0x338   : > { %11996 = vmatprep.mubr.bf16.mxu0 %v14567_v46  ;;  %12025 = vmatpush3.bf16.msra.mxu0 %v13166_v19  ;;  %v13172_v46 = vld [vmem:[%s15847_s3 + $0x668] sm:$0xff]  }
 0x339   : > { %12026 = vmatprep.subr.bf16.mxu0 %v13168_v58 }
 0x33b   : > { %11365 = vmatmul.mubr.bf16.vlgmr.msra.gmra.mrb[0].mxu1 %v16278_v48  ;;  %v13175_v48 = vld [vmem:[%s15847_s3 + $0x318] sm:$0xff]  }
 0x33c   : > { %12027 = vmatpush3.bf16.msra.mxu0 %v13168_v58  ;;  %11397 = vmatpush3.bf16.msra.mxu1 %v13169_v49  ;;  %v16339_v49 = vld [vmem:[#allocation25_spill] sm:$0xff] }
 0x33d   : > { %12028 = vmatprep.subr.bf16.mxu0 %v13170_v45  ;;  %11368 = vmatprep.mubr.bf16.mxu1 %v16282_v44  ;;  %v13174_v44 = vld [vmem:[%s15847_s3 + $0x670] sm:$0xff]  }
 0x33e   : > { %11398 = vmatprep.subr.bf16.mxu1 %v13171_v17 }
 0x33f   : > { %11997 = vmatmul.mubr.bf16.gmra.mrb[8].mxu0 %v14577_v40  ;;  %v13176_v40 = vld [vmem:[%s15847_s3 + $0x678] sm:$0xff]  }
 0x340   : > { %12000 = vmatprep.mubr.bf16.mxu0 %v14615_v2  ;;  %12029 = vmatpush3.bf16.msra.mxu0 %v13170_v45  ;;  %v13177_v2 = vld [vmem:[%s15847_s3 + $0x320] sm:$0xff]  }
 0x341   : > { %12030 = vmatprep.subr.bf16.mxu0 %v13172_v46  ;;  %11399 = vmatpush3.bf16.msra.mxu1 %v13171_v17 }
 0x342   : > { %11400 = vmatprep.subr.bf16.mxu1 %v13173_v21 }
 0x343   : > { %11369 = vmatmul.mubr.bf16.gmra.mrb[4].mxu1 %v16285_v25  ;;  %v13179_v25 = vld [vmem:[%s15847_s3 + $0x328] sm:$0xff]  }
 0x344   : > { %12031 = vmatpush3.bf16.msra.mxu0 %v13172_v46  ;;  %11372 = vmatprep.mubr.bf16.mxu1 %v14727_v8  ;;  %v13178_v8 = vld [vmem:[%s15847_s3 + $0x680] sm:$0xff]  }
 0x345   : > { %12032 = vmatprep.subr.bf16.mxu0 %v13174_v44  ;;  %11401 = vmatpush3.bf16.msra.mxu1 %v13173_v21 }
 0x346   : > { %11402 = vmatprep.subr.bf16.mxu1 %v13175_v48 }
 0x347   : > { %12001 = vmatmul.mubr.bf16.gmra.mrb[12].mxu0 %v14734_v12  ;;  %v13181_v12 = vld [vmem:[%s15847_s3 + $0x330] sm:$0xff]  }
 0x348   : > { %12004 = vmatprep.mubr.bf16.mxu0 %v16310_v50  ;;  %12033 = vmatpush3.bf16.msra.mxu0 %v13174_v44  ;;  %v13183_v50 = vld [vmem:[%s15847_s3 + $0x338] sm:$0xff]  }
 0x349   : > { %12034 = vmatprep.subr.bf16.mxu0 %v13176_v40  ;;  %11403 = vmatpush3.bf16.msra.mxu1 %v13175_v48 }
 0x34a   : > { %11404 = vmatprep.subr.bf16.mxu1 %v13177_v2 }
 0x34b   : > { %11373 = vmatmul.mubr.bf16.gmra.mrb[8].mxu1 %v16175_v13 }
 0x34c   : > { %11376 = vmatprep.mubr.bf16.mxu1 %v14174_v59  ;;  %12035 = vmatpush3.bf16.msra.mxu0 %v13176_v40 }
 0x34d   : > { %12068 = vmatprep.subr.bf16.mxu0 %v13178_v8  ;;  %11405 = vmatpush3.bf16.msra.mxu1 %v13177_v2 }
 0x34e   : > { %11406 = vmatprep.subr.bf16.mxu1 %v13179_v25 }
 0x34f   : > { %12005 = vmatmul.mubr.bf16.gmra.mrb[16].mxu0 %v16311_v4  ;;  %v16330_v4 = vld [vmem:[#allocation33_spill] sm:$0xff] }
 0x350   : > { %12008 = vmatprep.mubr.bf16.mxu0 %v16314_v32  ;;  %v13194_v32 = vld [vmem:[%s15847_s3 + $0x340] sm:$0xff]  }
 0x351   : > { %11407 = vmatpush3.bf16.msra.mxu1 %v13179_v25 }
 0x352   : > { %11408 = vmatprep.subr.bf16.mxu1 %v13181_v12 }
 0x353   : > { %11377 = vmatmul.mubr.bf16.gmra.mrb[12].mxu1 %v14194_v31 }
 0x354   : > { %11380 = vmatprep.mubr.bf16.mxu1 %v14761_v42  ;;  %v13180_v42 = vld [vmem:[%s15847_s3 + $0x688] sm:$0xff]  }
 0x355   : > { %11409 = vmatpush3.bf16.msra.mxu1 %v13181_v12 }
 0x356   : > { %11410 = vmatprep.subr.bf16.mxu1 %v13183_v50 }
 0x357   : > { %12009 = vmatmul.mubr.bf16.gmra.mrb[20].mxu0 %v16327_v27 }
 0x358   : > { %12012 = vmatprep.mubr.bf16.mxu0 %v13257_v3 }
 0x359   : > { %11411 = vmatpush3.bf16.msra.mxu1 %v13183_v50 }
 0x35a   : > { %12116 = vmatprep.subr.bf16.mxu1 %v13194_v32 }
 0x35b   : > { %11381 = vmatmul.mubr.bf16.gmra.mrb[16].mxu1 %v14240_v28 }
 0x35c   : > { %11384 = vmatprep.mubr.bf16.mxu1 %v14248_v36 }
 0x35f   : > { %12013 = vmatmul.mubr.bf16.gmra.mrb[24].mxu0 %v13257_v3 }
 0x360   : > { %12016 = vmatprep.mubr.bf16.mxu0 %v13257_v3 }
 0x363   : > { %11385 = vmatmul.mubr.bf16.gmra.mrb[20].mxu1 %v14265_v30 }
 0x364   : > { %11388 = vmatprep.mubr.bf16.mxu1 %v15256_v16  ;;  %v13184_v16 = vld [vmem:[%s15847_s3 + $0x698] sm:$0xff]  }
 0x367   : > { %12017 = vmatmul.mubr.bf16.gmra.mrb[28].mxu0 %v13257_v3  ;;  %v13182_v3 = vld [vmem:[%s15847_s3 + $0x690] sm:$0xff]  }
 0x368   : > { %12036 = vmatprep.mubr.bf16.mxu0 %v16183_v18  ;;  %v16328_v18 = vld [vmem:[#allocation15_spill] sm:$0xff] }
 0x36b   : > { %11389 = vmatmul.mubr.bf16.gmra.mrb[24].mxu1 %v16233_v38 }
 0x36c   : > { %11392 = vmatprep.mubr.bf16.mxu1 %v16236_v43 }
 0x36f   : > { %12037 = vmatmul.mubr.bf16.vlgmr.msra.gmra.mrb[0].mxu0 %v16184_v52  ;;  %v16329_v52 = vld [vmem:[#allocation28_spill] sm:$0xff] }
 0x370   : > { %12069 = vmatpush3.bf16.msra.mxu0 %v13178_v8  ;;  %12040 = vmatprep.mubr.bf16.mxu0 %v16185_v41  ;;  %v13185_v41 = vld [vmem:[%s15847_s3 + $0x6a0] sm:$0xff]  }
 0x371   : > { %12070 = vmatprep.subr.bf16.mxu0 %v13180_v42 }
 0x373   : > { %11393 = vmatmul.mubr.bf16.gmra.mrb[28].mxu1 %v16237_v51 }
 0x374   : > { %12071 = vmatpush3.bf16.msra.mxu0 %v13180_v42  ;;  %11412 = vmatprep.mubr.bf16.mxu1 %v16328_v18 }
 0x375   : > { %12072 = vmatprep.subr.bf16.mxu0 %v13182_v3 }
 0x377   : > { %12041 = vmatmul.mubr.bf16.gmra.mrb[4].mxu0 %v16272_v22  ;;  %v13187_v22 = vld [vmem:[%s15847_s3 + $0x6b0] sm:$0xff]  }
 0x378   : > { %12044 = vmatprep.mubr.bf16.mxu0 %v16194_v55  ;;  %12073 = vmatpush3.bf16.msra.mxu0 %v13182_v3  ;;  %v13195_v55 = vld [vmem:[%s15847_s3 + $0x348] sm:$0xff]  }
 0x379   : > { %12074 = vmatprep.subr.bf16.mxu0 %v13184_v16 }
 0x37b   : > { %11413 = vmatmul.mubr.bf16.vlgmr.msra.gmra.mrb[0].mxu1 %v16329_v52 }
 0x37c   : > { %12075 = vmatpush3.bf16.msra.mxu0 %v13184_v16  ;;  %12124 = vmatpush3.bf16.msra.mxu1 %v13194_v32 }
 0x37d   : > { %12076 = vmatprep.subr.bf16.mxu0 %v13185_v41  ;;  %11416 = vmatprep.mubr.bf16.mxu1 %v16330_v4 }
 0x37e   : > { %12117 = vmatprep.subr.bf16.mxu1 %v13195_v55 }
 0x37f   : > { %12045 = vmatmul.mubr.bf16.gmra.mrb[8].mxu0 %v16198_v14  ;;  %v13188_v14 = vld [vmem:[%s15847_s3 + $0x6b8] sm:$0xff]  }
 0x380   : > { %12048 = vmatprep.mubr.bf16.mxu0 %v16201_v62  ;;  %12077 = vmatpush3.bf16.msra.mxu0 %v13185_v41  ;;  %v13197_v62 = vld [vmem:[%s15847_s3 + $0x358] sm:$0xff]  }
 0x381   : > { %12078 = vmatprep.subr.bf16.mxu0 %v13186_v7  ;;  %12125 = vmatpush3.bf16.msra.mxu1 %v13195_v55 }
 0x382   : > { %12118 = vmatprep.subr.bf16.mxu1 %v13196_v11 }
 0x383   : > { %11417 = vmatmul.mubr.bf16.gmra.mrb[4].mxu1 %v16331_v60 }
 0x384   : > { %12079 = vmatpush3.bf16.msra.mxu0 %v13186_v7  ;;  %11420 = vmatprep.mubr.bf16.mxu1 %v14859_v20  ;;  %v13198_v20 = vld [vmem:[%s15847_s3 + $0x360] sm:$0xff]  }
 0x385   : > { %12080 = vmatprep.subr.bf16.mxu0 %v13187_v22  ;;  %12126 = vmatpush3.bf16.msra.mxu1 %v13196_v11 }
 0x386   : > { %12119 = vmatprep.subr.bf16.mxu1 %v13197_v62 }
 0x387   : > { %12049 = vmatmul.mubr.bf16.gmra.mrb[12].mxu0 %v14866_v47  ;;  %v13199_v47 = vld [vmem:[%s15847_s3 + $0x368] sm:$0xff]  }
 0x388   : > { %12052 = vmatprep.mubr.bf16.mxu0 %v14871_v35  ;;  %12081 = vmatpush3.bf16.msra.mxu0 %v13187_v22  ;;  %v13200_v35 = vld [vmem:[%s15847_s3 + $0x370] sm:$0xff]  }
 0x389   : > { %12082 = vmatprep.subr.bf16.mxu0 %v13188_v14  ;;  %12127 = vmatpush3.bf16.msra.mxu1 %v13197_v62 }
 0x38a   : > { %12120 = vmatprep.subr.bf16.mxu1 %v13198_v20 }
 0x38b   : > { %11421 = vmatmul.mubr.bf16.gmra.mrb[8].mxu1 %v14880_v61  ;;  %v16333_v61 = vld [vmem:[#allocation4_spill] sm:$0xff] }
 0x38c   : > { %11424 = vmatprep.mubr.bf16.mxu1 %v16332_v10  ;;  %12083 = vmatpush3.bf16.msra.mxu0 %v13188_v14 }
 0x38d   : > { %12128 = vmatpush3.bf16.msra.mxu1 %v13198_v20 }
 0x38e   : > { %12121 = vmatprep.subr.bf16.mxu1 %v13199_v47 }
 0x38f   : > { %12053 = vmatmul.mubr.bf16.gmra.mrb[16].mxu0 %v14889_v6  ;;  %v16337_v6 = vld [vmem:[#allocation58_spill] sm:$0xff] }
 0x390   : > { %12056 = vmatprep.mubr.bf16.mxu0 %v14894_v33  ;;  %v16336_v33 = vld [vmem:[#allocation6_spill] sm:$0xff] }
 0x391   : > { %12129 = vmatpush3.bf16.msra.mxu1 %v13199_v47 }
 0x392   : > { %12122 = vmatprep.subr.bf16.mxu1 %v13200_v35 }
 0x393   : > { %11425 = vmatmul.mubr.bf16.gmra.mrb[12].mxu1 %v16333_v61 }
 0x394   : > { %11428 = vmatprep.mubr.bf16.mxu1 %v16334_v56 }
 0x395   : > { %12130 = vmatpush3.bf16.msra.mxu1 %v13200_v35 }
 0x396   : > { %12123 = vmatprep.subr.bf16.mxu1 %v13201_v9 }
 0x397   : > { %12057 = vmatmul.mubr.bf16.gmra.mrb[20].mxu0 %v16335_v39 }
 0x398   : > { %12060 = vmatprep.mubr.bf16.mxu0 %v16223_v29 }
 0x399   : > { %12131 = vmatpush3.bf16.msra.mxu1 %v13201_v9 }
 0x39b   : > { %11429 = vmatmul.mubr.bf16.gmra.mrb[16].mxu1 %v16336_v33 }
 0x39c   : > { %11432 = vmatprep.mubr.bf16.mxu1 %v16337_v6 }
 0x39f   : > { %12061 = vmatmul.mubr.bf16.gmra.mrb[24].mxu0 %v16223_v29 }
 0x3a0   : > { %12064 = vmatprep.mubr.bf16.mxu0 %v16223_v29 }
 0x3a3   : > { %11433 = vmatmul.mubr.bf16.gmra.mrb[20].mxu1 %v16338_v34 }
 0x3a4   : > { %11436 = vmatprep.mubr.bf16.mxu1 %v16339_v49 }
 0x3a7   : > { %12065 = vmatmul.mubr.bf16.gmra.mrb[28].mxu0 %v16223_v29 }
 0x3a8   : > { %12084 = vmatprep.mubr.bf16.mxu0 %v16175_v13 }
 0x3ab   : > { %11437 = vmatmul.mubr.bf16.gmra.mrb[24].mxu1 %v15359_v37 }
 0x3ac   : > { %11440 = vmatprep.mubr.bf16.mxu1 %v15364_v63 }
 0x3af   : > { %12085 = vmatmul.mubr.bf16.vlgmr.msra.gmra.mrb[0].mxu0 %v14174_v59  ;;  %v16342_v59 = vld [vmem:[#allocation29_spill] sm:$0xff] }
 0x3b0   : > { %12088 = vmatprep.mubr.bf16.mxu0 %v14194_v31  ;;  %v16343_v31 = vld [vmem:[#allocation27_spill] sm:$0xff] }
 0x3b3   : > { %11441 = vmatmul.mubr.bf16.gmra.mrb[28].mxu1 %v16340_v1 }
 0x3b4   : > { %11476 = vmatprep.mubr.bf16.mxu1 %v15017_v0 }
 0x3b7   : > { %12089 = vmatmul.mubr.bf16.gmra.mrb[4].mxu0 %v16341_v53 }
 0x3b8   : > { %12092 = vmatprep.mubr.bf16.mxu0 %v14240_v28  ;;  %v16344_v28 = vld [vmem:[#allocation32_spill] sm:$0xff] }
 0x3bb   : > { %11477 = vmatmul.mubr.bf16.vlgmr.msra.gmra.mrb[16].mxu1 %v15028_v23 }
 0x3bc   : > { %11480 = vmatprep.mubr.bf16.mxu1 %v15033_v26 }
 0x3bf   : > { %12093 = vmatmul.mubr.bf16.gmra.mrb[8].mxu0 %v14248_v36  ;;  %v16345_v36 = vld [vmem:[#allocation69_spill] sm:$0xff] }
 0x3c0   : > { %12096 = vmatprep.mubr.bf16.mxu0 %v14265_v30 }
 0x3c3   : > { %11481 = vmatmul.mubr.bf16.gmra.mrb[20].mxu1 %v16297_v15 }
 0x3c4   : > { %11484 = vmatprep.mubr.bf16.mxu1 %v15436_v24 }
 0x3c7   : > { %12097 = vmatmul.mubr.bf16.gmra.mrb[12].mxu0 %v16294_v5 }
 0x3c8   : > { %12100 = vmatprep.mubr.bf16.mxu0 %v16233_v38 }
 0x3cb   : > { %11485 = vmatmul.mubr.bf16.gmra.mrb[24].mxu1 %v16342_v59 }
 0x3cc   : > { %11488 = vmatprep.mubr.bf16.mxu1 %v16343_v31 }
 0x3cf   : > { %12101 = vmatmul.mubr.bf16.gmra.mrb[16].mxu0 %v16236_v43 }
 0x3d0   : > { %12104 = vmatprep.mubr.bf16.mxu0 %v16237_v51 }
 0x3d3   : > { %11489 = vmatmul.mubr.bf16.gmra.mrb[28].mxu1 %v16344_v28 }
 0x3d7   : > { %12105 = vmatmul.mubr.bf16.gmra.mrb[20].mxu0 %v16345_v36 }
 0x3d8   : > { %12108 = vmatprep.mubr.bf16.mxu0 %v14629_v54 }
 0x3df   : > { %12109 = vmatmul.mubr.bf16.gmra.mrb[24].mxu0 %v14629_v54 }
 0x3e0   : > { %12112 = vmatprep.mubr.bf16.mxu0 %v14629_v54 }
 0x3e7   : > { %12113 = vmatmul.mubr.bf16.gmra.mrb[28].mxu0 %v14629_v54 }
 0x44e   : > { %v11414_v30 = vpop.f32.mrb[0].mxu1 }
 0x44f   : > { %v4906_v29 = vpop.f32.mrb[1].mxu1 }
 0x450   : > { %v11415_v0 = vpop.f32.mrb[2].mxu1 }
 0x451   : > { %v4909_v13 = vpop.f32.mrb[3].mxu1 }
 0x456   : > { %v11418_v23 = vpop.f32.mrb[4].mxu1 }
 0x457   : > { %v4922_v43 = vpop.f32.mrb[5].mxu1 }
 0x458   : > { %v11419_v38 = vpop.f32.mrb[6].mxu1 }
 0x459   : > { %v4925_v51 = vpop.f32.mrb[7].mxu1 }
 0x45e   : > { %v11422_v26 = vpop.f32.mrb[8].mxu1 }
 0x45f   : > { %v4938_v37 = vpop.f32.mrb[9].mxu1 }
 0x460   : > { %v11423_v63 = vpop.f32.mrb[10].mxu1 }
 0x461   : > { %v15750_v5 = vpop.f32.mrb[11].mxu1 }
 0x466   : > { %v15752_v24 = vpop.f32.mrb[12].mxu1 }
 0x467   : > { %v15754_v15 = vpop.f32.mrb[13].mxu1 }
 0x468   : > { %v15756_v19 = vpop.f32.mrb[14].mxu1 }
 0x469   : > { %v15758_v54 = vpop.f32.mrb[15].mxu1 }
 0x482   : > { %v12086_v57 = vpop.f32.mrb[0].mxu0 }
 0x483   : > { %v12132_v58 = vadd.f32 %v12086_v57, %v11414_v30  ;;  %v8563_v45 = vpop.f32.mrb[1].mxu0 }
 0x484   : > { %v12133_v17 = vadd.f32 %v8563_v45, %v4906_v29  ;;  %v12087_v46 = vpop.f32.mrb[2].mxu0 }
 0x485   : > { %v12134_v21 = vadd.f32 %v12087_v46, %v11415_v0  ;;  %v8566_v44 = vpop.f32.mrb[3].mxu0  ;;  %v8921_v50 = vmul.f32 %v12132_v58, %v12132_v58 }
 0x486   : > { %v12135_v48 = vadd.f32 %v8566_v44, %v4909_v13  ;;  %v8919_v2 = vmul.f32 %v12133_v17, %v12133_v17 }
 0x487   : > { %v10070_v40 = vpack.c.bf16 %v12134_v21, %v12132_v58  ;;  %v8922_v16 = vmul.f32 %v12134_v21, %v12134_v21 }
 0x488   : > { %v10065_v8 = vpack.c.bf16 %v12135_v48, %v12133_v17  ;;  %v8882_v25 = vadd.f32 %v12135_v48, %v12133_v17  ;;  %v8920_v12 = vmul.f32 %v12135_v48, %v12135_v48 }
 0x489   : > { %10157 = vst [vmem:[%s15765_s29 + $0x8] sm:$0xff] %v10070_v40  }
 0x48a   : > { %10066 = vst [vmem:[%s15765_s29] sm:$0xff] %v10065_v8   ;;  %v8883_v27 = vadd.f32 %v12132_v58, %v8882_v25  ;;  %v8951_v32 = vadd.f32 %v8920_v12, %v8919_v2  ;;  %v12090_v42 = vpop.f32.mrb[4].mxu0 }
 0x48b   : > { %v12136_v3 = vadd.f32 %v12090_v42, %v11418_v23  ;;  %v8579_v18 = vpop.f32.mrb[5].mxu0 }
 0x48c   : > { %v8952_v41 = vadd.f32 %v8951_v32, %v8921_v50  ;;  %v12137_v52 = vadd.f32 %v8579_v18, %v4922_v43  ;;  %v8884_v4 = vadd.f32 %v12134_v21, %v8883_v27  ;;  %v12091_v7 = vpop.f32.mrb[6].mxu0 }
 0x48d   : > { %v12138_v55 = vadd.f32 %v12091_v7, %v11419_v38  ;;  %v8582_v22 = vpop.f32.mrb[7].mxu0  ;;  %v8925_v6 = vmul.f32 %v12136_v3, %v12136_v3 }
 0x48e   : > { %v8885_v11 = vadd.f32 %v12137_v52, %v8884_v4  ;;  %v8923_v60 = vmul.f32 %v12137_v52, %v12137_v52  ;;  %v8953_v14 = vadd.f32 %v8952_v41, %v8922_v16  ;;  %v12139_v62 = vadd.f32 %v8582_v22, %v4925_v51  ;;  %v15769_v20 = vpop.f32.mrb[16].mxu1 }
 0x48f   : > { %v10080_v10 = vpack.c.bf16 %v12138_v55, %v12136_v3  ;;  %v15771_v47 = vpop.f32.mrb[17].mxu1  ;;  %v8926_v31 = vmul.f32 %v12138_v55, %v12138_v55 }
 0x490   : > { %v8954_v35 = vadd.f32 %v8953_v14, %v8923_v60  ;;  %v10075_v61 = vpack.c.bf16 %v12139_v62, %v12137_v52  ;;  %v8886_v56 = vadd.f32 %v12139_v62, %v8885_v11  ;;  %v8924_v9 = vmul.f32 %v12139_v62, %v12139_v62  ;;  %v15773_v39 = vpop.f32.mrb[18].mxu1 }
 0x491   : > { %10159 = vst [vmem:[%s15765_s29 + $0x18] sm:$0xff] %v10080_v10   ;;  %v15776_v33 = vpop.f32.mrb[19].mxu1 }
 0x492   : > { %10158 = vst [vmem:[%s15765_s29 + $0x10] sm:$0xff] %v10075_v61   ;;  %v8887_v34 = vadd.f32 %v12136_v3, %v8886_v56  ;;  %v8955_v49 = vadd.f32 %v8954_v35, %v8924_v9  ;;  %v12094_v1 = vpop.f32.mrb[8].mxu0 }
 0x493   : > { %v12140_v53 = vadd.f32 %v12094_v1, %v11422_v26  ;;  %v8595_v59 = vpop.f32.mrb[9].mxu0 }
 0x494   : > { %v8956_v28 = vadd.f32 %v8955_v49, %v8925_v6  ;;  %v12141_v36 = vadd.f32 %v8595_v59, %v4938_v37  ;;  %v8888_v30 = vadd.f32 %v12138_v55, %v8887_v34  ;;  %v12095_v29 = vpop.f32.mrb[10].mxu0 }
 0x495   : > { %v12142_v0 = vadd.f32 %v12095_v29, %v11423_v63  ;;  %v8598_v13 = vpop.f32.mrb[11].mxu0  ;;  %v8929_v44 = vmul.f32 %v12140_v53, %v12140_v53 }
 0x496   : > { %v8889_v23 = vadd.f32 %v12141_v36, %v8888_v30  ;;  %v8927_v43 = vmul.f32 %v12141_v36, %v12141_v36  ;;  %v8957_v38 = vadd.f32 %v8956_v28, %v8926_v31  ;;  %v12143_v51 = vadd.f32 %v8598_v13, %v15750_v5  ;;  %v15780_v57 = vpop.f32.mrb[20].mxu1 }
 0x497   : > { %v10090_v58 = vpack.c.bf16 %v12142_v0, %v12140_v53  ;;  %v15782_v45 = vpop.f32.mrb[21].mxu1  ;;  %v8930_v25 = vmul.f32 %v12142_v0, %v12142_v0 }
 0x498   : > { %v8958_v26 = vadd.f32 %v8957_v38, %v8927_v43  ;;  %v10085_v17 = vpack.c.bf16 %v12143_v51, %v12141_v36  ;;  %v8890_v46 = vadd.f32 %v12143_v51, %v8889_v23  ;;  %v8928_v37 = vmul.f32 %v12143_v51, %v12143_v51  ;;  %v15784_v21 = vpop.f32.mrb[22].mxu1 }
 0x499   : > { %10161 = vst [vmem:[%s15765_s29 + $0x28] sm:$0xff] %v10090_v58   ;;  %v15787_v63 = vpop.f32.mrb[23].mxu1 }
 0x49a   : > { %10160 = vst [vmem:[%s15765_s29 + $0x20] sm:$0xff] %v10085_v17   ;;  %v8891_v48 = vadd.f32 %v12140_v53, %v8890_v46  ;;  %v8959_v40 = vadd.f32 %v8958_v26, %v8928_v37  ;;  %v12098_v2 = vpop.f32.mrb[12].mxu0 }
 0x49b   : > { %v12144_v5 = vadd.f32 %v12098_v2, %v15752_v24  ;;  %v8611_v8 = vpop.f32.mrb[13].mxu0 }
 0x49c   : > { %v8960_v12 = vadd.f32 %v8959_v40, %v8929_v44  ;;  %v12145_v50 = vadd.f32 %v8611_v8, %v15754_v15  ;;  %v8892_v27 = vadd.f32 %v12142_v0, %v8891_v48  ;;  %v12099_v32 = vpop.f32.mrb[14].mxu0 }
 0x49d   : > { %v12146_v42 = vadd.f32 %v12099_v32, %v15756_v19  ;;  %v8614_v3 = vpop.f32.mrb[15].mxu0  ;;  %v8933_v14 = vmul.f32 %v12144_v5, %v12144_v5 }
 0x49e   : > { %v8893_v18 = vadd.f32 %v12145_v50, %v8892_v27  ;;  %v8931_v16 = vmul.f32 %v12145_v50, %v12145_v50  ;;  %v8961_v41 = vadd.f32 %v8960_v12, %v8930_v25  ;;  %v12147_v52 = vadd.f32 %v8614_v3, %v15758_v54  ;;  %v15794_v4 = vpop.f32.mrb[24].mxu1 }
 0x49f   : > { %v10100_v24 = vpack.c.bf16 %v12146_v42, %v12144_v5  ;;  %v15796_v7 = vpop.f32.mrb[25].mxu1  ;;  %v8934_v56 = vmul.f32 %v12146_v42, %v12146_v42 }
 0x4a0   : > { %v8962_v55 = vadd.f32 %v8961_v41, %v8931_v16  ;;  %v10095_v22 = vpack.c.bf16 %v12147_v52, %v12145_v50  ;;  %v8894_v15 = vadd.f32 %v12147_v52, %v8893_v18  ;;  %v8932_v11 = vmul.f32 %v12147_v52, %v12147_v52  ;;  %v15798_v60 = vpop.f32.mrb[26].mxu1 }
 0x4a1   : > { %10163 = vst [vmem:[%s15765_s29 + $0x38] sm:$0xff] %v10100_v24   ;;  %v15801_v19 = vpop.f32.mrb[27].mxu1 }
 0x4a2   : > { %10162 = vst [vmem:[%s15765_s29 + $0x30] sm:$0xff] %v10095_v22   ;;  %v8895_v62 = vadd.f32 %v12144_v5, %v8894_v15  ;;  %v8963_v10 = vadd.f32 %v8962_v55, %v8932_v11  ;;  %v12102_v35 = vpop.f32.mrb[16].mxu0 }
 0x4a3   : > { %v12148_v54 = vadd.f32 %v12102_v35, %v15769_v20  ;;  %v8627_v61 = vpop.f32.mrb[17].mxu0 }
 0x4a4   : > { %v8964_v9 = vadd.f32 %v8963_v10, %v8933_v14  ;;  %v12149_v6 = vadd.f32 %v8627_v61, %v15771_v47  ;;  %v8896_v34 = vadd.f32 %v12146_v42, %v8895_v62  ;;  %v12103_v49 = vpop.f32.mrb[18].mxu0 }
 0x4a5   : > { %v12150_v1 = vadd.f32 %v12103_v49, %v15773_v39  ;;  %v8630_v53 = vpop.f32.mrb[19].mxu0  ;;  %v8937_v38 = vmul.f32 %v12148_v54, %v12148_v54 }
 0x4a6   : > { %v8897_v59 = vadd.f32 %v12149_v6, %v8896_v34  ;;  %v8935_v31 = vmul.f32 %v12149_v6, %v12149_v6  ;;  %v8965_v28 = vadd.f32 %v8964_v9, %v8934_v56  ;;  %v12151_v36 = vadd.f32 %v8630_v53, %v15776_v33  ;;  %v15808_v30 = vpop.f32.mrb[28].mxu1 }
 0x4a7   : > { %v10110_v20 = vpack.c.bf16 %v12150_v1, %v12148_v54  ;;  %v15810_v29 = vpop.f32.mrb[29].mxu1  ;;  %v8938_v46 = vmul.f32 %v12150_v1, %v12150_v1 }
 0x4a8   : > { %v8966_v0 = vadd.f32 %v8965_v28, %v8935_v31  ;;  %v10105_v13 = vpack.c.bf16 %v12151_v36, %v12149_v6  ;;  %v8898_v47 = vadd.f32 %v12151_v36, %v8897_v59  ;;  %v8936_v23 = vmul.f32 %v12151_v36, %v12151_v36  ;;  %v15812_v43 = vpop.f32.mrb[30].mxu1 }
 0x4a9   : > { %10165 = vst [vmem:[%s15765_s29 + $0x48] sm:$0xff] %v10110_v20   ;;  %v15815_v39 = vpop.f32.mrb[31].mxu1 }
 0x4aa   : > { %10164 = vst [vmem:[%s15765_s29 + $0x40] sm:$0xff] %v10105_v13   ;;  %v8899_v51 = vadd.f32 %v12148_v54, %v8898_v47  ;;  %v8967_v58 = vadd.f32 %v8966_v0, %v8936_v23  ;;  %v12106_v26 = vpop.f32.mrb[20].mxu0 }
 0x4ab   : > { %v12152_v33 = vadd.f32 %v12106_v26, %v15780_v57  ;;  %v8643_v17 = vpop.f32.mrb[21].mxu0 }
 0x4ac   : > { %v8968_v37 = vadd.f32 %v8967_v58, %v8937_v38  ;;  %v12153_v44 = vadd.f32 %v8643_v17, %v15782_v45  ;;  %v8900_v48 = vadd.f32 %v12150_v1, %v8899_v51  ;;  %v12107_v40 = vpop.f32.mrb[22].mxu0 }
 0x4ad   : > { %v12154_v2 = vadd.f32 %v12107_v40, %v15784_v21  ;;  %v8646_v5 = vpop.f32.mrb[23].mxu0  ;;  %v8941_v18 = vmul.f32 %v12152_v33, %v12152_v33 }
 0x4ae   : > { %v8901_v8 = vadd.f32 %v12153_v44, %v8900_v48  ;;  %v8939_v25 = vmul.f32 %v12153_v44, %v12153_v44  ;;  %v8969_v12 = vadd.f32 %v8968_v37, %v8938_v46  ;;  %v12155_v50 = vadd.f32 %v8646_v5, %v15787_v63 }
 0x4af   : > { %v10120_v27 = vpack.c.bf16 %v12154_v2, %v12152_v33  ;;  %v8942_v24 = vmul.f32 %v12154_v2, %v12154_v2 }
 0x4b0   : > { %v8970_v32 = vadd.f32 %v8969_v12, %v8939_v25  ;;  %v10115_v57 = vpack.c.bf16 %v12155_v50, %v12153_v44  ;;  %v8902_v42 = vadd.f32 %v12155_v50, %v8901_v8  ;;  %v8940_v3 = vmul.f32 %v12155_v50, %v12155_v50 }
 0x4b1   : > { %10167 = vst [vmem:[%s15765_s29 + $0x58] sm:$0xff] %v10120_v27  }
 0x4b2   : > { %10166 = vst [vmem:[%s15765_s29 + $0x50] sm:$0xff] %v10115_v57   ;;  %v8903_v45 = vadd.f32 %v12152_v33, %v8902_v42  ;;  %v8971_v16 = vadd.f32 %v8970_v32, %v8940_v3  ;;  %v12110_v41 = vpop.f32.mrb[24].mxu0 }
 0x4b3   : > { %v12156_v52 = vadd.f32 %v12110_v41, %v15794_v4  ;;  %v8659_v21 = vpop.f32.mrb[25].mxu0 }
 0x4b4   : > { %v8972_v55 = vadd.f32 %v8971_v16, %v8941_v18  ;;  %v12157_v22 = vadd.f32 %v8659_v21, %v15796_v7  ;;  %v8904_v63 = vadd.f32 %v12154_v2, %v8903_v45  ;;  %v12111_v15 = vpop.f32.mrb[26].mxu0 }
 0x4b5   : > { %v12158_v11 = vadd.f32 %v12111_v15, %v15798_v60  ;;  %v8662_v14 = vpop.f32.mrb[27].mxu0  ;;  %v8945_v34 = vmul.f32 %v12156_v52, %v12156_v52 }
 0x4b6   : > { %v8905_v62 = vadd.f32 %v12157_v22, %v8904_v63  ;;  %v8943_v10 = vmul.f32 %v12157_v22, %v12157_v22  ;;  %v8973_v35 = vadd.f32 %v8972_v55, %v8942_v24  ;;  %v12159_v54 = vadd.f32 %v8662_v14, %v15801_v19 }
 0x4b7   : > { %v10130_v61 = vpack.c.bf16 %v12158_v11, %v12156_v52  ;;  %v8946_v59 = vmul.f32 %v12158_v11, %v12158_v11 }
 0x4b8   : > { %v8974_v56 = vadd.f32 %v8973_v35, %v8943_v10  ;;  %v10125_v4 = vpack.c.bf16 %v12159_v54, %v12157_v22  ;;  %v8906_v9 = vadd.f32 %v12159_v54, %v8905_v62  ;;  %v8944_v6 = vmul.f32 %v12159_v54, %v12159_v54 }
 0x4b9   : > { %10169 = vst [vmem:[%s15765_s29 + $0x68] sm:$0xff] %v10130_v61  }
 0x4ba   : > { %10168 = vst [vmem:[%s15765_s29 + $0x60] sm:$0xff] %v10125_v4   ;;  %v8907_v7 = vadd.f32 %v12156_v52, %v8906_v9  ;;  %v8975_v49 = vadd.f32 %v8974_v56, %v8944_v6  ;;  %v12114_v1 = vpop.f32.mrb[28].mxu0 }
 0x4bb   : > { %v12160_v53 = vadd.f32 %v12114_v1, %v15808_v30  ;;  %v8675_v60 = vpop.f32.mrb[29].mxu0 }
 0x4bc   : > { %v8976_v31 = vadd.f32 %v8975_v49, %v8945_v34  ;;  %v12161_v28 = vadd.f32 %v8675_v60, %v15810_v29  ;;  %v8908_v19 = vadd.f32 %v12158_v11, %v8907_v7  ;;  %v12115_v36 = vpop.f32.mrb[30].mxu0 }
 0x4bd   : > { %v12162_v20 = vadd.f32 %v12115_v36, %v15812_v43  ;;  %v8678_v0 = vpop.f32.mrb[31].mxu0  ;;  %v8949_v17 = vmul.f32 %v12160_v53, %v12160_v53 }
 0x4be   : > { %v8909_v13 = vadd.f32 %v12161_v28, %v8908_v19  ;;  %v8947_v47 = vmul.f32 %v12161_v28, %v12161_v28  ;;  %v8977_v23 = vadd.f32 %v8976_v31, %v8946_v59  ;;  %v12163_v38 = vadd.f32 %v8678_v0, %v15815_v39 }
 0x4bf   : > { %v10140_v51 = vpack.c.bf16 %v12162_v20, %v12160_v53  ;;  %v8950_v37 = vmul.f32 %v12162_v20, %v12162_v20 }
 0x4c0   : > { %v8978_v58 = vadd.f32 %v8977_v23, %v8947_v47  ;;  %v10135_v30 = vpack.c.bf16 %v12163_v38, %v12161_v28  ;;  %v8910_v26 = vadd.f32 %v12163_v38, %v8909_v13  ;;  %v8948_v33 = vmul.f32 %v12163_v38, %v12163_v38 }
 0x4c1   : > { %10171 = vst [vmem:[%s15765_s29 + $0x78] sm:$0xff] %v10140_v51  }
 0x4c2   : > { %10170 = vst [vmem:[%s15765_s29 + $0x70] sm:$0xff] %v10135_v30   ;;  %v8911_v29 = vadd.f32 %v12160_v53, %v8910_v26  ;;  %v8979_v46 = vadd.f32 %v8978_v58, %v8948_v33 }
 0x4c4   : > { %v8912_v44 = vadd.f32 %v12162_v20, %v8911_v29  ;;  %v8980_v43 = vadd.f32 %v8979_v46, %v8949_v17 }
 0x4c6   : > { %v8913_v48 = vrot.slane %v8912_v44, 4  ;;  %v8981_v40 = vadd.f32 %v8980_v43, %v8950_v37 }
 0x4c8   : > { %v8914_v2 = vadd.f32 %v8913_v48, %v8912_v44  ;;  %v8982_v5 = vrot.slane %v8981_v40, 4 }
 0x4ca   : > { %v8915_v8 = vrot.slane %v8914_v2, 2  ;;  %v8983_v39 = vadd.f32 %v8982_v5, %v8981_v40 }
 0x4cc   : > { %v8916_v25 = vadd.f32 %v8915_v8, %v8914_v2  ;;  %v8984_v12 = vrot.slane %v8983_v39, 2 }
 0x4ce   : > { %v8917_v50 = vrot.slane %v8916_v25, 1  ;;  %v8985_v27 = vadd.f32 %v8984_v12, %v8983_v39 }
 0x4d0   : > { %v8986_v32 = vrot.slane %v8985_v27, 1  ;;  %v8918_v57 = vadd.f32 %v8917_v50, %v8916_v25 }
 0x4d2   : > { %v8987_v42 = vadd.f32 %v8986_v32, %v8985_v27 }
 0x4d4   : > { %v8989_v3 = vsel %vm699_vm3, %v8918_v57, %v8987_v42 }
 0x4d5   : > { %8990 = vst [vmem:[%s235_s7] sm:$0x3] %v8989_v3 }
 0x4d6 PF: > { %s16_s18 = sadd.s32 1, %s13208_s18  }
 0x4d7   : > { %p13_p4 = scmp.ge.s32.totalorder %s16_s18, 4  }
 0x4d9   :  { %15 = sbr.rel (!%p13_p4) target bundleno = 1 (0x1), region = 104 }

</bundles_post_ra>
